<compile_context>
chip_gen: v5e
topology: v5e:2x2
jax: 0.10.0
libtpu: 0.0.40
codegen_flags: <defaults>
</compile_context>

<pallas_src>
import math

import jax
import jax.numpy as jnp
from jax import lax
from jax.experimental import pallas as pl
from jax.experimental.pallas import tpu as pltpu


def _round_up(x, m):
    return ((x + m - 1) // m) * m


def _build_kernel(bt, H, W, c_pad, num_classes, pad_rows, head_group):
    HW = H * W
    M = bt * HW
    C = c_pad
    N = num_classes
    P = pad_rows

    def kernel(x_ref, w1_ref, s1_ref, w2_ref, s2_ref, w3_ref, s3_ref,
               wh_ref, bh_ref, o_ref, act_ref, ys_ref):
        # ---- per-row (h, w) tap-validity masks, shared by all three layers ----
        h_i = lax.broadcasted_iota(jnp.int32, (bt, H, W, 1), 1).reshape(M, 1)
        w_i = lax.broadcasted_iota(jnp.int32, (bt, H, W, 1), 2).reshape(M, 1)
        masks = []
        for t in range(9):
            dh, dw = divmod(t, 3)
            if dh == 1 and dw == 1:
                masks.append(None)                       # center tap: always valid
                continue
            hh = h_i + (dh - 1)
            ww = w_i + (dw - 1)
            masks.append((hh >= 0) & (hh < H) & (ww >= 0) & (ww < W))

        # Zero only the row halos (never written elsewhere; reads of them are
        # always masked, this just keeps the scratch deterministic).
        act_ref[0:P, :] = jnp.zeros((P, C), jnp.float32)
        act_ref[P + M:, :] = jnp.zeros((act_ref.shape[0] - P - M, C), jnp.float32)

        def conv_bn_relu(w_ref, s_ref):
            acc = jnp.zeros((M, C), jnp.float32)
            for t in range(9):
                dh, dw = divmod(t, 3)
                delta = (dh - 1) * W + (dw - 1)
                lhs = act_ref[P + delta:P + delta + M, :]        # [M, C] f32
                if masks[t] is not None:
                    lhs = jnp.where(masks[t], lhs, 0.0)
                acc = acc + jnp.dot(lhs.astype(jnp.bfloat16),
                                    w_ref[t * C:(t + 1) * C, :],
                                    preferred_element_type=jnp.float32)
            return jnp.maximum(acc + s_ref[...], 0.0)            # BN shift + ReLU

        # ---- layer 1 ----
        act_ref[P:P + M, :] = x_ref[...].reshape(M, C)
        y = conv_bn_relu(w1_ref, s1_ref)
        # ---- layer 2 ----
        act_ref[P:P + M, :] = y
        y = conv_bn_relu(w2_ref, s2_ref)
        # ---- layer 3 ----
        act_ref[P:P + M, :] = y
        y = conv_bn_relu(w3_ref, s3_ref)                         # [M, C] f32

        # ---- flatten (NCHW order folded into the head weight) + linear head ----
        # o[b, n] = sum_{k, c} y3[b, k, c] * wh[k*C + c, n] + bh[n]
        ys_ref[...] = y.reshape(bt, HW, C)
        out = jnp.zeros((bt, N), jnp.float32)
        for k0 in range(0, HW, head_group):
            g = min(head_group, HW - k0)
            pieces = [ys_ref[:, k0 + j, :] for j in range(g)]    # g x [bt, C]
            lhs = jnp.concatenate(pieces, axis=-1).astype(jnp.bfloat16)  # [bt, g*C]
            out = out + jnp.dot(lhs, wh_ref[k0 * C:(k0 + g) * C, :],
                                preferred_element_type=jnp.float32)
        o_ref[...] = out + bh_ref[...]

    return kernel


def conv2d_forward(x_nchw, params, *, batch_tile=None, head_group=8):
    """Forward pass. x_nchw: [B, spectral_size, H, W] (PyTorch NCHW)."""
    B, Cin, H, W = x_nchw.shape
    c_pad = params['w1'].shape[-1]
    num_classes = params['head_b'].shape[-1]
    HW = H * W

    bt = B if batch_tile is None else batch_tile
    assert B % bt == 0 and (bt == B or bt % 8 == 0)

    # NCHW -> [B, HW, c_pad] (channels-last rows, zero-padded to the lane width).
    x_r = jnp.transpose(x_nchw, (0, 2, 3, 1)).reshape(B, HW, Cin)
    x_p = jnp.zeros((B, HW, c_pad), x_nchw.dtype).at[:, :, :Cin].set(x_r)

    pad_rows = _round_up(W + 1, 8)
    kernel = _build_kernel(bt, H, W, c_pad, num_classes, pad_rows, head_group)

    def const(shape):
        return pl.BlockSpec(shape, lambda i, _s=shape: tuple(0 for _ in _s))

    return pl.pallas_call(
        kernel,
        out_shape=jax.ShapeDtypeStruct((B, num_classes), jnp.float32),
        grid=(B // bt,),
        in_specs=[
            pl.BlockSpec((bt, HW, c_pad), lambda i: (i, 0, 0)),
            const((9 * c_pad, c_pad)), const((1, c_pad)),
            const((9 * c_pad, c_pad)), const((1, c_pad)),
            const((9 * c_pad, c_pad)), const((1, c_pad)),
            const((HW * c_pad, num_classes)), const((1, num_classes)),
        ],
        out_specs=pl.BlockSpec((bt, num_classes), lambda i: (i, 0)),
        scratch_shapes=[
            pltpu.VMEM((2 * pad_rows + bt * HW, c_pad), jnp.float32),  # row-halo act
            pltpu.VMEM((bt, HW, c_pad), jnp.float32),                  # head staging
        ],
        compiler_params=pltpu.CompilerParams(
            dimension_semantics=("parallel",)),
    )(x_p,
      params['w1'], params['s1'], params['w2'], params['s2'],
      params['w3'], params['s3'],
      params['head_w'], params['head_b'])


def make_params(key, spectral_size, num_classes, patch_size):
    """Init matching the PyTorch module; returns (kernel-ready, raw) params."""
    c_pad = max(128, _round_up(spectral_size, 128))
    H = W = patch_size
    HW = H * W
    eps = 1e-5
    keys = jax.random.split(key, 8)
    params, raw = {}, {}
    chans = [(spectral_size, 8), (8, 16), (16, 32)]
    for i, (cin, cout) in enumerate(chans):
        n = 3 * 3 * cout
        std = math.sqrt(2.0 / n)
        w = jax.random.normal(keys[i], (cout, cin, 3, 3), jnp.float32) * std
        gamma = jnp.ones((cout,), jnp.float32)
        beta = jnp.zeros((cout,), jnp.float32)
        running_mean = jnp.zeros((cout,), jnp.float32)
        running_var = jnp.ones((cout,), jnp.float32)
        scale = gamma / jnp.sqrt(running_var + eps)
        shift = beta - running_mean * scale
        raw[f'conv{i + 1}'] = (w, scale, shift)
        # Fold BN scale into the conv weight; layout [9*c_pad, c_pad],
        # rows = tap*c_pad + cin (tap = kh*3 + kw), zero padded.
        wt = jnp.transpose(w, (2, 3, 1, 0)) * scale[None, None, None, :]
        wt = wt.reshape(9, cin, cout)
        wm = jnp.zeros((9, c_pad, c_pad), jnp.float32).at[:, :cin, :cout].set(wt)
        params[f'w{i + 1}'] = wm.reshape(9 * c_pad, c_pad).astype(jnp.bfloat16)
        s = jnp.zeros((1, c_pad), jnp.float32).at[0, :cout].set(shift)
        params[f's{i + 1}'] = s
        # Padded-lane invariant: shifts outside real channels must be zero so
        # padded activation channels stay exactly zero through ReLU.
        assert float(jnp.max(jnp.abs(s[0, cout:]))) == 0.0

    c3 = chans[-1][1]                      # 32 channels out of layer 3
    feat = c3 * HW
    bound = 1.0 / math.sqrt(feat)
    w_fc = jax.random.uniform(keys[6], (num_classes, feat), jnp.float32,
                              -bound, bound)
    b_fc = jax.random.uniform(keys[7], (num_classes,), jnp.float32,
                              -bound, bound)
    raw['fc_w'] = w_fc
    raw['fc_b'] = b_fc
    # Head weight in the kernel's (k-major, c-minor) layout:
    #   wh[k*c_pad + c, n] = w_fc[n, c*HW + k],  k = h*W + w  (NCHW flatten folded in)
    wh3 = jnp.transpose(w_fc.reshape(num_classes, c3, HW), (2, 1, 0))   # [HW, c3, N]
    whp = jnp.zeros((HW, c_pad, num_classes), jnp.float32).at[:, :c3, :].set(wh3)
    params['head_w'] = whp.reshape(HW * c_pad, num_classes).astype(jnp.bfloat16)
    params['head_b'] = b_fc[None, :]
    return params, raw


def reference_forward(x_nchw, raw):
    """Pure-JAX f32 reference mirroring the PyTorch module (eval-mode BN)."""
    h = x_nchw
    for i in range(3):
        w, scale, shift = raw[f'conv{i + 1}']
        h = lax.conv_general_dilated(
            h, w, window_strides=(1, 1), padding='SAME',
            dimension_numbers=('NCHW', 'OIHW', 'NCHW'))
        h = h * scale[None, :, None, None] + shift[None, :, None, None]
        h = jnp.maximum(h, 0.0)
    B = h.shape[0]
    return h.reshape(B, -1) @ raw['fc_w'].T + raw['fc_b'][None, :]


if __name__ == "__main__":
    # Small, module-consistent shapes.
    batch = 2
    spectral_size = 32   # data_params['spectral_size']
    patch_size = 8       # data_params['patch_size']
    num_classes = 16     # data_params['num_classes']

    key = jax.random.PRNGKey(0)
    k_x, k_p = jax.random.split(key)
    x = jax.random.normal(k_x, (batch, spectral_size, patch_size, patch_size),
                          jnp.float32)
    params, raw = make_params(k_p, spectral_size, num_classes, patch_size)

    out = jax.jit(conv2d_forward)(x, params)
    jax.block_until_ready(out)
    assert out.shape == (batch, num_classes), out.shape

    # Loose check vs f32 reference (kernel uses bf16 MXU operands).
    ref = reference_forward(x, raw)
    max_err = float(jnp.max(jnp.abs(out - ref)))
    tol = 5e-2 * (1.0 + float(jnp.max(jnp.abs(ref))))
    assert max_err <= tol, (max_err, tol)

    print("KERNEL_OK")
</pallas_src>

<mosaic_0001>
module attributes {stable_mosaic.version = 11 : i64} {
  func.func @kernel(%arg0: i32, %arg1: memref<2x64x128xf32, #tpu.memory_space<vmem>>, %arg2: memref<1152x128xbf16, #tpu.memory_space<vmem>>, %arg3: memref<1x128xf32, #tpu.memory_space<vmem>>, %arg4: memref<1152x128xbf16, #tpu.memory_space<vmem>>, %arg5: memref<1x128xf32, #tpu.memory_space<vmem>>, %arg6: memref<1152x128xbf16, #tpu.memory_space<vmem>>, %arg7: memref<1x128xf32, #tpu.memory_space<vmem>>, %arg8: memref<8192x16xbf16, #tpu.memory_space<vmem>>, %arg9: memref<1x16xf32, #tpu.memory_space<vmem>>, %arg10: memref<2x16xf32, #tpu.memory_space<vmem>>, %arg11: memref<160x128xf32, #tpu.memory_space<vmem>>, %arg12: memref<2x64x128xf32, #tpu.memory_space<vmem>>) attributes {dimension_semantics = [#tpu.dimension_semantics<parallel>], iteration_bounds = array<i64: 1>, scalar_prefetch = 0 : i64, scratch_operands = 2 : i64, tpu.core_type = #tpu.core_type<tc>, window_params = [{transform_indices = @transform_0, window_bounds = array<i64: 2, 64, 128>}, {pipeline_mode = #tpu.pipeline_mode<synchronous>, transform_indices = @transform_1, window_bounds = array<i64: 1152, 128>}, {pipeline_mode = #tpu.pipeline_mode<synchronous>, transform_indices = @transform_2, window_bounds = array<i64: 1, 128>}, {pipeline_mode = #tpu.pipeline_mode<synchronous>, transform_indices = @transform_3, window_bounds = array<i64: 1152, 128>}, {pipeline_mode = #tpu.pipeline_mode<synchronous>, transform_indices = @transform_4, window_bounds = array<i64: 1, 128>}, {pipeline_mode = #tpu.pipeline_mode<synchronous>, transform_indices = @transform_5, window_bounds = array<i64: 1152, 128>}, {pipeline_mode = #tpu.pipeline_mode<synchronous>, transform_indices = @transform_6, window_bounds = array<i64: 1, 128>}, {pipeline_mode = #tpu.pipeline_mode<synchronous>, transform_indices = @transform_7, window_bounds = array<i64: 8192, 16>}, {pipeline_mode = #tpu.pipeline_mode<synchronous>, transform_indices = @transform_8, window_bounds = array<i64: 1, 16>}, {transform_indices = @transform_9, window_bounds = array<i64: 2, 16>}]} {
    %0 = tpu.iota {dimensions = array<i32: 1>} : vector<2x8x8x1xi32>
    %1 = vector.shape_cast %0 : vector<2x8x8x1xi32> to vector<128x1xi32>
    %2 = tpu.iota {dimensions = array<i32: 2>} : vector<2x8x8x1xi32>
    %3 = vector.shape_cast %2 : vector<2x8x8x1xi32> to vector<128x1xi32>
    %c-1_i32 = arith.constant -1 : i32
    %4 = vector.broadcast %c-1_i32 : i32 to vector<128x1xi32>
    %5 = arith.addi %1, %4 : vector<128x1xi32>
    %c-1_i32_0 = arith.constant -1 : i32
    %6 = vector.broadcast %c-1_i32_0 : i32 to vector<128x1xi32>
    %7 = arith.addi %3, %6 : vector<128x1xi32>
    %c0_i32 = arith.constant 0 : i32
    %8 = vector.broadcast %c0_i32 : i32 to vector<128x1xi32>
    %9 = arith.cmpi sge, %5, %8 : vector<128x1xi32>
    %c8_i32 = arith.constant 8 : i32
    %10 = vector.broadcast %c8_i32 : i32 to vector<128x1xi32>
    %11 = arith.cmpi slt, %5, %10 : vector<128x1xi32>
    %12 = arith.andi %9, %11 : vector<128x1xi1>
    %c0_i32_1 = arith.constant 0 : i32
    %13 = vector.broadcast %c0_i32_1 : i32 to vector<128x1xi32>
    %14 = arith.cmpi sge, %7, %13 : vector<128x1xi32>
    %15 = arith.andi %12, %14 : vector<128x1xi1>
    %c8_i32_2 = arith.constant 8 : i32
    %16 = vector.broadcast %c8_i32_2 : i32 to vector<128x1xi32>
    %17 = arith.cmpi slt, %7, %16 : vector<128x1xi32>
    %18 = arith.andi %15, %17 : vector<128x1xi1>
    %c-1_i32_3 = arith.constant -1 : i32
    %19 = vector.broadcast %c-1_i32_3 : i32 to vector<128x1xi32>
    %20 = arith.addi %1, %19 : vector<128x1xi32>
    %c0_i32_4 = arith.constant 0 : i32
    %21 = vector.broadcast %c0_i32_4 : i32 to vector<128x1xi32>
    %22 = arith.addi %3, %21 : vector<128x1xi32>
    %c0_i32_5 = arith.constant 0 : i32
    %23 = vector.broadcast %c0_i32_5 : i32 to vector<128x1xi32>
    %24 = arith.cmpi sge, %20, %23 : vector<128x1xi32>
    %c8_i32_6 = arith.constant 8 : i32
    %25 = vector.broadcast %c8_i32_6 : i32 to vector<128x1xi32>
    %26 = arith.cmpi slt, %20, %25 : vector<128x1xi32>
    %27 = arith.andi %24, %26 : vector<128x1xi1>
    %c0_i32_7 = arith.constant 0 : i32
    %28 = vector.broadcast %c0_i32_7 : i32 to vector<128x1xi32>
    %29 = arith.cmpi sge, %22, %28 : vector<128x1xi32>
    %30 = arith.andi %27, %29 : vector<128x1xi1>
    %c8_i32_8 = arith.constant 8 : i32
    %31 = vector.broadcast %c8_i32_8 : i32 to vector<128x1xi32>
    %32 = arith.cmpi slt, %22, %31 : vector<128x1xi32>
    %33 = arith.andi %30, %32 : vector<128x1xi1>
    %c-1_i32_9 = arith.constant -1 : i32
    %34 = vector.broadcast %c-1_i32_9 : i32 to vector<128x1xi32>
    %35 = arith.addi %1, %34 : vector<128x1xi32>
    %c1_i32 = arith.constant 1 : i32
    %36 = vector.broadcast %c1_i32 : i32 to vector<128x1xi32>
    %37 = arith.addi %3, %36 : vector<128x1xi32>
    %c0_i32_10 = arith.constant 0 : i32
    %38 = vector.broadcast %c0_i32_10 : i32 to vector<128x1xi32>
    %39 = arith.cmpi sge, %35, %38 : vector<128x1xi32>
    %c8_i32_11 = arith.constant 8 : i32
    %40 = vector.broadcast %c8_i32_11 : i32 to vector<128x1xi32>
    %41 = arith.cmpi slt, %35, %40 : vector<128x1xi32>
    %42 = arith.andi %39, %41 : vector<128x1xi1>
    %c0_i32_12 = arith.constant 0 : i32
    %43 = vector.broadcast %c0_i32_12 : i32 to vector<128x1xi32>
    %44 = arith.cmpi sge, %37, %43 : vector<128x1xi32>
    %45 = arith.andi %42, %44 : vector<128x1xi1>
    %c8_i32_13 = arith.constant 8 : i32
    %46 = vector.broadcast %c8_i32_13 : i32 to vector<128x1xi32>
    %47 = arith.cmpi slt, %37, %46 : vector<128x1xi32>
    %48 = arith.andi %45, %47 : vector<128x1xi1>
    %c0_i32_14 = arith.constant 0 : i32
    %49 = vector.broadcast %c0_i32_14 : i32 to vector<128x1xi32>
    %50 = arith.addi %1, %49 : vector<128x1xi32>
    %c-1_i32_15 = arith.constant -1 : i32
    %51 = vector.broadcast %c-1_i32_15 : i32 to vector<128x1xi32>
    %52 = arith.addi %3, %51 : vector<128x1xi32>
    %c0_i32_16 = arith.constant 0 : i32
    %53 = vector.broadcast %c0_i32_16 : i32 to vector<128x1xi32>
    %54 = arith.cmpi sge, %50, %53 : vector<128x1xi32>
    %c8_i32_17 = arith.constant 8 : i32
    %55 = vector.broadcast %c8_i32_17 : i32 to vector<128x1xi32>
    %56 = arith.cmpi slt, %50, %55 : vector<128x1xi32>
    %57 = arith.andi %54, %56 : vector<128x1xi1>
    %c0_i32_18 = arith.constant 0 : i32
    %58 = vector.broadcast %c0_i32_18 : i32 to vector<128x1xi32>
    %59 = arith.cmpi sge, %52, %58 : vector<128x1xi32>
    %60 = arith.andi %57, %59 : vector<128x1xi1>
    %c8_i32_19 = arith.constant 8 : i32
    %61 = vector.broadcast %c8_i32_19 : i32 to vector<128x1xi32>
    %62 = arith.cmpi slt, %52, %61 : vector<128x1xi32>
    %63 = arith.andi %60, %62 : vector<128x1xi1>
    %c0_i32_20 = arith.constant 0 : i32
    %64 = vector.broadcast %c0_i32_20 : i32 to vector<128x1xi32>
    %65 = arith.addi %1, %64 : vector<128x1xi32>
    %c1_i32_21 = arith.constant 1 : i32
    %66 = vector.broadcast %c1_i32_21 : i32 to vector<128x1xi32>
    %67 = arith.addi %3, %66 : vector<128x1xi32>
    %c0_i32_22 = arith.constant 0 : i32
    %68 = vector.broadcast %c0_i32_22 : i32 to vector<128x1xi32>
    %69 = arith.cmpi sge, %65, %68 : vector<128x1xi32>
    %c8_i32_23 = arith.constant 8 : i32
    %70 = vector.broadcast %c8_i32_23 : i32 to vector<128x1xi32>
    %71 = arith.cmpi slt, %65, %70 : vector<128x1xi32>
    %72 = arith.andi %69, %71 : vector<128x1xi1>
    %c0_i32_24 = arith.constant 0 : i32
    %73 = vector.broadcast %c0_i32_24 : i32 to vector<128x1xi32>
    %74 = arith.cmpi sge, %67, %73 : vector<128x1xi32>
    %75 = arith.andi %72, %74 : vector<128x1xi1>
    %c8_i32_25 = arith.constant 8 : i32
    %76 = vector.broadcast %c8_i32_25 : i32 to vector<128x1xi32>
    %77 = arith.cmpi slt, %67, %76 : vector<128x1xi32>
    %78 = arith.andi %75, %77 : vector<128x1xi1>
    %c1_i32_26 = arith.constant 1 : i32
    %79 = vector.broadcast %c1_i32_26 : i32 to vector<128x1xi32>
    %80 = arith.addi %1, %79 : vector<128x1xi32>
    %c-1_i32_27 = arith.constant -1 : i32
    %81 = vector.broadcast %c-1_i32_27 : i32 to vector<128x1xi32>
    %82 = arith.addi %3, %81 : vector<128x1xi32>
    %c0_i32_28 = arith.constant 0 : i32
    %83 = vector.broadcast %c0_i32_28 : i32 to vector<128x1xi32>
    %84 = arith.cmpi sge, %80, %83 : vector<128x1xi32>
    %c8_i32_29 = arith.constant 8 : i32
    %85 = vector.broadcast %c8_i32_29 : i32 to vector<128x1xi32>
    %86 = arith.cmpi slt, %80, %85 : vector<128x1xi32>
    %87 = arith.andi %84, %86 : vector<128x1xi1>
    %c0_i32_30 = arith.constant 0 : i32
    %88 = vector.broadcast %c0_i32_30 : i32 to vector<128x1xi32>
    %89 = arith.cmpi sge, %82, %88 : vector<128x1xi32>
    %90 = arith.andi %87, %89 : vector<128x1xi1>
    %c8_i32_31 = arith.constant 8 : i32
    %91 = vector.broadcast %c8_i32_31 : i32 to vector<128x1xi32>
    %92 = arith.cmpi slt, %82, %91 : vector<128x1xi32>
    %93 = arith.andi %90, %92 : vector<128x1xi1>
    %c1_i32_32 = arith.constant 1 : i32
    %94 = vector.broadcast %c1_i32_32 : i32 to vector<128x1xi32>
    %95 = arith.addi %1, %94 : vector<128x1xi32>
    %c0_i32_33 = arith.constant 0 : i32
    %96 = vector.broadcast %c0_i32_33 : i32 to vector<128x1xi32>
    %97 = arith.addi %3, %96 : vector<128x1xi32>
    %c0_i32_34 = arith.constant 0 : i32
    %98 = vector.broadcast %c0_i32_34 : i32 to vector<128x1xi32>
    %99 = arith.cmpi sge, %95, %98 : vector<128x1xi32>
    %c8_i32_35 = arith.constant 8 : i32
    %100 = vector.broadcast %c8_i32_35 : i32 to vector<128x1xi32>
    %101 = arith.cmpi slt, %95, %100 : vector<128x1xi32>
    %102 = arith.andi %99, %101 : vector<128x1xi1>
    %c0_i32_36 = arith.constant 0 : i32
    %103 = vector.broadcast %c0_i32_36 : i32 to vector<128x1xi32>
    %104 = arith.cmpi sge, %97, %103 : vector<128x1xi32>
    %105 = arith.andi %102, %104 : vector<128x1xi1>
    %c8_i32_37 = arith.constant 8 : i32
    %106 = vector.broadcast %c8_i32_37 : i32 to vector<128x1xi32>
    %107 = arith.cmpi slt, %97, %106 : vector<128x1xi32>
    %108 = arith.andi %105, %107 : vector<128x1xi1>
    %c1_i32_38 = arith.constant 1 : i32
    %109 = vector.broadcast %c1_i32_38 : i32 to vector<128x1xi32>
    %110 = arith.addi %1, %109 : vector<128x1xi32>
    %c1_i32_39 = arith.constant 1 : i32
    %111 = vector.broadcast %c1_i32_39 : i32 to vector<128x1xi32>
    %112 = arith.addi %3, %111 : vector<128x1xi32>
    %c0_i32_40 = arith.constant 0 : i32
    %113 = vector.broadcast %c0_i32_40 : i32 to vector<128x1xi32>
    %114 = arith.cmpi sge, %110, %113 : vector<128x1xi32>
    %c8_i32_41 = arith.constant 8 : i32
    %115 = vector.broadcast %c8_i32_41 : i32 to vector<128x1xi32>
    %116 = arith.cmpi slt, %110, %115 : vector<128x1xi32>
    %117 = arith.andi %114, %116 : vector<128x1xi1>
    %c0_i32_42 = arith.constant 0 : i32
    %118 = vector.broadcast %c0_i32_42 : i32 to vector<128x1xi32>
    %119 = arith.cmpi sge, %112, %118 : vector<128x1xi32>
    %120 = arith.andi %117, %119 : vector<128x1xi1>
    %c8_i32_43 = arith.constant 8 : i32
    %121 = vector.broadcast %c8_i32_43 : i32 to vector<128x1xi32>
    %122 = arith.cmpi slt, %112, %121 : vector<128x1xi32>
    %123 = arith.andi %120, %122 : vector<128x1xi1>
    %cst = arith.constant 0.000000e+00 : f32
    %124 = vector.broadcast %cst : f32 to vector<16x128xf32>
    %c0 = arith.constant 0 : index
    %c0_44 = arith.constant 0 : index
    %125 = vector.load %arg11[%c0, %c0_44] : memref<160x128xf32, #tpu.memory_space<vmem>>, vector<16x128xf32>
    tpu.vector_store %arg11[%c0, %c0_44], %124 {strides = array<i32>} : memref<160x128xf32, #tpu.memory_space<vmem>>, vector<16x128xf32>,
    %cst_45 = arith.constant 0.000000e+00 : f32
    %126 = vector.broadcast %cst_45 : f32 to vector<16x128xf32>
    %c144 = arith.constant 144 : index
    %c0_46 = arith.constant 0 : index
    %127 = vector.load %arg11[%c144, %c0_46] : memref<160x128xf32, #tpu.memory_space<vmem>>, vector<16x128xf32>
    tpu.vector_store %arg11[%c144, %c0_46], %126 {strides = array<i32>} : memref<160x128xf32, #tpu.memory_space<vmem>>, vector<16x128xf32>,
    %c0_47 = arith.constant 0 : index
    %c0_48 = arith.constant 0 : index
    %c0_49 = arith.constant 0 : index
    %128 = vector.load %arg1[%c0_47, %c0_48, %c0_49] : memref<2x64x128xf32, #tpu.memory_space<vmem>>, vector<2x64x128xf32>
    %129 = vector.shape_cast %128 : vector<2x64x128xf32> to vector<128x128xf32>
    %c16 = arith.constant 16 : index
    %c0_50 = arith.constant 0 : index
    %130 = vector.load %arg11[%c16, %c0_50] : memref<160x128xf32, #tpu.memory_space<vmem>>, vector<128x128xf32>
    tpu.vector_store %arg11[%c16, %c0_50], %129 {strides = array<i32>} : memref<160x128xf32, #tpu.memory_space<vmem>>, vector<128x128xf32>,
    %cst_51 = arith.constant 0.000000e+00 : f32
    %131 = vector.broadcast %cst_51 : f32 to vector<128x128xf32>
    %c7 = arith.constant 7 : index
    %c0_52 = arith.constant 0 : index
    %132 = vector.load %arg11[%c7, %c0_52] : memref<160x128xf32, #tpu.memory_space<vmem>>, vector<128x128xf32>
    %cst_53 = arith.constant 0.000000e+00 : f32
    %133 = vector.shape_cast %18 : vector<128x1xi1> to vector<128x1xi1>
    %134 = vector.broadcast %133 : vector<128x1xi1> to vector<128x128xi1>
    %135 = vector.broadcast %cst_53 : f32 to vector<128x128xf32>
    %136 = arith.select %134, %132, %135 : vector<128x128xi1>, vector<128x128xf32>
    %137 = arith.truncf %136 : vector<128x128xf32> to vector<128x128xbf16>
    %c0_54 = arith.constant 0 : index
    %c0_55 = arith.constant 0 : index
    %138 = vector.load %arg2[%c0_54, %c0_55] : memref<1152x128xbf16, #tpu.memory_space<vmem>>, vector<128x128xbf16>
    %cst_56 = arith.constant dense<0.000000e+00> : vector<128x128xf32>
    %139 = tpu.matmul %137, %138, %cst_56 {dimension_numbers = #tpu.dot_dimension_numbers<[1], [0], [0], [1], [0, 0, 1, 1], [], []>} : vector<128x128xbf16>, vector<128x128xbf16>, vector<128x128xf32> -> vector<128x128xf32>
    %140 = arith.addf %131, %139 : vector<128x128xf32>
    %c8 = arith.constant 8 : index
    %c0_57 = arith.constant 0 : index
    %141 = vector.load %arg11[%c8, %c0_57] : memref<160x128xf32, #tpu.memory_space<vmem>>, vector<128x128xf32>
    %cst_58 = arith.constant 0.000000e+00 : f32
    %142 = vector.shape_cast %33 : vector<128x1xi1> to vector<128x1xi1>
    %143 = vector.broadcast %142 : vector<128x1xi1> to vector<128x128xi1>
    %144 = vector.broadcast %cst_58 : f32 to vector<128x128xf32>
    %145 = arith.select %143, %141, %144 : vector<128x128xi1>, vector<128x128xf32>
    %146 = arith.truncf %145 : vector<128x128xf32> to vector<128x128xbf16>
    %c128 = arith.constant 128 : index
    %c0_59 = arith.constant 0 : index
    %147 = vector.load %arg2[%c128, %c0_59] : memref<1152x128xbf16, #tpu.memory_space<vmem>>, vector<128x128xbf16>
    %cst_60 = arith.constant dense<0.000000e+00> : vector<128x128xf32>
    %148 = tpu.matmul %146, %147, %cst_60 {dimension_numbers = #tpu.dot_dimension_numbers<[1], [0], [0], [1], [0, 0, 1, 1], [], []>} : vector<128x128xbf16>, vector<128x128xbf16>, vector<128x128xf32> -> vector<128x128xf32>
    %149 = arith.addf %140, %148 : vector<128x128xf32>
    %c9 = arith.constant 9 : index
    %c0_61 = arith.constant 0 : index
    %150 = vector.load %arg11[%c9, %c0_61] : memref<160x128xf32, #tpu.memory_space<vmem>>, vector<128x128xf32>
    %cst_62 = arith.constant 0.000000e+00 : f32
    %151 = vector.shape_cast %48 : vector<128x1xi1> to vector<128x1xi1>
    %152 = vector.broadcast %151 : vector<128x1xi1> to vector<128x128xi1>
    %153 = vector.broadcast %cst_62 : f32 to vector<128x128xf32>
    %154 = arith.select %152, %150, %153 : vector<128x128xi1>, vector<128x128xf32>
    %155 = arith.truncf %154 : vector<128x128xf32> to vector<128x128xbf16>
    %c256 = arith.constant 256 : index
    %c0_63 = arith.constant 0 : index
    %156 = vector.load %arg2[%c256, %c0_63] : memref<1152x128xbf16, #tpu.memory_space<vmem>>, vector<128x128xbf16>
    %cst_64 = arith.constant dense<0.000000e+00> : vector<128x128xf32>
    %157 = tpu.matmul %155, %156, %cst_64 {dimension_numbers = #tpu.dot_dimension_numbers<[1], [0], [0], [1], [0, 0, 1, 1], [], []>} : vector<128x128xbf16>, vector<128x128xbf16>, vector<128x128xf32> -> vector<128x128xf32>
    %158 = arith.addf %149, %157 : vector<128x128xf32>
    %c15 = arith.constant 15 : index
    %c0_65 = arith.constant 0 : index
    %159 = vector.load %arg11[%c15, %c0_65] : memref<160x128xf32, #tpu.memory_space<vmem>>, vector<128x128xf32>
    %cst_66 = arith.constant 0.000000e+00 : f32
    %160 = vector.shape_cast %63 : vector<128x1xi1> to vector<128x1xi1>
    %161 = vector.broadcast %160 : vector<128x1xi1> to vector<128x128xi1>
    %162 = vector.broadcast %cst_66 : f32 to vector<128x128xf32>
    %163 = arith.select %161, %159, %162 : vector<128x128xi1>, vector<128x128xf32>
    %164 = arith.truncf %163 : vector<128x128xf32> to vector<128x128xbf16>
    %c384 = arith.constant 384 : index
    %c0_67 = arith.constant 0 : index
    %165 = vector.load %arg2[%c384, %c0_67] : memref<1152x128xbf16, #tpu.memory_space<vmem>>, vector<128x128xbf16>
    %cst_68 = arith.constant dense<0.000000e+00> : vector<128x128xf32>
    %166 = tpu.matmul %164, %165, %cst_68 {dimension_numbers = #tpu.dot_dimension_numbers<[1], [0], [0], [1], [0, 0, 1, 1], [], []>} : vector<128x128xbf16>, vector<128x128xbf16>, vector<128x128xf32> -> vector<128x128xf32>
    %167 = arith.addf %158, %166 : vector<128x128xf32>
    %c16_69 = arith.constant 16 : index
    %c0_70 = arith.constant 0 : index
    %168 = vector.load %arg11[%c16_69, %c0_70] : memref<160x128xf32, #tpu.memory_space<vmem>>, vector<128x128xf32>
    %169 = arith.truncf %168 : vector<128x128xf32> to vector<128x128xbf16>
    %c512 = arith.constant 512 : index
    %c0_71 = arith.constant 0 : index
    %170 = vector.load %arg2[%c512, %c0_71] : memref<1152x128xbf16, #tpu.memory_space<vmem>>, vector<128x128xbf16>
    %cst_72 = arith.constant dense<0.000000e+00> : vector<128x128xf32>
    %171 = tpu.matmul %169, %170, %cst_72 {dimension_numbers = #tpu.dot_dimension_numbers<[1], [0], [0], [1], [0, 0, 1, 1], [], []>} : vector<128x128xbf16>, vector<128x128xbf16>, vector<128x128xf32> -> vector<128x128xf32>
    %172 = arith.addf %167, %171 : vector<128x128xf32>
    %c17 = arith.constant 17 : index
    %c0_73 = arith.constant 0 : index
    %173 = vector.load %arg11[%c17, %c0_73] : memref<160x128xf32, #tpu.memory_space<vmem>>, vector<128x128xf32>
    %cst_74 = arith.constant 0.000000e+00 : f32
    %174 = vector.shape_cast %78 : vector<128x1xi1> to vector<128x1xi1>
    %175 = vector.broadcast %174 : vector<128x1xi1> to vector<128x128xi1>
    %176 = vector.broadcast %cst_74 : f32 to vector<128x128xf32>
    %177 = arith.select %175, %173, %176 : vector<128x128xi1>, vector<128x128xf32>
    %178 = arith.truncf %177 : vector<128x128xf32> to vector<128x128xbf16>
    %c640 = arith.constant 640 : index
    %c0_75 = arith.constant 0 : index
    %179 = vector.load %arg2[%c640, %c0_75] : memref<1152x128xbf16, #tpu.memory_space<vmem>>, vector<128x128xbf16>
    %cst_76 = arith.constant dense<0.000000e+00> : vector<128x128xf32>
    %180 = tpu.matmul %178, %179, %cst_76 {dimension_numbers = #tpu.dot_dimension_numbers<[1], [0], [0], [1], [0, 0, 1, 1], [], []>} : vector<128x128xbf16>, vector<128x128xbf16>, vector<128x128xf32> -> vector<128x128xf32>
    %181 = arith.addf %172, %180 : vector<128x128xf32>
    %c23 = arith.constant 23 : index
    %c0_77 = arith.constant 0 : index
    %182 = vector.load %arg11[%c23, %c0_77] : memref<160x128xf32, #tpu.memory_space<vmem>>, vector<128x128xf32>
    %cst_78 = arith.constant 0.000000e+00 : f32
    %183 = vector.shape_cast %93 : vector<128x1xi1> to vector<128x1xi1>
    %184 = vector.broadcast %183 : vector<128x1xi1> to vector<128x128xi1>
    %185 = vector.broadcast %cst_78 : f32 to vector<128x128xf32>
    %186 = arith.select %184, %182, %185 : vector<128x128xi1>, vector<128x128xf32>
    %187 = arith.truncf %186 : vector<128x128xf32> to vector<128x128xbf16>
    %c768 = arith.constant 768 : index
    %c0_79 = arith.constant 0 : index
    %188 = vector.load %arg2[%c768, %c0_79] : memref<1152x128xbf16, #tpu.memory_space<vmem>>, vector<128x128xbf16>
    %cst_80 = arith.constant dense<0.000000e+00> : vector<128x128xf32>
    %189 = tpu.matmul %187, %188, %cst_80 {dimension_numbers = #tpu.dot_dimension_numbers<[1], [0], [0], [1], [0, 0, 1, 1], [], []>} : vector<128x128xbf16>, vector<128x128xbf16>, vector<128x128xf32> -> vector<128x128xf32>
    %190 = arith.addf %181, %189 : vector<128x128xf32>
    %c24 = arith.constant 24 : index
    %c0_81 = arith.constant 0 : index
    %191 = vector.load %arg11[%c24, %c0_81] : memref<160x128xf32, #tpu.memory_space<vmem>>, vector<128x128xf32>
    %cst_82 = arith.constant 0.000000e+00 : f32
    %192 = vector.shape_cast %108 : vector<128x1xi1> to vector<128x1xi1>
    %193 = vector.broadcast %192 : vector<128x1xi1> to vector<128x128xi1>
    %194 = vector.broadcast %cst_82 : f32 to vector<128x128xf32>
    %195 = arith.select %193, %191, %194 : vector<128x128xi1>, vector<128x128xf32>
    %196 = arith.truncf %195 : vector<128x128xf32> to vector<128x128xbf16>
    %c896 = arith.constant 896 : index
    %c0_83 = arith.constant 0 : index
    %197 = vector.load %arg2[%c896, %c0_83] : memref<1152x128xbf16, #tpu.memory_space<vmem>>, vector<128x128xbf16>
    %cst_84 = arith.constant dense<0.000000e+00> : vector<128x128xf32>
    %198 = tpu.matmul %196, %197, %cst_84 {dimension_numbers = #tpu.dot_dimension_numbers<[1], [0], [0], [1], [0, 0, 1, 1], [], []>} : vector<128x128xbf16>, vector<128x128xbf16>, vector<128x128xf32> -> vector<128x128xf32>
    %199 = arith.addf %190, %198 : vector<128x128xf32>
    %c25 = arith.constant 25 : index
    %c0_85 = arith.constant 0 : index
    %200 = vector.load %arg11[%c25, %c0_85] : memref<160x128xf32, #tpu.memory_space<vmem>>, vector<128x128xf32>
    %cst_86 = arith.constant 0.000000e+00 : f32
    %201 = vector.shape_cast %123 : vector<128x1xi1> to vector<128x1xi1>
    %202 = vector.broadcast %201 : vector<128x1xi1> to vector<128x128xi1>
    %203 = vector.broadcast %cst_86 : f32 to vector<128x128xf32>
    %204 = arith.select %202, %200, %203 : vector<128x128xi1>, vector<128x128xf32>
    %205 = arith.truncf %204 : vector<128x128xf32> to vector<128x128xbf16>
    %c1024 = arith.constant 1024 : index
    %c0_87 = arith.constant 0 : index
    %206 = vector.load %arg2[%c1024, %c0_87] : memref<1152x128xbf16, #tpu.memory_space<vmem>>, vector<128x128xbf16>
    %cst_88 = arith.constant dense<0.000000e+00> : vector<128x128xf32>
    %207 = tpu.matmul %205, %206, %cst_88 {dimension_numbers = #tpu.dot_dimension_numbers<[1], [0], [0], [1], [0, 0, 1, 1], [], []>} : vector<128x128xbf16>, vector<128x128xbf16>, vector<128x128xf32> -> vector<128x128xf32>
    %208 = arith.addf %199, %207 : vector<128x128xf32>
    %c0_89 = arith.constant 0 : index
    %c0_90 = arith.constant 0 : index
    %209 = vector.load %arg3[%c0_89, %c0_90] : memref<1x128xf32, #tpu.memory_space<vmem>>, vector<1x128xf32>
    %210 = vector.broadcast %209 : vector<1x128xf32> to vector<128x128xf32>
    %211 = arith.addf %208, %210 : vector<128x128xf32>
    %cst_91 = arith.constant 0.000000e+00 : f32
    %212 = vector.broadcast %cst_91 : f32 to vector<128x128xf32>
    %213 = arith.maximumf %211, %212 : vector<128x128xf32>
    %c16_92 = arith.constant 16 : index
    %c0_93 = arith.constant 0 : index
    %214 = vector.load %arg11[%c16_92, %c0_93] : memref<160x128xf32, #tpu.memory_space<vmem>>, vector<128x128xf32>
    tpu.vector_store %arg11[%c16_92, %c0_93], %213 {strides = array<i32>} : memref<160x128xf32, #tpu.memory_space<vmem>>, vector<128x128xf32>,
    %cst_94 = arith.constant 0.000000e+00 : f32
    %215 = vector.broadcast %cst_94 : f32 to vector<128x128xf32>
    %c7_95 = arith.constant 7 : index
    %c0_96 = arith.constant 0 : index
    %216 = vector.load %arg11[%c7_95, %c0_96] : memref<160x128xf32, #tpu.memory_space<vmem>>, vector<128x128xf32>
    %cst_97 = arith.constant 0.000000e+00 : f32
    %217 = vector.shape_cast %18 : vector<128x1xi1> to vector<128x1xi1>
    %218 = vector.broadcast %217 : vector<128x1xi1> to vector<128x128xi1>
    %219 = vector.broadcast %cst_97 : f32 to vector<128x128xf32>
    %220 = arith.select %218, %216, %219 : vector<128x128xi1>, vector<128x128xf32>
    %221 = arith.truncf %220 : vector<128x128xf32> to vector<128x128xbf16>
    %c0_98 = arith.constant 0 : index
    %c0_99 = arith.constant 0 : index
    %222 = vector.load %arg4[%c0_98, %c0_99] : memref<1152x128xbf16, #tpu.memory_space<vmem>>, vector<128x128xbf16>
    %cst_100 = arith.constant dense<0.000000e+00> : vector<128x128xf32>
    %223 = tpu.matmul %221, %222, %cst_100 {dimension_numbers = #tpu.dot_dimension_numbers<[1], [0], [0], [1], [0, 0, 1, 1], [], []>} : vector<128x128xbf16>, vector<128x128xbf16>, vector<128x128xf32> -> vector<128x128xf32>
    %224 = arith.addf %215, %223 : vector<128x128xf32>
    %c8_101 = arith.constant 8 : index
    %c0_102 = arith.constant 0 : index
    %225 = vector.load %arg11[%c8_101, %c0_102] : memref<160x128xf32, #tpu.memory_space<vmem>>, vector<128x128xf32>
    %cst_103 = arith.constant 0.000000e+00 : f32
    %226 = vector.shape_cast %33 : vector<128x1xi1> to vector<128x1xi1>
    %227 = vector.broadcast %226 : vector<128x1xi1> to vector<128x128xi1>
    %228 = vector.broadcast %cst_103 : f32 to vector<128x128xf32>
    %229 = arith.select %227, %225, %228 : vector<128x128xi1>, vector<128x128xf32>
    %230 = arith.truncf %229 : vector<128x128xf32> to vector<128x128xbf16>
    %c128_104 = arith.constant 128 : index
    %c0_105 = arith.constant 0 : index
    %231 = vector.load %arg4[%c128_104, %c0_105] : memref<1152x128xbf16, #tpu.memory_space<vmem>>, vector<128x128xbf16>
    %cst_106 = arith.constant dense<0.000000e+00> : vector<128x128xf32>
    %232 = tpu.matmul %230, %231, %cst_106 {dimension_numbers = #tpu.dot_dimension_numbers<[1], [0], [0], [1], [0, 0, 1, 1], [], []>} : vector<128x128xbf16>, vector<128x128xbf16>, vector<128x128xf32> -> vector<128x128xf32>
    %233 = arith.addf %224, %232 : vector<128x128xf32>
    %c9_107 = arith.constant 9 : index
    %c0_108 = arith.constant 0 : index
    %234 = vector.load %arg11[%c9_107, %c0_108] : memref<160x128xf32, #tpu.memory_space<vmem>>, vector<128x128xf32>
    %cst_109 = arith.constant 0.000000e+00 : f32
    %235 = vector.shape_cast %48 : vector<128x1xi1> to vector<128x1xi1>
    %236 = vector.broadcast %235 : vector<128x1xi1> to vector<128x128xi1>
    %237 = vector.broadcast %cst_109 : f32 to vector<128x128xf32>
    %238 = arith.select %236, %234, %237 : vector<128x128xi1>, vector<128x128xf32>
    %239 = arith.truncf %238 : vector<128x128xf32> to vector<128x128xbf16>
    %c256_110 = arith.constant 256 : index
    %c0_111 = arith.constant 0 : index
    %240 = vector.load %arg4[%c256_110, %c0_111] : memref<1152x128xbf16, #tpu.memory_space<vmem>>, vector<128x128xbf16>
    %cst_112 = arith.constant dense<0.000000e+00> : vector<128x128xf32>
    %241 = tpu.matmul %239, %240, %cst_112 {dimension_numbers = #tpu.dot_dimension_numbers<[1], [0], [0], [1], [0, 0, 1, 1], [], []>} : vector<128x128xbf16>, vector<128x128xbf16>, vector<128x128xf32> -> vector<128x128xf32>
    %242 = arith.addf %233, %241 : vector<128x128xf32>
    %c15_113 = arith.constant 15 : index
    %c0_114 = arith.constant 0 : index
    %243 = vector.load %arg11[%c15_113, %c0_114] : memref<160x128xf32, #tpu.memory_space<vmem>>, vector<128x128xf32>
    %cst_115 = arith.constant 0.000000e+00 : f32
    %244 = vector.shape_cast %63 : vector<128x1xi1> to vector<128x1xi1>
    %245 = vector.broadcast %244 : vector<128x1xi1> to vector<128x128xi1>
    %246 = vector.broadcast %cst_115 : f32 to vector<128x128xf32>
    %247 = arith.select %245, %243, %246 : vector<128x128xi1>, vector<128x128xf32>
    %248 = arith.truncf %247 : vector<128x128xf32> to vector<128x128xbf16>
    %c384_116 = arith.constant 384 : index
    %c0_117 = arith.constant 0 : index
    %249 = vector.load %arg4[%c384_116, %c0_117] : memref<1152x128xbf16, #tpu.memory_space<vmem>>, vector<128x128xbf16>
    %cst_118 = arith.constant dense<0.000000e+00> : vector<128x128xf32>
    %250 = tpu.matmul %248, %249, %cst_118 {dimension_numbers = #tpu.dot_dimension_numbers<[1], [0], [0], [1], [0, 0, 1, 1], [], []>} : vector<128x128xbf16>, vector<128x128xbf16>, vector<128x128xf32> -> vector<128x128xf32>
    %251 = arith.addf %242, %250 : vector<128x128xf32>
    %c16_119 = arith.constant 16 : index
    %c0_120 = arith.constant 0 : index
    %252 = vector.load %arg11[%c16_119, %c0_120] : memref<160x128xf32, #tpu.memory_space<vmem>>, vector<128x128xf32>
    %253 = arith.truncf %252 : vector<128x128xf32> to vector<128x128xbf16>
    %c512_121 = arith.constant 512 : index
    %c0_122 = arith.constant 0 : index
    %254 = vector.load %arg4[%c512_121, %c0_122] : memref<1152x128xbf16, #tpu.memory_space<vmem>>, vector<128x128xbf16>
    %cst_123 = arith.constant dense<0.000000e+00> : vector<128x128xf32>
    %255 = tpu.matmul %253, %254, %cst_123 {dimension_numbers = #tpu.dot_dimension_numbers<[1], [0], [0], [1], [0, 0, 1, 1], [], []>} : vector<128x128xbf16>, vector<128x128xbf16>, vector<128x128xf32> -> vector<128x128xf32>
    %256 = arith.addf %251, %255 : vector<128x128xf32>
    %c17_124 = arith.constant 17 : index
    %c0_125 = arith.constant 0 : index
    %257 = vector.load %arg11[%c17_124, %c0_125] : memref<160x128xf32, #tpu.memory_space<vmem>>, vector<128x128xf32>
    %cst_126 = arith.constant 0.000000e+00 : f32
    %258 = vector.shape_cast %78 : vector<128x1xi1> to vector<128x1xi1>
    %259 = vector.broadcast %258 : vector<128x1xi1> to vector<128x128xi1>
    %260 = vector.broadcast %cst_126 : f32 to vector<128x128xf32>
    %261 = arith.select %259, %257, %260 : vector<128x128xi1>, vector<128x128xf32>
    %262 = arith.truncf %261 : vector<128x128xf32> to vector<128x128xbf16>
    %c640_127 = arith.constant 640 : index
    %c0_128 = arith.constant 0 : index
    %263 = vector.load %arg4[%c640_127, %c0_128] : memref<1152x128xbf16, #tpu.memory_space<vmem>>, vector<128x128xbf16>
    %cst_129 = arith.constant dense<0.000000e+00> : vector<128x128xf32>
    %264 = tpu.matmul %262, %263, %cst_129 {dimension_numbers = #tpu.dot_dimension_numbers<[1], [0], [0], [1], [0, 0, 1, 1], [], []>} : vector<128x128xbf16>, vector<128x128xbf16>, vector<128x128xf32> -> vector<128x128xf32>
    %265 = arith.addf %256, %264 : vector<128x128xf32>
    %c23_130 = arith.constant 23 : index
    %c0_131 = arith.constant 0 : index
    %266 = vector.load %arg11[%c23_130, %c0_131] : memref<160x128xf32, #tpu.memory_space<vmem>>, vector<128x128xf32>
    %cst_132 = arith.constant 0.000000e+00 : f32
    %267 = vector.shape_cast %93 : vector<128x1xi1> to vector<128x1xi1>
    %268 = vector.broadcast %267 : vector<128x1xi1> to vector<128x128xi1>
    %269 = vector.broadcast %cst_132 : f32 to vector<128x128xf32>
    %270 = arith.select %268, %266, %269 : vector<128x128xi1>, vector<128x128xf32>
    %271 = arith.truncf %270 : vector<128x128xf32> to vector<128x128xbf16>
    %c768_133 = arith.constant 768 : index
    %c0_134 = arith.constant 0 : index
    %272 = vector.load %arg4[%c768_133, %c0_134] : memref<1152x128xbf16, #tpu.memory_space<vmem>>, vector<128x128xbf16>
    %cst_135 = arith.constant dense<0.000000e+00> : vector<128x128xf32>
    %273 = tpu.matmul %271, %272, %cst_135 {dimension_numbers = #tpu.dot_dimension_numbers<[1], [0], [0], [1], [0, 0, 1, 1], [], []>} : vector<128x128xbf16>, vector<128x128xbf16>, vector<128x128xf32> -> vector<128x128xf32>
    %274 = arith.addf %265, %273 : vector<128x128xf32>
    %c24_136 = arith.constant 24 : index
    %c0_137 = arith.constant 0 : index
    %275 = vector.load %arg11[%c24_136, %c0_137] : memref<160x128xf32, #tpu.memory_space<vmem>>, vector<128x128xf32>
    %cst_138 = arith.constant 0.000000e+00 : f32
    %276 = vector.shape_cast %108 : vector<128x1xi1> to vector<128x1xi1>
    %277 = vector.broadcast %276 : vector<128x1xi1> to vector<128x128xi1>
    %278 = vector.broadcast %cst_138 : f32 to vector<128x128xf32>
    %279 = arith.select %277, %275, %278 : vector<128x128xi1>, vector<128x128xf32>
    %280 = arith.truncf %279 : vector<128x128xf32> to vector<128x128xbf16>
    %c896_139 = arith.constant 896 : index
    %c0_140 = arith.constant 0 : index
    %281 = vector.load %arg4[%c896_139, %c0_140] : memref<1152x128xbf16, #tpu.memory_space<vmem>>, vector<128x128xbf16>
    %cst_141 = arith.constant dense<0.000000e+00> : vector<128x128xf32>
    %282 = tpu.matmul %280, %281, %cst_141 {dimension_numbers = #tpu.dot_dimension_numbers<[1], [0], [0], [1], [0, 0, 1, 1], [], []>} : vector<128x128xbf16>, vector<128x128xbf16>, vector<128x128xf32> -> vector<128x128xf32>
    %283 = arith.addf %274, %282 : vector<128x128xf32>
    %c25_142 = arith.constant 25 : index
    %c0_143 = arith.constant 0 : index
    %284 = vector.load %arg11[%c25_142, %c0_143] : memref<160x128xf32, #tpu.memory_space<vmem>>, vector<128x128xf32>
    %cst_144 = arith.constant 0.000000e+00 : f32
    %285 = vector.shape_cast %123 : vector<128x1xi1> to vector<128x1xi1>
    %286 = vector.broadcast %285 : vector<128x1xi1> to vector<128x128xi1>
    %287 = vector.broadcast %cst_144 : f32 to vector<128x128xf32>
    %288 = arith.select %286, %284, %287 : vector<128x128xi1>, vector<128x128xf32>
    %289 = arith.truncf %288 : vector<128x128xf32> to vector<128x128xbf16>
    %c1024_145 = arith.constant 1024 : index
    %c0_146 = arith.constant 0 : index
    %290 = vector.load %arg4[%c1024_145, %c0_146] : memref<1152x128xbf16, #tpu.memory_space<vmem>>, vector<128x128xbf16>
    %cst_147 = arith.constant dense<0.000000e+00> : vector<128x128xf32>
    %291 = tpu.matmul %289, %290, %cst_147 {dimension_numbers = #tpu.dot_dimension_numbers<[1], [0], [0], [1], [0, 0, 1, 1], [], []>} : vector<128x128xbf16>, vector<128x128xbf16>, vector<128x128xf32> -> vector<128x128xf32>
    %292 = arith.addf %283, %291 : vector<128x128xf32>
    %c0_148 = arith.constant 0 : index
    %c0_149 = arith.constant 0 : index
    %293 = vector.load %arg5[%c0_148, %c0_149] : memref<1x128xf32, #tpu.memory_space<vmem>>, vector<1x128xf32>
    %294 = vector.broadcast %293 : vector<1x128xf32> to vector<128x128xf32>
    %295 = arith.addf %292, %294 : vector<128x128xf32>
    %cst_150 = arith.constant 0.000000e+00 : f32
    %296 = vector.broadcast %cst_150 : f32 to vector<128x128xf32>
    %297 = arith.maximumf %295, %296 : vector<128x128xf32>
    %c16_151 = arith.constant 16 : index
    %c0_152 = arith.constant 0 : index
    %298 = vector.load %arg11[%c16_151, %c0_152] : memref<160x128xf32, #tpu.memory_space<vmem>>, vector<128x128xf32>
    tpu.vector_store %arg11[%c16_151, %c0_152], %297 {strides = array<i32>} : memref<160x128xf32, #tpu.memory_space<vmem>>, vector<128x128xf32>,
    %cst_153 = arith.constant 0.000000e+00 : f32
    %299 = vector.broadcast %cst_153 : f32 to vector<128x128xf32>
    %c7_154 = arith.constant 7 : index
    %c0_155 = arith.constant 0 : index
    %300 = vector.load %arg11[%c7_154, %c0_155] : memref<160x128xf32, #tpu.memory_space<vmem>>, vector<128x128xf32>
    %cst_156 = arith.constant 0.000000e+00 : f32
    %301 = vector.shape_cast %18 : vector<128x1xi1> to vector<128x1xi1>
    %302 = vector.broadcast %301 : vector<128x1xi1> to vector<128x128xi1>
    %303 = vector.broadcast %cst_156 : f32 to vector<128x128xf32>
    %304 = arith.select %302, %300, %303 : vector<128x128xi1>, vector<128x128xf32>
    %305 = arith.truncf %304 : vector<128x128xf32> to vector<128x128xbf16>
    %c0_157 = arith.constant 0 : index
    %c0_158 = arith.constant 0 : index
    %306 = vector.load %arg6[%c0_157, %c0_158] : memref<1152x128xbf16, #tpu.memory_space<vmem>>, vector<128x128xbf16>
    %cst_159 = arith.constant dense<0.000000e+00> : vector<128x128xf32>
    %307 = tpu.matmul %305, %306, %cst_159 {dimension_numbers = #tpu.dot_dimension_numbers<[1], [0], [0], [1], [0, 0, 1, 1], [], []>} : vector<128x128xbf16>, vector<128x128xbf16>, vector<128x128xf32> -> vector<128x128xf32>
    %308 = arith.addf %299, %307 : vector<128x128xf32>
    %c8_160 = arith.constant 8 : index
    %c0_161 = arith.constant 0 : index
    %309 = vector.load %arg11[%c8_160, %c0_161] : memref<160x128xf32, #tpu.memory_space<vmem>>, vector<128x128xf32>
    %cst_162 = arith.constant 0.000000e+00 : f32
    %310 = vector.shape_cast %33 : vector<128x1xi1> to vector<128x1xi1>
    %311 = vector.broadcast %310 : vector<128x1xi1> to vector<128x128xi1>
    %312 = vector.broadcast %cst_162 : f32 to vector<128x128xf32>
    %313 = arith.select %311, %309, %312 : vector<128x128xi1>, vector<128x128xf32>
    %314 = arith.truncf %313 : vector<128x128xf32> to vector<128x128xbf16>
    %c128_163 = arith.constant 128 : index
    %c0_164 = arith.constant 0 : index
    %315 = vector.load %arg6[%c128_163, %c0_164] : memref<1152x128xbf16, #tpu.memory_space<vmem>>, vector<128x128xbf16>
    %cst_165 = arith.constant dense<0.000000e+00> : vector<128x128xf32>
    %316 = tpu.matmul %314, %315, %cst_165 {dimension_numbers = #tpu.dot_dimension_numbers<[1], [0], [0], [1], [0, 0, 1, 1], [], []>} : vector<128x128xbf16>, vector<128x128xbf16>, vector<128x128xf32> -> vector<128x128xf32>
    %317 = arith.addf %308, %316 : vector<128x128xf32>
    %c9_166 = arith.constant 9 : index
    %c0_167 = arith.constant 0 : index
    %318 = vector.load %arg11[%c9_166, %c0_167] : memref<160x128xf32, #tpu.memory_space<vmem>>, vector<128x128xf32>
    %cst_168 = arith.constant 0.000000e+00 : f32
    %319 = vector.shape_cast %48 : vector<128x1xi1> to vector<128x1xi1>
    %320 = vector.broadcast %319 : vector<128x1xi1> to vector<128x128xi1>
    %321 = vector.broadcast %cst_168 : f32 to vector<128x128xf32>
    %322 = arith.select %320, %318, %321 : vector<128x128xi1>, vector<128x128xf32>
    %323 = arith.truncf %322 : vector<128x128xf32> to vector<128x128xbf16>
    %c256_169 = arith.constant 256 : index
    %c0_170 = arith.constant 0 : index
    %324 = vector.load %arg6[%c256_169, %c0_170] : memref<1152x128xbf16, #tpu.memory_space<vmem>>, vector<128x128xbf16>
    %cst_171 = arith.constant dense<0.000000e+00> : vector<128x128xf32>
    %325 = tpu.matmul %323, %324, %cst_171 {dimension_numbers = #tpu.dot_dimension_numbers<[1], [0], [0], [1], [0, 0, 1, 1], [], []>} : vector<128x128xbf16>, vector<128x128xbf16>, vector<128x128xf32> -> vector<128x128xf32>
    %326 = arith.addf %317, %325 : vector<128x128xf32>
    %c15_172 = arith.constant 15 : index
    %c0_173 = arith.constant 0 : index
    %327 = vector.load %arg11[%c15_172, %c0_173] : memref<160x128xf32, #tpu.memory_space<vmem>>, vector<128x128xf32>
    %cst_174 = arith.constant 0.000000e+00 : f32
    %328 = vector.shape_cast %63 : vector<128x1xi1> to vector<128x1xi1>
    %329 = vector.broadcast %328 : vector<128x1xi1> to vector<128x128xi1>
    %330 = vector.broadcast %cst_174 : f32 to vector<128x128xf32>
    %331 = arith.select %329, %327, %330 : vector<128x128xi1>, vector<128x128xf32>
    %332 = arith.truncf %331 : vector<128x128xf32> to vector<128x128xbf16>
    %c384_175 = arith.constant 384 : index
    %c0_176 = arith.constant 0 : index
    %333 = vector.load %arg6[%c384_175, %c0_176] : memref<1152x128xbf16, #tpu.memory_space<vmem>>, vector<128x128xbf16>
    %cst_177 = arith.constant dense<0.000000e+00> : vector<128x128xf32>
    %334 = tpu.matmul %332, %333, %cst_177 {dimension_numbers = #tpu.dot_dimension_numbers<[1], [0], [0], [1], [0, 0, 1, 1], [], []>} : vector<128x128xbf16>, vector<128x128xbf16>, vector<128x128xf32> -> vector<128x128xf32>
    %335 = arith.addf %326, %334 : vector<128x128xf32>
    %c16_178 = arith.constant 16 : index
    %c0_179 = arith.constant 0 : index
    %336 = vector.load %arg11[%c16_178, %c0_179] : memref<160x128xf32, #tpu.memory_space<vmem>>, vector<128x128xf32>
    %337 = arith.truncf %336 : vector<128x128xf32> to vector<128x128xbf16>
    %c512_180 = arith.constant 512 : index
    %c0_181 = arith.constant 0 : index
    %338 = vector.load %arg6[%c512_180, %c0_181] : memref<1152x128xbf16, #tpu.memory_space<vmem>>, vector<128x128xbf16>
    %cst_182 = arith.constant dense<0.000000e+00> : vector<128x128xf32>
    %339 = tpu.matmul %337, %338, %cst_182 {dimension_numbers = #tpu.dot_dimension_numbers<[1], [0], [0], [1], [0, 0, 1, 1], [], []>} : vector<128x128xbf16>, vector<128x128xbf16>, vector<128x128xf32> -> vector<128x128xf32>
    %340 = arith.addf %335, %339 : vector<128x128xf32>
    %c17_183 = arith.constant 17 : index
    %c0_184 = arith.constant 0 : index
    %341 = vector.load %arg11[%c17_183, %c0_184] : memref<160x128xf32, #tpu.memory_space<vmem>>, vector<128x128xf32>
    %cst_185 = arith.constant 0.000000e+00 : f32
    %342 = vector.shape_cast %78 : vector<128x1xi1> to vector<128x1xi1>
    %343 = vector.broadcast %342 : vector<128x1xi1> to vector<128x128xi1>
    %344 = vector.broadcast %cst_185 : f32 to vector<128x128xf32>
    %345 = arith.select %343, %341, %344 : vector<128x128xi1>, vector<128x128xf32>
    %346 = arith.truncf %345 : vector<128x128xf32> to vector<128x128xbf16>
    %c640_186 = arith.constant 640 : index
    %c0_187 = arith.constant 0 : index
    %347 = vector.load %arg6[%c640_186, %c0_187] : memref<1152x128xbf16, #tpu.memory_space<vmem>>, vector<128x128xbf16>
    %cst_188 = arith.constant dense<0.000000e+00> : vector<128x128xf32>
    %348 = tpu.matmul %346, %347, %cst_188 {dimension_numbers = #tpu.dot_dimension_numbers<[1], [0], [0], [1], [0, 0, 1, 1], [], []>} : vector<128x128xbf16>, vector<128x128xbf16>, vector<128x128xf32> -> vector<128x128xf32>
    %349 = arith.addf %340, %348 : vector<128x128xf32>
    %c23_189 = arith.constant 23 : index
    %c0_190 = arith.constant 0 : index
    %350 = vector.load %arg11[%c23_189, %c0_190] : memref<160x128xf32, #tpu.memory_space<vmem>>, vector<128x128xf32>
    %cst_191 = arith.constant 0.000000e+00 : f32
    %351 = vector.shape_cast %93 : vector<128x1xi1> to vector<128x1xi1>
    %352 = vector.broadcast %351 : vector<128x1xi1> to vector<128x128xi1>
    %353 = vector.broadcast %cst_191 : f32 to vector<128x128xf32>
    %354 = arith.select %352, %350, %353 : vector<128x128xi1>, vector<128x128xf32>
    %355 = arith.truncf %354 : vector<128x128xf32> to vector<128x128xbf16>
    %c768_192 = arith.constant 768 : index
    %c0_193 = arith.constant 0 : index
    %356 = vector.load %arg6[%c768_192, %c0_193] : memref<1152x128xbf16, #tpu.memory_space<vmem>>, vector<128x128xbf16>
    %cst_194 = arith.constant dense<0.000000e+00> : vector<128x128xf32>
    %357 = tpu.matmul %355, %356, %cst_194 {dimension_numbers = #tpu.dot_dimension_numbers<[1], [0], [0], [1], [0, 0, 1, 1], [], []>} : vector<128x128xbf16>, vector<128x128xbf16>, vector<128x128xf32> -> vector<128x128xf32>
    %358 = arith.addf %349, %357 : vector<128x128xf32>
    %c24_195 = arith.constant 24 : index
    %c0_196 = arith.constant 0 : index
    %359 = vector.load %arg11[%c24_195, %c0_196] : memref<160x128xf32, #tpu.memory_space<vmem>>, vector<128x128xf32>
    %cst_197 = arith.constant 0.000000e+00 : f32
    %360 = vector.shape_cast %108 : vector<128x1xi1> to vector<128x1xi1>
    %361 = vector.broadcast %360 : vector<128x1xi1> to vector<128x128xi1>
    %362 = vector.broadcast %cst_197 : f32 to vector<128x128xf32>
    %363 = arith.select %361, %359, %362 : vector<128x128xi1>, vector<128x128xf32>
    %364 = arith.truncf %363 : vector<128x128xf32> to vector<128x128xbf16>
    %c896_198 = arith.constant 896 : index
    %c0_199 = arith.constant 0 : index
    %365 = vector.load %arg6[%c896_198, %c0_199] : memref<1152x128xbf16, #tpu.memory_space<vmem>>, vector<128x128xbf16>
    %cst_200 = arith.constant dense<0.000000e+00> : vector<128x128xf32>
    %366 = tpu.matmul %364, %365, %cst_200 {dimension_numbers = #tpu.dot_dimension_numbers<[1], [0], [0], [1], [0, 0, 1, 1], [], []>} : vector<128x128xbf16>, vector<128x128xbf16>, vector<128x128xf32> -> vector<128x128xf32>
    %367 = arith.addf %358, %366 : vector<128x128xf32>
    %c25_201 = arith.constant 25 : index
    %c0_202 = arith.constant 0 : index
    %368 = vector.load %arg11[%c25_201, %c0_202] : memref<160x128xf32, #tpu.memory_space<vmem>>, vector<128x128xf32>
    %cst_203 = arith.constant 0.000000e+00 : f32
    %369 = vector.shape_cast %123 : vector<128x1xi1> to vector<128x1xi1>
    %370 = vector.broadcast %369 : vector<128x1xi1> to vector<128x128xi1>
    %371 = vector.broadcast %cst_203 : f32 to vector<128x128xf32>
    %372 = arith.select %370, %368, %371 : vector<128x128xi1>, vector<128x128xf32>
    %373 = arith.truncf %372 : vector<128x128xf32> to vector<128x128xbf16>
    %c1024_204 = arith.constant 1024 : index
    %c0_205 = arith.constant 0 : index
    %374 = vector.load %arg6[%c1024_204, %c0_205] : memref<1152x128xbf16, #tpu.memory_space<vmem>>, vector<128x128xbf16>
    %cst_206 = arith.constant dense<0.000000e+00> : vector<128x128xf32>
    %375 = tpu.matmul %373, %374, %cst_206 {dimension_numbers = #tpu.dot_dimension_numbers<[1], [0], [0], [1], [0, 0, 1, 1], [], []>} : vector<128x128xbf16>, vector<128x128xbf16>, vector<128x128xf32> -> vector<128x128xf32>
    %376 = arith.addf %367, %375 : vector<128x128xf32>
    %c0_207 = arith.constant 0 : index
    %c0_208 = arith.constant 0 : index
    %377 = vector.load %arg7[%c0_207, %c0_208] : memref<1x128xf32, #tpu.memory_space<vmem>>, vector<1x128xf32>
    %378 = vector.broadcast %377 : vector<1x128xf32> to vector<128x128xf32>
    %379 = arith.addf %376, %378 : vector<128x128xf32>
    %cst_209 = arith.constant 0.000000e+00 : f32
    %380 = vector.broadcast %cst_209 : f32 to vector<128x128xf32>
    %381 = arith.maximumf %379, %380 : vector<128x128xf32>
    %382 = vector.shape_cast %381 : vector<128x128xf32> to vector<2x64x128xf32>
    %c0_210 = arith.constant 0 : index
    %c0_211 = arith.constant 0 : index
    %c0_212 = arith.constant 0 : index
    %383 = vector.load %arg12[%c0_210, %c0_211, %c0_212] : memref<2x64x128xf32, #tpu.memory_space<vmem>>, vector<2x64x128xf32>
    tpu.vector_store %arg12[%c0_210, %c0_211, %c0_212], %382 {strides = array<i32>} : memref<2x64x128xf32, #tpu.memory_space<vmem>>, vector<2x64x128xf32>,
    %cst_213 = arith.constant 0.000000e+00 : f32
    %384 = vector.broadcast %cst_213 : f32 to vector<2x16xf32>
    %c0_214 = arith.constant 0 : index
    %c0_215 = arith.constant 0 : index
    %c0_216 = arith.constant 0 : index
    %385 = vector.load %arg12[%c0_214, %c0_215, %c0_216] : memref<2x64x128xf32, #tpu.memory_space<vmem>>, vector<2x1x128xf32>
    %386 = vector.shape_cast %385 : vector<2x1x128xf32> to vector<2x128xf32>
    %c0_217 = arith.constant 0 : index
    %c1 = arith.constant 1 : index
    %c0_218 = arith.constant 0 : index
    %387 = vector.load %arg12[%c0_217, %c1, %c0_218] : memref<2x64x128xf32, #tpu.memory_space<vmem>>, vector<2x1x128xf32>
    %388 = vector.shape_cast %387 : vector<2x1x128xf32> to vector<2x128xf32>
    %c0_219 = arith.constant 0 : index
    %c2 = arith.constant 2 : index
    %c0_220 = arith.constant 0 : index
    %389 = vector.load %arg12[%c0_219, %c2, %c0_220] : memref<2x64x128xf32, #tpu.memory_space<vmem>>, vector<2x1x128xf32>
    %390 = vector.shape_cast %389 : vector<2x1x128xf32> to vector<2x128xf32>
    %c0_221 = arith.constant 0 : index
    %c3 = arith.constant 3 : index
    %c0_222 = arith.constant 0 : index
    %391 = vector.load %arg12[%c0_221, %c3, %c0_222] : memref<2x64x128xf32, #tpu.memory_space<vmem>>, vector<2x1x128xf32>
    %392 = vector.shape_cast %391 : vector<2x1x128xf32> to vector<2x128xf32>
    %c0_223 = arith.constant 0 : index
    %c4 = arith.constant 4 : index
    %c0_224 = arith.constant 0 : index
    %393 = vector.load %arg12[%c0_223, %c4, %c0_224] : memref<2x64x128xf32, #tpu.memory_space<vmem>>, vector<2x1x128xf32>
    %394 = vector.shape_cast %393 : vector<2x1x128xf32> to vector<2x128xf32>
    %c0_225 = arith.constant 0 : index
    %c5 = arith.constant 5 : index
    %c0_226 = arith.constant 0 : index
    %395 = vector.load %arg12[%c0_225, %c5, %c0_226] : memref<2x64x128xf32, #tpu.memory_space<vmem>>, vector<2x1x128xf32>
    %396 = vector.shape_cast %395 : vector<2x1x128xf32> to vector<2x128xf32>
    %c0_227 = arith.constant 0 : index
    %c6 = arith.constant 6 : index
    %c0_228 = arith.constant 0 : index
    %397 = vector.load %arg12[%c0_227, %c6, %c0_228] : memref<2x64x128xf32, #tpu.memory_space<vmem>>, vector<2x1x128xf32>
    %398 = vector.shape_cast %397 : vector<2x1x128xf32> to vector<2x128xf32>
    %c0_229 = arith.constant 0 : index
    %c7_230 = arith.constant 7 : index
    %c0_231 = arith.constant 0 : index
    %399 = vector.load %arg12[%c0_229, %c7_230, %c0_231] : memref<2x64x128xf32, #tpu.memory_space<vmem>>, vector<2x1x128xf32>
    %400 = vector.shape_cast %399 : vector<2x1x128xf32> to vector<2x128xf32>
    %401 = tpu.concatenate %386, %388, %390, %392, %394, %396, %398, %400 in 1 : vector<2x128xf32>, vector<2x128xf32>, vector<2x128xf32>, vector<2x128xf32>, vector<2x128xf32>, vector<2x128xf32>, vector<2x128xf32>, vector<2x128xf32> -> vector<2x1024xf32>
    %402 = arith.truncf %401 : vector<2x1024xf32> to vector<2x1024xbf16>
    %c0_232 = arith.constant 0 : index
    %c0_233 = arith.constant 0 : index
    %403 = vector.load %arg8[%c0_232, %c0_233] : memref<8192x16xbf16, #tpu.memory_space<vmem>>, vector<1024x16xbf16>
    %cst_234 = arith.constant dense<0.000000e+00> : vector<2x16xf32>
    %404 = tpu.matmul %402, %403, %cst_234 {dimension_numbers = #tpu.dot_dimension_numbers<[1], [0], [0], [1], [0, 0, 1, 1], [], []>} : vector<2x1024xbf16>, vector<1024x16xbf16>, vector<2x16xf32> -> vector<2x16xf32>
    %405 = arith.addf %384, %404 : vector<2x16xf32>
    %c0_235 = arith.constant 0 : index
    %c8_236 = arith.constant 8 : index
    %c0_237 = arith.constant 0 : index
    %406 = vector.load %arg12[%c0_235, %c8_236, %c0_237] : memref<2x64x128xf32, #tpu.memory_space<vmem>>, vector<2x1x128xf32>
    %407 = vector.shape_cast %406 : vector<2x1x128xf32> to vector<2x128xf32>
    %c0_238 = arith.constant 0 : index
    %c9_239 = arith.constant 9 : index
    %c0_240 = arith.constant 0 : index
    %408 = vector.load %arg12[%c0_238, %c9_239, %c0_240] : memref<2x64x128xf32, #tpu.memory_space<vmem>>, vector<2x1x128xf32>
    %409 = vector.shape_cast %408 : vector<2x1x128xf32> to vector<2x128xf32>
    %c0_241 = arith.constant 0 : index
    %c10 = arith.constant 10 : index
    %c0_242 = arith.constant 0 : index
    %410 = vector.load %arg12[%c0_241, %c10, %c0_242] : memref<2x64x128xf32, #tpu.memory_space<vmem>>, vector<2x1x128xf32>
    %411 = vector.shape_cast %410 : vector<2x1x128xf32> to vector<2x128xf32>
    %c0_243 = arith.constant 0 : index
    %c11 = arith.constant 11 : index
    %c0_244 = arith.constant 0 : index
    %412 = vector.load %arg12[%c0_243, %c11, %c0_244] : memref<2x64x128xf32, #tpu.memory_space<vmem>>, vector<2x1x128xf32>
    %413 = vector.shape_cast %412 : vector<2x1x128xf32> to vector<2x128xf32>
    %c0_245 = arith.constant 0 : index
    %c12 = arith.constant 12 : index
    %c0_246 = arith.constant 0 : index
    %414 = vector.load %arg12[%c0_245, %c12, %c0_246] : memref<2x64x128xf32, #tpu.memory_space<vmem>>, vector<2x1x128xf32>
    %415 = vector.shape_cast %414 : vector<2x1x128xf32> to vector<2x128xf32>
    %c0_247 = arith.constant 0 : index
    %c13 = arith.constant 13 : index
    %c0_248 = arith.constant 0 : index
    %416 = vector.load %arg12[%c0_247, %c13, %c0_248] : memref<2x64x128xf32, #tpu.memory_space<vmem>>, vector<2x1x128xf32>
    %417 = vector.shape_cast %416 : vector<2x1x128xf32> to vector<2x128xf32>
    %c0_249 = arith.constant 0 : index
    %c14 = arith.constant 14 : index
    %c0_250 = arith.constant 0 : index
    %418 = vector.load %arg12[%c0_249, %c14, %c0_250] : memref<2x64x128xf32, #tpu.memory_space<vmem>>, vector<2x1x128xf32>
    %419 = vector.shape_cast %418 : vector<2x1x128xf32> to vector<2x128xf32>
    %c0_251 = arith.constant 0 : index
    %c15_252 = arith.constant 15 : index
    %c0_253 = arith.constant 0 : index
    %420 = vector.load %arg12[%c0_251, %c15_252, %c0_253] : memref<2x64x128xf32, #tpu.memory_space<vmem>>, vector<2x1x128xf32>
    %421 = vector.shape_cast %420 : vector<2x1x128xf32> to vector<2x128xf32>
    %422 = tpu.concatenate %407, %409, %411, %413, %415, %417, %419, %421 in 1 : vector<2x128xf32>, vector<2x128xf32>, vector<2x128xf32>, vector<2x128xf32>, vector<2x128xf32>, vector<2x128xf32>, vector<2x128xf32>, vector<2x128xf32> -> vector<2x1024xf32>
    %423 = arith.truncf %422 : vector<2x1024xf32> to vector<2x1024xbf16>
    %c1024_254 = arith.constant 1024 : index
    %c0_255 = arith.constant 0 : index
    %424 = vector.load %arg8[%c1024_254, %c0_255] : memref<8192x16xbf16, #tpu.memory_space<vmem>>, vector<1024x16xbf16>
    %cst_256 = arith.constant dense<0.000000e+00> : vector<2x16xf32>
    %425 = tpu.matmul %423, %424, %cst_256 {dimension_numbers = #tpu.dot_dimension_numbers<[1], [0], [0], [1], [0, 0, 1, 1], [], []>} : vector<2x1024xbf16>, vector<1024x16xbf16>, vector<2x16xf32> -> vector<2x16xf32>
    %426 = arith.addf %405, %425 : vector<2x16xf32>
    %c0_257 = arith.constant 0 : index
    %c16_258 = arith.constant 16 : index
    %c0_259 = arith.constant 0 : index
    %427 = vector.load %arg12[%c0_257, %c16_258, %c0_259] : memref<2x64x128xf32, #tpu.memory_space<vmem>>, vector<2x1x128xf32>
    %428 = vector.shape_cast %427 : vector<2x1x128xf32> to vector<2x128xf32>
    %c0_260 = arith.constant 0 : index
    %c17_261 = arith.constant 17 : index
    %c0_262 = arith.constant 0 : index
    %429 = vector.load %arg12[%c0_260, %c17_261, %c0_262] : memref<2x64x128xf32, #tpu.memory_space<vmem>>, vector<2x1x128xf32>
    %430 = vector.shape_cast %429 : vector<2x1x128xf32> to vector<2x128xf32>
    %c0_263 = arith.constant 0 : index
    %c18 = arith.constant 18 : index
    %c0_264 = arith.constant 0 : index
    %431 = vector.load %arg12[%c0_263, %c18, %c0_264] : memref<2x64x128xf32, #tpu.memory_space<vmem>>, vector<2x1x128xf32>
    %432 = vector.shape_cast %431 : vector<2x1x128xf32> to vector<2x128xf32>
    %c0_265 = arith.constant 0 : index
    %c19 = arith.constant 19 : index
    %c0_266 = arith.constant 0 : index
    %433 = vector.load %arg12[%c0_265, %c19, %c0_266] : memref<2x64x128xf32, #tpu.memory_space<vmem>>, vector<2x1x128xf32>
    %434 = vector.shape_cast %433 : vector<2x1x128xf32> to vector<2x128xf32>
    %c0_267 = arith.constant 0 : index
    %c20 = arith.constant 20 : index
    %c0_268 = arith.constant 0 : index
    %435 = vector.load %arg12[%c0_267, %c20, %c0_268] : memref<2x64x128xf32, #tpu.memory_space<vmem>>, vector<2x1x128xf32>
    %436 = vector.shape_cast %435 : vector<2x1x128xf32> to vector<2x128xf32>
    %c0_269 = arith.constant 0 : index
    %c21 = arith.constant 21 : index
    %c0_270 = arith.constant 0 : index
    %437 = vector.load %arg12[%c0_269, %c21, %c0_270] : memref<2x64x128xf32, #tpu.memory_space<vmem>>, vector<2x1x128xf32>
    %438 = vector.shape_cast %437 : vector<2x1x128xf32> to vector<2x128xf32>
    %c0_271 = arith.constant 0 : index
    %c22 = arith.constant 22 : index
    %c0_272 = arith.constant 0 : index
    %439 = vector.load %arg12[%c0_271, %c22, %c0_272] : memref<2x64x128xf32, #tpu.memory_space<vmem>>, vector<2x1x128xf32>
    %440 = vector.shape_cast %439 : vector<2x1x128xf32> to vector<2x128xf32>
    %c0_273 = arith.constant 0 : index
    %c23_274 = arith.constant 23 : index
    %c0_275 = arith.constant 0 : index
    %441 = vector.load %arg12[%c0_273, %c23_274, %c0_275] : memref<2x64x128xf32, #tpu.memory_space<vmem>>, vector<2x1x128xf32>
    %442 = vector.shape_cast %441 : vector<2x1x128xf32> to vector<2x128xf32>
    %443 = tpu.concatenate %428, %430, %432, %434, %436, %438, %440, %442 in 1 : vector<2x128xf32>, vector<2x128xf32>, vector<2x128xf32>, vector<2x128xf32>, vector<2x128xf32>, vector<2x128xf32>, vector<2x128xf32>, vector<2x128xf32> -> vector<2x1024xf32>
    %444 = arith.truncf %443 : vector<2x1024xf32> to vector<2x1024xbf16>
    %c2048 = arith.constant 2048 : index
    %c0_276 = arith.constant 0 : index
    %445 = vector.load %arg8[%c2048, %c0_276] : memref<8192x16xbf16, #tpu.memory_space<vmem>>, vector<1024x16xbf16>
    %cst_277 = arith.constant dense<0.000000e+00> : vector<2x16xf32>
    %446 = tpu.matmul %444, %445, %cst_277 {dimension_numbers = #tpu.dot_dimension_numbers<[1], [0], [0], [1], [0, 0, 1, 1], [], []>} : vector<2x1024xbf16>, vector<1024x16xbf16>, vector<2x16xf32> -> vector<2x16xf32>
    %447 = arith.addf %426, %446 : vector<2x16xf32>
    %c0_278 = arith.constant 0 : index
    %c24_279 = arith.constant 24 : index
    %c0_280 = arith.constant 0 : index
    %448 = vector.load %arg12[%c0_278, %c24_279, %c0_280] : memref<2x64x128xf32, #tpu.memory_space<vmem>>, vector<2x1x128xf32>
    %449 = vector.shape_cast %448 : vector<2x1x128xf32> to vector<2x128xf32>
    %c0_281 = arith.constant 0 : index
    %c25_282 = arith.constant 25 : index
    %c0_283 = arith.constant 0 : index
    %450 = vector.load %arg12[%c0_281, %c25_282, %c0_283] : memref<2x64x128xf32, #tpu.memory_space<vmem>>, vector<2x1x128xf32>
    %451 = vector.shape_cast %450 : vector<2x1x128xf32> to vector<2x128xf32>
    %c0_284 = arith.constant 0 : index
    %c26 = arith.constant 26 : index
    %c0_285 = arith.constant 0 : index
    %452 = vector.load %arg12[%c0_284, %c26, %c0_285] : memref<2x64x128xf32, #tpu.memory_space<vmem>>, vector<2x1x128xf32>
    %453 = vector.shape_cast %452 : vector<2x1x128xf32> to vector<2x128xf32>
    %c0_286 = arith.constant 0 : index
    %c27 = arith.constant 27 : index
    %c0_287 = arith.constant 0 : index
    %454 = vector.load %arg12[%c0_286, %c27, %c0_287] : memref<2x64x128xf32, #tpu.memory_space<vmem>>, vector<2x1x128xf32>
    %455 = vector.shape_cast %454 : vector<2x1x128xf32> to vector<2x128xf32>
    %c0_288 = arith.constant 0 : index
    %c28 = arith.constant 28 : index
    %c0_289 = arith.constant 0 : index
    %456 = vector.load %arg12[%c0_288, %c28, %c0_289] : memref<2x64x128xf32, #tpu.memory_space<vmem>>, vector<2x1x128xf32>
    %457 = vector.shape_cast %456 : vector<2x1x128xf32> to vector<2x128xf32>
    %c0_290 = arith.constant 0 : index
    %c29 = arith.constant 29 : index
    %c0_291 = arith.constant 0 : index
    %458 = vector.load %arg12[%c0_290, %c29, %c0_291] : memref<2x64x128xf32, #tpu.memory_space<vmem>>, vector<2x1x128xf32>
    %459 = vector.shape_cast %458 : vector<2x1x128xf32> to vector<2x128xf32>
    %c0_292 = arith.constant 0 : index
    %c30 = arith.constant 30 : index
    %c0_293 = arith.constant 0 : index
    %460 = vector.load %arg12[%c0_292, %c30, %c0_293] : memref<2x64x128xf32, #tpu.memory_space<vmem>>, vector<2x1x128xf32>
    %461 = vector.shape_cast %460 : vector<2x1x128xf32> to vector<2x128xf32>
    %c0_294 = arith.constant 0 : index
    %c31 = arith.constant 31 : index
    %c0_295 = arith.constant 0 : index
    %462 = vector.load %arg12[%c0_294, %c31, %c0_295] : memref<2x64x128xf32, #tpu.memory_space<vmem>>, vector<2x1x128xf32>
    %463 = vector.shape_cast %462 : vector<2x1x128xf32> to vector<2x128xf32>
    %464 = tpu.concatenate %449, %451, %453, %455, %457, %459, %461, %463 in 1 : vector<2x128xf32>, vector<2x128xf32>, vector<2x128xf32>, vector<2x128xf32>, vector<2x128xf32>, vector<2x128xf32>, vector<2x128xf32>, vector<2x128xf32> -> vector<2x1024xf32>
    %465 = arith.truncf %464 : vector<2x1024xf32> to vector<2x1024xbf16>
    %c3072 = arith.constant 3072 : index
    %c0_296 = arith.constant 0 : index
    %466 = vector.load %arg8[%c3072, %c0_296] : memref<8192x16xbf16, #tpu.memory_space<vmem>>, vector<1024x16xbf16>
    %cst_297 = arith.constant dense<0.000000e+00> : vector<2x16xf32>
    %467 = tpu.matmul %465, %466, %cst_297 {dimension_numbers = #tpu.dot_dimension_numbers<[1], [0], [0], [1], [0, 0, 1, 1], [], []>} : vector<2x1024xbf16>, vector<1024x16xbf16>, vector<2x16xf32> -> vector<2x16xf32>
    %468 = arith.addf %447, %467 : vector<2x16xf32>
    %c0_298 = arith.constant 0 : index
    %c32 = arith.constant 32 : index
    %c0_299 = arith.constant 0 : index
    %469 = vector.load %arg12[%c0_298, %c32, %c0_299] : memref<2x64x128xf32, #tpu.memory_space<vmem>>, vector<2x1x128xf32>
    %470 = vector.shape_cast %469 : vector<2x1x128xf32> to vector<2x128xf32>
    %c0_300 = arith.constant 0 : index
    %c33 = arith.constant 33 : index
    %c0_301 = arith.constant 0 : index
    %471 = vector.load %arg12[%c0_300, %c33, %c0_301] : memref<2x64x128xf32, #tpu.memory_space<vmem>>, vector<2x1x128xf32>
    %472 = vector.shape_cast %471 : vector<2x1x128xf32> to vector<2x128xf32>
    %c0_302 = arith.constant 0 : index
    %c34 = arith.constant 34 : index
    %c0_303 = arith.constant 0 : index
    %473 = vector.load %arg12[%c0_302, %c34, %c0_303] : memref<2x64x128xf32, #tpu.memory_space<vmem>>, vector<2x1x128xf32>
    %474 = vector.shape_cast %473 : vector<2x1x128xf32> to vector<2x128xf32>
    %c0_304 = arith.constant 0 : index
    %c35 = arith.constant 35 : index
    %c0_305 = arith.constant 0 : index
    %475 = vector.load %arg12[%c0_304, %c35, %c0_305] : memref<2x64x128xf32, #tpu.memory_space<vmem>>, vector<2x1x128xf32>
    %476 = vector.shape_cast %475 : vector<2x1x128xf32> to vector<2x128xf32>
    %c0_306 = arith.constant 0 : index
    %c36 = arith.constant 36 : index
    %c0_307 = arith.constant 0 : index
    %477 = vector.load %arg12[%c0_306, %c36, %c0_307] : memref<2x64x128xf32, #tpu.memory_space<vmem>>, vector<2x1x128xf32>
    %478 = vector.shape_cast %477 : vector<2x1x128xf32> to vector<2x128xf32>
    %c0_308 = arith.constant 0 : index
    %c37 = arith.constant 37 : index
    %c0_309 = arith.constant 0 : index
    %479 = vector.load %arg12[%c0_308, %c37, %c0_309] : memref<2x64x128xf32, #tpu.memory_space<vmem>>, vector<2x1x128xf32>
    %480 = vector.shape_cast %479 : vector<2x1x128xf32> to vector<2x128xf32>
    %c0_310 = arith.constant 0 : index
    %c38 = arith.constant 38 : index
    %c0_311 = arith.constant 0 : index
    %481 = vector.load %arg12[%c0_310, %c38, %c0_311] : memref<2x64x128xf32, #tpu.memory_space<vmem>>, vector<2x1x128xf32>
    %482 = vector.shape_cast %481 : vector<2x1x128xf32> to vector<2x128xf32>
    %c0_312 = arith.constant 0 : index
    %c39 = arith.constant 39 : index
    %c0_313 = arith.constant 0 : index
    %483 = vector.load %arg12[%c0_312, %c39, %c0_313] : memref<2x64x128xf32, #tpu.memory_space<vmem>>, vector<2x1x128xf32>
    %484 = vector.shape_cast %483 : vector<2x1x128xf32> to vector<2x128xf32>
    %485 = tpu.concatenate %470, %472, %474, %476, %478, %480, %482, %484 in 1 : vector<2x128xf32>, vector<2x128xf32>, vector<2x128xf32>, vector<2x128xf32>, vector<2x128xf32>, vector<2x128xf32>, vector<2x128xf32>, vector<2x128xf32> -> vector<2x1024xf32>
    %486 = arith.truncf %485 : vector<2x1024xf32> to vector<2x1024xbf16>
    %c4096 = arith.constant 4096 : index
    %c0_314 = arith.constant 0 : index
    %487 = vector.load %arg8[%c4096, %c0_314] : memref<8192x16xbf16, #tpu.memory_space<vmem>>, vector<1024x16xbf16>
    %cst_315 = arith.constant dense<0.000000e+00> : vector<2x16xf32>
    %488 = tpu.matmul %486, %487, %cst_315 {dimension_numbers = #tpu.dot_dimension_numbers<[1], [0], [0], [1], [0, 0, 1, 1], [], []>} : vector<2x1024xbf16>, vector<1024x16xbf16>, vector<2x16xf32> -> vector<2x16xf32>
    %489 = arith.addf %468, %488 : vector<2x16xf32>
    %c0_316 = arith.constant 0 : index
    %c40 = arith.constant 40 : index
    %c0_317 = arith.constant 0 : index
    %490 = vector.load %arg12[%c0_316, %c40, %c0_317] : memref<2x64x128xf32, #tpu.memory_space<vmem>>, vector<2x1x128xf32>
    %491 = vector.shape_cast %490 : vector<2x1x128xf32> to vector<2x128xf32>
    %c0_318 = arith.constant 0 : index
    %c41 = arith.constant 41 : index
    %c0_319 = arith.constant 0 : index
    %492 = vector.load %arg12[%c0_318, %c41, %c0_319] : memref<2x64x128xf32, #tpu.memory_space<vmem>>, vector<2x1x128xf32>
    %493 = vector.shape_cast %492 : vector<2x1x128xf32> to vector<2x128xf32>
    %c0_320 = arith.constant 0 : index
    %c42 = arith.constant 42 : index
    %c0_321 = arith.constant 0 : index
    %494 = vector.load %arg12[%c0_320, %c42, %c0_321] : memref<2x64x128xf32, #tpu.memory_space<vmem>>, vector<2x1x128xf32>
    %495 = vector.shape_cast %494 : vector<2x1x128xf32> to vector<2x128xf32>
    %c0_322 = arith.constant 0 : index
    %c43 = arith.constant 43 : index
    %c0_323 = arith.constant 0 : index
    %496 = vector.load %arg12[%c0_322, %c43, %c0_323] : memref<2x64x128xf32, #tpu.memory_space<vmem>>, vector<2x1x128xf32>
    %497 = vector.shape_cast %496 : vector<2x1x128xf32> to vector<2x128xf32>
    %c0_324 = arith.constant 0 : index
    %c44 = arith.constant 44 : index
    %c0_325 = arith.constant 0 : index
    %498 = vector.load %arg12[%c0_324, %c44, %c0_325] : memref<2x64x128xf32, #tpu.memory_space<vmem>>, vector<2x1x128xf32>
    %499 = vector.shape_cast %498 : vector<2x1x128xf32> to vector<2x128xf32>
    %c0_326 = arith.constant 0 : index
    %c45 = arith.constant 45 : index
    %c0_327 = arith.constant 0 : index
    %500 = vector.load %arg12[%c0_326, %c45, %c0_327] : memref<2x64x128xf32, #tpu.memory_space<vmem>>, vector<2x1x128xf32>
    %501 = vector.shape_cast %500 : vector<2x1x128xf32> to vector<2x128xf32>
    %c0_328 = arith.constant 0 : index
    %c46 = arith.constant 46 : index
    %c0_329 = arith.constant 0 : index
    %502 = vector.load %arg12[%c0_328, %c46, %c0_329] : memref<2x64x128xf32, #tpu.memory_space<vmem>>, vector<2x1x128xf32>
    %503 = vector.shape_cast %502 : vector<2x1x128xf32> to vector<2x128xf32>
    %c0_330 = arith.constant 0 : index
    %c47 = arith.constant 47 : index
    %c0_331 = arith.constant 0 : index
    %504 = vector.load %arg12[%c0_330, %c47, %c0_331] : memref<2x64x128xf32, #tpu.memory_space<vmem>>, vector<2x1x128xf32>
    %505 = vector.shape_cast %504 : vector<2x1x128xf32> to vector<2x128xf32>
    %506 = tpu.concatenate %491, %493, %495, %497, %499, %501, %503, %505 in 1 : vector<2x128xf32>, vector<2x128xf32>, vector<2x128xf32>, vector<2x128xf32>, vector<2x128xf32>, vector<2x128xf32>, vector<2x128xf32>, vector<2x128xf32> -> vector<2x1024xf32>
    %507 = arith.truncf %506 : vector<2x1024xf32> to vector<2x1024xbf16>
    %c5120 = arith.constant 5120 : index
    %c0_332 = arith.constant 0 : index
    %508 = vector.load %arg8[%c5120, %c0_332] : memref<8192x16xbf16, #tpu.memory_space<vmem>>, vector<1024x16xbf16>
    %cst_333 = arith.constant dense<0.000000e+00> : vector<2x16xf32>
    %509 = tpu.matmul %507, %508, %cst_333 {dimension_numbers = #tpu.dot_dimension_numbers<[1], [0], [0], [1], [0, 0, 1, 1], [], []>} : vector<2x1024xbf16>, vector<1024x16xbf16>, vector<2x16xf32> -> vector<2x16xf32>
    %510 = arith.addf %489, %509 : vector<2x16xf32>
    %c0_334 = arith.constant 0 : index
    %c48 = arith.constant 48 : index
    %c0_335 = arith.constant 0 : index
    %511 = vector.load %arg12[%c0_334, %c48, %c0_335] : memref<2x64x128xf32, #tpu.memory_space<vmem>>, vector<2x1x128xf32>
    %512 = vector.shape_cast %511 : vector<2x1x128xf32> to vector<2x128xf32>
    %c0_336 = arith.constant 0 : index
    %c49 = arith.constant 49 : index
    %c0_337 = arith.constant 0 : index
    %513 = vector.load %arg12[%c0_336, %c49, %c0_337] : memref<2x64x128xf32, #tpu.memory_space<vmem>>, vector<2x1x128xf32>
    %514 = vector.shape_cast %513 : vector<2x1x128xf32> to vector<2x128xf32>
    %c0_338 = arith.constant 0 : index
    %c50 = arith.constant 50 : index
    %c0_339 = arith.constant 0 : index
    %515 = vector.load %arg12[%c0_338, %c50, %c0_339] : memref<2x64x128xf32, #tpu.memory_space<vmem>>, vector<2x1x128xf32>
    %516 = vector.shape_cast %515 : vector<2x1x128xf32> to vector<2x128xf32>
    %c0_340 = arith.constant 0 : index
    %c51 = arith.constant 51 : index
    %c0_341 = arith.constant 0 : index
    %517 = vector.load %arg12[%c0_340, %c51, %c0_341] : memref<2x64x128xf32, #tpu.memory_space<vmem>>, vector<2x1x128xf32>
    %518 = vector.shape_cast %517 : vector<2x1x128xf32> to vector<2x128xf32>
    %c0_342 = arith.constant 0 : index
    %c52 = arith.constant 52 : index
    %c0_343 = arith.constant 0 : index
    %519 = vector.load %arg12[%c0_342, %c52, %c0_343] : memref<2x64x128xf32, #tpu.memory_space<vmem>>, vector<2x1x128xf32>
    %520 = vector.shape_cast %519 : vector<2x1x128xf32> to vector<2x128xf32>
    %c0_344 = arith.constant 0 : index
    %c53 = arith.constant 53 : index
    %c0_345 = arith.constant 0 : index
    %521 = vector.load %arg12[%c0_344, %c53, %c0_345] : memref<2x64x128xf32, #tpu.memory_space<vmem>>, vector<2x1x128xf32>
    %522 = vector.shape_cast %521 : vector<2x1x128xf32> to vector<2x128xf32>
    %c0_346 = arith.constant 0 : index
    %c54 = arith.constant 54 : index
    %c0_347 = arith.constant 0 : index
    %523 = vector.load %arg12[%c0_346, %c54, %c0_347] : memref<2x64x128xf32, #tpu.memory_space<vmem>>, vector<2x1x128xf32>
    %524 = vector.shape_cast %523 : vector<2x1x128xf32> to vector<2x128xf32>
    %c0_348 = arith.constant 0 : index
    %c55 = arith.constant 55 : index
    %c0_349 = arith.constant 0 : index
    %525 = vector.load %arg12[%c0_348, %c55, %c0_349] : memref<2x64x128xf32, #tpu.memory_space<vmem>>, vector<2x1x128xf32>
    %526 = vector.shape_cast %525 : vector<2x1x128xf32> to vector<2x128xf32>
    %527 = tpu.concatenate %512, %514, %516, %518, %520, %522, %524, %526 in 1 : vector<2x128xf32>, vector<2x128xf32>, vector<2x128xf32>, vector<2x128xf32>, vector<2x128xf32>, vector<2x128xf32>, vector<2x128xf32>, vector<2x128xf32> -> vector<2x1024xf32>
    %528 = arith.truncf %527 : vector<2x1024xf32> to vector<2x1024xbf16>
    %c6144 = arith.constant 6144 : index
    %c0_350 = arith.constant 0 : index
    %529 = vector.load %arg8[%c6144, %c0_350] : memref<8192x16xbf16, #tpu.memory_space<vmem>>, vector<1024x16xbf16>
    %cst_351 = arith.constant dense<0.000000e+00> : vector<2x16xf32>
    %530 = tpu.matmul %528, %529, %cst_351 {dimension_numbers = #tpu.dot_dimension_numbers<[1], [0], [0], [1], [0, 0, 1, 1], [], []>} : vector<2x1024xbf16>, vector<1024x16xbf16>, vector<2x16xf32> -> vector<2x16xf32>
    %531 = arith.addf %510, %530 : vector<2x16xf32>
    %c0_352 = arith.constant 0 : index
    %c56 = arith.constant 56 : index
    %c0_353 = arith.constant 0 : index
    %532 = vector.load %arg12[%c0_352, %c56, %c0_353] : memref<2x64x128xf32, #tpu.memory_space<vmem>>, vector<2x1x128xf32>
    %533 = vector.shape_cast %532 : vector<2x1x128xf32> to vector<2x128xf32>
    %c0_354 = arith.constant 0 : index
    %c57 = arith.constant 57 : index
    %c0_355 = arith.constant 0 : index
    %534 = vector.load %arg12[%c0_354, %c57, %c0_355] : memref<2x64x128xf32, #tpu.memory_space<vmem>>, vector<2x1x128xf32>
    %535 = vector.shape_cast %534 : vector<2x1x128xf32> to vector<2x128xf32>
    %c0_356 = arith.constant 0 : index
    %c58 = arith.constant 58 : index
    %c0_357 = arith.constant 0 : index
    %536 = vector.load %arg12[%c0_356, %c58, %c0_357] : memref<2x64x128xf32, #tpu.memory_space<vmem>>, vector<2x1x128xf32>
    %537 = vector.shape_cast %536 : vector<2x1x128xf32> to vector<2x128xf32>
    %c0_358 = arith.constant 0 : index
    %c59 = arith.constant 59 : index
    %c0_359 = arith.constant 0 : index
    %538 = vector.load %arg12[%c0_358, %c59, %c0_359] : memref<2x64x128xf32, #tpu.memory_space<vmem>>, vector<2x1x128xf32>
    %539 = vector.shape_cast %538 : vector<2x1x128xf32> to vector<2x128xf32>
    %c0_360 = arith.constant 0 : index
    %c60 = arith.constant 60 : index
    %c0_361 = arith.constant 0 : index
    %540 = vector.load %arg12[%c0_360, %c60, %c0_361] : memref<2x64x128xf32, #tpu.memory_space<vmem>>, vector<2x1x128xf32>
    %541 = vector.shape_cast %540 : vector<2x1x128xf32> to vector<2x128xf32>
    %c0_362 = arith.constant 0 : index
    %c61 = arith.constant 61 : index
    %c0_363 = arith.constant 0 : index
    %542 = vector.load %arg12[%c0_362, %c61, %c0_363] : memref<2x64x128xf32, #tpu.memory_space<vmem>>, vector<2x1x128xf32>
    %543 = vector.shape_cast %542 : vector<2x1x128xf32> to vector<2x128xf32>
    %c0_364 = arith.constant 0 : index
    %c62 = arith.constant 62 : index
    %c0_365 = arith.constant 0 : index
    %544 = vector.load %arg12[%c0_364, %c62, %c0_365] : memref<2x64x128xf32, #tpu.memory_space<vmem>>, vector<2x1x128xf32>
    %545 = vector.shape_cast %544 : vector<2x1x128xf32> to vector<2x128xf32>
    %c0_366 = arith.constant 0 : index
    %c63 = arith.constant 63 : index
    %c0_367 = arith.constant 0 : index
    %546 = vector.load %arg12[%c0_366, %c63, %c0_367] : memref<2x64x128xf32, #tpu.memory_space<vmem>>, vector<2x1x128xf32>
    %547 = vector.shape_cast %546 : vector<2x1x128xf32> to vector<2x128xf32>
    %548 = tpu.concatenate %533, %535, %537, %539, %541, %543, %545, %547 in 1 : vector<2x128xf32>, vector<2x128xf32>, vector<2x128xf32>, vector<2x128xf32>, vector<2x128xf32>, vector<2x128xf32>, vector<2x128xf32>, vector<2x128xf32> -> vector<2x1024xf32>
    %549 = arith.truncf %548 : vector<2x1024xf32> to vector<2x1024xbf16>
    %c7168 = arith.constant 7168 : index
    %c0_368 = arith.constant 0 : index
    %550 = vector.load %arg8[%c7168, %c0_368] : memref<8192x16xbf16, #tpu.memory_space<vmem>>, vector<1024x16xbf16>
    %cst_369 = arith.constant dense<0.000000e+00> : vector<2x16xf32>
    %551 = tpu.matmul %549, %550, %cst_369 {dimension_numbers = #tpu.dot_dimension_numbers<[1], [0], [0], [1], [0, 0, 1, 1], [], []>} : vector<2x1024xbf16>, vector<1024x16xbf16>, vector<2x16xf32> -> vector<2x16xf32>
    %552 = arith.addf %531, %551 : vector<2x16xf32>
    %c0_370 = arith.constant 0 : index
    %c0_371 = arith.constant 0 : index
    %553 = vector.load %arg9[%c0_370, %c0_371] : memref<1x16xf32, #tpu.memory_space<vmem>>, vector<1x16xf32>
    %554 = vector.broadcast %553 : vector<1x16xf32> to vector<2x16xf32>
    %555 = arith.addf %552, %554 : vector<2x16xf32>
    %c0_372 = arith.constant 0 : index
    %c0_373 = arith.constant 0 : index
    %556 = vector.load %arg10[%c0_372, %c0_373] : memref<2x16xf32, #tpu.memory_space<vmem>>, vector<2x16xf32>
    tpu.vector_store %arg10[%c0_372, %c0_373], %555 {strides = array<i32>} : memref<2x16xf32, #tpu.memory_space<vmem>>, vector<2x16xf32>,
    return
  }
  func.func @transform_0(%arg0: i32) -> (i32, i32, i32) {
    %c0_i32 = arith.constant 0 : i32
    %c0_i32_0 = arith.constant 0 : i32
    %c0_i32_1 = arith.constant 0 : i32
    return %arg0, %c0_i32, %c0_i32_0 : i32, i32, i32
  }
  func.func @transform_1(%arg0: i32) -> (i32, i32) {
    %c0_i32 = arith.constant 0 : i32
    %c0_i32_0 = arith.constant 0 : i32
    %c0_i32_1 = arith.constant 0 : i32
    return %c0_i32, %c0_i32_0 : i32, i32
  }
  func.func @transform_2(%arg0: i32) -> (i32, i32) {
    %c0_i32 = arith.constant 0 : i32
    %c0_i32_0 = arith.constant 0 : i32
    %c0_i32_1 = arith.constant 0 : i32
    return %c0_i32, %c0_i32_0 : i32, i32
  }
  func.func @transform_3(%arg0: i32) -> (i32, i32) {
    %c0_i32 = arith.constant 0 : i32
    %c0_i32_0 = arith.constant 0 : i32
    %c0_i32_1 = arith.constant 0 : i32
    return %c0_i32, %c0_i32_0 : i32, i32
  }
  func.func @transform_4(%arg0: i32) -> (i32, i32) {
    %c0_i32 = arith.constant 0 : i32
    %c0_i32_0 = arith.constant 0 : i32
    %c0_i32_1 = arith.constant 0 : i32
    return %c0_i32, %c0_i32_0 : i32, i32
  }
  func.func @transform_5(%arg0: i32) -> (i32, i32) {
    %c0_i32 = arith.constant 0 : i32
    %c0_i32_0 = arith.constant 0 : i32
    %c0_i32_1 = arith.constant 0 : i32
    return %c0_i32, %c0_i32_0 : i32, i32
  }
  func.func @transform_6(%arg0: i32) -> (i32, i32) {
    %c0_i32 = arith.constant 0 : i32
    %c0_i32_0 = arith.constant 0 : i32
    %c0_i32_1 = arith.constant 0 : i32
    return %c0_i32, %c0_i32_0 : i32, i32
  }
  func.func @transform_7(%arg0: i32) -> (i32, i32) {
    %c0_i32 = arith.constant 0 : i32
    %c0_i32_0 = arith.constant 0 : i32
    %c0_i32_1 = arith.constant 0 : i32
    return %c0_i32, %c0_i32_0 : i32, i32
  }
  func.func @transform_8(%arg0: i32) -> (i32, i32) {
    %c0_i32 = arith.constant 0 : i32
    %c0_i32_0 = arith.constant 0 : i32
    %c0_i32_1 = arith.constant 0 : i32
    return %c0_i32, %c0_i32_0 : i32, i32
  }
  func.func @transform_9(%arg0: i32) -> (i32, i32) {
    %c0_i32 = arith.constant 0 : i32
    %c0_i32_0 = arith.constant 0 : i32
    return %arg0, %c0_i32 : i32, i32
  }
}

</mosaic_0001>

<bundles_post_ra>
// kernel: conv2d_forward.1
= control target key start
LH: loop header
LB: loop body
LE: loop exit
PB: predicated region body
PF: predicated region fallthrough
CT: control target
= control target key end

     0   :  { %v14168_v4 = vmov 0.0   ;;  %v33_v23 = vlaneseq  ;;  %s18192_s0 = inlined_call_operand.vmem [shape: f32[2,64,128], index: 0, kind: input, shape index: {}]   ;;  %s18193_s1 = inlined_call_operand.vmem [shape: bf16[1152,128], index: 1, kind: input, shape index: {}]   ;;  %s18194_s2 = inlined_call_operand.vmem [shape: f32[1,128], index: 2, kind: input, shape index: {}]   ;;  %s18195_s3 = inlined_call_operand.vmem [shape: bf16[1152,128], index: 3, kind: input, shape index: {}]   ;;  %s18196_s4 = inlined_call_operand.vmem [shape: f32[1,128], index: 4, kind: input, shape index: {}]   ;;  %s18197_s5 = inlined_call_operand.vmem [shape: bf16[1152,128], index: 5, kind: input, shape index: {}]   ;;  %s18198_s6 = inlined_call_operand.vmem [shape: f32[1,128], index: 6, kind: input, shape index: {}]   ;;  %s18199_s7 = inlined_call_operand.vmem [shape: bf16[8192,16], index: 7, kind: input, shape index: {}]   ;;  %s18200_s8 = inlined_call_operand.vmem [shape: f32[1,16], index: 8, kind: input, shape index: {}]   ;;  %s18201_s9 = inlined_call_operand.hbm [shape: f32[2,16], index: 9, kind: output, shape index: {}]  }
   0x1   :  { %v13420_v0 = vld [vmem:[%s18193_s1 + $0x78] sm:$0xff]  ;;  %46 = vst [vmem:[#allocation2] sm:$0xff] %v14168_v4  ;;  %v13419_v5 = vld [vmem:[%s18193_s1 + $0x70] sm:$0xff]  ;;  %v13418_v9 = vld [vmem:[%s18193_s1 + $0x68] sm:$0xff] }
   0x2   :  { %v13412_v1 = vld [vmem:[%s18193_s1 + $0x38] sm:$0xff]  ;;  %238 = vmatpush.bf16.msra.mxu0 %v13420_v0  ;;  %v13411_v6 = vld [vmem:[%s18193_s1 + $0x30] sm:$0xff]  ;;  %47 = vst [vmem:[#allocation2 + $0x8] sm:$0xff] %v14168_v4  ;;  %v13410_v10 = vld [vmem:[%s18193_s1 + $0x28] sm:$0xff] }
   0x3   :  { %v13428_v2 = vld [vmem:[%s18193_s1 + $0xb8] sm:$0xff]  ;;  %335 = vmatpush.bf16.msra.mxu1 %v13412_v1  ;;  %v13427_v7 = vld [vmem:[%s18193_s1 + $0xb0] sm:$0xff]  ;;  %48 = vst [vmem:[#allocation2 + $0x90] sm:$0xff] %v14168_v4  ;;  %v13426_v11 = vld [vmem:[%s18193_s1 + $0xa8] sm:$0xff] }
   0x4   :  { %v13436_v3 = vld [vmem:[%s18193_s1 + $0xf8] sm:$0xff]  ;;  %486 = vmatpush.bf16.msra.mxu2 %v13428_v2  ;;  %v13435_v8 = vld [vmem:[%s18193_s1 + $0xf0] sm:$0xff]  ;;  %v13434_v12 = vld [vmem:[%s18193_s1 + $0xe8] sm:$0xff] }
   0x5   :  { %655 = vmatpush.bf16.msra.mxu3 %v13436_v3  ;;  %v13417_v13 = vld [vmem:[%s18193_s1 + $0x60] sm:$0xff]  ;;  %v14281_v18 = vld [vmem:[%s18192_s0 + $0x8] sm:$0xff]  ;;  %v14286_v19 = vld [vmem:[%s18192_s0 + $0x10] sm:$0xff] }
   0x6   :  { %239 = vmatpush.bf16.msra.mxu0 %v13419_v5  ;;  %v13409_v14 = vld [vmem:[%s18193_s1 + $0x20] sm:$0xff]  ;;  %67 = vst [vmem:[#allocation2 + $0x18] sm:$0xff] %v14281_v18  ;;  %v14292_v20 = vld [vmem:[%s18192_s0 + $0x18] sm:$0xff] }
   0x7   :  { %336 = vmatpush.bf16.msra.mxu1 %v13411_v6  ;;  %v13425_v15 = vld [vmem:[%s18193_s1 + $0xa0] sm:$0xff]  ;;  %68 = vst [vmem:[#allocation2 + $0x20] sm:$0xff] %v14286_v19  ;;  %v13416_v21 = vld [vmem:[%s18193_s1 + $0x58] sm:$0xff] }
   0x8   :  { %487 = vmatpush.bf16.msra.mxu2 %v13427_v7  ;;  %v14272_v16 = vld [vmem:[%s18192_s0] sm:$0xff]  ;;  %v13408_v22 = vld [vmem:[%s18193_s1 + $0x18] sm:$0xff]  ;;  %69 = vst [vmem:[#allocation2 + $0x28] sm:$0xff] %v14292_v20 }
   0x9   :  { %656 = vmatpush.bf16.msra.mxu3 %v13435_v8  ;;  %v13433_v17 = vld [vmem:[%s18193_s1 + $0xe0] sm:$0xff]  ;;  %66 = vst [vmem:[#allocation2 + $0x10] sm:$0xff] %v14272_v16  ;;  %v13424_v24 = vld [vmem:[%s18193_s1 + $0x98] sm:$0xff] }
   0xa   :  { %240 = vmatpush.bf16.msra.mxu0 %v13418_v9  ;;  %v13432_v25 = vld [vmem:[%s18193_s1 + $0xd8] sm:$0xff] }
   0xb   :  { %337 = vmatpush.bf16.msra.mxu1 %v13410_v10 }
   0xc   :  { %488 = vmatpush.bf16.msra.mxu2 %v13426_v11 }
   0xd   :  { %657 = vmatpush.bf16.msra.mxu3 %v13434_v12 }
   0xe   :  { %241 = vmatpush.bf16.msra.mxu0 %v13417_v13 }
   0xf   :  { %338 = vmatpush.bf16.msra.mxu1 %v13409_v14 }
  0x10   :  { %489 = vmatpush.bf16.msra.mxu2 %v13425_v15 }
  0x11   :  { %658 = vmatpush.bf16.msra.mxu3 %v13433_v17 }
  0x12   :  { %14 = vsyncpa [#allocation5], 0  ;;  %242 = vmatpush.bf16.msra.mxu0 %v13416_v21  ;;  %v13415_v26 = vld [vmem:[%s18193_s1 + $0x50] sm:$0xff]  ;;  %v34_v28 = vshrl.u32 %v33_v23, 7  ;;  %v14317_v29 = vld [vmem:[%s18192_s0 + $0x20] sm:$0xff]  ;;  %v166_v46 = vpack.c.bf16 %v14272_v16, %v14168_v4  ;;  %vm14169_vm2 = vmmov 1   ;;  %v14414_v59 = vpack.c.bf16 %v14286_v19, %v14281_v18 }
  0x13   :  { %339 = vmatpush.bf16.msra.mxu1 %v13408_v22  ;;  %v13407_v27 = vld [vmem:[%s18193_s1 + $0x10] sm:$0xff]  ;;  %70 = vst [vmem:[#allocation2 + $0x30] sm:$0xff] %v14317_v29  ;;  %v13414_v32 = vld [vmem:[%s18193_s1 + $0x48] sm:$0xff]  ;;  %v13413_v39 = vld [vmem:[%s18193_s1 + $0x40] sm:$0xff]  ;;  %v14453_v7 = vpack.c.bf16 %v14317_v29, %v14292_v20  ;;  %vm4610_vm9 = vcmask 1041409   ;;  %s14170_s24 = smov [#allocation4]  }
  0x14   :  { %490 = vmatpush.bf16.msra.mxu2 %v13424_v24  ;;  %v13423_v30 = vld [vmem:[%s18193_s1 + $0x90] sm:$0xff]  ;;  %v13406_v33 = vld [vmem:[%s18193_s1 + $0x8] sm:$0xff]  ;;  %v14332_v34 = vadd.s32 4294967295, %v34_v28  ;;  %v14345_v38 = vadd.s32 1, %v34_v28  ;;  %v13405_v40 = vld [vmem:[%s18193_s1] sm:$0xff]  ;;  %s10050_s25 = sshll.u32 %s14170_s24, 4  ;;  %s10051_s25 = int_to_ptr.vmem [resolvable:$true] %s10050_s25 }
  0x15   :  { %659 = vmatpush.bf16.msra.mxu3 %v13432_v25  ;;  %v13431_v31 = vld [vmem:[%s18193_s1 + $0xd0] sm:$0xff]  ;;  %v13422_v35 = vld [vmem:[%s18193_s1 + $0x88] sm:$0xff]  ;;  %v13421_v41 = vld [vmem:[%s18193_s1 + $0x80] sm:$0xff]  ;;  %s10052_s28 = sshll.u32 %s18201_s9, 4  ;;  %vm10043_vm10 = vcmask 123904   ;;  %s10053_s28 = int_to_ptr.hbm [resolvable:$true] %s10052_s28 }
  0x16   :  { %243 = vmatpush.bf16.msra.mxu0 %v13415_v26  ;;  %v13430_v36 = vld [vmem:[%s18193_s1 + $0xc8] sm:$0xff]  ;;  %vm36_vm0 = vcmp.ge.s32.totalorder %v14332_v34, 0  ;;  %v13429_v43 = vld [vmem:[%s18193_s1 + $0xc0] sm:$0xff]  ;;  %v14361_v44 = vld [vmem:[#allocation2 + $0x11] sm:$0xff]  ;;  %vm44_vm1 = vcmp.lt.s32.totalorder %v14345_v38, 8 }
  0x17   :  { %340 = vmatpush.bf16.msra.mxu1 %v13407_v27  ;;  %v14343_v37 = vld [vmem:[%s18192_s0 + $0x28] sm:$0xff]  ;;  %v552_v45 = vld [vmem:[#allocation2 + $0x17] sm:$0xff]  ;;  %vm14369_vm3 = vmpackc.low %vm36_vm0, %vm14169_vm2  ;;  %v10182_v50 = vpack.c.bf16 %v14361_v44, %v14168_v4 }
  0x18   :  { %491 = vmatpush.bf16.msra.mxu2 %v13423_v30  ;;  %71 = vst [vmem:[#allocation2 + $0x38] sm:$0xff] %v14343_v37  ;;  %v82_v42 = vld [vmem:[#allocation2 + $0xf] sm:$0xff]  ;;  %vm14377_vm4 = vmpackc.low %vm36_vm0, %vm36_vm0  ;;  %v14405_v54 = vld [vmem:[%s18192_s0 + $0x38] sm:$0xff] }
  0x19   :  { %660 = vmatpush.bf16.msra.mxu3 %v13431_v31  ;;  %v10126_v48 = vpack.c.bf16 %v82_v42, %v14168_v4  ;;  %v10238_v51 = vpack.c.bf16 %v552_v45, %v82_v42  ;;  %vm14386_vm5 = vmpackc.low %vm44_vm1, %vm14169_vm2  ;;  %v14399_v53 = vld [vmem:[%s18192_s0 + $0x30] sm:$0xff]  ;;  %73 = vst [vmem:[#allocation2 + $0x48] sm:$0xff] %v14405_v54  ;;  %v84_v55 = vld [vmem:[#allocation2 + $0x1f] sm:$0xff] }
  0x1a   :  { %244 = vmatpush.bf16.msra.mxu0 %v13414_v32  ;;  %72 = vst [vmem:[#allocation2 + $0x40] sm:$0xff] %v14399_v53  ;;  %v14408_v56 = vld [vmem:[#allocation2 + $0x19] sm:$0xff]  ;;  %v14410_v57 = vld [vmem:[#allocation2 + $0x21] sm:$0xff]  ;;  %v14416_v60 = vpack.c.bf16 %v84_v55, %v552_v45  ;;  %vm14423_vm6 = vmpackc.low %vm44_vm1, %vm44_vm1  ;;  %v14487_v21 = vpack.c.bf16 %v14399_v53, %v14343_v37 }
  0x1b   :  { %341 = vmatpush.bf16.msra.mxu1 %v13406_v33  ;;  %v554_v58 = vld [vmem:[#allocation2 + $0x27] sm:$0xff]  ;;  %v10185_v61 = vpack.c.bf16 %v14410_v57, %v14408_v56  ;;  %v86_v2 = vld [vmem:[#allocation2 + $0x2f] sm:$0xff]  ;;  %v14476_v12 = vld [vmem:[%s18192_s0 + $0x58] sm:$0xff] }
  0x1c   :  { %492 = vmatpush.bf16.msra.mxu2 %v13422_v35  ;;  %v10241_v62 = vpack.c.bf16 %v554_v58, %v84_v55  ;;  %v14438_v0 = vld [vmem:[%s18192_s0 + $0x40] sm:$0xff]  ;;  %v14444_v1 = vld [vmem:[%s18192_s0 + $0x48] sm:$0xff]  ;;  %v14455_v8 = vpack.c.bf16 %v86_v2, %v554_v58  ;;  %v14470_v11 = vld [vmem:[%s18192_s0 + $0x50] sm:$0xff]  ;;  %77 = vst [vmem:[#allocation2 + $0x68] sm:$0xff] %v14476_v12 }
  0x1d   :  { %661 = vmatpush.bf16.msra.mxu3 %v13430_v36  ;;  %74 = vst [vmem:[#allocation2 + $0x50] sm:$0xff] %v14438_v0  ;;  %v14447_v3 = vld [vmem:[#allocation2 + $0x29] sm:$0xff]  ;;  %v14505_v25 = vld [vmem:[%s18192_s0 + $0x60] sm:$0xff]  ;;  %v170_v31 = vpack.c.bf16 %v14438_v0, %v14168_v4  ;;  %v13444_v36 = vld [vmem:[%s18193_s1 + $0x138] sm:$0xff] }
  0x1e   :  { %245 = vmatpush.bf16.msra.mxu0 %v13413_v39  ;;  %75 = vst [vmem:[#allocation2 + $0x58] sm:$0xff] %v14444_v1  ;;  %v14511_v26 = vld [vmem:[%s18192_s0 + $0x68] sm:$0xff]  ;;  %v13460_v39 = vld [vmem:[%s18193_s1 + $0x1b8] sm:$0xff]  ;;  %v13459_v42 = vld [vmem:[%s18193_s1 + $0x1b0] sm:$0xff] }
  0x1f   :  { %342 = vmatpush.bf16.msra.mxu1 %v13405_v40  ;;  %v14449_v5 = vld [vmem:[#allocation2 + $0x31] sm:$0xff]  ;;  %76 = vst [vmem:[#allocation2 + $0x60] sm:$0xff] %v14470_v11  ;;  %v13450_v55 = vld [vmem:[%s18193_s1 + $0x168] sm:$0xff]  ;;  %vm14752_vm7 = vmpackc.low %vm14169_vm2, %vm36_vm0 }
  0x20   :  { %493 = vmatpush.bf16.msra.mxu2 %v13421_v41  ;;  %v556_v6 = vld [vmem:[#allocation2 + $0x37] sm:$0xff]  ;;  %v10188_v9 = vpack.c.bf16 %v14449_v5, %v14447_v3  ;;  %78 = vst [vmem:[#allocation2 + $0x70] sm:$0xff] %v14505_v25  ;;  %v13466_v58 = vld [vmem:[%s18193_s1 + $0x1e8] sm:$0xff]  ;;  %vm14894_vm8 = vmpackc.low %vm14169_vm2, %vm44_vm1 }
  0x21   :  { %662 = vmatpush.bf16.msra.mxu3 %v13429_v43  ;;  %246 = vmatmul.bf16.vlgmr.msra.gmra.mxu0 %v166_v46  ;;  %v10244_v10 = vpack.c.bf16 %v556_v6, %v86_v2  ;;  %v88_v13 = vld [vmem:[#allocation2 + $0x3f] sm:$0xff]  ;;  %v14483_v17 = vld [vmem:[#allocation2 + $0x47] sm:$0xff]  ;;  %79 = vst [vmem:[#allocation2 + $0x78] sm:$0xff] %v14511_v26  ;;  %v13443_v41 = vld [vmem:[%s18193_s1 + $0x130] sm:$0xff] }
  0x22   :  { %10127 = vmatmul.msk.bf16.vlgmr.msra.gmra.mxu1 %vm14369_vm3, %v10126_v48  ;;  %v14479_v14 = vld [vmem:[#allocation2 + $0x39] sm:$0xff]  ;;  %v14481_v15 = vld [vmem:[#allocation2 + $0x41] sm:$0xff]  ;;  %v14489_v22 = vpack.c.bf16 %v88_v13, %v556_v6  ;;  %v10247_v24 = vpack.c.bf16 %v14483_v17, %v88_v13  ;;  %808 = vmatpush.bf16.msrb.mxu0 %v13444_v36  ;;  %v13451_v43 = vld [vmem:[%s18193_s1 + $0x170] sm:$0xff] }
  0x23   :  { %10183 = vmatmul.msk.bf16.vlgmr.msra.gmra.mxu2 %vm14386_vm5, %v10182_v50  ;;  %v10191_v23 = vpack.c.bf16 %v14481_v15, %v14479_v14  ;;  %v13468_v40 = vld [vmem:[%s18193_s1 + $0x1f8] sm:$0xff]  ;;  %v13467_v45 = vld [vmem:[%s18193_s1 + $0x1f0] sm:$0xff]  ;;  %v13442_v48 = vld [vmem:[%s18193_s1 + $0x128] sm:$0xff] }
  0x24   :  { %10239 = vmatmul.msk.bf16.vlgmr.msra.gmra.mxu3 %vm14377_vm4, %v10238_v51  ;;  %v89_v27 = vld [vmem:[#allocation2 + $0x4f] sm:$0xff]  ;;  %1142 = vmatpush.bf16.msrb.mxu2 %v13460_v39  ;;  %v14566_v51 = vld [vmem:[%s18192_s0 + $0x78] sm:$0xff]  ;;  %v13449_v13 = vld [vmem:[%s18193_s1 + $0x160] sm:$0xff] }
  0x25   :  { %v14514_v28 = vld [vmem:[#allocation2 + $0x51] sm:$0xff]  ;;  %v10138_v32 = vpack.c.bf16 %v89_v27, %v14168_v4  ;;  %1307 = vmatpush.bf16.msrb.mxu3 %v13468_v40  ;;  %v13458_v50 = vld [vmem:[%s18193_s1 + $0x1a8] sm:$0xff]  ;;  %81 = vst [vmem:[#allocation2 + $0x88] sm:$0xff] %v14566_v51 }
  0x26   :  { %v560_v30 = vld [vmem:[#allocation2 + $0x57] sm:$0xff]  ;;  %v10194_v33 = vpack.c.bf16 %v14514_v28, %v14168_v4  ;;  %809 = vmatpush.bf16.msrb.mxu0 %v13443_v41  ;;  %v14577_v2 = vld [vmem:[#allocation2 + $0x61] sm:$0xff] }
  0x27   :  { %v10250_v35 = vpack.c.bf16 %v560_v30, %v89_v27  ;;  %v13452_v4 = vld [vmem:[%s18193_s1 + $0x178] sm:$0xff]  ;;  %v14554_v46 = vld [vmem:[%s18192_s0 + $0x70] sm:$0xff]  ;;  %v562_v6 = vld [vmem:[#allocation2 + $0x67] sm:$0xff] }
  0x28   :  { %977 = vmatpush.bf16.msrb.mxu1 %v13452_v4  ;;  %1143 = vmatpush.bf16.msrb.mxu2 %v13459_v42  ;;  %80 = vst [vmem:[#allocation2 + $0x80] sm:$0xff] %v14554_v46  ;;  %v13464_v36 = vld [vmem:[%s18193_s1 + $0x1d8] sm:$0xff]  ;;  %v13439_v39 = vld [vmem:[%s18193_s1 + $0x110] sm:$0xff]  ;;  %v13438_v42 = vld [vmem:[%s18193_s1 + $0x108] sm:$0xff] }
  0x29   :  { %1308 = vmatpush.bf16.msrb.mxu3 %v13467_v45  ;;  %v13455_v4 = vld [vmem:[%s18193_s1 + $0x190] sm:$0xff]  ;;  %v13446_v45 = vld [vmem:[%s18193_s1 + $0x148] sm:$0xff]  ;;  %v13584_v52 = vld [vmem:[%s18197_s5 + $0x118] sm:$0xff] }
  0x2a   :  { %810 = vmatpush.bf16.msrb.mxu0 %v13442_v48  ;;  %v13447_v40 = vld [vmem:[%s18193_s1 + $0x150] sm:$0xff]  ;;  %v13462_v48 = vld [vmem:[%s18193_s1 + $0x1c8] sm:$0xff] }
  0x2b   :  { %v13463_v41 = vld [vmem:[%s18193_s1 + $0x1d0] sm:$0xff] }
  0x2c   :  { %978 = vmatpush.bf16.msrb.mxu1 %v13451_v43  ;;  %1144 = vmatpush.bf16.msrb.mxu2 %v13458_v50  ;;  %v13454_v43 = vld [vmem:[%s18193_s1 + $0x188] sm:$0xff]  ;;  %v13595_v47 = vld [vmem:[%s18197_s5 + $0x170] sm:$0xff] }
  0x2d   :  { %1309 = vmatpush.bf16.msrb.mxu3 %v13466_v58  ;;  %v93_v50 = vld [vmem:[#allocation2 + $0x6f] sm:$0xff] }
  0x2e   :  { %v14645_v58 = vld [vmem:[#allocation2 + $0x71] sm:$0xff] }
  0x30   :  { %979 = vmatpush.bf16.msrb.mxu1 %v13450_v55  ;;  %v14643_v55 = vld [vmem:[#allocation2 + $0x69] sm:$0xff] }
  0x31   :  { %251 = vmatmul.bf16.gmra.mxu0 %v14414_v59 }
  0x32   :  { %10130 = vmatmul.msk.bf16.gmra.mxu1 %vm14377_vm4, %v14416_v60 }
  0x33   :  { %10186 = vmatmul.msk.bf16.gmra.mxu2 %vm14423_vm6, %v10185_v61  ;;  %v91_v61 = vld [vmem:[#allocation2 + $0x5f] sm:$0xff] }
  0x34   :  { %10242 = vmatmul.msk.bf16.gmra.mxu3 %vm14377_vm4, %v10241_v62  ;;  %v14575_v62 = vld [vmem:[#allocation2 + $0x59] sm:$0xff]  ;;  %v14595_v27 = vpack.c.bf16 %v91_v61, %v560_v30  ;;  %980 = vmatpush.bf16.msrb.mxu1 %v13449_v13 }
  0x35   :  { %v13456_v30 = vld [vmem:[%s18193_s1 + $0x198] sm:$0xff]  ;;  %v13437_v13 = vld [vmem:[%s18193_s1 + $0x100] sm:$0xff] }
  0x41   :  { %256 = vmatmul.bf16.gmra.mxu0 %v14453_v7 }
  0x42   :  { %10133 = vmatmul.msk.bf16.gmra.mxu1 %vm14377_vm4, %v14455_v8 }
  0x43   :  { %10189 = vmatmul.msk.bf16.gmra.mxu2 %vm14423_vm6, %v10188_v9  ;;  %v13441_v9 = vld [vmem:[%s18193_s1 + $0x120] sm:$0xff] }
  0x44   :  { %10245 = vmatmul.msk.bf16.gmra.mxu3 %vm14377_vm4, %v10244_v10  ;;  %v13457_v10 = vld [vmem:[%s18193_s1 + $0x1a0] sm:$0xff]  ;;  %811 = vmatpush.bf16.msrb.mxu0 %v13441_v9  ;;  %v14649_v9 = vpack.c.bf16 %v14505_v25, %v14476_v12 }
  0x45   :  { %1145 = vmatpush.bf16.msrb.mxu2 %v13457_v10  ;;  %v14651_v10 = vpack.c.bf16 %v93_v50, %v562_v6 }
  0x49   :  { %1146 = vmatpush.bf16.msrb.mxu2 %v13456_v30  ;;  %v95_v30 = vld [vmem:[#allocation2 + $0x7f] sm:$0xff] }
  0x4d   :  { %1147 = vmatpush.bf16.msrb.mxu2 %v13455_v4  ;;  %v14683_v4 = vpack.c.bf16 %v14554_v46, %v14511_v26 }
  0x51   :  { %261 = vmatmul.bf16.gmra.mxu0 %v14487_v21  ;;  %1148 = vmatpush.bf16.msrb.mxu2 %v13454_v43  ;;  %v736_v43 = vpack.c.bf16 %v14281_v18, %v14272_v16 }
  0x52   :  { %10136 = vmatmul.msk.bf16.gmra.mxu1 %vm14377_vm4, %v14489_v22 }
  0x53   :  { %10192 = vmatmul.msk.bf16.gmra.mxu2 %vm14423_vm6, %v10191_v23  ;;  %v13465_v23 = vld [vmem:[%s18193_s1 + $0x1e0] sm:$0xff] }
  0x54   :  { %10248 = vmatmul.msk.bf16.gmra.mxu3 %vm14377_vm4, %v10247_v24  ;;  %v14593_v24 = vpack.c.bf16 %v14470_v11, %v14444_v1 }
  0x55   :  { %1310 = vmatpush.bf16.msrb.mxu3 %v13465_v23  ;;  %v13453_v23 = vld [vmem:[%s18193_s1 + $0x180] sm:$0xff] }
  0x56   :  { %1149 = vmatpush.bf16.msrb.mxu2 %v13453_v23 }
  0x59   :  { %1311 = vmatpush.bf16.msrb.mxu3 %v13464_v36  ;;  %v14677_v36 = vld [vmem:[#allocation2 + $0x81] sm:$0xff] }
  0x5d   :  { %1312 = vmatpush.bf16.msrb.mxu3 %v13463_v41 }
  0x61   :  { %266 = vmatmul.bf16.gmra.mxu0 %v170_v31  ;;  %v10197_v31 = vpack.c.bf16 %v14577_v2, %v14575_v62  ;;  %1313 = vmatpush.bf16.msrb.mxu3 %v13462_v48 }
  0x62   :  { %10139 = vmatmul.msk.bf16.gmra.mxu1 %vm14369_vm3, %v10138_v32  ;;  %v10253_v32 = vpack.c.bf16 %v562_v6, %v91_v61  ;;  %v564_v61 = vld [vmem:[#allocation2 + $0x77] sm:$0xff]  ;;  %v13461_v6 = vld [vmem:[%s18193_s1 + $0x1c0] sm:$0xff] }
  0x63   :  { %10195 = vmatmul.msk.bf16.gmra.mxu2 %vm14386_vm5, %v10194_v33  ;;  %v13440_v33 = vld [vmem:[%s18193_s1 + $0x118] sm:$0xff] }
  0x64   :  { %10251 = vmatmul.msk.bf16.gmra.mxu3 %vm14377_vm4, %v10250_v35  ;;  %v13448_v35 = vld [vmem:[%s18193_s1 + $0x158] sm:$0xff]  ;;  %812 = vmatpush.bf16.msrb.mxu0 %v13440_v33  ;;  %v13445_v33 = vld [vmem:[%s18193_s1 + $0x140] sm:$0xff] }
  0x65   :  { %981 = vmatpush.bf16.msrb.mxu1 %v13448_v35  ;;  %1314 = vmatpush.bf16.msrb.mxu3 %v13461_v6  ;;  %v14675_v35 = vld [vmem:[#allocation2 + $0x79] sm:$0xff]  ;;  %v737_v6 = vpack.c.bf16 %v14292_v20, %v14286_v19 }
  0x66   :  { %v14689_v41 = vpack.c.bf16 %v14677_v36, %v14675_v35 }
  0x68   :  { %813 = vmatpush.bf16.msrb.mxu0 %v13439_v39  ;;  %v14679_v39 = vld [vmem:[#allocation2 + $0x87] sm:$0xff] }
  0x69   :  { %982 = vmatpush.bf16.msrb.mxu1 %v13447_v40  ;;  %v14685_v40 = vpack.c.bf16 %v95_v30, %v564_v61 }
  0x6c   :  { %814 = vmatpush.bf16.msrb.mxu0 %v13438_v42  ;;  %v10259_v42 = vpack.c.bf16 %v14679_v39, %v95_v30  ;;  %v10329_v30 = vpack.c.bf16 %v14447_v3, %v14410_v57 }
  0x6d   :  { %983 = vmatpush.bf16.msrb.mxu1 %v13446_v45  ;;  %v10326_v45 = vpack.c.bf16 %v14408_v56, %v14361_v44 }
  0x70   :  { %815 = vmatpush.bf16.msrb.mxu0 %v13437_v13 }
  0x71   :  { %271 = vmatmul.bf16.gmra.mxu0 %v14593_v24  ;;  %984 = vmatpush.bf16.msrb.mxu1 %v13445_v33 }
  0x72   :  { %10142 = vmatmul.msk.bf16.gmra.mxu1 %vm14377_vm4, %v14595_v27 }
  0x73   :  { %10198 = vmatmul.msk.bf16.gmra.mxu2 %vm14423_vm6, %v10197_v31  ;;  %v10200_v31 = vpack.c.bf16 %v14645_v58, %v14643_v55 }
  0x74   :  { %10254 = vmatmul.msk.bf16.gmra.mxu3 %vm14377_vm4, %v10253_v32  ;;  %v10256_v32 = vpack.c.bf16 %v564_v61, %v93_v50 }
  0x81   :  { %276 = vmatmul.bf16.gmra.mxu0 %v14649_v9 }
  0x82   :  { %10145 = vmatmul.msk.bf16.gmra.mxu1 %vm14377_vm4, %v14651_v10 }
  0x83   :  { %10201 = vmatmul.msk.bf16.gmra.mxu2 %vm14423_vm6, %v10200_v31 }
  0x84   :  { %10257 = vmatmul.msk.bf16.gmra.mxu3 %vm14377_vm4, %v10256_v32 }
  0x91   :  { %281 = vmatmul.bf16.gmra.mxu0 %v14683_v4 }
  0x92   :  { %10148 = vmatmul.msk.bf16.gmra.mxu1 %vm14377_vm4, %v14685_v40 }
  0x93   :  { %10204 = vmatmul.msk.bf16.gmra.mxu2 %vm14423_vm6, %v14689_v41 }
  0x94   :  { %10260 = vmatmul.msk.bf16.gmra.mxu3 %vm14377_vm4, %v10259_v42 }
  0x9e   :  { %v247_v48 = vpop.f32.mrf.mxu0 }
  0x9f   :  { %v344_v50 = vpop.f32.mrf.mxu1 }
  0xa0   :  { %v345_v61 = vadd.f32 %v344_v50, %v247_v48 }
  0xa1   :  { %816 = vmatmul.bf16.vlgmr.msrb.gmra.mxu0 %v736_v43 }
  0xa2   :  { %10327 = vmatmul.msk.bf16.vlgmr.msrb.gmra.mxu1 %vm14423_vm6, %v10326_v45 }
  0xa3   :  { %10383 = vmatmul.msk.bf16.vlgmr.msrb.gmra.mxu2 %vm14377_vm4, %v14416_v60 }
  0xa4   :  { %1315 = vmatmul.bf16.vlgmr.msrb.gmra.mxu3 %v14414_v59 }
  0xa6   :  { %v495_v13 = vpop.f32.mrf.mxu2  ;;  %v249_v16 = vpop.f32.mrf.mxu0 }
  0xa7   :  { %v664_v23 = vpop.f32.mrf.mxu3  ;;  %v535_v31 = vadd.f32 %v495_v13, %v345_v61  ;;  %v346_v18 = vpop.f32.mrf.mxu1 }
  0xa8   :  { %v347_v32 = vadd.f32 %v346_v18, %v249_v16  ;;  %v10332_v16 = vpack.c.bf16 %v14479_v14, %v14449_v5 }
  0xa9   :  { %v14711_v44 = vadd.f32 %v664_v23, %v535_v31  ;;  %v738_v31 = vpack.c.bf16 %v14343_v37, %v14317_v29 }
  0xae   :  { %v497_v56 = vpop.f32.mrf.mxu2  ;;  %v252_v60 = vpop.f32.mrf.mxu0 }
  0xaf   :  { %v666_v33 = vpop.f32.mrf.mxu3  ;;  %v536_v42 = vadd.f32 %v497_v56, %v347_v32  ;;  %v349_v43 = vpop.f32.mrf.mxu1 }
  0xb0   :  { %v350_v59 = vadd.f32 %v349_v43, %v252_v60 }
  0xb1   :  { %v14717_v45 = vadd.f32 %v666_v33, %v536_v42  ;;  %821 = vmatmul.bf16.gmra.mxu0 %v737_v6  ;;  %v14741_v42 = vld [vmem:[#allocation2 + $0x49] sm:$0xff] }
  0xb2   :  { %10330 = vmatmul.msk.bf16.gmra.mxu1 %vm14423_vm6, %v10329_v30 }
  0xb3   :  { %10386 = vmatmul.msk.bf16.gmra.mxu2 %vm14377_vm4, %v14455_v8 }
  0xb4   :  { %1320 = vmatmul.bf16.gmra.mxu3 %v14453_v7 }
  0xb6   :  { %v500_v19 = vpop.f32.mrf.mxu2  ;;  %v254_v57 = vpop.f32.mrf.mxu0 }
  0xb7   :  { %v669_v20 = vpop.f32.mrf.mxu3  ;;  %v537_v48 = vadd.f32 %v500_v19, %v350_v59  ;;  %v351_v3 = vpop.f32.mrf.mxu1  ;;  %v739_v59 = vpack.c.bf16 %v14405_v54, %v14399_v53 }
  0xb8   :  { %v352_v50 = vadd.f32 %v351_v3, %v254_v57  ;;  %v1238_v57 = vpack.c.bf16 0.0, %v14405_v54 }
  0xb9   :  { %v14725_v61 = vadd.f32 %v669_v20, %v537_v48  ;;  %v10391_v48 = vpack.c.bf16 0.0, %v14483_v17 }
  0xbe   :  { %v502_v13 = vpop.f32.mrf.mxu2  ;;  %v257_v8 = vpop.f32.mrf.mxu0 }
  0xbf   :  { %v671_v23 = vpop.f32.mrf.mxu3  ;;  %v538_v18 = vadd.f32 %v502_v13, %v352_v50  ;;  %v354_v32 = vpop.f32.mrf.mxu1  ;;  %v18217_v50 = vmov 0 }
  0xc0   :  { %v355_v7 = vadd.f32 %v354_v32, %v257_v8  ;;  %v18218_v50 = vsel %vm14752_vm7, 4294967295, %v18217_v50  ;;  %v740_v8 = vpack.c.bf16 %v14444_v1, %v14438_v0  ;;  %v10338_v32 = vpack.c.bf16 %v14575_v62, %v14514_v28  ;;  %v13475_v28 = vld [vmem:[%s18193_s1 + $0x230] sm:$0xff] }
  0xc1   :  { %v14731_v56 = vadd.f32 %v671_v23, %v538_v18  ;;  %826 = vmatmul.bf16.gmra.mxu0 %v738_v31  ;;  %18219 = vst [vmem:[#allocation7_spill] sm:$0xff] %v18218_v50 }
  0xc2   :  { %10333 = vmatmul.msk.bf16.gmra.mxu1 %vm14423_vm6, %v10332_v16 }
  0xc3   :  { %10389 = vmatmul.msk.bf16.gmra.mxu2 %vm14377_vm4, %v14489_v22  ;;  %v10335_v22 = vpack.c.bf16 %v14741_v42, %v14481_v15 }
  0xc4   :  { %1325 = vmatmul.bf16.gmra.mxu3 %v14487_v21 }
  0xc6   :  { %v505_v29 = vpop.f32.mrf.mxu2  ;;  %v259_v5 = vpop.f32.mrf.mxu0 }
  0xc7   :  { %v674_v37 = vpop.f32.mrf.mxu3  ;;  %v539_v33 = vadd.f32 %v505_v29, %v355_v7  ;;  %v356_v14 = vpop.f32.mrf.mxu1 }
  0xc8   :  { %v357_v6 = vadd.f32 %v356_v14, %v259_v5  ;;  %v13476_v14 = vld [vmem:[%s18193_s1 + $0x238] sm:$0xff] }
  0xc9   :  { %v14739_v30 = vadd.f32 %v674_v37, %v539_v33  ;;  %1472 = vmatpush.bf16.msra.mxu0 %v13476_v14 }
  0xcd   :  { %1473 = vmatpush.bf16.msra.mxu0 %v13475_v28  ;;  %v10403_v28 = vpack.c.bf16 0.0, %v14679_v39  ;;  %v1373_v39 = vld [vmem:[#allocation2 + $0x21] sm:$0xff] }
  0xce   :  { %v507_v60 = vpop.f32.mrf.mxu2  ;;  %v262_v21 = vpop.f32.mrf.mxu0 }
  0xcf   :  { %v676_v43 = vpop.f32.mrf.mxu3  ;;  %v540_v19 = vadd.f32 %v507_v60, %v357_v6  ;;  %v359_v20 = vpop.f32.mrf.mxu1 }
  0xd0   :  { %v360_v3 = vadd.f32 %v359_v20, %v262_v21  ;;  %v13473_v21 = vld [vmem:[%s18193_s1 + $0x220] sm:$0xff] }
  0xd1   :  { %v14756_v13 = vadd.f32 %v676_v43, %v540_v19  ;;  %831 = vmatmul.bf16.gmra.mxu0 %v739_v59  ;;  %v10341_v19 = vpack.c.bf16 %v14643_v55, %v14577_v2  ;;  %v13471_v2 = vld [vmem:[%s18193_s1 + $0x210] sm:$0xff] }
  0xd2   :  { %10336 = vmatmul.msk.bf16.gmra.mxu1 %vm14423_vm6, %v10335_v22  ;;  %v741_v22 = vpack.c.bf16 %v14476_v12, %v14470_v11 }
  0xd3   :  { %10392 = vmatmul.msk.bf16.gmra.mxu2 %vm14752_vm7, %v10391_v48 }
  0xd4   :  { %1330 = vmatmul.bf16.gmra.mxu3 %v1238_v57 }
  0xd6   :  { %v510_v53 = vpop.f32.mrf.mxu2  ;;  %v264_v17 = vpop.f32.mrf.mxu0 }
  0xd7   :  { %v679_v54 = vpop.f32.mrf.mxu3  ;;  %v541_v15 = vadd.f32 %v510_v53, %v360_v3  ;;  %v361_v34 = vpop.f32.mrf.mxu1  ;;  %v13472_v3 = vld [vmem:[%s18193_s1 + $0x218] sm:$0xff] }
  0xd8   :  { %v362_v23 = vadd.f32 %v361_v34, %v264_v17  ;;  %v742_v34 = vpack.c.bf16 %v14511_v26, %v14505_v25 }
  0xd9   :  { %v14762_v31 = vadd.f32 %v679_v54, %v541_v15 }
  0xde   :  { %v512_v16 = vpop.f32.mrf.mxu2  ;;  %v267_v29 = vpop.f32.mrf.mxu0 }
  0xdf   :  { %v681_v18 = vpop.f32.mrf.mxu3  ;;  %v542_v7 = vadd.f32 %v512_v16, %v362_v23  ;;  %v364_v37 = vpop.f32.mrf.mxu1  ;;  %v10344_v23 = vpack.c.bf16 %v14675_v35, %v14645_v58  ;;  %v13469_v16 = vld [vmem:[%s18193_s1 + $0x200] sm:$0xff] }
  0xe0   :  { %v365_v33 = vadd.f32 %v364_v37, %v267_v29  ;;  %v14846_v37 = vld [vmem:[#allocation2 + $0x89] sm:$0xff] }
  0xe1   :  { %v14768_v5 = vadd.f32 %v681_v18, %v542_v7  ;;  %836 = vmatmul.bf16.gmra.mxu0 %v740_v8 }
  0xe2   :  { %10339 = vmatmul.msk.bf16.gmra.mxu1 %vm14423_vm6, %v10338_v32 }
  0xe3   :  { %10395 = vmatmul.msk.bf16.gmra.mxu2 %vm14377_vm4, %v14595_v27  ;;  %v13474_v27 = vld [vmem:[%s18193_s1 + $0x228] sm:$0xff] }
  0xe4   :  { %1335 = vmatmul.bf16.gmra.mxu3 %v14593_v24  ;;  %1474 = vmatpush.bf16.msra.mxu0 %v13474_v27 }
  0xe6   :  { %v515_v0 = vpop.f32.mrf.mxu2  ;;  %v14782_v6 = vpop.f32.mrf.mxu0 }
  0xe7   :  { %v684_v1 = vpop.f32.mrf.mxu3  ;;  %v543_v62 = vadd.f32 %v515_v0, %v365_v33  ;;  %v14784_v60 = vpop.f32.mrf.mxu1 }
  0xe8   :  { %1475 = vmatpush.bf16.msra.mxu0 %v13473_v21 }
  0xe9   :  { %v14786_v43 = vadd.f32 %v684_v1, %v543_v62  ;;  %v1242_v62 = vpack.c.bf16 0.0, %v14566_v51 }
  0xec   :  { %1476 = vmatpush.bf16.msra.mxu0 %v13472_v3 }
  0xee   :  { %v14791_v24 = vpop.f32.mrf.mxu2  ;;  %v272_v20 = vpop.f32.mrf.mxu0 }
  0xef   :  { %v14793_v59 = vpop.f32.mrf.mxu3  ;;  %v369_v48 = vpop.f32.mrf.mxu1 }
  0xf0   :  { %v370_v57 = vadd.f32 %v369_v48, %v272_v20  ;;  %1477 = vmatpush.bf16.msra.mxu0 %v13471_v2  ;;  %v1372_v20 = vld [vmem:[#allocation2 + $0x19] sm:$0xff]  ;;  %v1375_v2 = vld [vmem:[#allocation2 + $0x31] sm:$0xff] }
  0xf1   :  { %841 = vmatmul.bf16.gmra.mxu0 %v741_v22  ;;  %v10470_v48 = vpack.c.bf16 %v1373_v39, %v1372_v20  ;;  %v13484_v39 = vld [vmem:[%s18195_s3 + $0x38] sm:$0xff] }
  0xf2   :  { %10342 = vmatmul.msk.bf16.gmra.mxu1 %vm14423_vm6, %v10341_v19  ;;  %1838 = vmatpush.bf16.msra.mxu2 %v13484_v39 }
  0xf3   :  { %10398 = vmatmul.msk.bf16.gmra.mxu2 %vm14377_vm4, %v14651_v10  ;;  %v13470_v10 = vld [vmem:[%s18193_s1 + $0x208] sm:$0xff] }
  0xf4   :  { %1340 = vmatmul.bf16.gmra.mxu3 %v14649_v9  ;;  %1478 = vmatpush.bf16.msra.mxu0 %v13470_v10 }
  0xf6   :  { %v520_v11 = vpop.f32.mrf.mxu2  ;;  %v14814_v53 = vpop.f32.mrf.mxu0 }
  0xf7   :  { %v689_v12 = vpop.f32.mrf.mxu3  ;;  %v545_v55 = vadd.f32 %v520_v11, %v370_v57  ;;  %v14816_v54 = vpop.f32.mrf.mxu1 }
  0xf8   :  { %1479 = vmatpush.bf16.msra.mxu0 %v13469_v16  ;;  %v1376_v16 = vld [vmem:[#allocation2 + $0x39] sm:$0xff] }
  0xf9   :  { %v14818_v15 = vadd.f32 %v689_v12, %v545_v55  ;;  %v1374_v12 = vld [vmem:[#allocation2 + $0x29] sm:$0xff] }
  0xfa   :  { %v10473_v55 = vpack.c.bf16 %v1375_v2, %v1374_v12 }
  0xfe   :  { %v14823_v9 = vpop.f32.mrf.mxu2  ;;  %v277_v18 = vpop.f32.mrf.mxu0 }
  0xff   :  { %v14825_v17 = vpop.f32.mrf.mxu3  ;;  %v374_v8 = vpop.f32.mrf.mxu1 }
 0x100   :  { %v375_v32 = vadd.f32 %v374_v8, %v277_v18  ;;  %v1377_v18 = vld [vmem:[#allocation2 + $0x41] sm:$0xff] }
 0x101   :  { %846 = vmatmul.bf16.gmra.mxu0 %v742_v34  ;;  %v10476_v8 = vpack.c.bf16 %v1377_v18, %v1376_v16  ;;  %v13508_v16 = vld [vmem:[%s18195_s3 + $0xf8] sm:$0xff] }
 0x102   :  { %10345 = vmatmul.msk.bf16.gmra.mxu1 %vm14423_vm6, %v10344_v23  ;;  %v13488_v18 = vld [vmem:[%s18195_s3 + $0x58] sm:$0xff]  ;;  %2156 = vmatpush.bf16.msrb.mxu0 %v13508_v16  ;;  %v13477_v16 = vld [vmem:[%s18195_s3] sm:$0xff] }
 0x103   :  { %10401 = vmatmul.msk.bf16.gmra.mxu2 %vm14377_vm4, %v14685_v40  ;;  %v743_v40 = vpack.c.bf16 %v14566_v51, %v14554_v46 }
 0x104   :  { %1345 = vmatmul.bf16.gmra.mxu3 %v14683_v4  ;;  %v10347_v4 = vpack.c.bf16 %v14846_v37, %v14677_v36 }
 0x106   :  { %v525_v25 = vpop.f32.mrf.mxu2  ;;  %v14840_v35 = vpop.f32.mrf.mxu0 }
 0x107   :  { %v694_v26 = vpop.f32.mrf.mxu3  ;;  %v547_v58 = vadd.f32 %v525_v25, %v375_v32  ;;  %v14842_v7 = vpop.f32.mrf.mxu1 }
 0x109   :  { %v14844_v29 = vadd.f32 %v694_v26, %v547_v58  ;;  %v10479_v26 = vpack.c.bf16 0.0, %v14741_v42  ;;  %v1380_v42 = vld [vmem:[#allocation2 + $0x61] sm:$0xff] }
 0x10e   :  { %v14848_v33 = vpop.f32.mrf.mxu2  ;;  %v282_v0 = vpop.f32.mrf.mxu0 }
 0x10f   :  { %v14850_v14 = vpop.f32.mrf.mxu3  ;;  %v379_v1 = vpop.f32.mrf.mxu1 }
 0x110   :  { %v380_v27 = vadd.f32 %v379_v1, %v282_v0 }
 0x111   :  { %851 = vmatmul.bf16.gmra.mxu0 %v743_v40 }
 0x112   :  { %10348 = vmatmul.msk.bf16.gmra.mxu1 %vm14423_vm6, %v10347_v4  ;;  %v1379_v4 = vld [vmem:[#allocation2 + $0x59] sm:$0xff] }
 0x113   :  { %10404 = vmatmul.msk.bf16.gmra.mxu2 %vm14752_vm7, %v10403_v28  ;;  %v10482_v0 = vpack.c.bf16 %v1380_v42, %v1379_v4 }
 0x114   :  { %1350 = vmatmul.bf16.gmra.mxu3 %v1242_v62  ;;  %v1381_v62 = vld [vmem:[#allocation2 + $0x69] sm:$0xff] }
 0x116   :  { %v530_v22 = vpop.f32.mrf.mxu2  ;;  %v14862_v21 = vpop.f32.mrf.mxu0 }
 0x117   :  { %v699_v46 = vpop.f32.mrf.mxu3  ;;  %v549_v19 = vadd.f32 %v530_v22, %v380_v27  ;;  %v13491_v27 = vld [vmem:[%s18195_s3 + $0x70] sm:$0xff]  ;;  %v14919_v22 = vpop.f32.mrf.mxu1 }
 0x119   :  { %v14864_v36 = vadd.f32 %v699_v46, %v549_v19 }
 0x11e   :  { %v817_v51 = vpop.f32.mrf.mxu0 }
 0x11f   :  { %v14867_v57 = vadd.f32 %v817_v51, %v14711_v44  ;;  %v14932_v51 = vpop.f32.mrf.mxu3  ;;  %v14942_v12 = vpop.f32.mrf.mxu1 }
 0x121   :  { %10471 = vmatmul.msk.bf16.vlgmr.msra.gmra.mxu0 %vm14423_vm6, %v10470_v48  ;;  %v13490_v48 = vld [vmem:[%s18195_s3 + $0x68] sm:$0xff] }
 0x126   :  { %v819_v3 = vpop.f32.mrf.mxu0 }
 0x127   :  { %v14872_v11 = vadd.f32 %v819_v3, %v14717_v45  ;;  %v13489_v3 = vld [vmem:[%s18195_s3 + $0x60] sm:$0xff]  ;;  %v988_v4 = vpop.f32.mrf.mxu1 }
 0x12e   :  { %v822_v10 = vpop.f32.mrf.mxu0 }
 0x12f   :  { %v14875_v34 = vadd.f32 %v822_v10, %v14725_v61  ;;  %v13482_v10 = vld [vmem:[%s18195_s3 + $0x28] sm:$0xff] }
 0x131   :  { %10474 = vmatmul.msk.bf16.gmra.mxu0 %vm14423_vm6, %v10473_v55 }
 0x136   :  { %v824_v23 = vpop.f32.mrf.mxu0 }
 0x137   :  { %v14880_v44 = vadd.f32 %v824_v23, %v14731_v56  ;;  %v18220_v56 = vmov 0  ;;  %v13500_v23 = vld [vmem:[%s18195_s3 + $0xb8] sm:$0xff] }
 0x138   :  { %v18221_v56 = vsel %vm14894_vm8, 4294967295, %v18220_v56  ;;  %1987 = vmatpush.bf16.msra.mxu3 %v13500_v23 }
 0x139   :  { %18222 = vst [vmem:[#allocation8_spill] sm:$0xff] %v18221_v56 }
 0x13e   :  { %v827_v32 = vpop.f32.mrf.mxu0 }
 0x13f   :  { %v14883_v45 = vadd.f32 %v827_v32, %v14739_v30  ;;  %v13481_v32 = vld [vmem:[%s18195_s3 + $0x20] sm:$0xff] }
 0x141   :  { %10477 = vmatmul.msk.bf16.gmra.mxu0 %vm14423_vm6, %v10476_v8  ;;  %v14960_v8 = vpop.f32.mrf.mxu3 }
 0x146   :  { %v829_v25 = vpop.f32.mrf.mxu0 }
 0x147   :  { %v14888_v61 = vadd.f32 %v829_v25, %v14756_v13  ;;  %v13499_v25 = vld [vmem:[%s18195_s3 + $0xb0] sm:$0xff] }
 0x148   :  { %1988 = vmatpush.bf16.msra.mxu3 %v13499_v25  ;;  %v10491_v25 = vpack.c.bf16 0.0, %v14846_v37 }
 0x14e   :  { %v832_v58 = vpop.f32.mrf.mxu0 }
 0x14f   :  { %v14899_v30 = vadd.f32 %v832_v58, %v14762_v31  ;;  %v13492_v31 = vld [vmem:[%s18195_s3 + $0x78] sm:$0xff]  ;;  %v13487_v58 = vld [vmem:[%s18195_s3 + $0x50] sm:$0xff] }
 0x150   :  { %1741 = vmatpush.bf16.msra.mxu1 %v13492_v31  ;;  %v13506_v31 = vld [vmem:[%s18195_s3 + $0xe8] sm:$0xff] }
 0x151   :  { %10480 = vmatmul.msk.bf16.gmra.mxu0 %vm14894_vm8, %v10479_v26  ;;  %v13507_v26 = vld [vmem:[%s18195_s3 + $0xf0] sm:$0xff] }
 0x152   :  { %2157 = vmatpush.bf16.msrb.mxu0 %v13507_v26 }
 0x154   :  { %1742 = vmatpush.bf16.msra.mxu1 %v13491_v27  ;;  %v13497_v27 = vld [vmem:[%s18195_s3 + $0xa0] sm:$0xff] }
 0x156   :  { %v834_v40 = vpop.f32.mrf.mxu0  ;;  %2158 = vmatpush.bf16.msrb.mxu0 %v13506_v31  ;;  %v13493_v31 = vld [vmem:[%s18195_s3 + $0x80] sm:$0xff] }
 0x157   :  { %v14904_v13 = vadd.f32 %v834_v40, %v14768_v5  ;;  %v1382_v5 = vld [vmem:[#allocation2 + $0x71] sm:$0xff] }
 0x158   :  { %v10485_v46 = vpack.c.bf16 %v1382_v5, %v1381_v62  ;;  %1743 = vmatpush.bf16.msra.mxu1 %v13490_v48  ;;  %v13486_v62 = vld [vmem:[%s18195_s3 + $0x48] sm:$0xff] }
 0x159   :  { %v13478_v48 = vld [vmem:[%s18195_s3 + $0x8] sm:$0xff] }
 0x15c   :  { %1744 = vmatpush.bf16.msra.mxu1 %v13489_v3  ;;  %v13504_v3 = vld [vmem:[%s18195_s3 + $0xd8] sm:$0xff] }
 0x15e   :  { %v837_v1 = vpop.f32.mrf.mxu0 }
 0x15f   :  { %v14907_v38 = vadd.f32 %v837_v1, %v14786_v43  ;;  %v14921_v43 = vpop.f32.mrf.mxu2  ;;  %v13498_v1 = vld [vmem:[%s18195_s3 + $0xa8] sm:$0xff] }
 0x160   :  { %1745 = vmatpush.bf16.msra.mxu1 %v13488_v18  ;;  %1989 = vmatpush.bf16.msra.mxu3 %v13498_v1  ;;  %v13495_v18 = vld [vmem:[%s18195_s3 + $0x90] sm:$0xff]  ;;  %v13502_v1 = vld [vmem:[%s18195_s3 + $0xc8] sm:$0xff] }
 0x161   :  { %10483 = vmatmul.msk.bf16.gmra.mxu0 %vm14423_vm6, %v10482_v0  ;;  %v13480_v0 = vld [vmem:[%s18195_s3 + $0x18] sm:$0xff] }
 0x164   :  { %1746 = vmatpush.bf16.msra.mxu1 %v13487_v58  ;;  %1990 = vmatpush.bf16.msra.mxu3 %v13497_v27  ;;  %v1026_v27 = vadd.f32 %v14942_v12, %v14867_v57 }
 0x166   :  { %v14911_v28 = vpop.f32.mrf.mxu0 }
 0x167   :  { %v14946_v55 = vpop.f32.mrf.mxu2 }
 0x168   :  { %1747 = vmatpush.bf16.msra.mxu1 %v13486_v62 }
 0x16e   :  { %v842_v19 = vpop.f32.mrf.mxu0 }
 0x16f   :  { %v14924_v20 = vadd.f32 %v842_v19, %v14818_v15  ;;  %v13483_v15 = vld [vmem:[%s18195_s3 + $0x30] sm:$0xff]  ;;  %v1153_v5 = vpop.f32.mrf.mxu2  ;;  %v1318_v19 = vpop.f32.mrf.mxu3 }
 0x170   :  { %1839 = vmatpush.bf16.msra.mxu2 %v13483_v15  ;;  %v13496_v15 = vld [vmem:[%s18195_s3 + $0x98] sm:$0xff] }
 0x171   :  { %10486 = vmatmul.msk.bf16.gmra.mxu0 %vm14423_vm6, %v10485_v46  ;;  %v13505_v46 = vld [vmem:[%s18195_s3 + $0xe0] sm:$0xff]  ;;  %1991 = vmatpush.bf16.msra.mxu3 %v13496_v15 }
 0x172   :  { %2159 = vmatpush.bf16.msrb.mxu0 %v13505_v46  ;;  %v1191_v46 = vadd.f32 %v14946_v55, %v1026_v27 }
 0x174   :  { %1840 = vmatpush.bf16.msra.mxu2 %v13482_v10  ;;  %v991_v10 = vpop.f32.mrf.mxu1 }
 0x175   :  { %1992 = vmatpush.bf16.msra.mxu3 %v13495_v18  ;;  %v1027_v18 = vadd.f32 %v988_v4, %v14872_v11 }
 0x176   :  { %v14944_v2 = vpop.f32.mrf.mxu0  ;;  %2160 = vmatpush.bf16.msrb.mxu0 %v13504_v3  ;;  %v15051_v3 = vld [vmem:[%s18194_s2] ss:$0 sm:$0xff] }
 0x177   :  { %v1156_v23 = vpop.f32.mrf.mxu2  ;;  %v1321_v58 = vpop.f32.mrf.mxu3 }
 0x178   :  { %1841 = vmatpush.bf16.msra.mxu2 %v13481_v32  ;;  %v13503_v32 = vld [vmem:[%s18195_s3 + $0xd0] sm:$0xff] }
 0x17a   :  { %2161 = vmatpush.bf16.msrb.mxu0 %v13503_v32 }
 0x17c   :  { %1842 = vmatpush.bf16.msra.mxu2 %v13480_v0  ;;  %v13494_v0 = vld [vmem:[%s18195_s3 + $0x88] sm:$0xff]  ;;  %v993_v37 = vpop.f32.mrf.mxu1 }
 0x17d   :  { %1993 = vmatpush.bf16.msra.mxu3 %v13494_v0 }
 0x17e   :  { %v847_v40 = vpop.f32.mrf.mxu0  ;;  %2162 = vmatpush.bf16.msrb.mxu0 %v13502_v1 }
 0x17f   :  { %v14975_v42 = vadd.f32 %v847_v40, %v14844_v29  ;;  %v13479_v29 = vld [vmem:[%s18195_s3 + $0x10] sm:$0xff]  ;;  %v1158_v62 = vpop.f32.mrf.mxu2 }
 0x180   :  { %1843 = vmatpush.bf16.msra.mxu2 %v13479_v29 }
 0x181   :  { %10489 = vmatmul.msk.bf16.gmra.mxu0 %vm14423_vm6, %v14689_v41  ;;  %v13485_v41 = vld [vmem:[%s18195_s3 + $0x40] sm:$0xff]  ;;  %1994 = vmatpush.bf16.msra.mxu3 %v13493_v31 }
 0x182   :  { %1748 = vmatpush.bf16.msra.mxu1 %v13485_v41  ;;  %v1323_v41 = vpop.f32.mrf.mxu3 }
 0x184   :  { %1844 = vmatpush.bf16.msra.mxu2 %v13478_v48  ;;  %v1356_v48 = vadd.f32 %v14960_v8, %v1191_v46  ;;  %v996_v15 = vpop.f32.mrf.mxu1  ;;  %v15058_v8 = vld [vmem:[#allocation2] sm:$0xff] }
 0x186   :  { %v15004_v39 = vpop.f32.mrf.mxu0 }
 0x187   :  { %v1161_v32 = vpop.f32.mrf.mxu2 }
 0x188   :  { %1845 = vmatpush.bf16.msra.mxu2 %v13477_v16 }
 0x18a   :  { %v1326_v57 = vpop.f32.mrf.mxu3 }
 0x18c   :  { %v998_v11 = vpop.f32.mrf.mxu1 }
 0x18e   :  { %v852_v26 = vpop.f32.mrf.mxu0 }
 0x18f   :  { %v15026_v40 = vadd.f32 %v852_v26, %v14864_v36  ;;  %v13501_v36 = vld [vmem:[%s18195_s3 + $0xc0] sm:$0xff]  ;;  %v1192_v26 = vadd.f32 %v1153_v5, %v1027_v18  ;;  %v1163_v27 = vpop.f32.mrf.mxu2 }
 0x190   :  { %2163 = vmatpush.bf16.msrb.mxu0 %v13501_v36  ;;  %v1028_v36 = vadd.f32 %v991_v10, %v14875_v34  ;;  %v1029_v10 = vadd.f32 %v993_v37, %v14880_v44 }
 0x191   :  { %10492 = vmatmul.msk.bf16.gmra.mxu0 %vm14894_vm8, %v10491_v25  ;;  %v1357_v55 = vadd.f32 %v1318_v19, %v1192_v26 }
 0x192   :  { %v1193_v5 = vadd.f32 %v1156_v23, %v1028_v36  ;;  %v1328_v18 = vpop.f32.mrf.mxu3  ;;  %v1194_v23 = vadd.f32 %v1158_v62, %v1029_v10 }
 0x196   :  { %v15042_v29 = vpop.f32.mrf.mxu0 }
 0x19e   :  { %v1481_v16 = vpop.f32.mrf.mxu0 }
 0x19f   :  { %v1521_v25 = vadd.f32 %v1481_v16, %v1356_v48  ;;  %v1358_v16 = vadd.f32 %v1321_v58, %v1193_v5  ;;  %v1166_v58 = vpop.f32.mrf.mxu2  ;;  %v1359_v5 = vadd.f32 %v1323_v41, %v1194_v23 }
 0x1a1   :  { %v1541_v0 = vadd.f32 %v15051_v3, %v1521_v25 }
 0x1a3   :  { %v15055_v12 = vmax.f32 %v1541_v0, 0.0 }
 0x1a5   :  { %1573 = vst [vmem:[#allocation2 + $0x10] sm:$0xff] %v15055_v12  ;;  %v1669_v1 = vpack.c.bf16 %v15055_v12, %v15058_v8 }
 0x1a6   :  { %v1483_v31 = vpop.f32.mrf.mxu0 }
 0x1a7   :  { %v1522_v4 = vadd.f32 %v1483_v31, %v1357_v55  ;;  %1749 = vmatmul.bf16.vlgmr.msra.gmra.mxu1 %v1669_v1  ;;  %v1001_v55 = vpop.f32.mrf.mxu1  ;;  %v1168_v26 = vpop.f32.mrf.mxu2 }
 0x1a9   :  { %v1542_v46 = vadd.f32 %v15051_v3, %v1522_v4 }
 0x1ab   :  { %v15064_v48 = vmax.f32 %v1542_v46, 0.0 }
 0x1ac   :  { %v1589_v19 = vld [vmem:[#allocation2 + $0xf] sm:$0xff] }
 0x1ad   :  { %1574 = vst [vmem:[#allocation2 + $0x18] sm:$0xff] %v15064_v48  ;;  %v10558_v25 = vpack.c.bf16 %v1589_v19, %v15058_v8 }
 0x1ae   :  { %v1486_v34 = vpop.f32.mrf.mxu0 }
 0x1af   :  { %v1523_v0 = vadd.f32 %v1486_v34, %v1358_v16  ;;  %10559 = vmatmul.msk.bf16.vlgmr.msra.gmra.mxu2 %vm14369_vm3, %v10558_v25  ;;  %v1030_v16 = vadd.f32 %v996_v15, %v14883_v45  ;;  %v1331_v25 = vpop.f32.mrf.mxu3  ;;  %v1003_v10 = vpop.f32.mrf.mxu1 }
 0x1b1   :  { %v1543_v1 = vadd.f32 %v15051_v3, %v1523_v0  ;;  %v1195_v41 = vadd.f32 %v1161_v32, %v1030_v16 }
 0x1b3   :  { %v15074_v31 = vmax.f32 %v1543_v1, 0.0  ;;  %v1360_v1 = vadd.f32 %v1326_v57, %v1195_v41 }
 0x1b4   :  { %v15076_v36 = vld [vmem:[#allocation2 + $0x11] sm:$0xff] }
 0x1b5   :  { %v2053_v4 = vld [vmem:[#allocation2 + $0x17] sm:$0xff]  ;;  %1575 = vst [vmem:[#allocation2 + $0x20] sm:$0xff] %v15074_v31  ;;  %v10614_v44 = vpack.c.bf16 %v15076_v36, %v15058_v8  ;;  %v15083_v46 = vpack.c.bf16 %v15074_v31, %v15064_v48 }
 0x1b6   :  { %v10670_v37 = vpack.c.bf16 %v2053_v4, %v1589_v19  ;;  %v1488_v62 = vpop.f32.mrf.mxu0 }
 0x1b7   :  { %v1524_v34 = vadd.f32 %v1488_v62, %v1359_v5  ;;  %10615 = vmatmul.msk.bf16.vlgmr.msra.gmra.mxu3 %vm14386_vm5, %v10614_v44  ;;  %1754 = vmatmul.bf16.gmra.mxu1 %v15083_v46  ;;  %v1031_v44 = vadd.f32 %v998_v11, %v14888_v61  ;;  %v1333_v62 = vpop.f32.mrf.mxu3  ;;  %v1006_v15 = vpop.f32.mrf.mxu1 }
 0x1b8   :  { %10671 = vmatmul.msk.bf16.vlgmr.msrb.gmra.mxu0 %vm14377_vm4, %v10670_v37 }
 0x1b9   :  { %v1544_v19 = vadd.f32 %v15051_v3, %v1524_v34  ;;  %v1196_v32 = vadd.f32 %v1163_v27, %v1031_v44  ;;  %v1171_v44 = vpop.f32.mrf.mxu2 }
 0x1bb   :  { %v15092_v0 = vmax.f32 %v1544_v19, 0.0  ;;  %v1361_v19 = vadd.f32 %v1328_v18, %v1196_v32 }
 0x1bc   :  { %v1591_v23 = vld [vmem:[#allocation2 + $0x1f] sm:$0xff] }
 0x1bd   :  { %1576 = vst [vmem:[#allocation2 + $0x28] sm:$0xff] %v15092_v0  ;;  %v15095_v45 = vpack.c.bf16 %v1591_v23, %v2053_v4  ;;  %v15106_v34 = vld [vmem:[#allocation2 + $0x19] sm:$0xff] }
 0x1be   :  { %v1491_v5 = vpop.f32.mrf.mxu0 }
 0x1bf   :  { %v1525_v37 = vadd.f32 %v1491_v5, %v1360_v1  ;;  %10562 = vmatmul.msk.bf16.gmra.mxu2 %vm14377_vm4, %v15095_v45  ;;  %v1032_v5 = vadd.f32 %v1001_v55, %v14899_v30  ;;  %v1336_v32 = vpop.f32.mrf.mxu3 }
 0x1c1   :  { %v1545_v57 = vadd.f32 %v15051_v3, %v1525_v37  ;;  %v1197_v18 = vadd.f32 %v1166_v58, %v1032_v5  ;;  %v1173_v5 = vpop.f32.mrf.mxu2 }
 0x1c3   :  { %v15104_v16 = vmax.f32 %v1545_v57, 0.0  ;;  %v1362_v50 = vadd.f32 %v1331_v25, %v1197_v18 }
 0x1c4   :  { %v15108_v4 = vld [vmem:[#allocation2 + $0x21] sm:$0xff] }
 0x1c5   :  { %v2055_v41 = vld [vmem:[#allocation2 + $0x27] sm:$0xff]  ;;  %1577 = vst [vmem:[#allocation2 + $0x30] sm:$0xff] %v15104_v16  ;;  %v10617_v61 = vpack.c.bf16 %v15108_v4, %v15106_v34  ;;  %v15115_v27 = vpack.c.bf16 %v15104_v16, %v15092_v0 }
 0x1c6   :  { %v10673_v11 = vpack.c.bf16 %v2055_v41, %v1591_v23  ;;  %v1493_v1 = vpop.f32.mrf.mxu0 }
 0x1c7   :  { %v1526_v37 = vadd.f32 %v1493_v1, %v1361_v19  ;;  %10618 = vmatmul.msk.bf16.gmra.mxu3 %vm14423_vm6, %v10617_v61  ;;  %1759 = vmatmul.bf16.gmra.mxu1 %v15115_v27  ;;  %v1033_v61 = vadd.f32 %v1003_v10, %v14904_v13 }
 0x1c8   :  { %10674 = vmatmul.msk.bf16.gmra.mxu0 %vm14377_vm4, %v10673_v11  ;;  %v1008_v11 = vpop.f32.mrf.mxu1 }
 0x1c9   :  { %v1546_v23 = vadd.f32 %v15051_v3, %v1526_v37  ;;  %v1198_v58 = vadd.f32 %v1168_v26, %v1033_v61  ;;  %v1176_v55 = vpop.f32.mrf.mxu2 }
 0x1cb   :  { %v15124_v57 = vmax.f32 %v1546_v23, 0.0  ;;  %v1363_v10 = vadd.f32 %v1333_v62, %v1198_v58 }
 0x1cc   :  { %v1593_v56 = vld [vmem:[#allocation2 + $0x2f] sm:$0xff] }
 0x1cd   :  { %1578 = vst [vmem:[#allocation2 + $0x38] sm:$0xff] %v15124_v57  ;;  %v15127_v30 = vpack.c.bf16 %v1593_v56, %v2055_v41  ;;  %v367_v41 = vadd.f32 %v14784_v60, %v14782_v6  ;;  %v15141_v23 = vld [vmem:[#allocation2 + $0x29] sm:$0xff] }
 0x1ce   :  { %v1496_v19 = vpop.f32.mrf.mxu0 }
 0x1cf   :  { %v1527_v1 = vadd.f32 %v1496_v19, %v1362_v50  ;;  %10565 = vmatmul.msk.bf16.gmra.mxu2 %vm14377_vm4, %v15127_v30  ;;  %v544_v18 = vadd.f32 %v14791_v24, %v367_v41  ;;  %v1338_v19 = vpop.f32.mrf.mxu3  ;;  %v1034_v24 = vadd.f32 %v1006_v15, %v14907_v38 }
 0x1d1   :  { %v1547_v25 = vadd.f32 %v15051_v3, %v1527_v1  ;;  %v713_v62 = vadd.f32 %v14793_v59, %v544_v18  ;;  %v1199_v58 = vadd.f32 %v1171_v44, %v1034_v24 }
 0x1d3   :  { %v15138_v37 = vmax.f32 %v1547_v25, 0.0  ;;  %v866_v41 = vadd.f32 %v14911_v28, %v713_v62  ;;  %v1364_v15 = vadd.f32 %v1336_v32, %v1199_v58  ;;  %v372_v32 = vadd.f32 %v14816_v54, %v14814_v53 }
 0x1d4   :  { %v15143_v13 = vld [vmem:[#allocation2 + $0x31] sm:$0xff] }
 0x1d5   :  { %18223 = vst [vmem:[#allocation9_spill] sm:$0xff] %v15143_v13  ;;  %v2057_v50 = vld [vmem:[#allocation2 + $0x37] sm:$0xff]  ;;  %v10620_v26 = vpack.c.bf16 %v15143_v13, %v15141_v23  ;;  %v15150_v6 = vpack.c.bf16 %v15138_v37, %v15124_v57  ;;  %v1035_v59 = vadd.f32 %v1008_v11, %v866_v41  ;;  %v1178_v41 = vpop.f32.mrf.mxu2 }
 0x1d6   :  { %1579 = vst [vmem:[#allocation2 + $0x40] sm:$0xff] %v15138_v37  ;;  %v10676_v61 = vpack.c.bf16 %v2057_v50, %v1593_v56  ;;  %v1498_v60 = vpop.f32.mrf.mxu0  ;;  %v1011_v56 = vpop.f32.mrf.mxu1 }
 0x1d7   :  { %v1528_v1 = vadd.f32 %v1498_v60, %v1363_v10  ;;  %10621 = vmatmul.msk.bf16.gmra.mxu3 %vm14423_vm6, %v10620_v26  ;;  %1764 = vmatmul.bf16.gmra.mxu1 %v15150_v6  ;;  %v1341_v44 = vpop.f32.mrf.mxu3  ;;  %v1200_v28 = vadd.f32 %v1173_v5, %v1035_v59 }
 0x1d8   :  { %10677 = vmatmul.msk.bf16.gmra.mxu0 %vm14377_vm4, %v10676_v61 }
 0x1d9   :  { %v1548_v25 = vadd.f32 %v15051_v3, %v1528_v1  ;;  %v546_v1 = vadd.f32 %v14823_v9, %v372_v32  ;;  %v1036_v9 = vadd.f32 %v1011_v56, %v14924_v20 }
 0x1db   :  { %v15161_v13 = vmax.f32 %v1548_v25, 0.0  ;;  %v1365_v25 = vadd.f32 %v1338_v19, %v1200_v28  ;;  %v13516_v19 = vld [vmem:[%s18195_s3 + $0x138] sm:$0xff]  ;;  %v715_v59 = vadd.f32 %v14825_v17, %v546_v1 }
 0x1dc   :  { %2309 = vmatpush.bf16.msrb.mxu1 %v13516_v19 }
 0x1dd   :  { %v1595_v38 = vld [vmem:[#allocation2 + $0x3f] sm:$0xff]  ;;  %1580 = vst [vmem:[#allocation2 + $0x48] sm:$0xff] %v15161_v13  ;;  %v2240_v26 = vpack.c.bf16 %v15161_v13, %v15138_v37  ;;  %v868_v20 = vadd.f32 %v14944_v2, %v715_v59  ;;  %v1181_v2 = vpop.f32.mrf.mxu2 }
 0x1de   :  { %v15164_v10 = vpack.c.bf16 %v1595_v38, %v2057_v50  ;;  %v1501_v61 = vpop.f32.mrf.mxu0  ;;  %v1013_v24 = vpop.f32.mrf.mxu1  ;;  %v15177_v62 = vld [vmem:[#allocation2 + $0x39] sm:$0xff] }
 0x1df   :  { %v1529_v18 = vadd.f32 %v1501_v61, %v1364_v15  ;;  %v1037_v1 = vadd.f32 %v1013_v24, %v868_v20  ;;  %v377_v24 = vadd.f32 %v14842_v7, %v14840_v35 }
 0x1e0   :  { %10568 = vmatmul.msk.bf16.gmra.mxu2 %vm14377_vm4, %v15164_v10 }
 0x1e1   :  { %v1549_v60 = vadd.f32 %v15051_v3, %v1529_v18  ;;  %v1343_v18 = vpop.f32.mrf.mxu3 }
 0x1e3   :  { %v15174_v50 = vmax.f32 %v1549_v60, 0.0  ;;  %v13515_v60 = vld [vmem:[%s18195_s3 + $0x130] sm:$0xff] }
 0x1e4   :  { %v15179_v11 = vld [vmem:[#allocation2 + $0x41] sm:$0xff]  ;;  %2310 = vmatpush.bf16.msrb.mxu1 %v13515_v60 }
 0x1e5   :  { %v15181_v58 = vld [vmem:[#allocation2 + $0x47] sm:$0xff]  ;;  %1581 = vst [vmem:[#allocation2 + $0x50] sm:$0xff] %v15174_v50  ;;  %v10623_v5 = vpack.c.bf16 %v15179_v11, %v15177_v62  ;;  %v1673_v54 = vpack.c.bf16 %v15174_v50, %v15058_v8 }
 0x1e6   :  { %v10679_v53 = vpack.c.bf16 %v15181_v58, %v1595_v38  ;;  %v1503_v15 = vpop.f32.mrf.mxu0  ;;  %v1201_v38 = vadd.f32 %v1176_v55, %v1036_v9  ;;  %v1202_v9 = vadd.f32 %v1178_v41, %v1037_v1  ;;  %v548_v41 = vadd.f32 %v14848_v33, %v377_v24 }
 0x1e7   :  { %v1530_v61 = vadd.f32 %v1503_v15, %v1365_v25  ;;  %10624 = vmatmul.msk.bf16.gmra.mxu3 %vm14423_vm6, %v10623_v5  ;;  %1769 = vmatmul.bf16.gmra.mxu1 %v1673_v54  ;;  %v1016_v5 = vpop.f32.mrf.mxu1  ;;  %v13514_v15 = vld [vmem:[%s18195_s3 + $0x128] sm:$0xff] }
 0x1e8   :  { %10680 = vmatmul.msk.bf16.gmra.mxu0 %vm14377_vm4, %v10679_v53  ;;  %v1366_v25 = vadd.f32 %v1341_v44, %v1201_v38  ;;  %v13524_v44 = vld [vmem:[%s18195_s3 + $0x178] sm:$0xff]  ;;  %2311 = vmatpush.bf16.msrb.mxu1 %v13514_v15  ;;  %v13523_v38 = vld [vmem:[%s18195_s3 + $0x170] sm:$0xff]  ;;  %v1367_v20 = vadd.f32 %v1343_v18, %v1202_v9  ;;  %v1183_v15 = vpop.f32.mrf.mxu2 }
 0x1e9   :  { %v1550_v28 = vadd.f32 %v15051_v3, %v1530_v61  ;;  %2478 = vmatpush.bf16.msrb.mxu2 %v13524_v44  ;;  %v1346_v19 = vpop.f32.mrf.mxu3 }
 0x1eb   :  { %v15200_v56 = vmax.f32 %v1550_v28, 0.0  ;;  %v13513_v28 = vld [vmem:[%s18195_s3 + $0x120] sm:$0xff] }
 0x1ec   :  { %v1596_v32 = vld [vmem:[#allocation2 + $0x4f] sm:$0xff]  ;;  %2312 = vmatpush.bf16.msrb.mxu1 %v13513_v28 }
 0x1ed   :  { %1582 = vst [vmem:[#allocation2 + $0x58] sm:$0xff] %v15200_v56  ;;  %v10570_v17 = vpack.c.bf16 %v1596_v32, %v15058_v8  ;;  %v2241_v55 = vpack.c.bf16 %v15200_v56, %v15174_v50  ;;  %2479 = vmatpush.bf16.msrb.mxu2 %v13523_v38  ;;  %v13531_v38 = vld [vmem:[%s18195_s3 + $0x1b0] sm:$0xff]  ;;  %v13546_v50 = vld [vmem:[%s18195_s3 + $0x228] sm:$0xff] }
 0x1ee   :  { %v1506_v53 = vpop.f32.mrf.mxu0 }
 0x1ef   :  { %v1531_v54 = vadd.f32 %v1506_v53, %v1366_v25  ;;  %v1038_v53 = vadd.f32 %v1016_v5, %v14975_v42  ;;  %v1018_v33 = vpop.f32.mrf.mxu1  ;;  %v13540_v42 = vld [vmem:[%s18195_s3 + $0x1f8] sm:$0xff]  ;;  %v717_v5 = vadd.f32 %v14850_v14, %v548_v41  ;;  %v13521_v14 = vld [vmem:[%s18195_s3 + $0x160] sm:$0xff] }
 0x1f0   :  { %10571 = vmatmul.msk.bf16.gmra.mxu2 %vm14369_vm3, %v10570_v17  ;;  %2808 = vmatpush.bf16.msra.mxu0 %v13540_v42 }
 0x1f1   :  { %v1551_v61 = vadd.f32 %v15051_v3, %v1531_v54  ;;  %v13512_v54 = vld [vmem:[%s18195_s3 + $0x118] sm:$0xff]  ;;  %v1203_v44 = vadd.f32 %v1181_v2, %v1038_v53  ;;  %v13539_v2 = vld [vmem:[%s18195_s3 + $0x1f0] sm:$0xff] }
 0x1f2   :  { %2313 = vmatpush.bf16.msrb.mxu1 %v13512_v54  ;;  %v13529_v54 = vld [vmem:[%s18195_s3 + $0x1a0] sm:$0xff] }
 0x1f3   :  { %v15220_v59 = vmax.f32 %v1551_v61, 0.0  ;;  %v870_v61 = vadd.f32 %v15004_v39, %v717_v5  ;;  %v13511_v39 = vld [vmem:[%s18195_s3 + $0x110] sm:$0xff]  ;;  %v1368_v41 = vadd.f32 %v1346_v19, %v1203_v44  ;;  %v13520_v19 = vld [vmem:[%s18195_s3 + $0x158] sm:$0xff]  ;;  %v13510_v44 = vld [vmem:[%s18195_s3 + $0x108] sm:$0xff] }
 0x1f4   :  { %v15229_v60 = vld [vmem:[#allocation2 + $0x51] sm:$0xff]  ;;  %2809 = vmatpush.bf16.msra.mxu0 %v13539_v2 }
 0x1f5   :  { %v2061_v25 = vld [vmem:[#allocation2 + $0x57] sm:$0xff]  ;;  %1583 = vst [vmem:[#allocation2 + $0x60] sm:$0xff] %v15220_v59  ;;  %v10626_v35 = vpack.c.bf16 %v15229_v60, %v15058_v8  ;;  %v15236_v17 = vpack.c.bf16 %v15220_v59, %v15200_v56  ;;  %v13522_v8 = vld [vmem:[%s18195_s3 + $0x168] sm:$0xff] }
 0x1f6   :  { %v10682_v7 = vpack.c.bf16 %v2061_v25, %v1596_v32  ;;  %v1508_v1 = vpop.f32.mrf.mxu0  ;;  %v13532_v32 = vld [vmem:[%s18195_s3 + $0x1b8] sm:$0xff]  ;;  %2480 = vmatpush.bf16.msrb.mxu2 %v13522_v8  ;;  %2314 = vmatpush.bf16.msrb.mxu1 %v13511_v39  ;;  %v13519_v5 = vld [vmem:[%s18195_s3 + $0x150] sm:$0xff] }
 0x1f7   :  { %v1532_v18 = vadd.f32 %v1508_v1, %v1367_v20  ;;  %10627 = vmatmul.msk.bf16.gmra.mxu3 %vm14386_vm5, %v10626_v35  ;;  %1774 = vmatmul.bf16.gmra.mxu1 %v15236_v17  ;;  %v1348_v20 = vpop.f32.mrf.mxu3  ;;  %v1039_v1 = vadd.f32 %v1018_v33, %v870_v61  ;;  %v13538_v33 = vld [vmem:[%s18195_s3 + $0x1e8] sm:$0xff]  ;;  %v1186_v61 = vpop.f32.mrf.mxu2 }
 0x1f8   :  { %10683 = vmatmul.msk.bf16.gmra.mxu0 %vm14377_vm4, %v10682_v7  ;;  %2643 = vmatpush.bf16.msrb.mxu3 %v13532_v32  ;;  %v1021_v32 = vpop.f32.mrf.mxu1 }
 0x1f9   :  { %v1552_v9 = vadd.f32 %v15051_v3, %v1532_v18  ;;  %v1204_v8 = vadd.f32 %v1183_v15, %v1039_v1  ;;  %v382_v15 = vadd.f32 %v14919_v22, %v14862_v21  ;;  %2810 = vmatpush.bf16.msra.mxu0 %v13538_v33  ;;  %v13528_v33 = vld [vmem:[%s18195_s3 + $0x198] sm:$0xff] }
 0x1fa   :  { %2481 = vmatpush.bf16.msrb.mxu2 %v13521_v14  ;;  %2315 = vmatpush.bf16.msrb.mxu1 %v13510_v44 }
 0x1fb   :  { %v15259_v24 = vmax.f32 %v1552_v9, 0.0  ;;  %v13537_v9 = vld [vmem:[%s18195_s3 + $0x1e0] sm:$0xff]  ;;  %v1369_v2 = vadd.f32 %v1348_v20, %v1204_v8 }
 0x1fc   :  { %v1598_v28 = vld [vmem:[#allocation2 + $0x5f] sm:$0xff]  ;;  %2644 = vmatpush.bf16.msrb.mxu3 %v13531_v38  ;;  %v550_v38 = vadd.f32 %v14921_v43, %v382_v15 }
 0x1fd   :  { %1584 = vst [vmem:[#allocation2 + $0x68] sm:$0xff] %v15259_v24  ;;  %v15274_v35 = vpack.c.bf16 %v1598_v28, %v2061_v25  ;;  %v2242_v7 = vpack.c.bf16 %v15259_v24, %v15220_v59  ;;  %v13530_v25 = vld [vmem:[%s18195_s3 + $0x1a8] sm:$0xff]  ;;  %v15308_v39 = vld [vmem:[#allocation2 + $0x59] sm:$0xff]  ;;  %2811 = vmatpush.bf16.msra.mxu0 %v13537_v9 }
 0x1fe   :  { %v1511_v53 = vpop.f32.mrf.mxu0  ;;  %2482 = vmatpush.bf16.msrb.mxu2 %v13520_v19  ;;  %v13509_v20 = vld [vmem:[%s18195_s3 + $0x100] sm:$0xff]  ;;  %v719_v8 = vadd.f32 %v14932_v51, %v550_v38  ;;  %v13535_v51 = vld [vmem:[%s18195_s3 + $0x1d0] sm:$0xff]  ;;  %v13542_v59 = vld [vmem:[%s18195_s3 + $0x208] sm:$0xff] }
 0x1ff   :  { %v1533_v18 = vadd.f32 %v1511_v53, %v1368_v41  ;;  %v1351_v19 = vpop.f32.mrf.mxu3  ;;  %2316 = vmatpush.bf16.msrb.mxu1 %v13509_v20 }
 0x200   :  { %10574 = vmatmul.msk.bf16.gmra.mxu2 %vm14377_vm4, %v15274_v35  ;;  %2645 = vmatpush.bf16.msrb.mxu3 %v13530_v25  ;;  %v872_v44 = vadd.f32 %v15042_v29, %v719_v8  ;;  %v1023_v15 = vpop.f32.mrf.mxu1  ;;  %v13525_v8 = vld [vmem:[%s18195_s3 + $0x180] sm:$0xff] }
 0x201   :  { %v1553_v42 = vadd.f32 %v15051_v3, %v1533_v18  ;;  %v1040_v18 = vadd.f32 %v1021_v32, %v15026_v40  ;;  %v13536_v40 = vld [vmem:[%s18195_s3 + $0x1d8] sm:$0xff] }
 0x202   :  { %2483 = vmatpush.bf16.msrb.mxu2 %v13519_v5  ;;  %v13517_v5 = vld [vmem:[%s18195_s3 + $0x140] sm:$0xff]  ;;  %2812 = vmatpush.bf16.msra.mxu0 %v13536_v40 }
 0x203   :  { %v15305_v14 = vmax.f32 %v1553_v42, 0.0  ;;  %v1205_v32 = vadd.f32 %v1186_v61, %v1040_v18 }
 0x204   :  { %v15310_v41 = vld [vmem:[#allocation2 + $0x61] sm:$0xff]  ;;  %2646 = vmatpush.bf16.msrb.mxu3 %v13529_v54  ;;  %v13527_v54 = vld [vmem:[%s18195_s3 + $0x190] sm:$0xff] }
 0x205   :  { %v2063_v1 = vld [vmem:[#allocation2 + $0x67] sm:$0xff]  ;;  %1585 = vst [vmem:[#allocation2 + $0x70] sm:$0xff] %v15305_v14  ;;  %v15315_v21 = vpack.c.bf16 %v15310_v41, %v15308_v39  ;;  %v15319_v53 = vpack.c.bf16 %v15305_v14, %v15259_v24  ;;  %v1370_v38 = vadd.f32 %v1351_v19, %v1205_v32 }
 0x206   :  { %v10685_v22 = vpack.c.bf16 %v2063_v1, %v1598_v28  ;;  %v1513_v43 = vpop.f32.mrf.mxu0  ;;  %v13518_v28 = vld [vmem:[%s18195_s3 + $0x148] sm:$0xff]  ;;  %2813 = vmatpush.bf16.msra.mxu0 %v13535_v51  ;;  %v13533_v32 = vld [vmem:[%s18195_s3 + $0x1c0] sm:$0xff] }
 0x207   :  { %v1534_v25 = vadd.f32 %v1513_v43, %v1369_v2  ;;  %10630 = vmatmul.msk.bf16.gmra.mxu3 %vm14423_vm6, %v15315_v21  ;;  %1779 = vmatmul.bf16.gmra.mxu1 %v15319_v53  ;;  %v1188_v2 = vpop.f32.mrf.mxu2  ;;  %v1041_v43 = vadd.f32 %v1023_v15, %v872_v44  ;;  %v13526_v19 = vld [vmem:[%s18195_s3 + $0x188] sm:$0xff] }
 0x208   :  { %10686 = vmatmul.msk.bf16.gmra.mxu0 %vm14377_vm4, %v10685_v22  ;;  %2484 = vmatpush.bf16.msrb.mxu2 %v13518_v28  ;;  %v1353_v28 = vpop.f32.mrf.mxu3 }
 0x209   :  { %v1554_v42 = vadd.f32 %v15051_v3, %v1534_v25  ;;  %2647 = vmatpush.bf16.msrb.mxu3 %v13528_v33  ;;  %v1206_v25 = vadd.f32 %v1188_v2, %v1041_v43 }
 0x20b   :  { %v15352_v9 = vmax.f32 %v1554_v42, 0.0  ;;  %v1371_v42 = vadd.f32 %v1353_v28, %v1206_v25 }
 0x20c   :  { %v1600_v61 = vld [vmem:[#allocation2 + $0x6f] sm:$0xff]  ;;  %2485 = vmatpush.bf16.msrb.mxu2 %v13517_v5 }
 0x20d   :  { %1586 = vst [vmem:[#allocation2 + $0x78] sm:$0xff] %v15352_v9  ;;  %v15355_v22 = vpack.c.bf16 %v1600_v61, %v2063_v1  ;;  %2648 = vmatpush.bf16.msrb.mxu3 %v13527_v54  ;;  %v13534_v1 = vld [vmem:[%s18195_s3 + $0x1c8] sm:$0xff] }
 0x20e   :  { %v1516_v20 = vpop.f32.mrf.mxu0  ;;  %2814 = vmatpush.bf16.msra.mxu0 %v13534_v1  ;;  %v15377_v5 = vld [vmem:[#allocation2 + $0x69] sm:$0xff] }
 0x20f   :  { %v1535_v18 = vadd.f32 %v1516_v20, %v1370_v38 }
 0x210   :  { %10577 = vmatmul.msk.bf16.gmra.mxu2 %vm14377_vm4, %v15355_v22 }
 0x211   :  { %v1555_v33 = vadd.f32 %v15051_v3, %v1535_v18  ;;  %2649 = vmatpush.bf16.msrb.mxu3 %v13526_v19 }
 0x212   :  { %2815 = vmatpush.bf16.msra.mxu0 %v13533_v32 }
 0x213   :  { %v15369_v40 = vmax.f32 %v1555_v33, 0.0 }
 0x214   :  { %v15379_v54 = vld [vmem:[#allocation2 + $0x71] sm:$0xff] }
 0x215   :  { %v2065_v44 = vld [vmem:[#allocation2 + $0x77] sm:$0xff]  ;;  %1587 = vst [vmem:[#allocation2 + $0x80] sm:$0xff] %v15369_v40  ;;  %v15384_v51 = vpack.c.bf16 %v15379_v54, %v15377_v5  ;;  %v15388_v38 = vpack.c.bf16 %v15369_v40, %v15352_v9  ;;  %2650 = vmatpush.bf16.msrb.mxu3 %v13525_v8 }
 0x216   :  { %v10688_v15 = vpack.c.bf16 %v2065_v44, %v1600_v61  ;;  %v1518_v2 = vpop.f32.mrf.mxu0 }
 0x217   :  { %v1536_v43 = vadd.f32 %v1518_v2, %v1371_v42  ;;  %10633 = vmatmul.msk.bf16.gmra.mxu3 %vm14423_vm6, %v15384_v51  ;;  %1784 = vmatmul.bf16.gmra.mxu1 %v15388_v38  ;;  %v18224_v42 = vpack.c.bf16 %v15064_v48, %v15055_v12  ;;  %v18225_v12 = vpack.c.bf16 %v15092_v0, %v15074_v31 }
 0x218   :  { %10689 = vmatmul.msk.bf16.gmra.mxu0 %vm14377_vm4, %v10688_v15  ;;  %v10758_v15 = vpack.c.bf16 %v15106_v34, %v15076_v36 }
 0x219   :  { %v1556_v20 = vadd.f32 %v15051_v3, %v1536_v43 }
 0x21b   :  { %v15397_v61 = vmax.f32 %v1556_v20, 0.0 }
 0x21c   :  { %v1602_v18 = vld [vmem:[#allocation2 + $0x7f] sm:$0xff] }
 0x21d   :  { %1588 = vst [vmem:[#allocation2 + $0x88] sm:$0xff] %v15397_v61  ;;  %v15400_v19 = vpack.c.bf16 %v1602_v18, %v2065_v44  ;;  %v15407_v25 = vld [vmem:[#allocation2 + $0x79] sm:$0xff] }
 0x220   :  { %10580 = vmatmul.msk.bf16.gmra.mxu2 %vm14377_vm4, %v15400_v19 }
 0x224   :  { %v15409_v28 = vld [vmem:[#allocation2 + $0x81] sm:$0xff]  ;;  %v1750_v3 = vpop.f32.mrf.mxu1 }
 0x225   :  { %v15411_v33 = vld [vmem:[#allocation2 + $0x87] sm:$0xff]  ;;  %v15415_v8 = vpack.c.bf16 %v15409_v28, %v15407_v25 }
 0x226   :  { %v10691_v32 = vpack.c.bf16 %v15411_v33, %v1602_v18 }
 0x227   :  { %10636 = vmatmul.msk.bf16.gmra.mxu3 %vm14423_vm6, %v15415_v8  ;;  %2317 = vmatmul.bf16.vlgmr.msrb.gmra.mxu1 %v18224_v42 }
 0x228   :  { %10692 = vmatmul.msk.bf16.gmra.mxu0 %vm14377_vm4, %v10691_v32 }
 0x22c   :  { %v1752_v44 = vpop.f32.mrf.mxu1 }
 0x230   :  { %10759 = vmatmul.msk.bf16.vlgmr.msrb.gmra.mxu2 %vm14423_vm6, %v10758_v15 }
 0x232   :  { %v1847_v2 = vpop.f32.mrf.mxu2 }
 0x233   :  { %v1848_v43 = vadd.f32 %v1847_v2, %v1750_v3  ;;  %v10761_v3 = vpack.c.bf16 %v15141_v23, %v15108_v4  ;;  %v18226_v4 = vpack.c.bf16 %v15124_v57, %v15104_v16 }
 0x234   :  { %v1755_v18 = vpop.f32.mrf.mxu1 }
 0x235   :  { %v2165_v20 = vpop.f32.mrf.mxu0 }
 0x237   :  { %10815 = vmatmul.msk.bf16.vlgmr.msrb.gmra.mxu3 %vm14377_vm4, %v15095_v45  ;;  %2322 = vmatmul.bf16.gmra.mxu1 %v18225_v12 }
 0x238   :  { %2816 = vmatmul.bf16.vlgmr.msra.gmra.mxu0 %v15083_v46 }
 0x23a   :  { %v1849_v48 = vpop.f32.mrf.mxu2  ;;  %v1996_v32 = vpop.f32.mrf.mxu3 }
 0x23b   :  { %v1850_v36 = vadd.f32 %v1849_v48, %v1752_v44  ;;  %v2036_v34 = vadd.f32 %v1996_v32, %v1848_v43  ;;  %v18227_v48 = vld [vmem:[#allocation9_spill] sm:$0xff] }
 0x23c   :  { %v1757_v15 = vpop.f32.mrf.mxu1  ;;  %v10764_v32 = vpack.c.bf16 %v15177_v62, %v18227_v48 }
 0x23d   :  { %v2167_v42 = vpop.f32.mrf.mxu0  ;;  %v15439_v2 = vadd.f32 %v2165_v20, %v2036_v34 }
 0x240   :  { %10762 = vmatmul.msk.bf16.gmra.mxu2 %vm14423_vm6, %v10761_v3 }
 0x242   :  { %v1852_v45 = vpop.f32.mrf.mxu2  ;;  %v1998_v46 = vpop.f32.mrf.mxu3 }
 0x243   :  { %v1853_v1 = vadd.f32 %v1852_v45, %v1755_v18  ;;  %v2037_v29 = vadd.f32 %v1998_v46, %v1850_v36 }
 0x244   :  { %v1760_v0 = vpop.f32.mrf.mxu1 }
 0x245   :  { %v2170_v31 = vpop.f32.mrf.mxu0  ;;  %v15443_v12 = vadd.f32 %v2167_v42, %v2037_v29 }
 0x247   :  { %10818 = vmatmul.msk.bf16.gmra.mxu3 %vm14377_vm4, %v15127_v30  ;;  %2327 = vmatmul.bf16.gmra.mxu1 %v18226_v4 }
 0x248   :  { %2821 = vmatmul.bf16.gmra.mxu0 %v15115_v27 }
 0x24a   :  { %v1854_v23 = vpop.f32.mrf.mxu2  ;;  %v2001_v44 = vpop.f32.mrf.mxu3 }
 0x24b   :  { %v1855_v43 = vadd.f32 %v1854_v23, %v1757_v15  ;;  %v2038_v20 = vadd.f32 %v2001_v44, %v1853_v1  ;;  %v15467_v15 = vld [vmem:[#allocation2 + $0x49] sm:$0xff] }
 0x24c   :  { %v1762_v29 = vpop.f32.mrf.mxu1 }
 0x24d   :  { %v2172_v18 = vpop.f32.mrf.mxu0  ;;  %v15454_v36 = vadd.f32 %v2170_v31, %v2038_v20  ;;  %v2739_v20 = vpack.c.bf16 0.0, %v15161_v13 }
 0x250   :  { %10765 = vmatmul.msk.bf16.gmra.mxu2 %vm14423_vm6, %v10764_v32 }
 0x252   :  { %v1857_v30 = vpop.f32.mrf.mxu2  ;;  %v2003_v27 = vpop.f32.mrf.mxu3 }
 0x253   :  { %v1858_v34 = vadd.f32 %v1857_v30, %v1760_v0  ;;  %v2039_v42 = vadd.f32 %v2003_v27, %v1855_v43  ;;  %v10767_v0 = vpack.c.bf16 %v15467_v15, %v15179_v11  ;;  %v10823_v43 = vpack.c.bf16 0.0, %v15181_v58  ;;  %v13548_v11 = vld [vmem:[%s18195_s3 + $0x238] sm:$0xff]  ;;  %v13547_v27 = vld [vmem:[%s18195_s3 + $0x230] sm:$0xff] }
 0x254   :  { %v1765_v57 = vpop.f32.mrf.mxu1  ;;  %2973 = vmatpush.bf16.msra.mxu1 %v13548_v11 }
 0x255   :  { %v2175_v16 = vpop.f32.mrf.mxu0  ;;  %v15458_v3 = vadd.f32 %v2172_v18, %v2039_v42  ;;  %v10770_v42 = vpack.c.bf16 %v15308_v39, %v15229_v60  ;;  %v13545_v60 = vld [vmem:[%s18195_s3 + $0x220] sm:$0xff] }
 0x257   :  { %10821 = vmatmul.msk.bf16.gmra.mxu3 %vm14377_vm4, %v15164_v10  ;;  %2332 = vmatmul.bf16.gmra.mxu1 %v2240_v26 }
 0x258   :  { %2826 = vmatmul.bf16.gmra.mxu0 %v15150_v6  ;;  %2974 = vmatpush.bf16.msra.mxu1 %v13547_v27 }
 0x25a   :  { %v1859_v62 = vpop.f32.mrf.mxu2  ;;  %v2006_v1 = vpop.f32.mrf.mxu3 }
 0x25b   :  { %v1860_v45 = vadd.f32 %v1859_v62, %v1762_v29  ;;  %v2040_v46 = vadd.f32 %v2006_v1, %v1858_v34 }
 0x25c   :  { %v1767_v4 = vpop.f32.mrf.mxu1  ;;  %2975 = vmatpush.bf16.msra.mxu1 %v13546_v50  ;;  %v15569_v50 = vld [vmem:[#allocation2 + $0x89] sm:$0xff] }
 0x25d   :  { %v2177_v31 = vpop.f32.mrf.mxu0  ;;  %v15471_v23 = vadd.f32 %v2175_v16, %v2040_v46 }
 0x260   :  { %10768 = vmatmul.msk.bf16.gmra.mxu2 %vm14423_vm6, %v10767_v0  ;;  %2976 = vmatpush.bf16.msra.mxu1 %v13545_v60 }
 0x262   :  { %v2008_v10 = vpop.f32.mrf.mxu3 }
 0x263   :  { %v1862_v6 = vpop.f32.mrf.mxu2  ;;  %v2041_v26 = vadd.f32 %v2008_v10, %v1860_v45  ;;  %v13543_v10 = vld [vmem:[%s18195_s3 + $0x210] sm:$0xff] }
 0x264   :  { %v1863_v37 = vadd.f32 %v1862_v6, %v1765_v57  ;;  %v1770_v18 = vpop.f32.mrf.mxu1 }
 0x265   :  { %v2180_v44 = vpop.f32.mrf.mxu0  ;;  %v15477_v48 = vadd.f32 %v2177_v31, %v2041_v26  ;;  %v13544_v31 = vld [vmem:[%s18195_s3 + $0x218] sm:$0xff] }
 0x266   :  { %2977 = vmatpush.bf16.msra.mxu1 %v13544_v31  ;;  %v2743_v31 = vpack.c.bf16 0.0, %v15397_v61 }
 0x267   :  { %10824 = vmatmul.msk.bf16.gmra.mxu3 %vm14752_vm7, %v10823_v43  ;;  %2337 = vmatmul.bf16.gmra.mxu1 %v2241_v55 }
 0x268   :  { %2831 = vmatmul.bf16.gmra.mxu0 %v2739_v20  ;;  %v18229_v20 = vpack.c.bf16 %v15352_v9, %v15305_v14 }
 0x26a   :  { %v2011_v58 = vpop.f32.mrf.mxu3  ;;  %2978 = vmatpush.bf16.msra.mxu1 %v13543_v10 }
 0x26b   :  { %v1864_v29 = vpop.f32.mrf.mxu2  ;;  %v2042_v13 = vadd.f32 %v2011_v58, %v1863_v37 }
 0x26c   :  { %v1865_v30 = vadd.f32 %v1864_v29, %v1767_v4  ;;  %v15492_v16 = vpop.f32.mrf.mxu1 }
 0x26d   :  { %v2182_v34 = vpop.f32.mrf.mxu0  ;;  %v15494_v57 = vadd.f32 %v2180_v44, %v2042_v13 }
 0x26e   :  { %2979 = vmatpush.bf16.msra.mxu1 %v13542_v59 }
 0x270   :  { %10771 = vmatmul.msk.bf16.gmra.mxu2 %vm14423_vm6, %v10770_v42 }
 0x272   :  { %v2013_v55 = vpop.f32.mrf.mxu3 }
 0x273   :  { %v1867_v56 = vpop.f32.mrf.mxu2  ;;  %v2043_v1 = vadd.f32 %v2013_v55, %v1865_v30  ;;  %v10776_v30 = vpack.c.bf16 %v15407_v25, %v15379_v54  ;;  %v18230_v54 = vpack.c.bf16 %v15397_v61, %v15369_v40  ;;  %v10779_v55 = vpack.c.bf16 %v15569_v50, %v15409_v28  ;;  %v2873_v28 = vld [vmem:[#allocation2 + $0x19] sm:$0xff] }
 0x274   :  { %v1868_v62 = vadd.f32 %v1867_v56, %v1770_v18  ;;  %v1775_v45 = vpop.f32.mrf.mxu1 }
 0x275   :  { %v2185_v39 = vpop.f32.mrf.mxu0  ;;  %v15504_v46 = vadd.f32 %v2182_v34, %v2043_v1 }
 0x277   :  { %10827 = vmatmul.msk.bf16.gmra.mxu3 %vm14377_vm4, %v15274_v35  ;;  %2342 = vmatmul.bf16.gmra.mxu1 %v2242_v7 }
 0x278   :  { %2836 = vmatmul.bf16.gmra.mxu0 %v15236_v17  ;;  %v10773_v17 = vpack.c.bf16 %v15377_v5, %v15310_v41  ;;  %v13541_v41 = vld [vmem:[%s18195_s3 + $0x200] sm:$0xff] }
 0x279   :  { %2980 = vmatpush.bf16.msra.mxu1 %v13541_v41  ;;  %v2876_v41 = vld [vmem:[#allocation2 + $0x31] sm:$0xff] }
 0x27a   :  { %v2016_v4 = vpop.f32.mrf.mxu3 }
 0x27b   :  { %v15516_v0 = vpop.f32.mrf.mxu2  ;;  %v2044_v6 = vadd.f32 %v2016_v4, %v1868_v62 }
 0x27c   :  { %v15525_v37 = vpop.f32.mrf.mxu1 }
 0x27d   :  { %v15521_v35 = vpop.f32.mrf.mxu0  ;;  %v15527_v26 = vadd.f32 %v2185_v39, %v2044_v6  ;;  %v2874_v39 = vld [vmem:[#allocation2 + $0x21] sm:$0xff] }
 0x27e   :  { %v10902_v10 = vpack.c.bf16 %v2874_v39, %v2873_v28  ;;  %v13561_v28 = vld [vmem:[%s18197_s5 + $0x60] sm:$0xff] }
 0x280   :  { %10774 = vmatmul.msk.bf16.gmra.mxu2 %vm14423_vm6, %v10773_v17 }
 0x282   :  { %v15534_v7 = vpop.f32.mrf.mxu3 }
 0x283   :  { %v1872_v24 = vpop.f32.mrf.mxu2 }
 0x284   :  { %v1873_v44 = vadd.f32 %v1872_v24, %v1775_v45  ;;  %v1780_v43 = vpop.f32.mrf.mxu1  ;;  %v10835_v45 = vpack.c.bf16 0.0, %v15411_v33 }
 0x285   :  { %v2190_v5 = vpop.f32.mrf.mxu0 }
 0x287   :  { %10830 = vmatmul.msk.bf16.gmra.mxu3 %vm14377_vm4, %v15355_v22  ;;  %2347 = vmatmul.bf16.gmra.mxu1 %v18229_v20 }
 0x288   :  { %2841 = vmatmul.bf16.gmra.mxu0 %v15319_v53 }
 0x28a   :  { %v2021_v11 = vpop.f32.mrf.mxu3 }
 0x28b   :  { %v15546_v18 = vpop.f32.mrf.mxu2  ;;  %v2046_v29 = vadd.f32 %v2021_v11, %v1873_v44 }
 0x28c   :  { %v15552_v13 = vpop.f32.mrf.mxu1 }
 0x28d   :  { %v15548_v58 = vpop.f32.mrf.mxu0  ;;  %v15554_v27 = vadd.f32 %v2190_v5, %v2046_v29  ;;  %v2875_v5 = vld [vmem:[#allocation2 + $0x29] sm:$0xff] }
 0x28e   :  { %v10905_v20 = vpack.c.bf16 %v2876_v41, %v2875_v5  ;;  %v13560_v41 = vld [vmem:[%s18197_s5 + $0x58] sm:$0xff]  ;;  %v13571_v5 = vld [vmem:[%s18197_s5 + $0xb0] sm:$0xff] }
 0x290   :  { %10777 = vmatmul.msk.bf16.gmra.mxu2 %vm14423_vm6, %v10776_v30  ;;  %v2878_v30 = vld [vmem:[#allocation2 + $0x41] sm:$0xff] }
 0x292   :  { %v15558_v22 = vpop.f32.mrf.mxu3 }
 0x293   :  { %v1877_v53 = vpop.f32.mrf.mxu2 }
 0x294   :  { %v1878_v14 = vadd.f32 %v1877_v53, %v1780_v43  ;;  %v1785_v9 = vpop.f32.mrf.mxu1 }
 0x295   :  { %v2195_v34 = vpop.f32.mrf.mxu0 }
 0x297   :  { %10833 = vmatmul.msk.bf16.gmra.mxu3 %vm14377_vm4, %v15400_v19  ;;  %2352 = vmatmul.bf16.gmra.mxu1 %v18230_v54 }
 0x298   :  { %2846 = vmatmul.bf16.gmra.mxu0 %v15388_v38 }
 0x29a   :  { %v2026_v42 = vpop.f32.mrf.mxu3 }
 0x29b   :  { %v15567_v25 = vpop.f32.mrf.mxu2  ;;  %v2048_v56 = vadd.f32 %v2026_v42, %v1878_v14  ;;  %v2877_v14 = vld [vmem:[#allocation2 + $0x39] sm:$0xff] }
 0x29c   :  { %v15573_v62 = vpop.f32.mrf.mxu1 }
 0x29d   :  { %v15575_v1 = vadd.f32 %v2195_v34, %v2048_v56  ;;  %v15579_v38 = vpop.f32.mrf.mxu0 }
 0x2a0   :  { %10780 = vmatmul.msk.bf16.gmra.mxu2 %vm14423_vm6, %v10779_v55 }
 0x2a2   :  { %v15581_v19 = vpop.f32.mrf.mxu3 }
 0x2a3   :  { %v1882_v40 = vpop.f32.mrf.mxu2 }
 0x2a4   :  { %v1883_v60 = vadd.f32 %v1882_v40, %v1785_v9  ;;  %v2318_v4 = vpop.f32.mrf.mxu1  ;;  %v10908_v9 = vpack.c.bf16 %v2878_v30, %v2877_v14  ;;  %v13552_v14 = vld [vmem:[%s18197_s5 + $0x18] sm:$0xff] }
 0x2a5   :  { %v15586_v6 = vadd.f32 %v2318_v4, %v15439_v2  ;;  %v2200_v24 = vpop.f32.mrf.mxu0  ;;  %v13555_v4 = vld [vmem:[%s18197_s5 + $0x30] sm:$0xff] }
 0x2a7   :  { %10836 = vmatmul.msk.bf16.gmra.mxu3 %vm14752_vm7, %v10835_v45  ;;  %10903 = vmatmul.msk.bf16.vlgmr.msra.gmra.mxu1 %vm14423_vm6, %v10902_v10  ;;  %v13562_v45 = vld [vmem:[%s18197_s5 + $0x68] sm:$0xff] }
 0x2a8   :  { %2851 = vmatmul.bf16.gmra.mxu0 %v2743_v31 }
 0x2aa   :  { %v2031_v17 = vpop.f32.mrf.mxu3 }
 0x2ab   :  { %v2050_v59 = vadd.f32 %v2031_v17, %v1883_v60 }
 0x2ac   :  { %v2320_v44 = vpop.f32.mrf.mxu1 }
 0x2ad   :  { %v15592_v33 = vadd.f32 %v2200_v24, %v2050_v59  ;;  %v15595_v61 = vadd.f32 %v2320_v44, %v15443_v12  ;;  %v15658_v10 = vpop.f32.mrf.mxu0  ;;  %v13572_v59 = vld [vmem:[%s18197_s5 + $0xb8] sm:$0xff] }
 0x2ae   :  { %v13580_v24 = vld [vmem:[%s18197_s5 + $0xf8] sm:$0xff]  ;;  %3488 = vmatpush.bf16.msrb.mxu0 %v13572_v59  ;;  %v13549_v59 = vld [vmem:[%s18197_s5] sm:$0xff] }
 0x2af   :  { %3657 = vmatpush.bf16.msrb.mxu1 %v13580_v24  ;;  %v13567_v24 = vld [vmem:[%s18197_s5 + $0x90] sm:$0xff] }
 0x2b2   :  { %3489 = vmatpush.bf16.msrb.mxu0 %v13571_v5 }
 0x2b4   :  { %v2323_v2 = vpop.f32.mrf.mxu1 }
 0x2b5   :  { %v15598_v43 = vadd.f32 %v2323_v2, %v15454_v36  ;;  %v13553_v2 = vld [vmem:[%s18197_s5 + $0x20] sm:$0xff]  ;;  %v2817_v30 = vpop.f32.mrf.mxu0 }
 0x2b7   :  { %10906 = vmatmul.msk.bf16.gmra.mxu1 %vm14423_vm6, %v10905_v20  ;;  %v13579_v20 = vld [vmem:[%s18197_s5 + $0xf0] sm:$0xff] }
 0x2b8   :  { %3658 = vmatpush.bf16.msrb.mxu1 %v13579_v20  ;;  %v13566_v20 = vld [vmem:[%s18197_s5 + $0x88] sm:$0xff] }
 0x2bc   :  { %v2325_v11 = vpop.f32.mrf.mxu1 }
 0x2bd   :  { %v15603_v29 = vadd.f32 %v2325_v11, %v15458_v3  ;;  %v10911_v3 = vpack.c.bf16 0.0, %v15467_v15  ;;  %v13564_v15 = vld [vmem:[%s18197_s5 + $0x78] sm:$0xff]  ;;  %v13559_v11 = vld [vmem:[%s18197_s5 + $0x50] sm:$0xff] }
 0x2be   :  { %3242 = vmatpush.bf16.msra.mxu2 %v13564_v15  ;;  %v13551_v15 = vld [vmem:[%s18197_s5 + $0x10] sm:$0xff] }
 0x2c4   :  { %v2328_v53 = vpop.f32.mrf.mxu1 }
 0x2c5   :  { %v15606_v12 = vadd.f32 %v2328_v53, %v15471_v23 }
 0x2c7   :  { %10909 = vmatmul.msk.bf16.gmra.mxu1 %vm14423_vm6, %v10908_v9  ;;  %v13570_v9 = vld [vmem:[%s18197_s5 + $0xa8] sm:$0xff] }
 0x2c8   :  { %3490 = vmatpush.bf16.msrb.mxu0 %v13570_v9 }
 0x2cc   :  { %v2330_v36 = vpop.f32.mrf.mxu1 }
 0x2cd   :  { %v15611_v34 = vadd.f32 %v2330_v36, %v15477_v48  ;;  %v13578_v36 = vld [vmem:[%s18197_s5 + $0xe8] sm:$0xff] }
 0x2ce   :  { %3659 = vmatpush.bf16.msrb.mxu1 %v13578_v36  ;;  %v13565_v36 = vld [vmem:[%s18197_s5 + $0x80] sm:$0xff] }
 0x2d4   :  { %v2333_v54 = vpop.f32.mrf.mxu1 }
 0x2d5   :  { %v15614_v42 = vadd.f32 %v2333_v54, %v15494_v57  ;;  %v13563_v57 = vld [vmem:[%s18197_s5 + $0x70] sm:$0xff] }
 0x2d6   :  { %3243 = vmatpush.bf16.msra.mxu2 %v13563_v57  ;;  %v13577_v57 = vld [vmem:[%s18197_s5 + $0xe0] sm:$0xff] }
 0x2d7   :  { %10912 = vmatmul.msk.bf16.gmra.mxu1 %vm14894_vm8, %v10911_v3 }
 0x2d8   :  { %3660 = vmatpush.bf16.msrb.mxu1 %v13577_v57 }
 0x2da   :  { %3244 = vmatpush.bf16.msra.mxu2 %v13562_v45  ;;  %v13568_v45 = vld [vmem:[%s18197_s5 + $0x98] sm:$0xff] }
 0x2dc   :  { %v2335_v55 = vpop.f32.mrf.mxu1 }
 0x2dd   :  { %v15620_v23 = vadd.f32 %v2335_v55, %v15504_v46  ;;  %v15636_v46 = vpop.f32.mrf.mxu2  ;;  %v13558_v55 = vld [vmem:[%s18197_s5 + $0x48] sm:$0xff] }
 0x2de   :  { %3245 = vmatpush.bf16.msra.mxu2 %v13561_v28  ;;  %v2819_v28 = vpop.f32.mrf.mxu0 }
 0x2e2   :  { %3246 = vmatpush.bf16.msra.mxu2 %v13560_v41  ;;  %v13575_v41 = vld [vmem:[%s18197_s5 + $0xd0] sm:$0xff] }
 0x2e4   :  { %v2338_v40 = vpop.f32.mrf.mxu1 }
 0x2e5   :  { %v15623_v60 = vadd.f32 %v2338_v40, %v15527_v26  ;;  %v15638_v26 = vpop.f32.mrf.mxu3 }
 0x2e6   :  { %3247 = vmatpush.bf16.msra.mxu2 %v13559_v11  ;;  %v13574_v11 = vld [vmem:[%s18197_s5 + $0xc8] sm:$0xff]  ;;  %v2822_v9 = vpop.f32.mrf.mxu0 }
 0x2e7   :  { %10915 = vmatmul.msk.bf16.gmra.mxu1 %vm14423_vm6, %v15315_v21  ;;  %v13556_v21 = vld [vmem:[%s18197_s5 + $0x38] sm:$0xff] }
 0x2e8   :  { %3339 = vmatpush.bf16.msra.mxu3 %v13556_v21  ;;  %v13550_v21 = vld [vmem:[%s18197_s5 + $0x8] sm:$0xff] }
 0x2ea   :  { %3248 = vmatpush.bf16.msra.mxu2 %v13558_v55  ;;  %v13573_v55 = vld [vmem:[%s18197_s5 + $0xc0] sm:$0xff] }
 0x2ec   :  { %v15628_v48 = vpop.f32.mrf.mxu1  ;;  %3340 = vmatpush.bf16.msra.mxu3 %v13555_v4  ;;  %v13576_v4 = vld [vmem:[%s18197_s5 + $0xd8] sm:$0xff] }
 0x2ed   :  { %v15673_v44 = vpop.f32.mrf.mxu3  ;;  %3661 = vmatpush.bf16.msrb.mxu1 %v13576_v4  ;;  %v15766_v4 = vld [vmem:[%s18196_s4] ss:$0 sm:$0xff] }
 0x2f1   :  { %3662 = vmatpush.bf16.msrb.mxu1 %v13575_v41 }
 0x2f4   :  { %v2343_v39 = vpop.f32.mrf.mxu1 }
 0x2f5   :  { %v15647_v31 = vadd.f32 %v2343_v39, %v15554_v27  ;;  %v15660_v27 = vpop.f32.mrf.mxu2  ;;  %v2654_v40 = vpop.f32.mrf.mxu3  ;;  %v13557_v39 = vld [vmem:[%s18197_s5 + $0x40] sm:$0xff]  ;;  %3663 = vmatpush.bf16.msrb.mxu1 %v13574_v11 }
 0x2f6   :  { %3249 = vmatpush.bf16.msra.mxu2 %v13557_v39  ;;  %v2824_v39 = vpop.f32.mrf.mxu0 }
 0x2f7   :  { %10918 = vmatmul.msk.bf16.gmra.mxu1 %vm14423_vm6, %v15384_v51  ;;  %v13554_v51 = vld [vmem:[%s18197_s5 + $0x28] sm:$0xff] }
 0x2f8   :  { %3341 = vmatpush.bf16.msra.mxu3 %v13554_v51 }
 0x2f9   :  { %3664 = vmatpush.bf16.msrb.mxu1 %v13573_v55 }
 0x2fc   :  { %v15662_v17 = vpop.f32.mrf.mxu1  ;;  %3342 = vmatpush.bf16.msra.mxu3 %v13553_v2 }
 0x2fd   :  { %v2489_v54 = vpop.f32.mrf.mxu2  ;;  %v2657_v2 = vpop.f32.mrf.mxu3 }
 0x300   :  { %3343 = vmatpush.bf16.msra.mxu3 %v13552_v14  ;;  %v10923_v14 = vpack.c.bf16 0.0, %v15569_v50  ;;  %v2527_v50 = vadd.f32 %v15660_v27, %v15586_v6  ;;  %v2827_v6 = vpop.f32.mrf.mxu0 }
 0x302   :  { %v2692_v57 = vadd.f32 %v15673_v44, %v2527_v50  ;;  %v15773_v44 = vld [vmem:[#allocation2] sm:$0xff] }
 0x304   :  { %v2348_v53 = vpop.f32.mrf.mxu1  ;;  %3344 = vmatpush.bf16.msra.mxu3 %v13551_v15 }
 0x305   :  { %v15700_v3 = vadd.f32 %v2348_v53, %v15575_v1  ;;  %v13569_v1 = vld [vmem:[%s18197_s5 + $0xa0] sm:$0xff]  ;;  %v2492_v51 = vpop.f32.mrf.mxu2 }
 0x306   :  { %3491 = vmatpush.bf16.msrb.mxu0 %v13569_v1  ;;  %v2529_v55 = vadd.f32 %v2492_v51, %v15598_v43 }
 0x307   :  { %10921 = vmatmul.msk.bf16.gmra.mxu1 %vm14423_vm6, %v15415_v8 }
 0x308   :  { %3345 = vmatpush.bf16.msra.mxu3 %v13550_v21  ;;  %v2829_v51 = vpop.f32.mrf.mxu0 }
 0x30a   :  { %3492 = vmatpush.bf16.msrb.mxu0 %v13568_v45  ;;  %v2857_v45 = vadd.f32 %v2817_v30, %v2692_v57 }
 0x30c   :  { %v15720_v8 = vpop.f32.mrf.mxu1  ;;  %3346 = vmatpush.bf16.msra.mxu3 %v13549_v59 }
 0x30d   :  { %v2494_v15 = vpop.f32.mrf.mxu2 }
 0x30e   :  { %3493 = vmatpush.bf16.msrb.mxu0 %v13567_v24  ;;  %v2528_v24 = vadd.f32 %v2489_v54, %v15595_v61  ;;  %v2530_v43 = vadd.f32 %v2494_v15, %v15603_v29 }
 0x312   :  { %3494 = vmatpush.bf16.msrb.mxu0 %v13566_v20  ;;  %v2693_v20 = vadd.f32 %v2654_v40, %v2528_v24  ;;  %v2694_v40 = vadd.f32 %v2657_v2, %v2529_v55 }
 0x314   :  { %v2353_v5 = vpop.f32.mrf.mxu1  ;;  %v2858_v27 = vadd.f32 %v2819_v28, %v2693_v20  ;;  %v2859_v28 = vadd.f32 %v2822_v9, %v2694_v40 }
 0x315   :  { %v15747_v53 = vadd.f32 %v2353_v5, %v15592_v33  ;;  %v2659_v33 = vpop.f32.mrf.mxu3  ;;  %v2497_v21 = vpop.f32.mrf.mxu2 }
 0x316   :  { %3495 = vmatpush.bf16.msrb.mxu0 %v13565_v36  ;;  %v2695_v2 = vadd.f32 %v2659_v33, %v2530_v43 }
 0x317   :  { %10924 = vmatmul.msk.bf16.gmra.mxu1 %vm14894_vm8, %v10923_v14 }
 0x318   :  { %v2860_v40 = vadd.f32 %v2824_v39, %v2695_v2 }
 0x31c   :  { %v15758_v1 = vpop.f32.mrf.mxu1 }
 0x31d   :  { %v2662_v41 = vpop.f32.mrf.mxu3  ;;  %v2499_v61 = vpop.f32.mrf.mxu2 }
 0x324   :  { %v2982_v59 = vpop.f32.mrf.mxu1 }
 0x325   :  { %v3022_v5 = vadd.f32 %v2982_v59, %v2857_v45  ;;  %v2664_v50 = vpop.f32.mrf.mxu3 }
 0x327   :  { %v3042_v11 = vadd.f32 %v15766_v4, %v3022_v5 }
 0x329   :  { %v15770_v14 = vmax.f32 %v3042_v11, 0.0 }
 0x32b   :  { %3074 = vst [vmem:[#allocation2 + $0x10] sm:$0xff] %v15770_v14  ;;  %v3170_v30 = vpack.c.bf16 %v15770_v14, %v15773_v44 }
 0x32c   :  { %v2984_v36 = vpop.f32.mrf.mxu1 }
 0x32d   :  { %v3023_v54 = vadd.f32 %v2984_v36, %v2858_v27  ;;  %3250 = vmatmul.bf16.vlgmr.msra.gmra.mxu2 %v3170_v30  ;;  %v2502_v27 = vpop.f32.mrf.mxu2  ;;  %v2667_v36 = vpop.f32.mrf.mxu3 }
 0x32f   :  { %v3043_v57 = vadd.f32 %v15766_v4, %v3023_v54 }
 0x331   :  { %v15779_v45 = vmax.f32 %v3043_v57, 0.0 }
 0x332   :  { %v3090_v59 = vld [vmem:[#allocation2 + $0xf] sm:$0xff] }
 0x333   :  { %3075 = vst [vmem:[#allocation2 + $0x18] sm:$0xff] %v15779_v45  ;;  %v10990_v24 = vpack.c.bf16 %v3090_v59, %v15773_v44 }
 0x334   :  { %v2987_v20 = vpop.f32.mrf.mxu1 }
 0x335   :  { %v3024_v11 = vadd.f32 %v2987_v20, %v2859_v28  ;;  %10991 = vmatmul.msk.bf16.vlgmr.msra.gmra.mxu3 %vm14369_vm3, %v10990_v24  ;;  %v2531_v28 = vadd.f32 %v2497_v21, %v15606_v12  ;;  %v2832_v20 = vpop.f32.mrf.mxu0  ;;  %v2504_v43 = vpop.f32.mrf.mxu2 }
 0x336   :  { %v2669_v12 = vpop.f32.mrf.mxu3 }
 0x337   :  { %v3044_v30 = vadd.f32 %v15766_v4, %v3024_v11  ;;  %v2696_v39 = vadd.f32 %v2662_v41, %v2531_v28 }
 0x339   :  { %v15789_v55 = vmax.f32 %v3044_v30, 0.0  ;;  %v2861_v21 = vadd.f32 %v2827_v6, %v2696_v39 }
 0x33a   :  { %v15791_v9 = vld [vmem:[#allocation2 + $0x11] sm:$0xff] }
 0x33b   :  { %v3554_v54 = vld [vmem:[#allocation2 + $0x17] sm:$0xff]  ;;  %3076 = vst [vmem:[#allocation2 + $0x20] sm:$0xff] %v15789_v55  ;;  %v11046_v29 = vpack.c.bf16 %v15791_v9, %v15773_v44  ;;  %v15798_v57 = vpack.c.bf16 %v15789_v55, %v15779_v45 }
 0x33c   :  { %v11102_v15 = vpack.c.bf16 %v3554_v54, %v3090_v59  ;;  %v2989_v33 = vpop.f32.mrf.mxu1 }
 0x33d   :  { %v3025_v24 = vadd.f32 %v2989_v33, %v2860_v40  ;;  %11047 = vmatmul.msk.bf16.vlgmr.msrb.gmra.mxu0 %vm14386_vm5, %v11046_v29  ;;  %3255 = vmatmul.bf16.gmra.mxu2 %v15798_v57  ;;  %v2532_v33 = vadd.f32 %v2499_v61, %v15611_v34  ;;  %v2834_v6 = vpop.f32.mrf.mxu0  ;;  %v2507_v5 = vpop.f32.mrf.mxu2 }
 0x33e   :  { %11103 = vmatmul.msk.bf16.vlgmr.msrb.gmra.mxu1 %vm14377_vm4, %v11102_v15 }
 0x33f   :  { %v3045_v59 = vadd.f32 %v15766_v4, %v3025_v24  ;;  %v2697_v24 = vadd.f32 %v2664_v50, %v2532_v33  ;;  %v2672_v33 = vpop.f32.mrf.mxu3 }
 0x341   :  { %v15807_v11 = vmax.f32 %v3045_v59, 0.0  ;;  %v2862_v41 = vadd.f32 %v2829_v51, %v2697_v24 }
 0x342   :  { %v3092_v2 = vld [vmem:[#allocation2 + $0x1f] sm:$0xff] }
 0x343   :  { %v15809_v30 = vld [vmem:[#allocation2 + $0x19] sm:$0xff]  ;;  %3077 = vst [vmem:[#allocation2 + $0x28] sm:$0xff] %v15807_v11  ;;  %v15812_v40 = vpack.c.bf16 %v3092_v2, %v3554_v54 }
 0x344   :  { %v2992_v15 = vpop.f32.mrf.mxu1 }
 0x345   :  { %v3026_v28 = vadd.f32 %v2992_v15, %v2861_v21  ;;  %10994 = vmatmul.msk.bf16.gmra.mxu3 %vm14377_vm4, %v15812_v40  ;;  %v2533_v15 = vadd.f32 %v2502_v27, %v15614_v42  ;;  %v2837_v32 = vpop.f32.mrf.mxu0 }
 0x347   :  { %v3046_v59 = vadd.f32 %v15766_v4, %v3026_v28  ;;  %v2698_v51 = vadd.f32 %v2667_v36, %v2533_v15 }
 0x349   :  { %v15823_v54 = vmax.f32 %v3046_v59, 0.0  ;;  %v2863_v42 = vadd.f32 %v2832_v20, %v2698_v51  ;;  %v1870_v51 = vadd.f32 %v15516_v0, %v15492_v16 }
 0x34a   :  { %v15825_v39 = vld [vmem:[#allocation2 + $0x21] sm:$0xff] }
 0x34b   :  { %v3556_v29 = vld [vmem:[#allocation2 + $0x27] sm:$0xff]  ;;  %3078 = vst [vmem:[#allocation2 + $0x30] sm:$0xff] %v15823_v54  ;;  %v11049_v34 = vpack.c.bf16 %v15825_v39, %v15809_v30  ;;  %v15832_v21 = vpack.c.bf16 %v15823_v54, %v15807_v11 }
 0x34c   :  { %v11105_v61 = vpack.c.bf16 %v3556_v29, %v3092_v2  ;;  %v2994_v50 = vpop.f32.mrf.mxu1 }
 0x34d   :  { %v3027_v28 = vadd.f32 %v2994_v50, %v2862_v41  ;;  %11050 = vmatmul.msk.bf16.gmra.mxu0 %vm14423_vm6, %v11049_v34  ;;  %3260 = vmatmul.bf16.gmra.mxu2 %v15832_v21  ;;  %v2509_v50 = vpop.f32.mrf.mxu2  ;;  %v2839_v16 = vpop.f32.mrf.mxu0 }
 0x34e   :  { %11106 = vmatmul.msk.bf16.gmra.mxu1 %vm14377_vm4, %v11105_v61  ;;  %v2534_v61 = vadd.f32 %v2504_v43, %v15620_v23 }
 0x34f   :  { %v3047_v2 = vadd.f32 %v15766_v4, %v3027_v28 }
 0x350   :  { %v2699_v28 = vadd.f32 %v2669_v12, %v2534_v61 }
 0x351   :  { %v15841_v24 = vmax.f32 %v3047_v2, 0.0  ;;  %v2674_v2 = vpop.f32.mrf.mxu3 }
 0x352   :  { %v3094_v59 = vld [vmem:[#allocation2 + $0x2f] sm:$0xff]  ;;  %v2864_v23 = vadd.f32 %v2834_v6, %v2699_v28 }
 0x353   :  { %v15843_v56 = vld [vmem:[#allocation2 + $0x29] sm:$0xff]  ;;  %3079 = vst [vmem:[#allocation2 + $0x38] sm:$0xff] %v15841_v24  ;;  %v15846_v27 = vpack.c.bf16 %v3094_v59, %v3556_v29 }
 0x354   :  { %v2997_v36 = vpop.f32.mrf.mxu1 }
 0x355   :  { %v3028_v15 = vadd.f32 %v2997_v36, %v2863_v42  ;;  %10997 = vmatmul.msk.bf16.gmra.mxu3 %vm14377_vm4, %v15846_v27  ;;  %v2045_v36 = vadd.f32 %v15534_v7, %v1870_v51 }
 0x357   :  { %v3048_v20 = vadd.f32 %v15766_v4, %v3028_v15  ;;  %v2535_v15 = vadd.f32 %v2507_v5, %v15623_v60 }
 0x359   :  { %v15857_v29 = vmax.f32 %v3048_v20, 0.0  ;;  %v2700_v6 = vadd.f32 %v2672_v33, %v2535_v15  ;;  %v2214_v20 = vadd.f32 %v15521_v35, %v2045_v36  ;;  %v2677_v7 = vpop.f32.mrf.mxu3 }
 0x35a   :  { %v15861_v41 = vld [vmem:[#allocation2 + $0x31] sm:$0xff] }
 0x35b   :  { %v3558_v34 = vld [vmem:[#allocation2 + $0x37] sm:$0xff]  ;;  %3080 = vst [vmem:[#allocation2 + $0x40] sm:$0xff] %v15857_v29  ;;  %v11052_v43 = vpack.c.bf16 %v15861_v41, %v15843_v56  ;;  %v15868_v12 = vpack.c.bf16 %v15857_v29, %v15841_v24  ;;  %v2367_v60 = vadd.f32 %v15628_v48, %v2214_v20 }
 0x35c   :  { %v11108_v42 = vpack.c.bf16 %v3558_v34, %v3094_v59  ;;  %v2999_v61 = vpop.f32.mrf.mxu1  ;;  %v2512_v59 = vpop.f32.mrf.mxu2 }
 0x35d   :  { %v3029_v0 = vadd.f32 %v2999_v61, %v2864_v23  ;;  %11053 = vmatmul.msk.bf16.gmra.mxu0 %vm14423_vm6, %v11052_v43  ;;  %3265 = vmatmul.bf16.gmra.mxu2 %v15868_v12  ;;  %v2865_v43 = vadd.f32 %v2837_v32, %v2700_v6  ;;  %v2536_v36 = vadd.f32 %v2509_v50, %v2367_v60 }
 0x35e   :  { %11109 = vmatmul.msk.bf16.gmra.mxu1 %vm14377_vm4, %v11108_v42  ;;  %v1875_v6 = vadd.f32 %v15546_v18, %v15525_v37  ;;  %v2537_v37 = vadd.f32 %v2512_v59, %v15647_v31  ;;  %v13587_v59 = vld [vmem:[%s18197_s5 + $0x130] sm:$0xff] }
 0x35f   :  { %v3049_v28 = vadd.f32 %v15766_v4, %v3029_v0  ;;  %v2701_v48 = vadd.f32 %v2674_v2, %v2536_v36  ;;  %v2842_v0 = vpop.f32.mrf.mxu0 }
 0x360   :  { %v2047_v36 = vadd.f32 %v15558_v22, %v1875_v6 }
 0x361   :  { %v15879_v51 = vmax.f32 %v3049_v28, 0.0  ;;  %v2679_v50 = vpop.f32.mrf.mxu3  ;;  %v2866_v60 = vadd.f32 %v2839_v16, %v2701_v48  ;;  %v13588_v16 = vld [vmem:[%s18197_s5 + $0x138] sm:$0xff] }
 0x362   :  { %v3096_v5 = vld [vmem:[#allocation2 + $0x3f] sm:$0xff]  ;;  %3810 = vmatpush.bf16.msrb.mxu2 %v13588_v16  ;;  %v2216_v22 = vadd.f32 %v15548_v58, %v2047_v36 }
 0x363   :  { %v15882_v23 = vld [vmem:[#allocation2 + $0x39] sm:$0xff]  ;;  %3081 = vst [vmem:[#allocation2 + $0x48] sm:$0xff] %v15879_v51  ;;  %v15885_v42 = vpack.c.bf16 %v3096_v5, %v3558_v34 }
 0x364   :  { %v11196_v33 = vpack.c.bf16 %v15882_v23, %v15861_v41  ;;  %v3002_v35 = vpop.f32.mrf.mxu1  ;;  %v2514_v32 = vpop.f32.mrf.mxu2  ;;  %v2369_v6 = vadd.f32 %v15662_v17, %v2216_v22  ;;  %v13596_v17 = vld [vmem:[%s18197_s5 + $0x178] sm:$0xff]  ;;  %v18237_v41 = vpack.c.bf16 %v15879_v51, %v15857_v29 }
 0x365   :  { %v3030_v15 = vadd.f32 %v3002_v35, %v2865_v43  ;;  %11000 = vmatmul.msk.bf16.gmra.mxu3 %vm14377_vm4, %v15885_v42 }
 0x366   :  { %3811 = vmatpush.bf16.msrb.mxu2 %v13587_v59  ;;  %3979 = vmatpush.bf16.msrb.mxu3 %v13596_v17 }
 0x367   :  { %v3050_v28 = vadd.f32 %v15766_v4, %v3030_v15 }
 0x369   :  { %v15895_v34 = vmax.f32 %v3050_v28, 0.0  ;;  %v2844_v28 = vpop.f32.mrf.mxu0 }
 0x36a   :  { %v15899_v20 = vld [vmem:[#allocation2 + $0x41] sm:$0xff]  ;;  %3980 = vmatpush.bf16.msrb.mxu3 %v13595_v47  ;;  %v13611_v47 = vld [vmem:[%s18197_s5 + $0x1f0] sm:$0xff] }
 0x36b   :  { %v15901_v61 = vld [vmem:[#allocation2 + $0x47] sm:$0xff]  ;;  %3082 = vst [vmem:[#allocation2 + $0x50] sm:$0xff] %v15895_v34  ;;  %v11055_v2 = vpack.c.bf16 %v15899_v20, %v15882_v23  ;;  %v3174_v35 = vpack.c.bf16 %v15895_v34, %v15773_v44 }
 0x36c   :  { %v11111_v43 = vpack.c.bf16 %v15901_v61, %v3096_v5  ;;  %v3004_v15 = vpop.f32.mrf.mxu1  ;;  %v2702_v5 = vadd.f32 %v2677_v7, %v2537_v37 }
 0x36d   :  { %v3031_v18 = vadd.f32 %v3004_v15, %v2866_v60  ;;  %11056 = vmatmul.msk.bf16.gmra.mxu0 %vm14423_vm6, %v11055_v2  ;;  %3270 = vmatmul.bf16.gmra.mxu2 %v3174_v35  ;;  %v2517_v2 = vpop.f32.mrf.mxu2  ;;  %v2538_v35 = vadd.f32 %v2514_v32, %v2369_v6  ;;  %v2682_v15 = vpop.f32.mrf.mxu3 }
 0x36e   :  { %11112 = vmatmul.msk.bf16.gmra.mxu1 %vm14377_vm4, %v11111_v43  ;;  %v2867_v43 = vadd.f32 %v2842_v0, %v2702_v5  ;;  %v13586_v0 = vld [vmem:[%s18197_s5 + $0x128] sm:$0xff]  ;;  %v13585_v5 = vld [vmem:[%s18197_s5 + $0x120] sm:$0xff] }
 0x36f   :  { %v3051_v48 = vadd.f32 %v15766_v4, %v3031_v18  ;;  %v2703_v18 = vadd.f32 %v2679_v50, %v2538_v35  ;;  %3812 = vmatpush.bf16.msrb.mxu2 %v13586_v0 }
 0x371   :  { %v15920_v31 = vmax.f32 %v3051_v48, 0.0  ;;  %v1880_v48 = vadd.f32 %v15567_v25, %v15552_v13  ;;  %v2868_v22 = vadd.f32 %v2844_v28, %v2703_v18  ;;  %v2847_v6 = vpop.f32.mrf.mxu0  ;;  %v2539_v13 = vadd.f32 %v2517_v2, %v15700_v3 }
 0x372   :  { %v3097_v60 = vld [vmem:[#allocation2 + $0x4f] sm:$0xff] }
 0x373   :  { %3083 = vst [vmem:[#allocation2 + $0x58] sm:$0xff] %v15920_v31  ;;  %v11002_v7 = vpack.c.bf16 %v3097_v60, %v15773_v44  ;;  %v3742_v58 = vpack.c.bf16 %v15920_v31, %v15895_v34  ;;  %3813 = vmatpush.bf16.msrb.mxu2 %v13585_v5  ;;  %v2704_v3 = vadd.f32 %v2682_v15, %v2539_v13  ;;  %v13593_v15 = vld [vmem:[%s18197_s5 + $0x160] sm:$0xff]  ;;  %v13618_v34 = vld [vmem:[%s18197_s5 + $0x228] sm:$0xff] }
 0x374   :  { %v3007_v36 = vpop.f32.mrf.mxu1 }
 0x375   :  { %v3032_v37 = vadd.f32 %v3007_v36, %v2867_v43  ;;  %11003 = vmatmul.msk.bf16.gmra.mxu3 %vm14369_vm3, %v11002_v7  ;;  %v2049_v36 = vadd.f32 %v15581_v19, %v1880_v48  ;;  %v2519_v28 = vpop.f32.mrf.mxu2  ;;  %v13612_v19 = vld [vmem:[%s18197_s5 + $0x1f8] sm:$0xff]  ;;  %v2684_v2 = vpop.f32.mrf.mxu3  ;;  %v2869_v48 = vadd.f32 %v2847_v6, %v2704_v3 }
 0x376   :  { %4309 = vmatpush.bf16.msra.mxu1 %v13612_v19 }
 0x377   :  { %v3052_v16 = vadd.f32 %v15766_v4, %v3032_v37  ;;  %v2218_v0 = vadd.f32 %v15579_v38, %v2049_v36  ;;  %3814 = vmatpush.bf16.msrb.mxu2 %v13584_v52  ;;  %v13591_v52 = vld [vmem:[%s18197_s5 + $0x150] sm:$0xff] }
 0x379   :  { %v15939_v32 = vmax.f32 %v3052_v16, 0.0  ;;  %v13603_v16 = vld [vmem:[%s18197_s5 + $0x1b0] sm:$0xff]  ;;  %v2371_v5 = vadd.f32 %v15720_v8, %v2218_v0  ;;  %v13582_v0 = vld [vmem:[%s18197_s5 + $0x108] sm:$0xff] }
 0x37a   :  { %v15949_v59 = vld [vmem:[#allocation2 + $0x51] sm:$0xff]  ;;  %4310 = vmatpush.bf16.msra.mxu1 %v13611_v47  ;;  %v1885_v47 = vadd.f32 %v15636_v46, %v15573_v62 }
 0x37b   :  { %v3562_v50 = vld [vmem:[#allocation2 + $0x57] sm:$0xff]  ;;  %3084 = vst [vmem:[#allocation2 + $0x60] sm:$0xff] %v15939_v32  ;;  %v11058_v43 = vpack.c.bf16 %v15949_v59, %v15773_v44  ;;  %v15956_v35 = vpack.c.bf16 %v15939_v32, %v15920_v31  ;;  %v13594_v44 = vld [vmem:[%s18197_s5 + $0x168] sm:$0xff]  ;;  %v2540_v6 = vadd.f32 %v2519_v28, %v2371_v5 }
 0x37c   :  { %v11114_v7 = vpack.c.bf16 %v3562_v50, %v3097_v60  ;;  %v3009_v25 = vpop.f32.mrf.mxu1  ;;  %v13604_v60 = vld [vmem:[%s18197_s5 + $0x1b8] sm:$0xff]  ;;  %3981 = vmatpush.bf16.msrb.mxu3 %v13594_v44  ;;  %v13602_v44 = vld [vmem:[%s18197_s5 + $0x1a8] sm:$0xff] }
 0x37d   :  { %v3033_v37 = vadd.f32 %v3009_v25, %v2868_v22  ;;  %11059 = vmatmul.msk.bf16.gmra.mxu0 %vm14386_vm5, %v11058_v43  ;;  %3275 = vmatmul.bf16.gmra.mxu2 %v15956_v35  ;;  %v13583_v43 = vld [vmem:[%s18197_s5 + $0x110] sm:$0xff]  ;;  %v2849_v25 = vpop.f32.mrf.mxu0  ;;  %v13610_v28 = vld [vmem:[%s18197_s5 + $0x1e8] sm:$0xff]  ;;  %v2522_v19 = vpop.f32.mrf.mxu2 }
 0x37e   :  { %11115 = vmatmul.msk.bf16.gmra.mxu1 %vm14377_vm4, %v11114_v7  ;;  %4144 = vmatpush.bf16.msra.mxu0 %v13604_v60  ;;  %v2705_v60 = vadd.f32 %v2684_v2, %v2540_v6  ;;  %v13609_v2 = vld [vmem:[%s18197_s5 + $0x1e0] sm:$0xff]  ;;  %v2541_v62 = vadd.f32 %v2522_v19, %v15747_v53  ;;  %v13608_v53 = vld [vmem:[%s18197_s5 + $0x1d8] sm:$0xff] }
 0x37f   :  { %v3053_v17 = vadd.f32 %v15766_v4, %v3033_v37  ;;  %3815 = vmatpush.bf16.msrb.mxu2 %v13583_v43  ;;  %4311 = vmatpush.bf16.msra.mxu1 %v13610_v28 }
 0x380   :  { %3982 = vmatpush.bf16.msrb.mxu3 %v13593_v15  ;;  %v2687_v15 = vpop.f32.mrf.mxu3  ;;  %v2870_v5 = vadd.f32 %v2849_v25, %v2705_v60  ;;  %v13581_v25 = vld [vmem:[%s18197_s5 + $0x100] sm:$0xff] }
 0x381   :  { %v15979_v18 = vmax.f32 %v3053_v17, 0.0  ;;  %v13601_v17 = vld [vmem:[%s18197_s5 + $0x1a0] sm:$0xff]  ;;  %v2706_v28 = vadd.f32 %v2687_v15, %v2541_v62 }
 0x382   :  { %v3099_v38 = vld [vmem:[#allocation2 + $0x5f] sm:$0xff]  ;;  %4145 = vmatpush.bf16.msra.mxu0 %v13603_v16 }
 0x383   :  { %v15991_v22 = vld [vmem:[#allocation2 + $0x59] sm:$0xff]  ;;  %3085 = vst [vmem:[#allocation2 + $0x68] sm:$0xff] %v15979_v18  ;;  %v15997_v7 = vpack.c.bf16 %v3099_v38, %v3562_v50  ;;  %v3743_v8 = vpack.c.bf16 %v15979_v18, %v15939_v32  ;;  %3816 = vmatpush.bf16.msrb.mxu2 %v13582_v0  ;;  %4312 = vmatpush.bf16.msra.mxu1 %v13609_v2  ;;  %v13607_v0 = vld [vmem:[%s18197_s5 + $0x1d0] sm:$0xff]  ;;  %v13614_v32 = vld [vmem:[%s18197_s5 + $0x208] sm:$0xff] }
 0x384   :  { %v11202_v36 = vpack.c.bf16 %v15991_v22, %v15949_v59  ;;  %v3012_v13 = vpop.f32.mrf.mxu1  ;;  %v13592_v50 = vld [vmem:[%s18197_s5 + $0x158] sm:$0xff] }
 0x385   :  { %v3034_v37 = vadd.f32 %v3012_v13, %v2869_v48  ;;  %11006 = vmatmul.msk.bf16.gmra.mxu3 %vm14377_vm4, %v15997_v7  ;;  %v2852_v60 = vpop.f32.mrf.mxu0  ;;  %v2524_v2 = vpop.f32.mrf.mxu2 }
 0x386   :  { %3983 = vmatpush.bf16.msrb.mxu3 %v13592_v50  ;;  %4146 = vmatpush.bf16.msra.mxu0 %v13602_v44  ;;  %v2051_v50 = vadd.f32 %v15638_v26, %v1885_v47  ;;  %v13600_v26 = vld [vmem:[%s18197_s5 + $0x198] sm:$0xff] }
 0x387   :  { %v3054_v3 = vadd.f32 %v15766_v4, %v3034_v37  ;;  %4313 = vmatpush.bf16.msra.mxu1 %v13608_v53  ;;  %3817 = vmatpush.bf16.msrb.mxu2 %v13581_v25 }
 0x388   :  { %v2689_v62 = vpop.f32.mrf.mxu3 }
 0x389   :  { %v16028_v16 = vmax.f32 %v3054_v3, 0.0  ;;  %v13589_v3 = vld [vmem:[%s18197_s5 + $0x140] sm:$0xff] }
 0x38a   :  { %v16032_v48 = vld [vmem:[#allocation2 + $0x61] sm:$0xff]  ;;  %3984 = vmatpush.bf16.msrb.mxu3 %v13591_v52  ;;  %4147 = vmatpush.bf16.msra.mxu0 %v13601_v17  ;;  %v13599_v52 = vld [vmem:[%s18197_s5 + $0x190] sm:$0xff]  ;;  %v2220_v17 = vadd.f32 %v15658_v10, %v2051_v50 }
 0x38b   :  { %v3564_v43 = vld [vmem:[#allocation2 + $0x67] sm:$0xff]  ;;  %3086 = vst [vmem:[#allocation2 + $0x70] sm:$0xff] %v16028_v16  ;;  %v11061_v6 = vpack.c.bf16 %v16032_v48, %v15991_v22  ;;  %v16039_v37 = vpack.c.bf16 %v16028_v16, %v15979_v18  ;;  %4314 = vmatpush.bf16.msra.mxu1 %v13607_v0  ;;  %v13616_v22 = vld [vmem:[%s18197_s5 + $0x218] sm:$0xff] }
 0x38c   :  { %v11117_v13 = vpack.c.bf16 %v3564_v43, %v3099_v38  ;;  %v3014_v46 = vpop.f32.mrf.mxu1  ;;  %v13590_v38 = vld [vmem:[%s18197_s5 + $0x148] sm:$0xff]  ;;  %v2373_v47 = vadd.f32 %v15758_v1, %v2220_v17 }
 0x38d   :  { %v3035_v44 = vadd.f32 %v3014_v46, %v2870_v5  ;;  %11062 = vmatmul.msk.bf16.gmra.mxu0 %vm14423_vm6, %v11061_v6  ;;  %3280 = vmatmul.bf16.gmra.mxu2 %v16039_v37  ;;  %v2871_v5 = vadd.f32 %v2852_v60, %v2706_v28  ;;  %v2854_v28 = vpop.f32.mrf.mxu0 }
 0x38e   :  { %11118 = vmatmul.msk.bf16.gmra.mxu1 %vm14377_vm4, %v11117_v13  ;;  %3985 = vmatpush.bf16.msrb.mxu3 %v13590_v38  ;;  %v2542_v25 = vadd.f32 %v2524_v2, %v2373_v47  ;;  %v13606_v38 = vld [vmem:[%s18197_s5 + $0x1c8] sm:$0xff] }
 0x38f   :  { %v3055_v19 = vadd.f32 %v15766_v4, %v3035_v44  ;;  %4148 = vmatpush.bf16.msra.mxu0 %v13600_v26  ;;  %4315 = vmatpush.bf16.msra.mxu1 %v13606_v38 }
 0x390   :  { %v2707_v26 = vadd.f32 %v2689_v62, %v2542_v25 }
 0x391   :  { %v16071_v15 = vmax.f32 %v3055_v19, 0.0  ;;  %v13597_v19 = vld [vmem:[%s18197_s5 + $0x180] sm:$0xff] }
 0x392   :  { %v3101_v6 = vld [vmem:[#allocation2 + $0x6f] sm:$0xff]  ;;  %3986 = vmatpush.bf16.msrb.mxu3 %v13589_v3  ;;  %v13605_v3 = vld [vmem:[%s18197_s5 + $0x1c0] sm:$0xff] }
 0x393   :  { %v16074_v13 = vld [vmem:[#allocation2 + $0x69] sm:$0xff]  ;;  %3087 = vst [vmem:[#allocation2 + $0x78] sm:$0xff] %v16071_v15  ;;  %v16077_v46 = vpack.c.bf16 %v3101_v6, %v3564_v43  ;;  %4149 = vmatpush.bf16.msra.mxu0 %v13599_v52  ;;  %v2872_v52 = vadd.f32 %v2854_v28, %v2707_v26  ;;  %4316 = vmatpush.bf16.msra.mxu1 %v13605_v3 }
 0x394   :  { %v11205_v10 = vpack.c.bf16 %v16074_v13, %v16032_v48  ;;  %v3017_v44 = vpop.f32.mrf.mxu1  ;;  %v13598_v43 = vld [vmem:[%s18197_s5 + $0x188] sm:$0xff] }
 0x395   :  { %v3036_v1 = vadd.f32 %v3017_v44, %v2871_v5  ;;  %11009 = vmatmul.msk.bf16.gmra.mxu3 %vm14377_vm4, %v16077_v46 }
 0x397   :  { %v3056_v53 = vadd.f32 %v15766_v4, %v3036_v1  ;;  %4150 = vmatpush.bf16.msra.mxu0 %v13598_v43 }
 0x399   :  { %v16093_v60 = vmax.f32 %v3056_v53, 0.0 }
 0x39a   :  { %v16101_v17 = vld [vmem:[#allocation2 + $0x71] sm:$0xff] }
 0x39b   :  { %v3566_v0 = vld [vmem:[#allocation2 + $0x77] sm:$0xff]  ;;  %3088 = vst [vmem:[#allocation2 + $0x80] sm:$0xff] %v16093_v60  ;;  %v16106_v2 = vpack.c.bf16 %v16101_v17, %v16074_v13  ;;  %v16110_v5 = vpack.c.bf16 %v16093_v60, %v16071_v15  ;;  %4151 = vmatpush.bf16.msra.mxu0 %v13597_v19  ;;  %v18239_v13 = vpack.c.bf16 %v16071_v15, %v16028_v16 }
 0x39c   :  { %v11120_v47 = vpack.c.bf16 %v3566_v0, %v3101_v6  ;;  %v3019_v62 = vpop.f32.mrf.mxu1 }
 0x39d   :  { %v3037_v25 = vadd.f32 %v3019_v62, %v2872_v52  ;;  %11065 = vmatmul.msk.bf16.gmra.mxu0 %vm14423_vm6, %v16106_v2  ;;  %3285 = vmatmul.bf16.gmra.mxu2 %v16110_v5  ;;  %v18232_v52 = vpack.c.bf16 %v15779_v45, %v15770_v14  ;;  %v18234_v14 = vpack.c.bf16 %v15807_v11, %v15789_v55 }
 0x39e   :  { %11121 = vmatmul.msk.bf16.gmra.mxu1 %vm14377_vm4, %v11120_v47  ;;  %v18233_v47 = vpack.c.bf16 %v15809_v30, %v15791_v9 }
 0x39f   :  { %v3057_v44 = vadd.f32 %v15766_v4, %v3037_v25 }
 0x3a1   :  { %v16119_v6 = vmax.f32 %v3057_v44, 0.0 }
 0x3a2   :  { %v3103_v1 = vld [vmem:[#allocation2 + $0x7f] sm:$0xff] }
 0x3a3   :  { %v16121_v43 = vld [vmem:[#allocation2 + $0x79] sm:$0xff]  ;;  %3089 = vst [vmem:[#allocation2 + $0x88] sm:$0xff] %v16119_v6  ;;  %v16124_v38 = vpack.c.bf16 %v3103_v1, %v3566_v0 }
 0x3a5   :  { %11012 = vmatmul.msk.bf16.gmra.mxu3 %vm14377_vm4, %v16124_v38 }
 0x3aa   :  { %v16133_v4 = vld [vmem:[#allocation2 + $0x81] sm:$0xff] }
 0x3ab   :  { %v16135_v28 = vld [vmem:[#allocation2 + $0x87] sm:$0xff]  ;;  %v16139_v19 = vpack.c.bf16 %v16133_v4, %v16121_v43 }
 0x3ac   :  { %v11123_v3 = vpack.c.bf16 %v16135_v28, %v3103_v1 }
 0x3ad   :  { %11068 = vmatmul.msk.bf16.gmra.mxu0 %vm14423_vm6, %v16139_v19  ;;  %3818 = vmatmul.bf16.vlgmr.msrb.gmra.mxu2 %v18232_v52 }
 0x3ae   :  { %11124 = vmatmul.msk.bf16.gmra.mxu1 %vm14377_vm4, %v11123_v3 }
 0x3b0   :  { %v3251_v0 = vpop.f32.mrf.mxu2 }
 0x3b5   :  { %11191 = vmatmul.msk.bf16.vlgmr.msrb.gmra.mxu3 %vm14423_vm6, %v18233_v47 }
 0x3b8   :  { %v3348_v62 = vpop.f32.mrf.mxu3  ;;  %v3253_v25 = vpop.f32.mrf.mxu2 }
 0x3b9   :  { %v3349_v44 = vadd.f32 %v3348_v62, %v3251_v0 }
 0x3ba   :  { %v3497_v1 = vpop.f32.mrf.mxu0 }
 0x3bb   :  { %v3666_v53 = vpop.f32.mrf.mxu1  ;;  %v3537_v26 = vadd.f32 %v3497_v1, %v3349_v44 }
 0x3bd   :  { %v16155_v50 = vadd.f32 %v3666_v53, %v3537_v26  ;;  %11247 = vmatmul.msk.bf16.vlgmr.msra.gmra.mxu0 %vm14377_vm4, %v15812_v40  ;;  %3823 = vmatmul.bf16.gmra.mxu2 %v18234_v14  ;;  %v18235_v26 = vpack.c.bf16 %v15843_v56, %v15825_v39  ;;  %v18236_v56 = vpack.c.bf16 %v15841_v24, %v15823_v54 }
 0x3be   :  { %4317 = vmatmul.bf16.vlgmr.msra.gmra.mxu1 %v15798_v57 }
 0x3c0   :  { %v3350_v45 = vpop.f32.mrf.mxu3  ;;  %v3256_v30 = vpop.f32.mrf.mxu2 }
 0x3c1   :  { %v3351_v9 = vadd.f32 %v3350_v45, %v3253_v25 }
 0x3c2   :  { %v3499_v3 = vpop.f32.mrf.mxu0 }
 0x3c3   :  { %v3668_v52 = vpop.f32.mrf.mxu1  ;;  %v3538_v0 = vadd.f32 %v3499_v3, %v3351_v9 }
 0x3c5   :  { %v16164_v47 = vadd.f32 %v3668_v52, %v3538_v0  ;;  %11194 = vmatmul.msk.bf16.gmra.mxu3 %vm14423_vm6, %v18235_v26 }
 0x3c8   :  { %v3353_v40 = vpop.f32.mrf.mxu3  ;;  %v3258_v53 = vpop.f32.mrf.mxu2 }
 0x3c9   :  { %v3354_v57 = vadd.f32 %v3353_v40, %v3256_v30 }
 0x3ca   :  { %v3502_v62 = vpop.f32.mrf.mxu0 }
 0x3cb   :  { %v3671_v55 = vpop.f32.mrf.mxu1  ;;  %v3539_v11 = vadd.f32 %v3502_v62, %v3354_v57 }
 0x3cd   :  { %v16171_v44 = vadd.f32 %v3671_v55, %v3539_v11  ;;  %11250 = vmatmul.msk.bf16.gmra.mxu0 %vm14377_vm4, %v15846_v27  ;;  %3828 = vmatmul.bf16.gmra.mxu2 %v18236_v56 }
 0x3ce   :  { %4322 = vmatmul.bf16.gmra.mxu1 %v15832_v21 }
 0x3d0   :  { %v3355_v39 = vpop.f32.mrf.mxu3  ;;  %v3261_v1 = vpop.f32.mrf.mxu2 }
 0x3d1   :  { %v3356_v25 = vadd.f32 %v3355_v39, %v3258_v53 }
 0x3d2   :  { %v3504_v14 = vpop.f32.mrf.mxu0 }
 0x3d3   :  { %v3673_v45 = vpop.f32.mrf.mxu1  ;;  %v3540_v9 = vadd.f32 %v3504_v14, %v3356_v25  ;;  %v4240_v14 = vpack.c.bf16 0.0, %v15879_v51  ;;  %v13619_v51 = vld [vmem:[%s18197_s5 + $0x230] sm:$0xff] }
 0x3d5   :  { %v16180_v30 = vadd.f32 %v3673_v45, %v3540_v9  ;;  %11197 = vmatmul.msk.bf16.gmra.mxu3 %vm14423_vm6, %v11196_v33  ;;  %v16196_v33 = vld [vmem:[#allocation2 + $0x49] sm:$0xff] }
 0x3d6   :  { %v11199_v55 = vpack.c.bf16 %v16196_v33, %v15899_v20  ;;  %v13620_v20 = vld [vmem:[%s18197_s5 + $0x238] sm:$0xff] }
 0x3d7   :  { %4474 = vmatpush.bf16.msra.mxu2 %v13620_v20 }
 0x3d8   :  { %v3358_v27 = vpop.f32.mrf.mxu3  ;;  %v3263_v3 = vpop.f32.mrf.mxu2 }
 0x3d9   :  { %v3359_v21 = vadd.f32 %v3358_v27, %v3261_v1  ;;  %v11255_v1 = vpack.c.bf16 0.0, %v15901_v61 }
 0x3da   :  { %v3507_v52 = vpop.f32.mrf.mxu0 }
 0x3db   :  { %v3676_v54 = vpop.f32.mrf.mxu1  ;;  %v3541_v24 = vadd.f32 %v3507_v52, %v3359_v21  ;;  %4475 = vmatpush.bf16.msra.mxu2 %v13619_v51 }
 0x3dd   :  { %v16187_v0 = vadd.f32 %v3676_v54, %v3541_v24  ;;  %11253 = vmatmul.msk.bf16.gmra.mxu0 %vm14377_vm4, %v15885_v42  ;;  %3833 = vmatmul.bf16.gmra.mxu2 %v18237_v41 }
 0x3de   :  { %4327 = vmatmul.bf16.gmra.mxu1 %v15868_v12 }
 0x3df   :  { %4476 = vmatpush.bf16.msra.mxu2 %v13618_v34 }
 0x3e0   :  { %v3360_v23 = vpop.f32.mrf.mxu3  ;;  %v3266_v40 = vpop.f32.mrf.mxu2 }
 0x3e1   :  { %v3361_v26 = vadd.f32 %v3360_v23, %v3263_v3  ;;  %v13617_v23 = vld [vmem:[%s18197_s5 + $0x220] sm:$0xff] }
 0x3e2   :  { %v3509_v57 = vpop.f32.mrf.mxu0 }
 0x3e3   :  { %v3678_v53 = vpop.f32.mrf.mxu1  ;;  %v3542_v62 = vadd.f32 %v3509_v57, %v3361_v26  ;;  %4477 = vmatpush.bf16.msra.mxu2 %v13617_v23  ;;  %v4244_v23 = vpack.c.bf16 0.0, %v16119_v6 }
 0x3e5   :  { %v16200_v11 = vadd.f32 %v3678_v53, %v3542_v62  ;;  %11200 = vmatmul.msk.bf16.gmra.mxu3 %vm14423_vm6, %v11199_v55  ;;  %v13615_v62 = vld [vmem:[%s18197_s5 + $0x210] sm:$0xff] }
 0x3e7   :  { %4478 = vmatpush.bf16.msra.mxu2 %v13616_v22 }
 0x3e8   :  { %v3363_v12 = vpop.f32.mrf.mxu3  ;;  %v3268_v29 = vpop.f32.mrf.mxu2 }
 0x3e9   :  { %v3364_v42 = vadd.f32 %v3363_v12, %v3266_v40  ;;  %v13613_v12 = vld [vmem:[%s18197_s5 + $0x200] sm:$0xff] }
 0x3ea   :  { %v3512_v56 = vpop.f32.mrf.mxu0 }
 0x3eb   :  { %v3681_v39 = vpop.f32.mrf.mxu1  ;;  %v3543_v25 = vadd.f32 %v3512_v56, %v3364_v42  ;;  %4479 = vmatpush.bf16.msra.mxu2 %v13615_v62 }
 0x3ed   :  { %v16206_v45 = vadd.f32 %v3681_v39, %v3543_v25  ;;  %11256 = vmatmul.msk.bf16.gmra.mxu0 %vm14752_vm7, %v11255_v1  ;;  %3838 = vmatmul.bf16.gmra.mxu2 %v3742_v58 }
 0x3ee   :  { %4332 = vmatmul.bf16.gmra.mxu1 %v4240_v14  ;;  %v18240_v14 = vpack.c.bf16 %v16121_v43, %v16101_v17  ;;  %v18241_v17 = vpack.c.bf16 %v16119_v6, %v16093_v60  ;;  %v4375_v60 = vld [vmem:[#allocation2 + $0x21] sm:$0xff] }
 0x3ef   :  { %4480 = vmatpush.bf16.msra.mxu2 %v13614_v32  ;;  %v4377_v32 = vld [vmem:[#allocation2 + $0x31] sm:$0xff] }
 0x3f0   :  { %v3365_v27 = vpop.f32.mrf.mxu3  ;;  %v3271_v61 = vpop.f32.mrf.mxu2 }
 0x3f1   :  { %v3366_v21 = vadd.f32 %v3365_v27, %v3268_v29 }
 0x3f2   :  { %v3514_v3 = vpop.f32.mrf.mxu0 }
 0x3f3   :  { %v3683_v52 = vpop.f32.mrf.mxu1  ;;  %v3544_v54 = vadd.f32 %v3514_v3, %v3366_v21  ;;  %4481 = vmatpush.bf16.msra.mxu2 %v13613_v12 }
 0x3f5   :  { %v16219_v24 = vadd.f32 %v3683_v52, %v3544_v54  ;;  %11203 = vmatmul.msk.bf16.gmra.mxu3 %vm14423_vm6, %v11202_v36 }
 0x3f8   :  { %v3368_v31 = vpop.f32.mrf.mxu3  ;;  %v16229_v41 = vpop.f32.mrf.mxu2 }
 0x3f9   :  { %v3369_v58 = vadd.f32 %v3368_v31, %v3271_v61  ;;  %v16301_v61 = vld [vmem:[#allocation2 + $0x89] sm:$0xff] }
 0x3fa   :  { %v3517_v26 = vpop.f32.mrf.mxu0  ;;  %v11211_v54 = vpack.c.bf16 %v16301_v61, %v16133_v4 }
 0x3fb   :  { %v3686_v40 = vpop.f32.mrf.mxu1  ;;  %v3545_v57 = vadd.f32 %v3517_v26, %v3369_v58  ;;  %v11267_v58 = vpack.c.bf16 0.0, %v16135_v28  ;;  %v4374_v26 = vld [vmem:[#allocation2 + $0x19] sm:$0xff] }
 0x3fd   :  { %v16234_v59 = vadd.f32 %v3686_v40, %v3545_v57  ;;  %11259 = vmatmul.msk.bf16.gmra.mxu0 %vm14377_vm4, %v15997_v7  ;;  %3843 = vmatmul.bf16.gmra.mxu2 %v3743_v8  ;;  %v11334_v57 = vpack.c.bf16 %v4375_v60, %v4374_v26 }
 0x3fe   :  { %4337 = vmatmul.bf16.gmra.mxu1 %v15956_v35 }
 0x400   :  { %v16246_v36 = vpop.f32.mrf.mxu3  ;;  %v3276_v53 = vpop.f32.mrf.mxu2 }
 0x402   :  { %v16251_v55 = vpop.f32.mrf.mxu0 }
 0x403   :  { %v16253_v7 = vpop.f32.mrf.mxu1 }
 0x405   :  { %11206 = vmatmul.msk.bf16.gmra.mxu3 %vm14423_vm6, %v11205_v10 }
 0x408   :  { %v3373_v35 = vpop.f32.mrf.mxu3  ;;  %v16263_v8 = vpop.f32.mrf.mxu2 }
 0x409   :  { %v3374_v18 = vadd.f32 %v3373_v35, %v3276_v53  ;;  %v4376_v35 = vld [vmem:[#allocation2 + $0x29] sm:$0xff] }
 0x40a   :  { %v3522_v42 = vpop.f32.mrf.mxu0  ;;  %v11337_v6 = vpack.c.bf16 %v4377_v32, %v4376_v35 }
 0x40b   :  { %v3691_v29 = vpop.f32.mrf.mxu1  ;;  %v3547_v56 = vadd.f32 %v3522_v42, %v3374_v18  ;;  %v4379_v42 = vld [vmem:[#allocation2 + $0x41] sm:$0xff] }
 0x40d   :  { %v16268_v48 = vadd.f32 %v3691_v29, %v3547_v56  ;;  %11262 = vmatmul.msk.bf16.gmra.mxu0 %vm14377_vm4, %v16077_v46  ;;  %3848 = vmatmul.bf16.gmra.mxu2 %v18239_v13  ;;  %v4378_v56 = vld [vmem:[#allocation2 + $0x39] sm:$0xff] }
 0x40e   :  { %4342 = vmatmul.bf16.gmra.mxu1 %v16039_v37 }
 0x410   :  { %v16277_v10 = vpop.f32.mrf.mxu3  ;;  %v3281_v39 = vpop.f32.mrf.mxu2 }
 0x412   :  { %v16279_v25 = vpop.f32.mrf.mxu0 }
 0x413   :  { %v16281_v1 = vpop.f32.mrf.mxu1 }
 0x415   :  { %11209 = vmatmul.msk.bf16.gmra.mxu3 %vm14423_vm6, %v18240_v14 }
 0x418   :  { %v3378_v46 = vpop.f32.mrf.mxu3  ;;  %v16288_v37 = vpop.f32.mrf.mxu2 }
 0x419   :  { %v3379_v20 = vadd.f32 %v3378_v46, %v3281_v39 }
 0x41a   :  { %v3527_v27 = vpop.f32.mrf.mxu0 }
 0x41b   :  { %v3696_v16 = vpop.f32.mrf.mxu1  ;;  %v3549_v15 = vadd.f32 %v3527_v27, %v3379_v20 }
 0x41d   :  { %v16290_v21 = vadd.f32 %v3696_v16, %v3549_v15  ;;  %11265 = vmatmul.msk.bf16.gmra.mxu0 %vm14377_vm4, %v16124_v38  ;;  %3853 = vmatmul.bf16.gmra.mxu2 %v18241_v17  ;;  %v4382_v16 = vld [vmem:[#allocation2 + $0x61] sm:$0xff] }
 0x41e   :  { %4347 = vmatmul.bf16.gmra.mxu1 %v16110_v5 }
 0x420   :  { %v16299_v43 = vpop.f32.mrf.mxu3  ;;  %v3286_v51 = vpop.f32.mrf.mxu2 }
 0x422   :  { %v16303_v3 = vpop.f32.mrf.mxu0 }
 0x423   :  { %v16305_v52 = vpop.f32.mrf.mxu1 }
 0x425   :  { %11212 = vmatmul.msk.bf16.gmra.mxu3 %vm14423_vm6, %v11211_v54 }
 0x428   :  { %v3383_v49 = vpop.f32.mrf.mxu3  ;;  %v16311_v38 = vpop.f32.mrf.mxu2 }
 0x429   :  { %v3384_v5 = vadd.f32 %v3383_v49, %v3286_v51 }
 0x42a   :  { %v3532_v34 = vpop.f32.mrf.mxu0 }
 0x42b   :  { %v3551_v31 = vadd.f32 %v3532_v34, %v3384_v5  ;;  %v3701_v40 = vpop.f32.mrf.mxu1 }
 0x42d   :  { %v3720_v22 = vadd.f32 %v3701_v40, %v3551_v31  ;;  %11268 = vmatmul.msk.bf16.gmra.mxu0 %vm14752_vm7, %v11267_v58  ;;  %11335 = vmatmul.msk.bf16.vlgmr.msra.gmra.mxu2 %vm14423_vm6, %v11334_v57 }
 0x42e   :  { %4352 = vmatmul.bf16.gmra.mxu1 %v4244_v23 }
 0x430   :  { %v3819_v4 = vpop.f32.mrf.mxu2  ;;  %v16353_v54 = vpop.f32.mrf.mxu3 }
 0x431   :  { %v3859_v53 = vadd.f32 %v3819_v4, %v16155_v50  ;;  %v11340_v50 = vpack.c.bf16 %v4379_v42, %v4378_v56  ;;  %v11355_v4 = vpack.c.bf16 0.0, %v16301_v61 }
 0x433   :  { %v16363_v5 = vpop.f32.mrf.mxu1 }
 0x438   :  { %v3821_v62 = vpop.f32.mrf.mxu2  ;;  %v3988_v60 = vpop.f32.mrf.mxu3 }
 0x439   :  { %v3860_v28 = vadd.f32 %v3821_v62, %v16164_v47 }
 0x43b   :  { %v4318_v31 = vpop.f32.mrf.mxu1 }
 0x43d   :  { %11338 = vmatmul.msk.bf16.gmra.mxu2 %vm14423_vm6, %v11337_v6  ;;  %v4028_v6 = vadd.f32 %v3988_v60, %v3859_v53  ;;  %v13692_v53 = vld [vmem:[%s18199_s7 + $0x238] sm:$0xff]  ;;  %v13739_v60 = vld [vmem:[%s18199_s7 + $0x3b0] sm:$0xff] }
 0x43e   :  { %5360 = vmatpush.bf16.msra.mxu3 %v13692_v53  ;;  %v13729_v53 = vld [vmem:[%s18199_s7 + $0x360] sm:$0xff] }
 0x440   :  { %v3824_v18 = vpop.f32.mrf.mxu2  ;;  %v3990_v58 = vpop.f32.mrf.mxu3 }
 0x441   :  { %v16324_v9 = vadd.f32 %v3824_v18, %v16171_v44  ;;  %v11343_v44 = vpack.c.bf16 0.0, %v16196_v33 }
 0x448   :  { %v3826_v12 = vpop.f32.mrf.mxu2  ;;  %v3993_v57 = vpop.f32.mrf.mxu3 }
 0x449   :  { %v16327_v29 = vadd.f32 %v3826_v12, %v16180_v30 }
 0x44d   :  { %11341 = vmatmul.msk.bf16.gmra.mxu2 %vm14423_vm6, %v11340_v50  ;;  %v4029_v50 = vadd.f32 %v3990_v58, %v3860_v28  ;;  %v13740_v28 = vld [vmem:[%s18199_s7 + $0x3b8] sm:$0xff] }
 0x44e   :  { %5438 = vmatpush.bf16.msrb.mxu2 %v13740_v28 }
 0x450   :  { %v3829_v47 = vpop.f32.mrf.mxu2  ;;  %v3995_v35 = vpop.f32.mrf.mxu3 }
 0x451   :  { %v16332_v13 = vadd.f32 %v3829_v47, %v16187_v0  ;;  %v4381_v0 = vld [vmem:[#allocation2 + $0x59] sm:$0xff] }
 0x452   :  { %v11346_v17 = vpack.c.bf16 %v4382_v16, %v4381_v0  ;;  %v16391_v47 = vld [vmem:[%s18198_s6] ss:$0 sm:$0xff]  ;;  %v13691_v0 = vld [vmem:[%s18199_s7 + $0x230] sm:$0xff]  ;;  %5439 = vmatpush.bf16.msrb.mxu2 %v13739_v60 }
 0x453   :  { %5361 = vmatpush.bf16.msra.mxu3 %v13691_v0  ;;  %v13728_v0 = vld [vmem:[%s18199_s7 + $0x358] sm:$0xff]  ;;  %v13687_v60 = vld [vmem:[%s18199_s7 + $0x210] sm:$0xff] }
 0x458   :  { %v3831_v39 = vpop.f32.mrf.mxu2  ;;  %v16386_v56 = vpop.f32.mrf.mxu3 }
 0x459   :  { %v16335_v14 = vadd.f32 %v3831_v39, %v16200_v11  ;;  %v13724_v39 = vld [vmem:[%s18199_s7 + $0x338] sm:$0xff] }
 0x45a   :  { %5412 = vmatpush.bf16.msrb.mxu0 %v13724_v39 }
 0x45d   :  { %11344 = vmatmul.msk.bf16.gmra.mxu2 %vm14894_vm8, %v11343_v44  ;;  %v13732_v44 = vld [vmem:[%s18199_s7 + $0x378] sm:$0xff] }
 0x45e   :  { %5425 = vmatpush.bf16.msrb.mxu1 %v13732_v44 }
 0x460   :  { %v3834_v30 = vpop.f32.mrf.mxu2 }
 0x461   :  { %v16341_v20 = vadd.f32 %v3834_v30, %v16206_v45  ;;  %v16358_v45 = vpop.f32.mrf.mxu0 }
 0x468   :  { %v3836_v27 = vpop.f32.mrf.mxu2 }
 0x469   :  { %v16344_v15 = vadd.f32 %v3836_v27, %v16219_v24 }
 0x46d   :  { %11347 = vmatmul.msk.bf16.gmra.mxu2 %vm14423_vm6, %v11346_v17  ;;  %v13723_v17 = vld [vmem:[%s18199_s7 + $0x330] sm:$0xff] }
 0x46e   :  { %5413 = vmatpush.bf16.msrb.mxu0 %v13723_v17 }
 0x470   :  { %v3839_v11 = vpop.f32.mrf.mxu2 }
 0x471   :  { %v16349_v33 = vadd.f32 %v3839_v11, %v16234_v59  ;;  %v4153_v59 = vpop.f32.mrf.mxu0  ;;  %v13731_v11 = vld [vmem:[%s18199_s7 + $0x370] sm:$0xff] }
 0x472   :  { %v4193_v12 = vadd.f32 %v4153_v59, %v4028_v6  ;;  %5426 = vmatpush.bf16.msrb.mxu1 %v13731_v11 }
 0x474   :  { %v4358_v61 = vadd.f32 %v4318_v31, %v4193_v12  ;;  %v4030_v31 = vadd.f32 %v3993_v57, %v16324_v9  ;;  %v13730_v9 = vld [vmem:[%s18199_s7 + $0x368] sm:$0xff] }
 0x475   :  { %v13738_v57 = vld [vmem:[%s18199_s7 + $0x3a8] sm:$0xff] }
 0x476   :  { %5427 = vmatpush.bf16.msrb.mxu1 %v13730_v9  ;;  %5440 = vmatpush.bf16.msrb.mxu2 %v13738_v57  ;;  %v4032_v9 = vadd.f32 %v16386_v56, %v16332_v13  ;;  %v13686_v57 = vld [vmem:[%s18199_s7 + $0x208] sm:$0xff] }
 0x477   :  { %v13734_v13 = vld [vmem:[%s18199_s7 + $0x388] sm:$0xff] }
 0x478   :  { %v16351_v51 = vpop.f32.mrf.mxu2 }
 0x479   :  { %v4155_v26 = vpop.f32.mrf.mxu0 }
 0x47a   :  { %v4194_v27 = vadd.f32 %v4155_v26, %v4029_v50  ;;  %v13689_v50 = vld [vmem:[%s18199_s7 + $0x220] sm:$0xff]  ;;  %5428 = vmatpush.bf16.msrb.mxu1 %v13729_v53 }
 0x47d   :  { %11350 = vmatmul.msk.bf16.gmra.mxu2 %vm14423_vm6, %v16106_v2 }
 0x47e   :  { %5429 = vmatpush.bf16.msrb.mxu1 %v13728_v0  ;;  %v13644_v0 = vld [vmem:[%s18199_s7 + $0xb8] sm:$0xff] }
 0x480   :  { %v3844_v24 = vpop.f32.mrf.mxu2 }
 0x481   :  { %v16361_v49 = vadd.f32 %v3844_v24, %v16268_v48  ;;  %v4320_v48 = vpop.f32.mrf.mxu1  ;;  %v4158_v62 = vpop.f32.mrf.mxu0 }
 0x482   :  { %v4359_v59 = vadd.f32 %v4320_v48, %v4194_v27  ;;  %v4195_v6 = vadd.f32 %v4158_v62, %v4030_v31  ;;  %v13737_v62 = vld [vmem:[%s18199_s7 + $0x3a0] sm:$0xff]  ;;  %v13688_v27 = vld [vmem:[%s18199_s7 + $0x218] sm:$0xff]  ;;  %v13727_v31 = vld [vmem:[%s18199_s7 + $0x350] sm:$0xff] }
 0x483   :  { %5441 = vmatpush.bf16.msrb.mxu2 %v13737_v62  ;;  %5430 = vmatpush.bf16.msrb.mxu1 %v13727_v31  ;;  %v13717_v62 = vld [vmem:[%s18199_s7 + $0x300] sm:$0xff] }
 0x488   :  { %v16365_v34 = vpop.f32.mrf.mxu2 }
 0x489   :  { %v16380_v18 = vpop.f32.mrf.mxu0 }
 0x48d   :  { %11353 = vmatmul.msk.bf16.gmra.mxu2 %vm14423_vm6, %v16139_v19  ;;  %v4323_v19 = vpop.f32.mrf.mxu1 }
 0x48e   :  { %v4360_v44 = vadd.f32 %v4323_v19, %v4195_v6  ;;  %v13718_v6 = vld [vmem:[%s18199_s7 + $0x308] sm:$0xff] }
 0x490   :  { %v3849_v23 = vpop.f32.mrf.mxu2 }
 0x491   :  { %v16371_v2 = vadd.f32 %v3849_v23, %v16290_v21  ;;  %v16405_v30 = vpop.f32.mrf.mxu0  ;;  %v16423_v23 = vpop.f32.mrf.mxu3 }
 0x492   :  { %v4197_v56 = vadd.f32 %v16405_v30, %v4032_v9  ;;  %v13725_v30 = vld [vmem:[%s18199_s7 + $0x340] sm:$0xff]  ;;  %v13698_v9 = vld [vmem:[%s18199_s7 + $0x268] sm:$0xff] }
 0x495   :  { %v16384_v42 = vpop.f32.mrf.mxu1 }
 0x498   :  { %v16373_v40 = vpop.f32.mrf.mxu2 }
 0x49d   :  { %11356 = vmatmul.msk.bf16.gmra.mxu2 %vm14894_vm8, %v11355_v4  ;;  %v16421_v58 = vpop.f32.mrf.mxu1  ;;  %v13690_v4 = vld [vmem:[%s18199_s7 + $0x228] sm:$0xff] }
 0x49e   :  { %5362 = vmatpush.bf16.msra.mxu3 %v13690_v4 }
 0x4a0   :  { %v3854_v32 = vpop.f32.mrf.mxu2 }
 0x4a1   :  { %v16378_v63 = vadd.f32 %v3854_v32, %v3720_v22  ;;  %v13722_v32 = vld [vmem:[%s18199_s7 + $0x328] sm:$0xff] }
 0x4a2   :  { %5414 = vmatpush.bf16.msrb.mxu0 %v13722_v32  ;;  %5363 = vmatpush.bf16.msra.mxu3 %v13689_v50 }
 0x4a5   :  { %v16462_v17 = vpop.f32.mrf.mxu1 }
 0x4a6   :  { %5364 = vmatpush.bf16.msra.mxu3 %v13688_v27  ;;  %v13628_v27 = vld [vmem:[%s18199_s7 + $0x38] sm:$0xff] }
 0x4a8   :  { %v16382_v21 = vpop.f32.mrf.mxu2 }
 0x4aa   :  { %5365 = vmatpush.bf16.msra.mxu3 %v13687_v60 }
 0x4ad   :  { %v16501_v50 = vpop.f32.mrf.mxu1 }
 0x4ae   :  { %5366 = vmatpush.bf16.msra.mxu3 %v13686_v57 }
 0x4b0   :  { %v4483_v22 = vpop.f32.mrf.mxu2 }
 0x4b1   :  { %v4523_v46 = vadd.f32 %v4483_v22, %v4358_v61  ;;  %v16438_v61 = vpop.f32.mrf.mxu0  ;;  %v13721_v22 = vld [vmem:[%s18199_s7 + $0x320] sm:$0xff] }
 0x4b2   :  { %5415 = vmatpush.bf16.msrb.mxu0 %v13721_v22 }
 0x4b3   :  { %v4543_v16 = vadd.f32 %v16391_v47, %v4523_v46  ;;  %v4031_v46 = vadd.f32 %v3995_v35, %v16327_v29  ;;  %v13736_v29 = vld [vmem:[%s18199_s7 + $0x398] sm:$0xff]  ;;  %v16467_v35 = vpop.f32.mrf.mxu3 }
 0x4b4   :  { %5442 = vmatpush.bf16.msrb.mxu2 %v13736_v29  ;;  %v4033_v29 = vadd.f32 %v16423_v23, %v16335_v14  ;;  %v13635_v14 = vld [vmem:[%s18199_s7 + $0x70] sm:$0xff] }
 0x4b5   :  { %v4559_v24 = vmax.f32 %v4543_v16, 0.0  ;;  %v13720_v16 = vld [vmem:[%s18199_s7 + $0x318] sm:$0xff]  ;;  %v4196_v11 = vadd.f32 %v16380_v18, %v4031_v46  ;;  %v13735_v18 = vld [vmem:[%s18199_s7 + $0x390] sm:$0xff]  ;;  %v13733_v46 = vld [vmem:[%s18199_s7 + $0x380] sm:$0xff] }
 0x4b6   :  { %5416 = vmatpush.bf16.msrb.mxu0 %v13720_v16  ;;  %v13636_v16 = vld [vmem:[%s18199_s7 + $0x78] sm:$0xff]  ;;  %v13643_v23 = vld [vmem:[%s18199_s7 + $0xb0] sm:$0xff]  ;;  %v4198_v31 = vadd.f32 %v16438_v61, %v4033_v29  ;;  %v13634_v61 = vld [vmem:[%s18199_s7 + $0x68] sm:$0xff] }
 0x4b7   :  { %4575 = vst [vmem:[#allocation3] sm:$0xff] %v4559_v24  ;;  %v4361_v32 = vadd.f32 %v16384_v42, %v4196_v11 }
 0x4b8   :  { %v4485_v26 = vpop.f32.mrf.mxu2  ;;  %5443 = vmatpush.bf16.msrb.mxu2 %v13735_v18  ;;  %v16549_v18 = vpop.f32.mrf.mxu1 }
 0x4b9   :  { %v4524_v48 = vadd.f32 %v4485_v26, %v4359_v59  ;;  %v13719_v59 = vld [vmem:[%s18199_s7 + $0x310] sm:$0xff]  ;;  %v16483_v4 = vpop.f32.mrf.mxu0 }
 0x4ba   :  { %5417 = vmatpush.bf16.msrb.mxu0 %v13719_v59  ;;  %v13699_v59 = vld [vmem:[%s18199_s7 + $0x270] sm:$0xff] }
 0x4bb   :  { %v4544_v12 = vadd.f32 %v16391_v47, %v4524_v48  ;;  %v16504_v53 = vpop.f32.mrf.mxu3 }
 0x4bc   :  { %5444 = vmatpush.bf16.msrb.mxu2 %v13734_v13 }
 0x4bd   :  { %v4560_v39 = vmax.f32 %v4544_v12, 0.0  ;;  %v13726_v12 = vld [vmem:[%s18199_s7 + $0x348] sm:$0xff] }
 0x4be   :  { %5418 = vmatpush.bf16.msrb.mxu0 %v13718_v6  ;;  %5431 = vmatpush.bf16.msrb.mxu1 %v13726_v12  ;;  %v13642_v6 = vld [vmem:[%s18199_s7 + $0xa8] sm:$0xff]  ;;  %v4363_v12 = vadd.f32 %v16462_v17, %v4198_v31  ;;  %v13633_v17 = vld [vmem:[%s18199_s7 + $0x60] sm:$0xff] }
 0x4bf   :  { %4576 = vst [vmem:[#allocation3 + $0x8] sm:$0xff] %v4560_v39  ;;  %v13685_v39 = vld [vmem:[%s18199_s7 + $0x200] sm:$0xff] }
 0x4c0   :  { %v4488_v28 = vpop.f32.mrf.mxu2  ;;  %5367 = vmatpush.bf16.msra.mxu3 %v13685_v39  ;;  %5445 = vmatpush.bf16.msrb.mxu2 %v13733_v46  ;;  %v13625_v39 = vld [vmem:[%s18199_s7 + $0x20] sm:$0xff]  ;;  %v13696_v46 = vld [vmem:[%s18199_s7 + $0x258] sm:$0xff] }
 0x4c1   :  { %v4525_v19 = vadd.f32 %v4488_v28, %v4360_v44  ;;  %v13700_v28 = vld [vmem:[%s18199_s7 + $0x278] sm:$0xff]  ;;  %v16533_v11 = vpop.f32.mrf.mxu0 }
 0x4c2   :  { %5419 = vmatpush.bf16.msrb.mxu0 %v13717_v62  ;;  %5432 = vmatpush.bf16.msrb.mxu1 %v13725_v30 }
 0x4c3   :  { %v4545_v24 = vadd.f32 %v16391_v47, %v4525_v19  ;;  %v4362_v19 = vadd.f32 %v16421_v58, %v4197_v56  ;;  %v13627_v58 = vld [vmem:[%s18199_s7 + $0x30] sm:$0xff]  ;;  %v4008_v57 = vpop.f32.mrf.mxu3 }
 0x4c4   :  { %5373 = vmatpush.bf16.msrb.mxu3 %v13700_v28  ;;  %5874 = vmatpush.bf16.msra.mxu2 %v13644_v0  ;;  %v13624_v28 = vld [vmem:[%s18199_s7 + $0x18] sm:$0xff]  ;;  %v4035_v0 = vadd.f32 %v16504_v53, %v16344_v15  ;;  %v13631_v15 = vld [vmem:[%s18199_s7 + $0x50] sm:$0xff] }
 0x4c5   :  { %v4561_v26 = vmax.f32 %v4545_v24, 0.0  ;;  %v13639_v53 = vld [vmem:[%s18199_s7 + $0x90] sm:$0xff] }
 0x4c6   :  { %5848 = vmatpush.bf16.msra.mxu0 %v13628_v27  ;;  %5861 = vmatpush.bf16.msra.mxu1 %v13636_v16  ;;  %v13632_v27 = vld [vmem:[%s18199_s7 + $0x58] sm:$0xff] }
 0x4c7   :  { %4577 = vst [vmem:[#allocation3 + $0x10] sm:$0xff] %v4561_v26 }
 0x4c8   :  { %v4490_v48 = vpop.f32.mrf.mxu2  ;;  %5374 = vmatpush.bf16.msrb.mxu3 %v13699_v59  ;;  %5875 = vmatpush.bf16.msra.mxu2 %v13643_v23  ;;  %v13695_v59 = vld [vmem:[%s18199_s7 + $0x250] sm:$0xff] }
 0x4c9   :  { %v4526_v42 = vadd.f32 %v4490_v48, %v4361_v32  ;;  %v13626_v48 = vld [vmem:[%s18199_s7 + $0x28] sm:$0xff] }
 0x4ca   :  { %5849 = vmatpush.bf16.msra.mxu0 %v13627_v58  ;;  %5862 = vmatpush.bf16.msra.mxu1 %v13635_v14  ;;  %v3371_v58 = vadd.f32 %v16246_v36, %v16229_v41  ;;  %v4200_v14 = vadd.f32 %v16533_v11, %v4035_v0  ;;  %v13630_v41 = vld [vmem:[%s18199_s7 + $0x48] sm:$0xff] }
 0x4cb   :  { %v4546_v22 = vadd.f32 %v16391_v47, %v4526_v42  ;;  %v4034_v42 = vadd.f32 %v16467_v35, %v16341_v20  ;;  %v4173_v20 = vpop.f32.mrf.mxu0  ;;  %v13641_v35 = vld [vmem:[%s18199_s7 + $0xa0] sm:$0xff]  ;;  %v4010_v29 = vpop.f32.mrf.mxu3  ;;  %v13638_v36 = vld [vmem:[%s18199_s7 + $0x88] sm:$0xff] }
 0x4cc   :  { %5375 = vmatpush.bf16.msrb.mxu3 %v13698_v9  ;;  %5876 = vmatpush.bf16.msra.mxu2 %v13642_v6  ;;  %v13622_v9 = vld [vmem:[%s18199_s7 + $0x8] sm:$0xff]  ;;  %v3546_v11 = vadd.f32 %v16251_v55, %v3371_v58  ;;  %v13621_v55 = vld [vmem:[%s18199_s7] sm:$0xff] }
 0x4cd   :  { %v4562_v44 = vmax.f32 %v4546_v22, 0.0  ;;  %v13697_v22 = vld [vmem:[%s18199_s7 + $0x260] sm:$0xff]  ;;  %v4199_v62 = vadd.f32 %v16483_v4, %v4034_v42  ;;  %v13640_v4 = vld [vmem:[%s18199_s7 + $0x98] sm:$0xff] }
 0x4ce   :  { %5850 = vmatpush.bf16.msra.mxu0 %v13626_v48  ;;  %5863 = vmatpush.bf16.msra.mxu1 %v13634_v61  ;;  %v4365_v48 = vadd.f32 %v16549_v18, %v4200_v14  ;;  %v4036_v61 = vadd.f32 %v4008_v57, %v16349_v33  ;;  %v13629_v33 = vld [vmem:[%s18199_s7 + $0x40] sm:$0xff] }
 0x4cf   :  { %4578 = vst [vmem:[#allocation3 + $0x18] sm:$0xff] %v4562_v44  ;;  %v4364_v16 = vadd.f32 %v16501_v50, %v4199_v62  ;;  %v13623_v50 = vld [vmem:[%s18199_s7 + $0x10] sm:$0xff]  ;;  %v13637_v57 = vld [vmem:[%s18199_s7 + $0x80] sm:$0xff] }
 0x4d0   :  { %v4493_v24 = vpop.f32.mrf.mxu2  ;;  %5376 = vmatpush.bf16.msrb.mxu3 %v13697_v22  ;;  %5877 = vmatpush.bf16.msra.mxu2 %v13641_v35  ;;  %v4201_v22 = vadd.f32 %v4173_v20, %v4036_v61 }
 0x4d1   :  { %v4527_v60 = vadd.f32 %v4493_v24, %v4362_v19  ;;  %v4338_v19 = vpop.f32.mrf.mxu1 }
 0x4d2   :  { %5851 = vmatpush.bf16.msra.mxu0 %v13625_v39  ;;  %5864 = vmatpush.bf16.msra.mxu1 %v13633_v17 }
 0x4d3   :  { %v4547_v26 = vadd.f32 %v16391_v47, %v4527_v60  ;;  %v4175_v31 = vpop.f32.mrf.mxu0  ;;  %v4013_v18 = vpop.f32.mrf.mxu3 }
 0x4d4   :  { %5377 = vmatpush.bf16.msrb.mxu3 %v13696_v46  ;;  %5878 = vmatpush.bf16.msra.mxu2 %v13640_v4 }
 0x4d5   :  { %v4563_v32 = vmax.f32 %v4547_v26, 0.0 }
 0x4d6   :  { %5852 = vmatpush.bf16.msra.mxu0 %v13624_v28  ;;  %5865 = vmatpush.bf16.msra.mxu1 %v13632_v27  ;;  %v3376_v27 = vadd.f32 %v16277_v10, %v16263_v8 }
 0x4d7   :  { %4579 = vst [vmem:[#allocation3 + $0x20] sm:$0xff] %v4563_v32  ;;  %v13694_v32 = vld [vmem:[%s18199_s7 + $0x248] sm:$0xff] }
 0x4d8   :  { %v4495_v13 = vpop.f32.mrf.mxu2  ;;  %5378 = vmatpush.bf16.msrb.mxu3 %v13695_v59  ;;  %5879 = vmatpush.bf16.msra.mxu2 %v13639_v53 }
 0x4d9   :  { %v4528_v56 = vadd.f32 %v4495_v13, %v4363_v12  ;;  %v4340_v12 = vpop.f32.mrf.mxu1  ;;  %v13693_v13 = vld [vmem:[%s18199_s7 + $0x240] sm:$0xff] }
 0x4da   :  { %5853 = vmatpush.bf16.msra.mxu0 %v13623_v50  ;;  %5866 = vmatpush.bf16.msra.mxu1 %v13631_v15 }
 0x4db   :  { %v4548_v30 = vadd.f32 %v16391_v47, %v4528_v56  ;;  %v3715_v56 = vadd.f32 %v16253_v7, %v3546_v11  ;;  %v4178_v62 = vpop.f32.mrf.mxu0 }
 0x4dc   :  { %5379 = vmatpush.bf16.msrb.mxu3 %v13694_v32  ;;  %5880 = vmatpush.bf16.msra.mxu2 %v13638_v36 }
 0x4dd   :  { %v4564_v44 = vmax.f32 %v4548_v30, 0.0  ;;  %v3868_v17 = vadd.f32 %v16351_v51, %v3715_v56  ;;  %v4366_v30 = vadd.f32 %v4338_v19, %v4201_v22  ;;  %v3548_v51 = vadd.f32 %v16279_v25, %v3376_v27  ;;  %v4794_v56 = vld [vmem:[#allocation3 + $0xd] sm:$0x1]  ;;  %v13660_v27 = vld [vmem:[%s18199_s7 + $0x138] sm:$0xff] }
 0x4de   :  { %5854 = vmatpush.bf16.msra.mxu0 %v13622_v9  ;;  %5867 = vmatpush.bf16.msra.mxu1 %v13630_v41  ;;  %v3381_v25 = vadd.f32 %v16299_v43, %v16288_v37 }
 0x4df   :  { %4580 = vst [vmem:[#allocation3 + $0x28] sm:$0xff] %v4564_v44  ;;  %v4037_v44 = vadd.f32 %v4010_v29, %v3868_v17  ;;  %v3717_v50 = vadd.f32 %v16281_v1, %v3548_v51 }
 0x4e0   :  { %v4498_v24 = vpop.f32.mrf.mxu2  ;;  %5380 = vmatpush.bf16.msrb.mxu3 %v13693_v13  ;;  %5881 = vmatpush.bf16.msra.mxu2 %v13637_v57  ;;  %v3550_v41 = vadd.f32 %v16303_v3, %v3381_v25  ;;  %v4792_v3 = vld [vmem:[#allocation3 + $0xc] sm:$0x1] }
 0x4e1   :  { %v4529_v60 = vadd.f32 %v4498_v24, %v4364_v16  ;;  %v4202_v7 = vadd.f32 %v4175_v31, %v4037_v44  ;;  %v4343_v20 = vpop.f32.mrf.mxu1  ;;  %v4015_v16 = vpop.f32.mrf.mxu3  ;;  %v3870_v10 = vadd.f32 %v16365_v34, %v3717_v50  ;;  %v4784_v34 = vld [vmem:[#allocation3 + $0x8] sm:$0x1] }
 0x4e2   :  { %5855 = vmatpush.bf16.msra.mxu0 %v13621_v55  ;;  %5868 = vmatpush.bf16.msra.mxu1 %v13629_v33  ;;  %v3719_v33 = vadd.f32 %v16305_v52, %v3550_v41  ;;  %v13666_v41 = vld [vmem:[%s18199_s7 + $0x168] sm:$0xff] }
 0x4e3   :  { %v4549_v23 = vadd.f32 %v16391_v47, %v4529_v60  ;;  %v4367_v24 = vadd.f32 %v4340_v12, %v4202_v7  ;;  %v4038_v60 = vadd.f32 %v4013_v18, %v16361_v49  ;;  %v4180_v19 = vpop.f32.mrf.mxu0  ;;  %v4039_v14 = vadd.f32 %v4015_v16, %v3870_v10  ;;  %v13668_v16 = vld [vmem:[%s18199_s7 + $0x178] sm:$0xff] }
 0x4e4   :  { %v3872_v51 = vadd.f32 %v16373_v40, %v3719_v33  ;;  %v13667_v40 = vld [vmem:[%s18199_s7 + $0x170] sm:$0xff]  ;;  %v13665_v33 = vld [vmem:[%s18199_s7 + $0x160] sm:$0xff] }
 0x4e5   :  { %v4565_v26 = vmax.f32 %v4549_v23, 0.0  ;;  %v4203_v15 = vadd.f32 %v4178_v62, %v4038_v60  ;;  %v4204_v32 = vadd.f32 %v4180_v19, %v4039_v14  ;;  %v13707_v19 = vld [vmem:[%s18199_s7 + $0x2b0] sm:$0xff]  ;;  %v13706_v14 = vld [vmem:[%s18199_s7 + $0x2a8] sm:$0xff] }
 0x4e7   :  { %4581 = vst [vmem:[#allocation3 + $0x30] sm:$0xff] %v4565_v26  ;;  %v4368_v31 = vadd.f32 %v4343_v20, %v4203_v15  ;;  %v13675_v15 = vld [vmem:[%s18199_s7 + $0x1b0] sm:$0xff] }
 0x4e8   :  { %v4500_v6 = vpop.f32.mrf.mxu2 }
 0x4e9   :  { %v4530_v42 = vadd.f32 %v4500_v6, %v4365_v48  ;;  %v4345_v53 = vpop.f32.mrf.mxu1  ;;  %v4018_v23 = vpop.f32.mrf.mxu3 }
 0x4ea   :  { %v4369_v11 = vadd.f32 %v4345_v53, %v4204_v32  ;;  %v4040_v12 = vadd.f32 %v4018_v23, %v16371_v2  ;;  %v13708_v2 = vld [vmem:[%s18199_s7 + $0x2b8] sm:$0xff]  ;;  %v13658_v32 = vld [vmem:[%s18199_s7 + $0x128] sm:$0xff] }
 0x4eb   :  { %v4550_v39 = vadd.f32 %v16391_v47, %v4530_v42  ;;  %v4183_v9 = vpop.f32.mrf.mxu0 }
 0x4ec   :  { %v4205_v7 = vadd.f32 %v4183_v9, %v4040_v12 }
 0x4ed   :  { %v4566_v35 = vmax.f32 %v4550_v39, 0.0 }
 0x4ef   :  { %4582 = vst [vmem:[#allocation3 + $0x38] sm:$0xff] %v4566_v35 }
 0x4f0   :  { %v4503_v46 = vpop.f32.mrf.mxu2 }
 0x4f1   :  { %v4531_v28 = vadd.f32 %v4503_v46, %v4366_v30  ;;  %v4348_v42 = vpop.f32.mrf.mxu1  ;;  %v4020_v18 = vpop.f32.mrf.mxu3  ;;  %v4796_v30 = vld [vmem:[#allocation3 + $0xe] sm:$0x1] }
 0x4f2   :  { %v4370_v50 = vadd.f32 %v4348_v42, %v4205_v7 }
 0x4f3   :  { %v4551_v4 = vadd.f32 %v16391_v47, %v4531_v28 }
 0x4f5   :  { %v4567_v0 = vmax.f32 %v4551_v4, 0.0 }
 0x4f7   :  { %4583 = vst [vmem:[#allocation3 + $0x40] sm:$0xff] %v4567_v0  ;;  %v13676_v0 = vld [vmem:[%s18199_s7 + $0x1b8] sm:$0xff] }
 0x4f8   :  { %v4505_v29 = vpop.f32.mrf.mxu2 }
 0x4f9   :  { %v4532_v59 = vadd.f32 %v4505_v29, %v4367_v24  ;;  %v4185_v24 = vpop.f32.mrf.mxu0  ;;  %v4041_v29 = vadd.f32 %v4020_v18, %v3872_v51  ;;  %v13703_v51 = vld [vmem:[%s18199_s7 + $0x290] sm:$0xff] }
 0x4fb   :  { %v4552_v8 = vadd.f32 %v16391_v47, %v4532_v59  ;;  %v13659_v59 = vld [vmem:[%s18199_s7 + $0x130] sm:$0xff]  ;;  %v4206_v25 = vadd.f32 %v4185_v24, %v4041_v29 }
 0x4fc   :  { %v13655_v24 = vld [vmem:[%s18199_s7 + $0x110] sm:$0xff] }
 0x4fd   :  { %v4568_v58 = vmax.f32 %v4552_v8, 0.0  ;;  %v13671_v29 = vld [vmem:[%s18199_s7 + $0x190] sm:$0xff] }
 0x4fe   :  { %v4592_v53 = vld [vmem:[#allocation3 + $0x40] sm:$0x1]  ;;  %v4594_v23 = vld [vmem:[#allocation3 + $0x41] sm:$0x1]  ;;  %v4596_v9 = vld [vmem:[#allocation3 + $0x42] sm:$0x1] }
 0x4ff   :  { %4584 = vst [vmem:[#allocation3 + $0x48] sm:$0xff] %v4568_v58 }
 0x500   :  { %v4508_v49 = vpop.f32.mrf.mxu2 }
 0x501   :  { %v4533_v26 = vadd.f32 %v4508_v49, %v4368_v31  ;;  %v3386_v31 = vadd.f32 %v16353_v54, %v16311_v38  ;;  %v4350_v49 = vpop.f32.mrf.mxu1  ;;  %v13674_v38 = vld [vmem:[%s18199_s7 + $0x1a8] sm:$0xff]  ;;  %v4188_v42 = vpop.f32.mrf.mxu0 }
 0x502   :  { %v4371_v12 = vadd.f32 %v4350_v49, %v4206_v25  ;;  %v13670_v25 = vld [vmem:[%s18199_s7 + $0x188] sm:$0xff]  ;;  %v4604_v49 = vld [vmem:[#allocation3 + $0x46] sm:$0x1] }
 0x503   :  { %v4553_v1 = vadd.f32 %v16391_v47, %v4533_v26  ;;  %v4023_v26 = vpop.f32.mrf.mxu3 }
 0x505   :  { %v4569_v36 = vmax.f32 %v4553_v1, 0.0 }
 0x506   :  { %v4785_v48 = vld [vmem:[#allocation3 + $0x48] sm:$0x1]  ;;  %v4793_v61 = vld [vmem:[#allocation3 + $0x4c] sm:$0x1]  ;;  %v4795_v6 = vld [vmem:[#allocation3 + $0x4d] sm:$0x1] }
 0x507   :  { %4585 = vst [vmem:[#allocation3 + $0x50] sm:$0xff] %v4569_v36  ;;  %v4802_v13 = vrot.slane %v4785_v48, 7  ;;  %v4822_v37 = vrot.slane %v4793_v61, 7  ;;  %v4827_v43 = vrot.slane %v4795_v6, 7  ;;  %v4797_v55 = vld [vmem:[#allocation3 + $0x4e] sm:$0x1]  ;;  %v3552_v6 = vadd.f32 %v16358_v45, %v3386_v31 }
 0x508   :  { %v4510_v57 = vpop.f32.mrf.mxu2  ;;  %v4832_v22 = vrot.slane %v4797_v55, 7  ;;  %v4787_v10 = vld [vmem:[#allocation3 + $0x49] sm:$0x1]  ;;  %v4609_v36 = vrot.slane %v4592_v53, 7  ;;  %v13705_v48 = vld [vmem:[%s18199_s7 + $0x2a0] sm:$0xff]  ;;  %v4620_v61 = vrot.slane %v4596_v9, 7  ;;  %v4042_v55 = vadd.f32 %v4023_v26, %v16378_v63 }
 0x509   :  { %v4534_v39 = vadd.f32 %v4510_v57, %v4369_v11  ;;  %v4803_v17 = vsel %vm4610_vm9, %v4802_v13, %v4784_v34  ;;  %v4823_v35 = vsel %vm4610_vm9, %v4822_v37, %v4792_v3  ;;  %v4828_v62 = vsel %vm4610_vm9, %v4827_v43, %v4794_v56  ;;  %v13657_v13 = vld [vmem:[%s18199_s7 + $0x120] sm:$0xff]  ;;  %v4786_v37 = vld [vmem:[#allocation3 + $0x9] sm:$0x1]  ;;  %v4353_v7 = vpop.f32.mrf.mxu1 }
 0x50a   :  { %v4840_v44 = vpack.c.bf16 %v4803_v17, %v4803_v17  ;;  %v4844_v52 = vpack.c.bf16 %v4823_v35, %v4823_v35  ;;  %v4845_v46 = vpack.c.bf16 %v4828_v62, %v4828_v62  ;;  %v4833_v28 = vsel %vm4610_vm9, %v4832_v22, %v4796_v30  ;;  %v4591_v43 = vld [vmem:[#allocation3] sm:$0x1]  ;;  %v4593_v3 = vld [vmem:[#allocation3 + $0x1] sm:$0x1]  ;;  %v4595_v63 = vld [vmem:[#allocation3 + $0x2] sm:$0x1] }
 0x50b   :  { %v4554_v20 = vadd.f32 %v16391_v47, %v4534_v39  ;;  %v4846_v4 = vpack.c.bf16 %v4833_v28, %v4833_v28  ;;  %v4807_v54 = vrot.slane %v4787_v10, 7  ;;  %v4615_v11 = vrot.slane %v4594_v23, 7  ;;  %v13673_v45 = vld [vmem:[%s18199_s7 + $0x1a0] sm:$0xff]  ;;  %v13704_v17 = vld [vmem:[%s18199_s7 + $0x298] sm:$0xff]  ;;  %v13654_v10 = vld [vmem:[%s18199_s7 + $0x108] sm:$0xff] }
 0x50c   :  { %5368 = vmatmul.bf16.vlgmr.msra.gmra.mxu3 %v4840_v44  ;;  %5420 = vmatmul.bf16.vlgmr.msrb.gmra.mxu0 %v4844_v52  ;;  %v4611_v57 = vsel %vm4610_vm9, %v4609_v36, %v4591_v43  ;;  %v3721_v35 = vadd.f32 %v16363_v5, %v3552_v6  ;;  %v13656_v44 = vld [vmem:[%s18199_s7 + $0x118] sm:$0xff]  ;;  %v4207_v52 = vadd.f32 %v4188_v42, %v4042_v55  ;;  %v4600_v53 = vld [vmem:[#allocation3 + $0x44] sm:$0x1]  ;;  %v13662_v31 = vld [vmem:[%s18199_s7 + $0x148] sm:$0xff] }
 0x50d   :  { %v4570_v60 = vmax.f32 %v4554_v20, 0.0  ;;  %5386 = vmatpush.bf16.msra.mxu3 %v13708_v2  ;;  %5433 = vmatmul.bf16.vlgmr.msrb.gmra.mxu1 %v4845_v46  ;;  %v4808_v18 = vsel %vm4610_vm9, %v4807_v54, %v4786_v37  ;;  %v4616_v22 = vsel %vm4610_vm9, %v4615_v11, %v4593_v3  ;;  %v4621_v2 = vsel %vm4610_vm9, %v4620_v61, %v4595_v63  ;;  %v13672_v5 = vld [vmem:[%s18199_s7 + $0x198] sm:$0xff]  ;;  %v4025_v20 = vpop.f32.mrf.mxu3  ;;  %v13701_v9 = vld [vmem:[%s18199_s7 + $0x280] sm:$0xff] }
 0x50e   :  { %5446 = vmatmul.bf16.vlgmr.msrb.gmra.mxu2 %v4846_v4  ;;  %5900 = vmatpush.bf16.msrb.mxu0 %v13660_v27  ;;  %v4841_v62 = vpack.c.bf16 %v4808_v18, %v4808_v18  ;;  %v4648_v30 = vpack.c.bf16 %v4611_v57, %v4611_v57  ;;  %v4649_v28 = vpack.c.bf16 %v4616_v22, %v4616_v22  ;;  %v13664_v27 = vld [vmem:[%s18199_s7 + $0x158] sm:$0xff]  ;;  %v13653_v54 = vld [vmem:[%s18199_s7 + $0x100] sm:$0xff] }
 0x50f   :  { %4586 = vst [vmem:[#allocation3 + $0x58] sm:$0xff] %v4570_v60  ;;  %5913 = vmatpush.bf16.msrb.mxu1 %v13668_v16  ;;  %5926 = vmatpush.bf16.msrb.mxu2 %v13676_v0  ;;  %v4650_v4 = vpack.c.bf16 %v4621_v2, %v4621_v2  ;;  %v3874_v16 = vadd.f32 %v16382_v21, %v3721_v35  ;;  %v13663_v21 = vld [vmem:[%s18199_s7 + $0x150] sm:$0xff]  ;;  %v13716_v36 = vld [vmem:[%s18199_s7 + $0x2f8] sm:$0xff]  ;;  %v4599_v11 = vld [vmem:[#allocation3 + $0x4] sm:$0x1] }
 0x510   :  { %v4513_v8 = vpop.f32.mrf.mxu2  ;;  %v4372_v60 = vadd.f32 %v4353_v7, %v4207_v52  ;;  %v13661_v61 = vld [vmem:[%s18199_s7 + $0x140] sm:$0xff]  ;;  %v13764_v37 = vld [vmem:[%s18199_s7 + $0x478] sm:$0xff]  ;;  %v13755_v35 = vld [vmem:[%s18199_s7 + $0x430] sm:$0xff] }
 0x511   :  { %v4535_v58 = vadd.f32 %v4513_v8, %v4370_v50  ;;  %5387 = vmatpush.bf16.msra.mxu3 %v13707_v19  ;;  %v4043_v19 = vadd.f32 %v4025_v20, %v3874_v16  ;;  %v4789_v8 = vld [vmem:[#allocation3 + $0x4a] sm:$0x1]  ;;  %v13669_v6 = vld [vmem:[%s18199_s7 + $0x180] sm:$0xff]  ;;  %v13712_v16 = vld [vmem:[%s18199_s7 + $0x2d8] sm:$0xff] }
 0x512   :  { %5901 = vmatpush.bf16.msrb.mxu0 %v13659_v59  ;;  %v4190_v59 = vpop.f32.mrf.mxu0  ;;  %v4812_v26 = vrot.slane %v4789_v8, 7  ;;  %v4601_v55 = vld [vmem:[#allocation3 + $0x5] sm:$0x1]  ;;  %v4603_v3 = vld [vmem:[#allocation3 + $0x6] sm:$0x1]  ;;  %v13714_v52 = vld [vmem:[%s18199_s7 + $0x2e8] sm:$0xff] }
 0x513   :  { %v4555_v1 = vadd.f32 %v16391_v47, %v4535_v58  ;;  %5914 = vmatpush.bf16.msrb.mxu1 %v13667_v40  ;;  %5927 = vmatpush.bf16.msrb.mxu2 %v13675_v15  ;;  %v13702_v15 = vld [vmem:[%s18199_s7 + $0x288] sm:$0xff]  ;;  %v4602_v58 = vld [vmem:[#allocation3 + $0x45] sm:$0x1] }
 0x514   :  { %v13753_v7 = vld [vmem:[%s18199_s7 + $0x420] sm:$0xff]  ;;  %v13758_v8 = vld [vmem:[%s18199_s7 + $0x448] sm:$0xff] }
 0x515   :  { %v4571_v34 = vmax.f32 %v4555_v1, 0.0  ;;  %5388 = vmatpush.bf16.msra.mxu3 %v13706_v14  ;;  %v4208_v14 = vadd.f32 %v4190_v59, %v4043_v19  ;;  %v4630_v1 = vrot.slane %v4600_v53, 7  ;;  %v13761_v20 = vld [vmem:[%s18199_s7 + $0x460] sm:$0xff]  ;;  %v13751_v19 = vld [vmem:[%s18199_s7 + $0x410] sm:$0xff]  ;;  %v13710_v59 = vld [vmem:[%s18199_s7 + $0x2c8] sm:$0xff] }
 0x516   :  { %5902 = vmatpush.bf16.msrb.mxu0 %v13658_v32  ;;  %v13766_v53 = vld [vmem:[%s18199_s7 + $0x488] sm:$0xff] }
 0x517   :  { %4587 = vst [vmem:[#allocation3 + $0x60] sm:$0xff] %v4571_v34  ;;  %5915 = vmatpush.bf16.msrb.mxu1 %v13666_v41  ;;  %5928 = vmatpush.bf16.msrb.mxu2 %v13674_v38  ;;  %v4635_v41 = vrot.slane %v4602_v58, 7  ;;  %v4355_v38 = vpop.f32.mrf.mxu1  ;;  %v4640_v34 = vrot.slane %v4604_v49, 7  ;;  %v4631_v18 = vsel %vm4610_vm9, %v4630_v1, %v4599_v11  ;;  %v5957_v58 = vld [vmem:[#allocation3 + $0x52] sm:$0x1]  ;;  %v13749_v49 = vld [vmem:[%s18199_s7 + $0x400] sm:$0xff] }
 0x518   :  { %v4515_v56 = vpop.f32.mrf.mxu2  ;;  %v13765_v1 = vld [vmem:[%s18199_s7 + $0x480] sm:$0xff] }
 0x519   :  { %v4536_v39 = vadd.f32 %v4515_v56, %v4371_v12  ;;  %5389 = vmatpush.bf16.msra.mxu3 %v13705_v48  ;;  %v4373_v48 = vadd.f32 %v4355_v38, %v4208_v14  ;;  %v4788_v12 = vld [vmem:[#allocation3 + $0xa] sm:$0x1]  ;;  %v4636_v57 = vsel %vm4610_vm9, %v4635_v41, %v4601_v55  ;;  %v4641_v56 = vsel %vm4610_vm9, %v4640_v34, %v4603_v3  ;;  %v13748_v41 = vld [vmem:[%s18199_s7 + $0x3f8] sm:$0xff]  ;;  %v5952_v38 = vld [vmem:[#allocation3 + $0x10] sm:$0x1] }
 0x51a   :  { %5903 = vmatpush.bf16.msrb.mxu0 %v13657_v13  ;;  %v13756_v13 = vld [vmem:[%s18199_s7 + $0x438] sm:$0xff]  ;;  %v4813_v43 = vsel %vm4610_vm9, %v4812_v26, %v4788_v12  ;;  %v4653_v2 = vpack.c.bf16 %v4636_v57, %v4636_v57  ;;  %v13757_v26 = vld [vmem:[%s18199_s7 + $0x440] sm:$0xff]  ;;  %v5954_v34 = vld [vmem:[#allocation3 + $0x11] sm:$0x1] }
 0x51b   :  { %v4556_v46 = vadd.f32 %v16391_v47, %v4536_v39  ;;  %5916 = vmatpush.bf16.msrb.mxu1 %v13665_v33  ;;  %5929 = vmatpush.bf16.msrb.mxu2 %v13673_v45  ;;  %v13772_v45 = vld [vmem:[%s18199_s7 + $0x4b8] sm:$0xff]  ;;  %v4842_v63 = vpack.c.bf16 %v4813_v43, %v4813_v43  ;;  %v13715_v39 = vld [vmem:[%s18199_s7 + $0x2f0] sm:$0xff]  ;;  %v13746_v3 = vld [vmem:[%s18199_s7 + $0x3e8] sm:$0xff] }
 0x51c   :  { %5381 = vmatmul.bf16.vlgmr.msrb.gmra.mxu3 %v4841_v62  ;;  %5856 = vmatmul.bf16.vlgmr.msra.gmra.mxu0 %v4648_v30  ;;  %v13763_v62 = vld [vmem:[%s18199_s7 + $0x470] sm:$0xff]  ;;  %v4654_v30 = vpack.c.bf16 %v4641_v56, %v4641_v56  ;;  %v13786_v56 = vld [vmem:[%s18199_s7 + $0x528] sm:$0xff] }
 0x51d   :  { %v4572_v0 = vmax.f32 %v4556_v46, 0.0  ;;  %5390 = vmatpush.bf16.msra.mxu3 %v13704_v17  ;;  %5869 = vmatmul.bf16.vlgmr.msra.gmra.mxu1 %v4649_v28  ;;  %v4652_v17 = vpack.c.bf16 %v4631_v18, %v4631_v18  ;;  %v13754_v46 = vld [vmem:[%s18199_s7 + $0x428] sm:$0xff]  ;;  %v5956_v12 = vld [vmem:[#allocation3 + $0x12] sm:$0x1] }
 0x51e   :  { %5882 = vmatmul.bf16.vlgmr.msra.gmra.mxu2 %v4650_v4  ;;  %5904 = vmatpush.bf16.msrb.mxu0 %v13656_v44  ;;  %v13771_v44 = vld [vmem:[%s18199_s7 + $0x4b0] sm:$0xff]  ;;  %v13762_v28 = vld [vmem:[%s18199_s7 + $0x468] sm:$0xff]  ;;  %v13769_v4 = vld [vmem:[%s18199_s7 + $0x4a0] sm:$0xff] }
 0x51f   :  { %4588 = vst [vmem:[#allocation3 + $0x68] sm:$0xff] %v4572_v0  ;;  %5917 = vmatpush.bf16.msrb.mxu1 %v13664_v27  ;;  %5930 = vmatpush.bf16.msrb.mxu2 %v13672_v5  ;;  %v13770_v27 = vld [vmem:[%s18199_s7 + $0x4a8] sm:$0xff]  ;;  %v13713_v5 = vld [vmem:[%s18199_s7 + $0x2e0] sm:$0xff]  ;;  %v13752_v0 = vld [vmem:[%s18199_s7 + $0x418] sm:$0xff] }
 0x520   :  { %v4518_v50 = vpop.f32.mrf.mxu2  ;;  %v13803_v57 = vld [vmem:[%s18199_s7 + $0x5b0] sm:$0xff] }
 0x521   :  { %v4537_v40 = vadd.f32 %v4518_v50, %v4372_v60  ;;  %5391 = vmatpush.bf16.msra.mxu3 %v13703_v51  ;;  %v13760_v51 = vld [vmem:[%s18199_s7 + $0x458] sm:$0xff]  ;;  %v13711_v60 = vld [vmem:[%s18199_s7 + $0x2d0] sm:$0xff]  ;;  %v4791_v50 = vld [vmem:[#allocation3 + $0x4b] sm:$0x1] }
 0x522   :  { %5905 = vmatpush.bf16.msrb.mxu0 %v13655_v24  ;;  %v13768_v24 = vld [vmem:[%s18199_s7 + $0x498] sm:$0xff]  ;;  %v4817_v14 = vrot.slane %v4791_v50, 7  ;;  %v13789_v50 = vld [vmem:[%s18199_s7 + $0x540] sm:$0xff] }
 0x523   :  { %v4557_v23 = vadd.f32 %v16391_v47, %v4537_v40  ;;  %5918 = vmatpush.bf16.msrb.mxu1 %v13663_v21  ;;  %5931 = vmatpush.bf16.msrb.mxu2 %v13671_v29  ;;  %v13759_v21 = vld [vmem:[%s18199_s7 + $0x450] sm:$0xff] }
 0x524   :  { %v13767_v29 = vld [vmem:[%s18199_s7 + $0x490] sm:$0xff] }
 0x525   :  { %v4573_v32 = vmax.f32 %v4557_v23, 0.0  ;;  %5392 = vmatpush.bf16.msra.mxu3 %v13702_v15  ;;  %v5953_v40 = vld [vmem:[#allocation3 + $0x50] sm:$0x1]  ;;  %v13750_v15 = vld [vmem:[%s18199_s7 + $0x408] sm:$0xff]  ;;  %v13709_v23 = vld [vmem:[%s18199_s7 + $0x2c0] sm:$0xff] }
 0x526   :  { %5906 = vmatpush.bf16.msrb.mxu0 %v13654_v10  ;;  %v5955_v10 = vld [vmem:[#allocation3 + $0x51] sm:$0x1] }
 0x527   :  { %4589 = vst [vmem:[#allocation3 + $0x70] sm:$0xff] %v4573_v32  ;;  %5919 = vmatpush.bf16.msrb.mxu1 %v13662_v31  ;;  %5932 = vmatpush.bf16.msrb.mxu2 %v13670_v25  ;;  %v5970_v31 = vrot.slane %v5953_v40, 7  ;;  %v5975_v25 = vrot.slane %v5955_v10, 7  ;;  %v4790_v32 = vld [vmem:[#allocation3 + $0xb] sm:$0x1]  ;;  %v13652_v10 = vld [vmem:[%s18199_s7 + $0xf8] sm:$0xff] }
 0x528   :  { %v4520_v42 = vpop.f32.mrf.mxu2  ;;  %v4818_v11 = vsel %vm4610_vm9, %v4817_v14, %v4790_v32  ;;  %v4798_v40 = vld [vmem:[#allocation3 + $0xf] sm:$0x1]  ;;  %v13828_v14 = vld [vmem:[%s18199_s7 + $0x678] sm:$0xff]  ;;  %v5964_v32 = vld [vmem:[#allocation3 + $0x16] sm:$0x1] }
 0x529   :  { %v4538_v33 = vadd.f32 %v4520_v42, %v4373_v48  ;;  %5393 = vmatpush.bf16.msra.mxu3 %v13701_v9  ;;  %v5980_v9 = vrot.slane %v5957_v58, 7  ;;  %v13804_v48 = vld [vmem:[%s18199_s7 + $0x5b8] sm:$0xff] }
 0x52a   :  { %5907 = vmatpush.bf16.msrb.mxu0 %v13653_v54  ;;  %v13788_v54 = vld [vmem:[%s18199_s7 + $0x538] sm:$0xff] }
 0x52b   :  { %v4558_v22 = vadd.f32 %v16391_v47, %v4538_v33  ;;  %5920 = vmatpush.bf16.msrb.mxu1 %v13661_v61  ;;  %5933 = vmatpush.bf16.msrb.mxu2 %v13669_v6  ;;  %v5971_v61 = vsel %vm4610_vm9, %v5970_v31, %v5952_v38  ;;  %v5976_v6 = vsel %vm4610_vm9, %v5975_v25, %v5954_v34  ;;  %v13787_v33 = vld [vmem:[%s18199_s7 + $0x530] sm:$0xff]  ;;  %v13820_v58 = vld [vmem:[%s18199_s7 + $0x638] sm:$0xff] }
 0x52c   :  { %5394 = vmatmul.bf16.vlgmr.msra.gmra.mxu3 %v4842_v63  ;;  %v5981_v42 = vsel %vm4610_vm9, %v5980_v9, %v5956_v12  ;;  %v6008_v43 = vpack.c.bf16 %v5971_v61, %v5971_v61  ;;  %v6009_v55 = vpack.c.bf16 %v5976_v6, %v5976_v6  ;;  %v13802_v63 = vld [vmem:[%s18199_s7 + $0x5a8] sm:$0xff]  ;;  %v5962_v31 = vld [vmem:[#allocation3 + $0x15] sm:$0x1]  ;;  %v13836_v25 = vld [vmem:[%s18199_s7 + $0x6b8] sm:$0xff] }
 0x52d   :  { %5399 = vmatpush.bf16.msrb.mxu3 %v13716_v36  ;;  %v4574_v47 = vmax.f32 %v4558_v22, 0.0  ;;  %5908 = vmatmul.bf16.vlgmr.msrb.gmra.mxu0 %v4652_v17  ;;  %v13796_v36 = vld [vmem:[%s18199_s7 + $0x578] sm:$0xff]  ;;  %v6010_v18 = vpack.c.bf16 %v5981_v42, %v5981_v42  ;;  %v13794_v22 = vld [vmem:[%s18199_s7 + $0x568] sm:$0xff]  ;;  %v13785_v17 = vld [vmem:[%s18199_s7 + $0x520] sm:$0xff] }
 0x52e   :  { %6528 = vmatpush.bf16.msra.mxu0 %v13756_v13  ;;  %5921 = vmatmul.bf16.vlgmr.msrb.gmra.mxu1 %v4653_v2  ;;  %v4843_v13 = vpack.c.bf16 %v4818_v11, %v4818_v11  ;;  %v13793_v2 = vld [vmem:[%s18199_s7 + $0x560] sm:$0xff]  ;;  %v13827_v11 = vld [vmem:[%s18199_s7 + $0x670] sm:$0xff]  ;;  %v13650_v61 = vld [vmem:[%s18199_s7 + $0xe8] sm:$0xff] }
 0x52f   :  { %6541 = vmatpush.bf16.msra.mxu1 %v13764_v37  ;;  %6554 = vmatpush.bf16.msra.mxu2 %v13772_v45  ;;  %4590 = vst [vmem:[#allocation3 + $0x78] sm:$0xff] %v4574_v47  ;;  %v13747_v37 = vld [vmem:[%s18199_s7 + $0x3f0] sm:$0xff]  ;;  %v13784_v47 = vld [vmem:[%s18199_s7 + $0x518] sm:$0xff]  ;;  %v13818_v6 = vld [vmem:[%s18199_s7 + $0x628] sm:$0xff] }
 0x530   :  { %5934 = vmatmul.bf16.vlgmr.msrb.gmra.mxu2 %v4654_v30  ;;  %v13795_v45 = vld [vmem:[%s18199_s7 + $0x570] sm:$0xff]  ;;  %v13792_v30 = vld [vmem:[%s18199_s7 + $0x558] sm:$0xff]  ;;  %v13826_v12 = vld [vmem:[%s18199_s7 + $0x668] sm:$0xff] }
 0x531   :  { %5400 = vmatpush.bf16.msrb.mxu3 %v13715_v39  ;;  %v13745_v39 = vld [vmem:[%s18199_s7 + $0x3e0] sm:$0xff]  ;;  %v13834_v42 = vld [vmem:[%s18199_s7 + $0x6a8] sm:$0xff] }
 0x532   :  { %6529 = vmatpush.bf16.msra.mxu0 %v13755_v35  ;;  %v13801_v35 = vld [vmem:[%s18199_s7 + $0x5a0] sm:$0xff] }
 0x533   :  { %6542 = vmatpush.bf16.msra.mxu1 %v13763_v62  ;;  %6555 = vmatpush.bf16.msra.mxu2 %v13771_v44  ;;  %v13744_v62 = vld [vmem:[%s18199_s7 + $0x3d8] sm:$0xff] }
 0x534   :  { %v13800_v44 = vld [vmem:[%s18199_s7 + $0x598] sm:$0xff] }
 0x535   :  { %5401 = vmatpush.bf16.msrb.mxu3 %v13714_v52  ;;  %v13743_v52 = vld [vmem:[%s18199_s7 + $0x3d0] sm:$0xff] }
 0x536   :  { %6530 = vmatpush.bf16.msra.mxu0 %v13754_v46  ;;  %v13783_v46 = vld [vmem:[%s18199_s7 + $0x510] sm:$0xff] }
 0x537   :  { %6543 = vmatpush.bf16.msra.mxu1 %v13762_v28  ;;  %6556 = vmatpush.bf16.msra.mxu2 %v13770_v27  ;;  %v13791_v28 = vld [vmem:[%s18199_s7 + $0x550] sm:$0xff] }
 0x538   :  { %v13799_v27 = vld [vmem:[%s18199_s7 + $0x590] sm:$0xff] }
 0x539   :  { %5402 = vmatpush.bf16.msrb.mxu3 %v13713_v5  ;;  %v13742_v5 = vld [vmem:[%s18199_s7 + $0x3c8] sm:$0xff] }
 0x53a   :  { %6531 = vmatpush.bf16.msra.mxu0 %v13753_v7  ;;  %v4799_v7 = vld [vmem:[#allocation3 + $0x4f] sm:$0x1] }
 0x53b   :  { %6544 = vmatpush.bf16.msra.mxu1 %v13761_v20  ;;  %6557 = vmatpush.bf16.msra.mxu2 %v13769_v4  ;;  %v5961_v20 = vld [vmem:[#allocation3 + $0x54] sm:$0x1]  ;;  %v13782_v4 = vld [vmem:[%s18199_s7 + $0x508] sm:$0xff] }
 0x53d   :  { %5403 = vmatpush.bf16.msrb.mxu3 %v13712_v16  ;;  %v13790_v16 = vld [vmem:[%s18199_s7 + $0x548] sm:$0xff] }
 0x53e   :  { %6532 = vmatpush.bf16.msra.mxu0 %v13752_v0  ;;  %v5963_v0 = vld [vmem:[#allocation3 + $0x55] sm:$0x1] }
 0x53f   :  { %6545 = vmatpush.bf16.msra.mxu1 %v13760_v51  ;;  %6558 = vmatpush.bf16.msra.mxu2 %v13768_v24  ;;  %v13798_v51 = vld [vmem:[%s18199_s7 + $0x588] sm:$0xff]  ;;  %v5965_v24 = vld [vmem:[#allocation3 + $0x56] sm:$0x1] }
 0x541   :  { %5404 = vmatpush.bf16.msrb.mxu3 %v13711_v60  ;;  %v4837_v60 = vrot.slane %v4799_v7, 7  ;;  %v13821_v7 = vld [vmem:[%s18199_s7 + $0x640] sm:$0xff] }
 0x542   :  { %6533 = vmatpush.bf16.msra.mxu0 %v13751_v19  ;;  %v13741_v19 = vld [vmem:[%s18199_s7 + $0x3c0] sm:$0xff] }
 0x543   :  { %6546 = vmatpush.bf16.msra.mxu1 %v13759_v21  ;;  %6559 = vmatpush.bf16.msra.mxu2 %v13767_v29  ;;  %v5990_v21 = vrot.slane %v5961_v20, 7  ;;  %v5995_v29 = vrot.slane %v5963_v0, 7  ;;  %v4597_v20 = vld [vmem:[#allocation3 + $0x3] sm:$0x1]  ;;  %v13684_v0 = vld [vmem:[%s18199_s7 + $0x1f8] sm:$0xff] }
 0x545   :  { %5405 = vmatpush.bf16.msrb.mxu3 %v13710_v59  ;;  %v13781_v59 = vld [vmem:[%s18199_s7 + $0x500] sm:$0xff] }
 0x546   :  { %6534 = vmatpush.bf16.msra.mxu0 %v13750_v15  ;;  %v6000_v15 = vrot.slane %v5965_v24, 7  ;;  %v13852_v24 = vld [vmem:[%s18199_s7 + $0x738] sm:$0xff] }
 0x547   :  { %6547 = vmatpush.bf16.msra.mxu1 %v13758_v8  ;;  %6560 = vmatpush.bf16.msra.mxu2 %v13766_v53  ;;  %v13797_v8 = vld [vmem:[%s18199_s7 + $0x580] sm:$0xff]  ;;  %v5960_v53 = vld [vmem:[#allocation3 + $0x14] sm:$0x1] }
 0x548   :  { %v6001_v9 = vsel %vm4610_vm9, %v6000_v15, %v5964_v32  ;;  %v13850_v32 = vld [vmem:[%s18199_s7 + $0x728] sm:$0xff] }
 0x549   :  { %5406 = vmatpush.bf16.msrb.mxu3 %v13709_v23  ;;  %v4838_v23 = vsel %vm4610_vm9, %v4837_v60, %v4798_v40  ;;  %v6014_v34 = vpack.c.bf16 %v6001_v9, %v6001_v9  ;;  %v13860_v60 = vld [vmem:[%s18199_s7 + $0x778] sm:$0xff]  ;;  %v13858_v9 = vld [vmem:[%s18199_s7 + $0x768] sm:$0xff] }
 0x54a   :  { %6535 = vmatpush.bf16.msra.mxu0 %v13749_v49  ;;  %v5991_v49 = vsel %vm4610_vm9, %v5990_v21, %v5960_v53  ;;  %v6635_v21 = vld [vmem:[#allocation3 + $0x19] sm:$0x1]  ;;  %v6637_v40 = vld [vmem:[#allocation3 + $0x1a] sm:$0x1] }
 0x54b   :  { %6548 = vmatpush.bf16.msra.mxu1 %v13757_v26  ;;  %6561 = vmatpush.bf16.msra.mxu2 %v13765_v1  ;;  %v5996_v26 = vsel %vm4610_vm9, %v5995_v29, %v5962_v31  ;;  %v4847_v1 = vpack.c.bf16 %v4838_v23, %v4838_v23  ;;  %v6012_v38 = vpack.c.bf16 %v5991_v49, %v5991_v49  ;;  %v13868_v29 = vld [vmem:[%s18199_s7 + $0x7b8] sm:$0xff]  ;;  %v13859_v23 = vld [vmem:[%s18199_s7 + $0x770] sm:$0xff]  ;;  %v13682_v49 = vld [vmem:[%s18199_s7 + $0x1e8] sm:$0xff] }
 0x54c   :  { %5407 = vmatmul.bf16.vlgmr.msrb.gmra.mxu3 %v4843_v13  ;;  %v13649_v13 = vld [vmem:[%s18199_s7 + $0xe0] sm:$0xff] }
 0x54d   :  { %5451 = vmatpush.bf16.msra.mxu3 %v13748_v41  ;;  %6536 = vmatmul.bf16.vlgmr.msra.gmra.mxu0 %v6008_v43  ;;  %v13651_v41 = vld [vmem:[%s18199_s7 + $0xf0] sm:$0xff]  ;;  %v13825_v43 = vld [vmem:[%s18199_s7 + $0x660] sm:$0xff] }
 0x54e   :  { %6580 = vmatpush.bf16.msrb.mxu0 %v13788_v54  ;;  %6549 = vmatmul.bf16.vlgmr.msra.gmra.mxu1 %v6009_v55  ;;  %v6013_v54 = vpack.c.bf16 %v5996_v26, %v5996_v26  ;;  %v13833_v55 = vld [vmem:[%s18199_s7 + $0x6a0] sm:$0xff] }
 0x54f   :  { %6593 = vmatpush.bf16.msrb.mxu1 %v13796_v36  ;;  %6606 = vmatpush.bf16.msrb.mxu2 %v13804_v48  ;;  %v13819_v36 = vld [vmem:[%s18199_s7 + $0x630] sm:$0xff] }
 0x550   :  { %6562 = vmatmul.bf16.vlgmr.msra.gmra.mxu2 %v6010_v18  ;;  %v13835_v48 = vld [vmem:[%s18199_s7 + $0x6b0] sm:$0xff]  ;;  %v13824_v18 = vld [vmem:[%s18199_s7 + $0x658] sm:$0xff] }
 0x551   :  { %5452 = vmatpush.bf16.msra.mxu3 %v13747_v37  ;;  %v13817_v37 = vld [vmem:[%s18199_s7 + $0x620] sm:$0xff] }
 0x552   :  { %6581 = vmatpush.bf16.msrb.mxu0 %v13787_v33  ;;  %v13648_v33 = vld [vmem:[%s18199_s7 + $0xd8] sm:$0xff] }
 0x553   :  { %6594 = vmatpush.bf16.msrb.mxu1 %v13795_v45  ;;  %6607 = vmatpush.bf16.msrb.mxu2 %v13803_v57  ;;  %v13816_v45 = vld [vmem:[%s18199_s7 + $0x618] sm:$0xff] }
 0x554   :  { %v13832_v57 = vld [vmem:[%s18199_s7 + $0x698] sm:$0xff] }
 0x555   :  { %5453 = vmatpush.bf16.msra.mxu3 %v13746_v3  ;;  %v13647_v3 = vld [vmem:[%s18199_s7 + $0xd0] sm:$0xff] }
 0x556   :  { %6582 = vmatpush.bf16.msrb.mxu0 %v13786_v56  ;;  %v13815_v56 = vld [vmem:[%s18199_s7 + $0x610] sm:$0xff] }
 0x557   :  { %6595 = vmatpush.bf16.msrb.mxu1 %v13794_v22  ;;  %6608 = vmatpush.bf16.msrb.mxu2 %v13802_v63  ;;  %v13823_v22 = vld [vmem:[%s18199_s7 + $0x650] sm:$0xff] }
 0x558   :  { %v13831_v63 = vld [vmem:[%s18199_s7 + $0x690] sm:$0xff] }
 0x559   :  { %5454 = vmatpush.bf16.msra.mxu3 %v13745_v39  ;;  %v13646_v39 = vld [vmem:[%s18199_s7 + $0xc8] sm:$0xff] }
 0x55a   :  { %6583 = vmatpush.bf16.msrb.mxu0 %v13785_v17  ;;  %v4598_v17 = vld [vmem:[#allocation3 + $0x43] sm:$0x1] }
 0x55b   :  { %6596 = vmatpush.bf16.msrb.mxu1 %v13793_v2  ;;  %6609 = vmatpush.bf16.msrb.mxu2 %v13801_v35  ;;  %v6634_v2 = vld [vmem:[#allocation3 + $0x58] sm:$0x1]  ;;  %v13814_v35 = vld [vmem:[%s18199_s7 + $0x608] sm:$0xff] }
 0x55d   :  { %5455 = vmatpush.bf16.msra.mxu3 %v13744_v62  ;;  %v13822_v62 = vld [vmem:[%s18199_s7 + $0x648] sm:$0xff] }
 0x55e   :  { %6584 = vmatpush.bf16.msrb.mxu0 %v13784_v47  ;;  %v6636_v47 = vld [vmem:[#allocation3 + $0x59] sm:$0x1] }
 0x55f   :  { %6597 = vmatpush.bf16.msrb.mxu1 %v13792_v30  ;;  %6610 = vmatpush.bf16.msrb.mxu2 %v13800_v44  ;;  %v13830_v30 = vld [vmem:[%s18199_s7 + $0x688] sm:$0xff]  ;;  %v6638_v44 = vld [vmem:[#allocation3 + $0x5a] sm:$0x1] }
 0x561   :  { %5456 = vmatpush.bf16.msra.mxu3 %v13743_v52  ;;  %v4625_v52 = vrot.slane %v4598_v17, 7  ;;  %v13854_v17 = vld [vmem:[%s18199_s7 + $0x748] sm:$0xff] }
 0x562   :  { %6585 = vmatpush.bf16.msrb.mxu0 %v13783_v46  ;;  %v13645_v46 = vld [vmem:[%s18199_s7 + $0xc0] sm:$0xff] }
 0x563   :  { %6598 = vmatpush.bf16.msrb.mxu1 %v13791_v28  ;;  %6611 = vmatpush.bf16.msrb.mxu2 %v13799_v27  ;;  %v6651_v28 = vrot.slane %v6634_v2, 7  ;;  %v6656_v27 = vrot.slane %v6636_v47, 7  ;;  %v6646_v47 = vld [vmem:[#allocation3 + $0x5e] sm:$0x1] }
 0x565   :  { %5457 = vmatpush.bf16.msra.mxu3 %v13742_v5  ;;  %v13813_v5 = vld [vmem:[%s18199_s7 + $0x600] sm:$0xff] }
 0x566   :  { %6586 = vmatpush.bf16.msrb.mxu0 %v13782_v4  ;;  %v6661_v4 = vrot.slane %v6638_v44, 7  ;;  %v13677_v44 = vld [vmem:[%s18199_s7 + $0x1c0] sm:$0xff] }
 0x567   :  { %6599 = vmatpush.bf16.msrb.mxu1 %v13790_v16  ;;  %6612 = vmatpush.bf16.msrb.mxu2 %v13798_v51  ;;  %v13829_v16 = vld [vmem:[%s18199_s7 + $0x680] sm:$0xff]  ;;  %v6633_v51 = vld [vmem:[#allocation3 + $0x18] sm:$0x1] }
 0x568   :  { %v6662_v15 = vsel %vm4610_vm9, %v6661_v4, %v6637_v40  ;;  %v13780_v4 = vld [vmem:[%s18199_s7 + $0x4f8] sm:$0xff] }
 0x569   :  { %5458 = vmatpush.bf16.msra.mxu3 %v13741_v19  ;;  %v4626_v19 = vsel %vm4610_vm9, %v4625_v52, %v4597_v20  ;;  %v6691_v31 = vpack.c.bf16 %v6662_v15, %v6662_v15  ;;  %v13861_v20 = vld [vmem:[%s18199_s7 + $0x780] sm:$0xff]  ;;  %v6645_v15 = vld [vmem:[#allocation3 + $0x1e] sm:$0x1] }
 0x56a   :  { %6587 = vmatpush.bf16.msrb.mxu0 %v13781_v59  ;;  %v6652_v59 = vsel %vm4610_vm9, %v6651_v28, %v6633_v51  ;;  %v13845_v28 = vld [vmem:[%s18199_s7 + $0x700] sm:$0xff]  ;;  %v13884_v51 = vld [vmem:[%s18199_s7 + $0x838] sm:$0xff] }
 0x56b   :  { %6600 = vmatpush.bf16.msrb.mxu1 %v13789_v50  ;;  %6613 = vmatpush.bf16.msrb.mxu2 %v13797_v8  ;;  %v6657_v50 = vsel %vm4610_vm9, %v6656_v27, %v6635_v21  ;;  %v4651_v8 = vpack.c.bf16 %v4626_v19, %v4626_v19  ;;  %v6689_v53 = vpack.c.bf16 %v6652_v59, %v6652_v59  ;;  %v13853_v27 = vld [vmem:[%s18199_s7 + $0x740] sm:$0xff]  ;;  %v6643_v21 = vld [vmem:[#allocation3 + $0x1d] sm:$0x1] }
 0x56c   :  { %5459 = vmatmul.bf16.vlgmr.msra.gmra.mxu3 %v4847_v1 }
 0x56d   :  { %5887 = vmatpush.bf16.msrb.mxu3 %v13652_v10  ;;  %6588 = vmatmul.bf16.vlgmr.msrb.gmra.mxu0 %v6012_v38  ;;  %v13683_v10 = vld [vmem:[%s18199_s7 + $0x1f0] sm:$0xff]  ;;  %v13681_v38 = vld [vmem:[%s18199_s7 + $0x1e0] sm:$0xff] }
 0x56e   :  { %7209 = vmatpush.bf16.msra.mxu0 %v13820_v58  ;;  %6601 = vmatmul.bf16.vlgmr.msrb.gmra.mxu1 %v6013_v54  ;;  %v6690_v58 = vpack.c.bf16 %v6657_v50, %v6657_v50  ;;  %v13849_v54 = vld [vmem:[%s18199_s7 + $0x720] sm:$0xff] }
 0x56f   :  { %7222 = vmatpush.bf16.msra.mxu1 %v13828_v14  ;;  %7235 = vmatpush.bf16.msra.mxu2 %v13836_v25  ;;  %v13851_v14 = vld [vmem:[%s18199_s7 + $0x730] sm:$0xff] }
 0x570   :  { %6614 = vmatmul.bf16.vlgmr.msrb.gmra.mxu2 %v6014_v34  ;;  %v13867_v25 = vld [vmem:[%s18199_s7 + $0x7b0] sm:$0xff] }
 0x571   :  { %5888 = vmatpush.bf16.msrb.mxu3 %v13651_v41  ;;  %v13866_v41 = vld [vmem:[%s18199_s7 + $0x7a8] sm:$0xff] }
 0x572   :  { %7210 = vmatpush.bf16.msra.mxu0 %v13819_v36  ;;  %v13857_v36 = vld [vmem:[%s18199_s7 + $0x760] sm:$0xff] }
 0x573   :  { %7223 = vmatpush.bf16.msra.mxu1 %v13827_v11  ;;  %7236 = vmatpush.bf16.msra.mxu2 %v13835_v48  ;;  %v13865_v11 = vld [vmem:[%s18199_s7 + $0x7a0] sm:$0xff] }
 0x575   :  { %5889 = vmatpush.bf16.msrb.mxu3 %v13650_v61  ;;  %v13680_v61 = vld [vmem:[%s18199_s7 + $0x1d8] sm:$0xff] }
 0x576   :  { %7211 = vmatpush.bf16.msra.mxu0 %v13818_v6 }
 0x577   :  { %7224 = vmatpush.bf16.msra.mxu1 %v13826_v12  ;;  %7237 = vmatpush.bf16.msra.mxu2 %v13834_v42  ;;  %v13848_v12 = vld [vmem:[%s18199_s7 + $0x718] sm:$0xff] }
 0x578   :  { %v13856_v42 = vld [vmem:[%s18199_s7 + $0x758] sm:$0xff] }
 0x579   :  { %5890 = vmatpush.bf16.msrb.mxu3 %v13649_v13 }
 0x57a   :  { %7212 = vmatpush.bf16.msra.mxu0 %v13817_v37  ;;  %v13864_v37 = vld [vmem:[%s18199_s7 + $0x798] sm:$0xff] }
 0x57b   :  { %7225 = vmatpush.bf16.msra.mxu1 %v13825_v43  ;;  %7238 = vmatpush.bf16.msra.mxu2 %v13833_v55  ;;  %v13679_v43 = vld [vmem:[%s18199_s7 + $0x1d0] sm:$0xff] }
 0x57c   :  { %v13847_v55 = vld [vmem:[%s18199_s7 + $0x710] sm:$0xff] }
 0x57d   :  { %5891 = vmatpush.bf16.msrb.mxu3 %v13648_v33  ;;  %v13855_v33 = vld [vmem:[%s18199_s7 + $0x750] sm:$0xff] }
 0x57e   :  { %7213 = vmatpush.bf16.msra.mxu0 %v13816_v45  ;;  %v13863_v45 = vld [vmem:[%s18199_s7 + $0x790] sm:$0xff] }
 0x57f   :  { %7226 = vmatpush.bf16.msra.mxu1 %v13824_v18  ;;  %7239 = vmatpush.bf16.msra.mxu2 %v13832_v57 }
 0x581   :  { %5892 = vmatpush.bf16.msrb.mxu3 %v13647_v3  ;;  %v13678_v3 = vld [vmem:[%s18199_s7 + $0x1c8] sm:$0xff] }
 0x582   :  { %7214 = vmatpush.bf16.msra.mxu0 %v13815_v56 }
 0x583   :  { %7227 = vmatpush.bf16.msra.mxu1 %v13823_v22  ;;  %7240 = vmatpush.bf16.msra.mxu2 %v13831_v63  ;;  %v4606_v22 = vld [vmem:[#allocation3 + $0x47] sm:$0x1]  ;;  %v6642_v63 = vld [vmem:[#allocation3 + $0x5c] sm:$0x1] }
 0x584   :  { %v6671_v52 = vrot.slane %v6642_v63, 7 }
 0x585   :  { %5893 = vmatpush.bf16.msrb.mxu3 %v13646_v39  ;;  %v13846_v39 = vld [vmem:[%s18199_s7 + $0x708] sm:$0xff] }
 0x586   :  { %7215 = vmatpush.bf16.msra.mxu0 %v13814_v35  ;;  %v6644_v35 = vld [vmem:[#allocation3 + $0x5d] sm:$0x1] }
 0x587   :  { %7228 = vmatpush.bf16.msra.mxu1 %v13822_v62  ;;  %7241 = vmatpush.bf16.msra.mxu2 %v13830_v30  ;;  %v13862_v62 = vld [vmem:[%s18199_s7 + $0x788] sm:$0xff]  ;;  %v4645_v30 = vrot.slane %v4606_v22, 7 }
 0x589   :  { %5894 = vmatpush.bf16.msrb.mxu3 %v13645_v46  ;;  %v17102_v26 = vpop.f32.mrf.mxu0  ;;  %v6676_v46 = vrot.slane %v6644_v35, 7  ;;  %v13887_v35 = vld [vmem:[%s18199_s7 + $0x850] sm:$0xff] }
 0x58a   :  { %7216 = vmatpush.bf16.msra.mxu0 %v13813_v5  ;;  %v17110_v1 = vpop.f32.mrf.mxu1  ;;  %v4605_v5 = vld [vmem:[#allocation3 + $0x7] sm:$0x1] }
 0x58b   :  { %7229 = vmatpush.bf16.msra.mxu1 %v13821_v7  ;;  %7242 = vmatpush.bf16.msra.mxu2 %v13829_v16  ;;  %v6681_v7 = vrot.slane %v6646_v47, 7  ;;  %v4646_v19 = vsel %vm4610_vm9, %v4645_v30, %v4605_v5  ;;  %v6677_v40 = vsel %vm4610_vm9, %v6676_v46, %v6643_v21  ;;  %v13774_v47 = vld [vmem:[%s18199_s7 + $0x4c8] sm:$0xff]  ;;  %v5959_v30 = vld [vmem:[#allocation3 + $0x53] sm:$0x1] }
 0x58c   :  { %5895 = vmatmul.bf16.vlgmr.msrb.gmra.mxu3 %v4651_v8  ;;  %v13886_v46 = vld [vmem:[%s18199_s7 + $0x848] sm:$0xff] }
 0x58d   :  { %5939 = vmatpush.bf16.msra.mxu3 %v13684_v0  ;;  %7217 = vmatmul.bf16.vlgmr.msra.gmra.mxu0 %v6689_v53  ;;  %v6641_v0 = vld [vmem:[#allocation3 + $0x1c] sm:$0x1]  ;;  %v13894_v5 = vld [vmem:[%s18199_s7 + $0x888] sm:$0xff] }
 0x58e   :  { %7261 = vmatpush.bf16.msrb.mxu0 %v13852_v24  ;;  %7230 = vmatmul.bf16.vlgmr.msra.gmra.mxu1 %v6690_v58  ;;  %v13892_v24 = vld [vmem:[%s18199_s7 + $0x878] sm:$0xff]  ;;  %v6672_v50 = vsel %vm4610_vm9, %v6671_v52, %v6641_v0  ;;  %v4655_v58 = vpack.c.bf16 %v4646_v19, %v4646_v19  ;;  %v13878_v52 = vld [vmem:[%s18199_s7 + $0x808] sm:$0xff]  ;;  %v5958_v19 = vld [vmem:[#allocation3 + $0x13] sm:$0x1] }
 0x58f   :  { %7274 = vmatpush.bf16.msrb.mxu1 %v13860_v60  ;;  %7287 = vmatpush.bf16.msrb.mxu2 %v13868_v29  ;;  %v5369_v34 = vpop.f32.mrf.mxu3  ;;  %v13900_v29 = vld [vmem:[%s18199_s7 + $0x8b8] sm:$0xff] }
 0x590   :  { %7243 = vmatmul.bf16.vlgmr.msra.gmra.mxu2 %v6691_v31  ;;  %v6694_v31 = vpack.c.bf16 %v6677_v40, %v6677_v40  ;;  %v7314_v40 = vld [vmem:[#allocation3 + $0x20] sm:$0x1] }
 0x591   :  { %5940 = vmatpush.bf16.msra.mxu3 %v13683_v10  ;;  %v17127_v48 = vpop.f32.mrf.mxu2  ;;  %v5423_v6 = vpop.f32.mrf.mxu0  ;;  %v6682_v10 = vsel %vm4610_vm9, %v6681_v7, %v6645_v15  ;;  %v7319_v7 = vld [vmem:[#allocation3 + $0x62] sm:$0x1]  ;;  %v13916_v15 = vld [vmem:[%s18199_s7 + $0x938] sm:$0xff] }
 0x592   :  { %7262 = vmatpush.bf16.msrb.mxu0 %v13851_v14  ;;  %v5436_v13 = vpop.f32.mrf.mxu1  ;;  %v13779_v14 = vld [vmem:[%s18199_s7 + $0x4f0] sm:$0xff]  ;;  %v7342_v21 = vrot.slane %v7319_v7, 7 }
 0x593   :  { %7275 = vmatpush.bf16.msrb.mxu1 %v13859_v23  ;;  %7288 = vmatpush.bf16.msrb.mxu2 %v13867_v25  ;;  %v6693_v23 = vpack.c.bf16 %v6672_v50, %v6672_v50  ;;  %v13883_v25 = vld [vmem:[%s18199_s7 + $0x830] sm:$0xff]  ;;  %v13889_v13 = vld [vmem:[%s18199_s7 + $0x860] sm:$0xff]  ;;  %v13812_v50 = vld [vmem:[%s18199_s7 + $0x5f8] sm:$0xff] }
 0x595   :  { %5941 = vmatpush.bf16.msra.mxu3 %v13682_v49  ;;  %v13891_v49 = vld [vmem:[%s18199_s7 + $0x870] sm:$0xff] }
 0x596   :  { %7263 = vmatpush.bf16.msrb.mxu0 %v13850_v32  ;;  %v6695_v32 = vpack.c.bf16 %v6682_v10, %v6682_v10 }
 0x597   :  { %7276 = vmatpush.bf16.msrb.mxu1 %v13858_v9  ;;  %7289 = vmatpush.bf16.msrb.mxu2 %v13866_v41  ;;  %v5371_v18 = vpop.f32.mrf.mxu3  ;;  %v13899_v9 = vld [vmem:[%s18199_s7 + $0x8b0] sm:$0xff]  ;;  %v13778_v41 = vld [vmem:[%s18199_s7 + $0x4e8] sm:$0xff] }
 0x598   :  { %v13896_v18 = vld [vmem:[%s18199_s7 + $0x898] sm:$0xff] }
 0x599   :  { %5942 = vmatpush.bf16.msra.mxu3 %v13681_v38  ;;  %v5449_v57 = vpop.f32.mrf.mxu2  ;;  %v17156_v56 = vpop.f32.mrf.mxu0 }
 0x59a   :  { %7264 = vmatpush.bf16.msrb.mxu0 %v13849_v54  ;;  %v17164_v2 = vpop.f32.mrf.mxu1  ;;  %v13882_v54 = vld [vmem:[%s18199_s7 + $0x828] sm:$0xff] }
 0x59b   :  { %7277 = vmatpush.bf16.msrb.mxu1 %v13857_v36  ;;  %7290 = vmatpush.bf16.msrb.mxu2 %v13865_v11  ;;  %v13890_v36 = vld [vmem:[%s18199_s7 + $0x868] sm:$0xff] }
 0x59c   :  { %v13898_v11 = vld [vmem:[%s18199_s7 + $0x8a8] sm:$0xff] }
 0x59d   :  { %5943 = vmatpush.bf16.msra.mxu3 %v13680_v61 }
 0x59e   :  { %7265 = vmatpush.bf16.msrb.mxu0 %v13848_v12  ;;  %v13777_v12 = vld [vmem:[%s18199_s7 + $0x4e0] sm:$0xff] }
 0x59f   :  { %7278 = vmatpush.bf16.msrb.mxu1 %v13856_v42  ;;  %7291 = vmatpush.bf16.msrb.mxu2 %v13864_v37  ;;  %v5382_v16 = vpop.f32.mrf.mxu3  ;;  %v13881_v42 = vld [vmem:[%s18199_s7 + $0x820] sm:$0xff] }
 0x5a0   :  { %v5383_v60 = vadd.f32 %v5382_v16, %v5369_v34  ;;  %v13897_v37 = vld [vmem:[%s18199_s7 + $0x8a0] sm:$0xff] }
 0x5a1   :  { %5944 = vmatpush.bf16.msra.mxu3 %v13679_v43  ;;  %v17194_v59 = vpop.f32.mrf.mxu2  ;;  %v5859_v8 = vpop.f32.mrf.mxu0  ;;  %v13776_v43 = vld [vmem:[%s18199_s7 + $0x4d8] sm:$0xff]  ;;  %v13773_v16 = vld [vmem:[%s18199_s7 + $0x4c0] sm:$0xff] }
 0x5a2   :  { %7266 = vmatpush.bf16.msrb.mxu0 %v13847_v55  ;;  %v5872_v53 = vpop.f32.mrf.mxu1  ;;  %v13880_v55 = vld [vmem:[%s18199_s7 + $0x818] sm:$0xff] }
 0x5a3   :  { %7279 = vmatpush.bf16.msrb.mxu1 %v13855_v33  ;;  %7292 = vmatpush.bf16.msrb.mxu2 %v13863_v45  ;;  %v13888_v33 = vld [vmem:[%s18199_s7 + $0x858] sm:$0xff]  ;;  %v7316_v53 = vld [vmem:[#allocation3 + $0x21] sm:$0x1] }
 0x5a4   :  { %v13924_v8 = vld [vmem:[%s18199_s7 + $0x978] sm:$0xff] }
 0x5a5   :  { %5945 = vmatpush.bf16.msra.mxu3 %v13678_v3 }
 0x5a6   :  { %7267 = vmatpush.bf16.msrb.mxu0 %v13846_v39  ;;  %v13775_v39 = vld [vmem:[%s18199_s7 + $0x4d0] sm:$0xff] }
 0x5a7   :  { %7280 = vmatpush.bf16.msrb.mxu1 %v13854_v17  ;;  %7293 = vmatpush.bf16.msrb.mxu2 %v13862_v62  ;;  %v5384_v38 = vpop.f32.mrf.mxu3  ;;  %v13879_v17 = vld [vmem:[%s18199_s7 + $0x810] sm:$0xff] }
 0x5a8   :  { %v13895_v62 = vld [vmem:[%s18199_s7 + $0x890] sm:$0xff] }
 0x5a9   :  { %5946 = vmatpush.bf16.msra.mxu3 %v13677_v44  ;;  %v5885_v34 = vpop.f32.mrf.mxu2  ;;  %v7315_v44 = vld [vmem:[#allocation3 + $0x60] sm:$0x1]  ;;  %v13915_v38 = vld [vmem:[%s18199_s7 + $0x930] sm:$0xff] }
 0x5aa   :  { %7268 = vmatpush.bf16.msrb.mxu0 %v13845_v28  ;;  %v17223_v61 = vpop.f32.mrf.mxu0  ;;  %v7332_v0 = vrot.slane %v7315_v44, 7  ;;  %v13810_v34 = vld [vmem:[%s18199_s7 + $0x5e8] sm:$0xff] }
 0x5ab   :  { %7281 = vmatpush.bf16.msrb.mxu1 %v13853_v27  ;;  %7294 = vmatpush.bf16.msrb.mxu2 %v13861_v20  ;;  %v17225_v6 = vpop.f32.mrf.mxu1  ;;  %v7317_v27 = vld [vmem:[#allocation3 + $0x61] sm:$0x1] }
 0x5ac   :  { %5947 = vmatmul.bf16.vlgmr.msra.gmra.mxu3 %v4655_v58  ;;  %v13932_v58 = vld [vmem:[%s18199_s7 + $0x9b8] sm:$0xff] }
 0x5ad   :  { %6567 = vmatpush.bf16.msrb.mxu3 %v13780_v4  ;;  %7269 = vmatmul.bf16.vlgmr.msrb.gmra.mxu0 %v6693_v23  ;;  %v5985_v4 = vrot.slane %v5959_v30, 7 }
 0x5ae   :  { %7890 = vmatpush.bf16.msra.mxu0 %v13884_v51  ;;  %7282 = vmatmul.bf16.vlgmr.msrb.gmra.mxu1 %v6694_v31  ;;  %v7337_v51 = vrot.slane %v7317_v27, 7  ;;  %v7318_v31 = vld [vmem:[#allocation3 + $0x22] sm:$0x1]  ;;  %v13807_v27 = vld [vmem:[%s18199_s7 + $0x5d0] sm:$0xff] }
 0x5af   :  { %7903 = vmatpush.bf16.msra.mxu1 %v13892_v24  ;;  %7916 = vmatpush.bf16.msra.mxu2 %v13900_v29  ;;  %v5395_v45 = vpop.f32.mrf.mxu3  ;;  %v13877_v24 = vld [vmem:[%s18199_s7 + $0x800] sm:$0xff]  ;;  %v5986_v10 = vsel %vm4610_vm9, %v5985_v4, %v5958_v19  ;;  %v5967_v4 = vld [vmem:[#allocation3 + $0x57] sm:$0x1]  ;;  %v13926_v19 = vld [vmem:[%s18199_s7 + $0x988] sm:$0xff] }
 0x5b0   :  { %7295 = vmatmul.bf16.vlgmr.msrb.gmra.mxu2 %v6695_v32  ;;  %v17251_v57 = vadd.f32 %v5395_v45, %v5383_v60  ;;  %v13885_v60 = vld [vmem:[%s18199_s7 + $0x840] sm:$0xff]  ;;  %v7338_v23 = vsel %vm4610_vm9, %v7337_v51, %v7316_v53  ;;  %v13811_v32 = vld [vmem:[%s18199_s7 + $0x5f0] sm:$0xff]  ;;  %v13910_v51 = vld [vmem:[%s18199_s7 + $0x908] sm:$0xff] }
 0x5b1   :  { %6568 = vmatpush.bf16.msrb.mxu3 %v13779_v14  ;;  %v13893_v29 = vld [vmem:[%s18199_s7 + $0x880] sm:$0xff]  ;;  %v7333_v14 = vsel %vm4610_vm9, %v7332_v0, %v7314_v40  ;;  %v5966_v53 = vld [vmem:[#allocation3 + $0x17] sm:$0x1] }
 0x5b2   :  { %7891 = vmatpush.bf16.msra.mxu0 %v13883_v25  ;;  %v5911_v22 = vpop.f32.mrf.mxu0  ;;  %v7343_v25 = vsel %vm4610_vm9, %v7342_v21, %v7318_v31  ;;  %v13913_v45 = vld [vmem:[%s18199_s7 + $0x920] sm:$0xff] }
 0x5b3   :  { %7904 = vmatpush.bf16.msra.mxu1 %v13891_v49  ;;  %7917 = vmatpush.bf16.msra.mxu2 %v13899_v9  ;;  %v17253_v3 = vpop.f32.mrf.mxu2  ;;  %v5924_v63 = vpop.f32.mrf.mxu1  ;;  %v6011_v49 = vpack.c.bf16 %v5986_v10, %v5986_v10  ;;  %v7370_v9 = vpack.c.bf16 %v7333_v14, %v7333_v14  ;;  %v13929_v22 = vld [vmem:[%s18199_s7 + $0x9a0] sm:$0xff] }
 0x5b4   :  { %v13808_v63 = vld [vmem:[%s18199_s7 + $0x5d8] sm:$0xff]  ;;  %v7327_v21 = vld [vmem:[#allocation3 + $0x66] sm:$0x1]  ;;  %v7322_v31 = vld [vmem:[#allocation3 + $0x24] sm:$0x1] }
 0x5b5   :  { %6569 = vmatpush.bf16.msrb.mxu3 %v13778_v41  ;;  %v7371_v41 = vpack.c.bf16 %v7338_v23, %v7338_v23  ;;  %v13917_v10 = vld [vmem:[%s18199_s7 + $0x940] sm:$0xff]  ;;  %v13844_v23 = vld [vmem:[%s18199_s7 + $0x6f8] sm:$0xff] }
 0x5b6   :  { %7892 = vmatpush.bf16.msra.mxu0 %v13882_v54  ;;  %v13923_v54 = vld [vmem:[%s18199_s7 + $0x970] sm:$0xff]  ;;  %v13925_v14 = vld [vmem:[%s18199_s7 + $0x980] sm:$0xff] }
 0x5b7   :  { %7905 = vmatpush.bf16.msra.mxu1 %v13890_v36  ;;  %7918 = vmatpush.bf16.msra.mxu2 %v13898_v11  ;;  %v5397_v28 = vpop.f32.mrf.mxu3  ;;  %v7372_v36 = vpack.c.bf16 %v7343_v25, %v7343_v25  ;;  %v13931_v11 = vld [vmem:[%s18199_s7 + $0x9b0] sm:$0xff]  ;;  %v13948_v25 = vld [vmem:[%s18199_s7 + $0xa38] sm:$0xff] }
 0x5b9   :  { %6570 = vmatpush.bf16.msrb.mxu3 %v13777_v12  ;;  %v13914_v12 = vld [vmem:[%s18199_s7 + $0x928] sm:$0xff] }
 0x5ba   :  { %7893 = vmatpush.bf16.msra.mxu0 %v13881_v42  ;;  %v13922_v42 = vld [vmem:[%s18199_s7 + $0x968] sm:$0xff] }
 0x5bb   :  { %7906 = vmatpush.bf16.msra.mxu1 %v13889_v13  ;;  %7919 = vmatpush.bf16.msra.mxu2 %v13897_v37  ;;  %v5937_v20 = vpop.f32.mrf.mxu2  ;;  %v13930_v13 = vld [vmem:[%s18199_s7 + $0x9a8] sm:$0xff] }
 0x5bc   :  { %v13806_v20 = vld [vmem:[%s18199_s7 + $0x5c8] sm:$0xff] }
 0x5bd   :  { %6571 = vmatpush.bf16.msrb.mxu3 %v13776_v43 }
 0x5be   :  { %7894 = vmatpush.bf16.msra.mxu0 %v13880_v55  ;;  %v13809_v55 = vld [vmem:[%s18199_s7 + $0x5e0] sm:$0xff] }
 0x5bf   :  { %7907 = vmatpush.bf16.msra.mxu1 %v13888_v33  ;;  %7920 = vmatpush.bf16.msra.mxu2 %v13896_v18  ;;  %v13921_v18 = vld [vmem:[%s18199_s7 + $0x960] sm:$0xff] }
 0x5c1   :  { %6572 = vmatpush.bf16.msrb.mxu3 %v13775_v39  ;;  %v13912_v39 = vld [vmem:[%s18199_s7 + $0x918] sm:$0xff] }
 0x5c2   :  { %7895 = vmatpush.bf16.msra.mxu0 %v13879_v17  ;;  %v13920_v17 = vld [vmem:[%s18199_s7 + $0x958] sm:$0xff] }
 0x5c3   :  { %7908 = vmatpush.bf16.msra.mxu1 %v13887_v35  ;;  %7921 = vmatpush.bf16.msra.mxu2 %v13895_v62  ;;  %v13928_v62 = vld [vmem:[%s18199_s7 + $0x998] sm:$0xff] }
 0x5c5   :  { %6573 = vmatpush.bf16.msrb.mxu3 %v13774_v47 }
 0x5c6   :  { %7896 = vmatpush.bf16.msra.mxu0 %v13878_v52 }
 0x5c7   :  { %7909 = vmatpush.bf16.msra.mxu1 %v13886_v46  ;;  %7922 = vmatpush.bf16.msra.mxu2 %v13894_v5  ;;  %v13911_v5 = vld [vmem:[%s18199_s7 + $0x910] sm:$0xff] }
 0x5c9   :  { %6574 = vmatpush.bf16.msrb.mxu3 %v13773_v16  ;;  %v7323_v16 = vld [vmem:[#allocation3 + $0x64] sm:$0x1] }
 0x5ca   :  { %7897 = vmatpush.bf16.msra.mxu0 %v13877_v24  ;;  %v6537_v37 = vpop.f32.mrf.mxu0  ;;  %v7352_v40 = vrot.slane %v7323_v16, 7  ;;  %v13943_v16 = vld [vmem:[%s18199_s7 + $0xa10] sm:$0xff] }
 0x5cb   :  { %7910 = vmatpush.bf16.msra.mxu1 %v13885_v60  ;;  %7923 = vmatpush.bf16.msra.mxu2 %v13893_v29  ;;  %v6550_v43 = vpop.f32.mrf.mxu1  ;;  %v7325_v60 = vld [vmem:[#allocation3 + $0x65] sm:$0x1]  ;;  %v6005_v29 = vrot.slane %v5967_v4, 7  ;;  %v13839_v4 = vld [vmem:[%s18199_s7 + $0x6d0] sm:$0xff] }
 0x5cc   :  { %6575 = vmatmul.bf16.vlgmr.msrb.gmra.mxu3 %v6011_v49  ;;  %v6551_v33 = vadd.f32 %v6550_v43, %v6537_v37  ;;  %v13956_v49 = vld [vmem:[%s18199_s7 + $0xa78] sm:$0xff]  ;;  %v13947_v37 = vld [vmem:[%s18199_s7 + $0xa30] sm:$0xff] }
 0x5cd   :  { %6619 = vmatpush.bf16.msra.mxu3 %v13812_v50  ;;  %7898 = vmatmul.bf16.vlgmr.msra.gmra.mxu0 %v7370_v9  ;;  %v13805_v50 = vld [vmem:[%s18199_s7 + $0x5c0] sm:$0xff]  ;;  %v13955_v43 = vld [vmem:[%s18199_s7 + $0xa70] sm:$0xff] }
 0x5ce   :  { %7942 = vmatpush.bf16.msrb.mxu0 %v13916_v15  ;;  %7911 = vmatmul.bf16.vlgmr.msra.gmra.mxu1 %v7371_v41  ;;  %v7357_v15 = vrot.slane %v7325_v60, 7  ;;  %v7324_v9 = vld [vmem:[#allocation3 + $0x25] sm:$0x1]  ;;  %v13964_v41 = vld [vmem:[%s18199_s7 + $0xab8] sm:$0xff]  ;;  %v7996_v60 = vld [vmem:[#allocation3 + $0x68] sm:$0x1] }
 0x5cf   :  { %7955 = vmatpush.bf16.msrb.mxu1 %v13924_v8  ;;  %7968 = vmatpush.bf16.msrb.mxu2 %v13932_v58  ;;  %v5408_v35 = vpop.f32.mrf.mxu3  ;;  %v13909_v8 = vld [vmem:[%s18199_s7 + $0x900] sm:$0xff]  ;;  %v7362_v58 = vrot.slane %v7327_v21, 7  ;;  %v13950_v21 = vld [vmem:[%s18199_s7 + $0xa48] sm:$0xff] }
 0x5d0   :  { %7924 = vmatmul.bf16.vlgmr.msra.gmra.mxu2 %v7372_v36  ;;  %v5409_v47 = vadd.f32 %v5408_v35, %v17251_v57  ;;  %v13919_v57 = vld [vmem:[%s18199_s7 + $0x950] sm:$0xff]  ;;  %v7326_v36 = vld [vmem:[#allocation3 + $0x26] sm:$0x1] }
 0x5d1   :  { %6620 = vmatpush.bf16.msra.mxu3 %v13811_v32  ;;  %v6006_v32 = vsel %vm4610_vm9, %v6005_v29, %v5966_v53  ;;  %v13841_v35 = vld [vmem:[%s18199_s7 + $0x6e0] sm:$0xff]  ;;  %v7998_v29 = vld [vmem:[#allocation3 + $0x69] sm:$0x1]  ;;  %v8013_v53 = vrot.slane %v7996_v60, 7 }
 0x5d2   :  { %7943 = vmatpush.bf16.msrb.mxu0 %v13915_v38  ;;  %v5422_v44 = vadd.f32 %v17102_v26, %v5409_v47  ;;  %v6539_v46 = vpop.f32.mrf.mxu0  ;;  %v13927_v26 = vld [vmem:[%s18199_s7 + $0x990] sm:$0xff]  ;;  %v7353_v38 = vsel %vm4610_vm9, %v7352_v40, %v7322_v31  ;;  %v13953_v47 = vld [vmem:[%s18199_s7 + $0xa60] sm:$0xff]  ;;  %v8000_v40 = vld [vmem:[#allocation3 + $0x6a] sm:$0x1] }
 0x5d3   :  { %7956 = vmatpush.bf16.msrb.mxu1 %v13923_v54  ;;  %7969 = vmatpush.bf16.msrb.mxu2 %v13931_v11  ;;  %v6563_v30 = vpop.f32.mrf.mxu2  ;;  %v6552_v28 = vpop.f32.mrf.mxu1  ;;  %v7358_v54 = vsel %vm4610_vm9, %v7357_v15, %v7324_v9  ;;  %v7363_v11 = vsel %vm4610_vm9, %v7362_v58, %v7326_v36  ;;  %v13944_v46 = vld [vmem:[%s18199_s7 + $0xa18] sm:$0xff]  ;;  %v8018_v58 = vrot.slane %v7998_v29, 7  ;;  %v7995_v9 = vld [vmem:[#allocation3 + $0x28] sm:$0x1]  ;;  %v7997_v36 = vld [vmem:[#allocation3 + $0x29] sm:$0x1] }
 0x5d4   :  { %v17357_v52 = vadd.f32 %v6563_v30, %v6551_v33  ;;  %v5435_v7 = vadd.f32 %v17110_v1, %v5422_v44  ;;  %v13918_v1 = vld [vmem:[%s18199_s7 + $0x948] sm:$0xff]  ;;  %v13963_v33 = vld [vmem:[%s18199_s7 + $0xab0] sm:$0xff]  ;;  %v13961_v30 = vld [vmem:[%s18199_s7 + $0xaa0] sm:$0xff] }
 0x5d5   :  { %6621 = vmatpush.bf16.msra.mxu3 %v13810_v34  ;;  %v6015_v34 = vpack.c.bf16 %v6006_v32, %v6006_v32  ;;  %v13840_v44 = vld [vmem:[%s18199_s7 + $0x6d8] sm:$0xff]  ;;  %v13975_v29 = vld [vmem:[%s18199_s7 + $0xb10] sm:$0xff] }
 0x5d6   :  { %7944 = vmatpush.bf16.msrb.mxu0 %v13914_v12  ;;  %v17376_v0 = vadd.f32 %v17127_v48, %v5435_v7  ;;  %v13843_v12 = vld [vmem:[%s18199_s7 + $0x6f0] sm:$0xff]  ;;  %v13952_v28 = vld [vmem:[%s18199_s7 + $0xa58] sm:$0xff] }
 0x5d7   :  { %7957 = vmatpush.bf16.msrb.mxu1 %v13922_v42  ;;  %7970 = vmatpush.bf16.msrb.mxu2 %v13930_v13  ;;  %v5410_v24 = vpop.f32.mrf.mxu3  ;;  %v7374_v42 = vpack.c.bf16 %v7353_v38, %v7353_v38  ;;  %v7375_v13 = vpack.c.bf16 %v7358_v54, %v7358_v54  ;;  %v6639_v31 = vld [vmem:[#allocation3 + $0x1b] sm:$0x1] }
 0x5d8   :  { %v6640_v24 = vld [vmem:[#allocation3 + $0x5b] sm:$0x1] }
 0x5d9   :  { %6622 = vmatpush.bf16.msra.mxu3 %v13809_v55  ;;  %v7376_v55 = vpack.c.bf16 %v7363_v11, %v7363_v11  ;;  %v13876_v32 = vld [vmem:[%s18199_s7 + $0x7f8] sm:$0xff] }
 0x5da   :  { %7945 = vmatpush.bf16.msrb.mxu0 %v13913_v45  ;;  %v13842_v45 = vld [vmem:[%s18199_s7 + $0x6e8] sm:$0xff]  ;;  %v13988_v38 = vld [vmem:[%s18199_s7 + $0xb78] sm:$0xff] }
 0x5db   :  { %7958 = vmatpush.bf16.msrb.mxu1 %v13921_v18  ;;  %7971 = vmatpush.bf16.msrb.mxu2 %v13929_v22  ;;  %v6565_v48 = vpop.f32.mrf.mxu2  ;;  %v13946_v18 = vld [vmem:[%s18199_s7 + $0xa28] sm:$0xff]  ;;  %v13996_v11 = vld [vmem:[%s18199_s7 + $0xbb8] sm:$0xff] }
 0x5dc   :  { %v13954_v22 = vld [vmem:[%s18199_s7 + $0xa68] sm:$0xff] }
 0x5dd   :  { %6623 = vmatpush.bf16.msra.mxu3 %v13808_v63  ;;  %v13962_v63 = vld [vmem:[%s18199_s7 + $0xaa8] sm:$0xff] }
 0x5de   :  { %7946 = vmatpush.bf16.msrb.mxu0 %v13912_v39 }
 0x5df   :  { %7959 = vmatpush.bf16.msrb.mxu1 %v13920_v17  ;;  %7972 = vmatpush.bf16.msrb.mxu2 %v13928_v62  ;;  %v13945_v62 = vld [vmem:[%s18199_s7 + $0xa20] sm:$0xff] }
 0x5e1   :  { %6624 = vmatpush.bf16.msra.mxu3 %v13807_v27 }
 0x5e2   :  { %7947 = vmatpush.bf16.msrb.mxu0 %v13911_v5  ;;  %v13960_v5 = vld [vmem:[%s18199_s7 + $0xa98] sm:$0xff] }
 0x5e3   :  { %7960 = vmatpush.bf16.msrb.mxu1 %v13919_v57  ;;  %7973 = vmatpush.bf16.msrb.mxu2 %v13927_v26 }
 0x5e5   :  { %6625 = vmatpush.bf16.msra.mxu3 %v13806_v20 }
 0x5e6   :  { %7948 = vmatpush.bf16.msrb.mxu0 %v13910_v51  ;;  %v13959_v51 = vld [vmem:[%s18199_s7 + $0xa90] sm:$0xff] }
 0x5e7   :  { %7961 = vmatpush.bf16.msrb.mxu1 %v13918_v1  ;;  %7974 = vmatpush.bf16.msrb.mxu2 %v13926_v19  ;;  %v13838_v1 = vld [vmem:[%s18199_s7 + $0x6c8] sm:$0xff] }
 0x5e8   :  { %v13942_v19 = vld [vmem:[%s18199_s7 + $0xa08] sm:$0xff] }
 0x5e9   :  { %6626 = vmatpush.bf16.msra.mxu3 %v13805_v50  ;;  %v13958_v50 = vld [vmem:[%s18199_s7 + $0xa88] sm:$0xff] }
 0x5ea   :  { %7949 = vmatpush.bf16.msrb.mxu0 %v13909_v8  ;;  %v17439_v39 = vpop.f32.mrf.mxu0  ;;  %v6666_v8 = vrot.slane %v6640_v24, 7 }
 0x5eb   :  { %7962 = vmatpush.bf16.msrb.mxu1 %v13917_v10  ;;  %7975 = vmatpush.bf16.msrb.mxu2 %v13925_v14  ;;  %v17441_v17 = vpop.f32.mrf.mxu1  ;;  %v13837_v10 = vld [vmem:[%s18199_s7 + $0x6c0] sm:$0xff] }
 0x5ec   :  { %6627 = vmatmul.bf16.vlgmr.msra.gmra.mxu3 %v6015_v34  ;;  %v13941_v14 = vld [vmem:[%s18199_s7 + $0xa00] sm:$0xff]  ;;  %v6667_v54 = vsel %vm4610_vm9, %v6666_v8, %v6639_v31  ;;  %v8014_v34 = vsel %vm4610_vm9, %v8013_v53, %v7995_v9  ;;  %v6648_v8 = vld [vmem:[#allocation3 + $0x5f] sm:$0x1]  ;;  %v13974_v53 = vld [vmem:[%s18199_s7 + $0xb08] sm:$0xff] }
 0x5ed   :  { %7248 = vmatpush.bf16.msrb.mxu3 %v13844_v23  ;;  %7950 = vmatmul.bf16.vlgmr.msrb.gmra.mxu0 %v7374_v42  ;;  %v13949_v23 = vld [vmem:[%s18199_s7 + $0xa40] sm:$0xff]  ;;  %v7999_v42 = vld [vmem:[#allocation3 + $0x2a] sm:$0x1] }
 0x5ee   :  { %8571 = vmatpush.bf16.msra.mxu0 %v13948_v25  ;;  %7963 = vmatmul.bf16.vlgmr.msrb.gmra.mxu1 %v7375_v13  ;;  %v8023_v25 = vrot.slane %v8000_v40, 7  ;;  %v13991_v40 = vld [vmem:[%s18199_s7 + $0xb90] sm:$0xff]  ;;  %v13990_v31 = vld [vmem:[%s18199_s7 + $0xb88] sm:$0xff]  ;;  %v13869_v9 = vld [vmem:[%s18199_s7 + $0x7c0] sm:$0xff] }
 0x5ef   :  { %8584 = vmatpush.bf16.msra.mxu1 %v13956_v49  ;;  %8597 = vmatpush.bf16.msra.mxu2 %v13964_v41  ;;  %v5460_v27 = vpop.f32.mrf.mxu3  ;;  %v13957_v49 = vld [vmem:[%s18199_s7 + $0xa80] sm:$0xff]  ;;  %v13980_v41 = vld [vmem:[%s18199_s7 + $0xb38] sm:$0xff] }
 0x5f0   :  { %7976 = vmatmul.bf16.vlgmr.msrb.gmra.mxu2 %v7376_v55  ;;  %v17468_v57 = vadd.f32 %v5460_v27, %v17376_v0  ;;  %v13951_v0 = vld [vmem:[%s18199_s7 + $0xa50] sm:$0xff]  ;;  %v8024_v13 = vsel %vm4610_vm9, %v8023_v25, %v7999_v42  ;;  %v8051_v55 = vpack.c.bf16 %v8014_v34, %v8014_v34  ;;  %v8008_v25 = vld [vmem:[#allocation3 + $0x6e] sm:$0x1]  ;;  %v13908_v42 = vld [vmem:[%s18199_s7 + $0x8f8] sm:$0xff] }
 0x5f1   :  { %7249 = vmatpush.bf16.msrb.mxu3 %v13843_v12  ;;  %v8019_v12 = vsel %vm4610_vm9, %v8018_v58, %v7997_v36  ;;  %v13982_v58 = vld [vmem:[%s18199_s7 + $0xb48] sm:$0xff]  ;;  %v13981_v36 = vld [vmem:[%s18199_s7 + $0xb40] sm:$0xff]  ;;  %v8043_v34 = vrot.slane %v8008_v25, 7 }
 0x5f2   :  { %8572 = vmatpush.bf16.msra.mxu0 %v13947_v37  ;;  %v6591_v7 = vpop.f32.mrf.mxu0  ;;  %v6692_v37 = vpack.c.bf16 %v6667_v54, %v6667_v54  ;;  %v13973_v54 = vld [vmem:[%s18199_s7 + $0xb00] sm:$0xff]  ;;  %v14006_v25 = vld [vmem:[%s18199_s7 + $0xc08] sm:$0xff] }
 0x5f3   :  { %8585 = vmatpush.bf16.msra.mxu1 %v13955_v43  ;;  %8598 = vmatpush.bf16.msra.mxu2 %v13963_v33  ;;  %v17470_v26 = vpop.f32.mrf.mxu2  ;;  %v6604_v20 = vpop.f32.mrf.mxu1  ;;  %v13875_v43 = vld [vmem:[%s18199_s7 + $0x7f0] sm:$0xff]  ;;  %v8052_v33 = vpack.c.bf16 %v8019_v12, %v8019_v12  ;;  %v13985_v7 = vld [vmem:[%s18199_s7 + $0xb60] sm:$0xff] }
 0x5f4   :  { %v13993_v20 = vld [vmem:[%s18199_s7 + $0xba0] sm:$0xff] }
 0x5f5   :  { %7250 = vmatpush.bf16.msrb.mxu3 %v13842_v45  ;;  %v13979_v45 = vld [vmem:[%s18199_s7 + $0xb30] sm:$0xff]  ;;  %v13989_v12 = vld [vmem:[%s18199_s7 + $0xb80] sm:$0xff] }
 0x5f6   :  { %8573 = vmatpush.bf16.msra.mxu0 %v13946_v18  ;;  %v13987_v18 = vld [vmem:[%s18199_s7 + $0xb70] sm:$0xff] }
 0x5f7   :  { %8586 = vmatpush.bf16.msra.mxu1 %v13954_v22  ;;  %8599 = vmatpush.bf16.msra.mxu2 %v13962_v63  ;;  %v5462_v48 = vpop.f32.mrf.mxu3  ;;  %v8053_v22 = vpack.c.bf16 %v8024_v13, %v8024_v13  ;;  %v13995_v63 = vld [vmem:[%s18199_s7 + $0xbb0] sm:$0xff]  ;;  %v8003_v13 = vld [vmem:[#allocation3 + $0x2c] sm:$0x1] }
 0x5f8   :  { %v13871_v48 = vld [vmem:[%s18199_s7 + $0x7d0] sm:$0xff] }
 0x5f9   :  { %7251 = vmatpush.bf16.msrb.mxu3 %v13841_v35  ;;  %v5858_v35 = vadd.f32 %v17156_v56, %v17468_v57  ;;  %v13994_v56 = vld [vmem:[%s18199_s7 + $0xba8] sm:$0xff]  ;;  %v13977_v57 = vld [vmem:[%s18199_s7 + $0xb20] sm:$0xff] }
 0x5fa   :  { %8574 = vmatpush.bf16.msra.mxu0 %v13945_v62  ;;  %v13874_v62 = vld [vmem:[%s18199_s7 + $0x7e8] sm:$0xff] }
 0x5fb   :  { %8587 = vmatpush.bf16.msra.mxu1 %v13953_v47  ;;  %8600 = vmatpush.bf16.msra.mxu2 %v13961_v30  ;;  %v6617_v15 = vpop.f32.mrf.mxu2  ;;  %v13978_v47 = vld [vmem:[%s18199_s7 + $0xb28] sm:$0xff]  ;;  %v5871_v27 = vadd.f32 %v17164_v2, %v5858_v35  ;;  %v13872_v2 = vld [vmem:[%s18199_s7 + $0x7d8] sm:$0xff] }
 0x5fc   :  { %v13986_v30 = vld [vmem:[%s18199_s7 + $0xb68] sm:$0xff] }
 0x5fd   :  { %7252 = vmatpush.bf16.msrb.mxu3 %v13840_v44  ;;  %v13870_v15 = vld [vmem:[%s18199_s7 + $0x7c8] sm:$0xff] }
 0x5fe   :  { %8575 = vmatpush.bf16.msra.mxu0 %v13944_v46 }
 0x5ff   :  { %8588 = vmatpush.bf16.msra.mxu1 %v13952_v28  ;;  %8601 = vmatpush.bf16.msra.mxu2 %v13960_v5  ;;  %v13873_v28 = vld [vmem:[%s18199_s7 + $0x7e0] sm:$0xff] }
 0x601   :  { %7253 = vmatpush.bf16.msrb.mxu3 %v13839_v4  ;;  %v5884_v4 = vadd.f32 %v17194_v59, %v5871_v27  ;;  %v14027_v27 = vld [vmem:[%s18199_s7 + $0xcb0] sm:$0xff] }
 0x602   :  { %8576 = vmatpush.bf16.msra.mxu0 %v13943_v16  ;;  %v13976_v16 = vld [vmem:[%s18199_s7 + $0xb18] sm:$0xff] }
 0x603   :  { %8589 = vmatpush.bf16.msra.mxu1 %v13951_v0  ;;  %8602 = vmatpush.bf16.msra.mxu2 %v13959_v51  ;;  %v13984_v0 = vld [vmem:[%s18199_s7 + $0xb58] sm:$0xff] }
 0x605   :  { %7254 = vmatpush.bf16.msrb.mxu3 %v13838_v1  ;;  %v13992_v1 = vld [vmem:[%s18199_s7 + $0xb98] sm:$0xff] }
 0x606   :  { %8577 = vmatpush.bf16.msra.mxu0 %v13942_v19 }
 0x607   :  { %8590 = vmatpush.bf16.msra.mxu1 %v13950_v21  ;;  %8603 = vmatpush.bf16.msra.mxu2 %v13958_v50  ;;  %v13983_v50 = vld [vmem:[%s18199_s7 + $0xb50] sm:$0xff] }
 0x609   :  { %7255 = vmatpush.bf16.msrb.mxu3 %v13837_v10  ;;  %v8004_v10 = vld [vmem:[#allocation3 + $0x6c] sm:$0x1] }
 0x60a   :  { %8578 = vmatpush.bf16.msra.mxu0 %v13941_v14  ;;  %v7218_v44 = vpop.f32.mrf.mxu0 }
 0x60b   :  { %8591 = vmatpush.bf16.msra.mxu1 %v13949_v23  ;;  %8604 = vmatpush.bf16.msra.mxu2 %v13957_v49  ;;  %v7231_v46 = vpop.f32.mrf.mxu1  ;;  %v8006_v23 = vld [vmem:[#allocation3 + $0x6d] sm:$0x1] }
 0x60c   :  { %7256 = vmatmul.bf16.vlgmr.msrb.gmra.mxu3 %v6692_v37  ;;  %v7232_v5 = vadd.f32 %v7231_v46, %v7218_v44  ;;  %v14012_v37 = vld [vmem:[%s18199_s7 + $0xc38] sm:$0xff]  ;;  %v14011_v44 = vld [vmem:[%s18199_s7 + $0xc30] sm:$0xff] }
 0x60d   :  { %7300 = vmatpush.bf16.msra.mxu3 %v13876_v32  ;;  %8579 = vmatmul.bf16.vlgmr.msra.gmra.mxu0 %v8051_v55  ;;  %v6686_v32 = vrot.slane %v6648_v8, 7  ;;  %v14019_v46 = vld [vmem:[%s18199_s7 + $0xc70] sm:$0xff] }
 0x60e   :  { %8623 = vmatpush.bf16.msrb.mxu0 %v13980_v41  ;;  %8592 = vmatmul.bf16.vlgmr.msra.gmra.mxu1 %v8052_v33  ;;  %v8033_v41 = vrot.slane %v8004_v10, 7  ;;  %v8005_v33 = vld [vmem:[#allocation3 + $0x2d] sm:$0x1]  ;;  %v13903_v8 = vld [vmem:[%s18199_s7 + $0x8d0] sm:$0xff] }
 0x60f   :  { %8636 = vmatpush.bf16.msrb.mxu1 %v13988_v38  ;;  %8649 = vmatpush.bf16.msrb.mxu2 %v13996_v11  ;;  %v5896_v51 = vpop.f32.mrf.mxu3  ;;  %v8038_v38 = vrot.slane %v8006_v23, 7  ;;  %v6647_v11 = vld [vmem:[#allocation3 + $0x1f] sm:$0x1]  ;;  %v14007_v10 = vld [vmem:[%s18199_s7 + $0xc10] sm:$0xff]  ;;  %v7321_v23 = vld [vmem:[#allocation3 + $0x63] sm:$0x1] }
 0x610   :  { %8605 = vmatmul.bf16.vlgmr.msra.gmra.mxu2 %v8053_v22  ;;  %v17576_v24 = vadd.f32 %v5896_v51, %v5884_v4  ;;  %v6687_v55 = vsel %vm4610_vm9, %v6686_v32, %v6647_v11  ;;  %v14009_v51 = vld [vmem:[%s18199_s7 + $0xc20] sm:$0xff] }
 0x611   :  { %7301 = vmatpush.bf16.msra.mxu3 %v13875_v43  ;;  %v14020_v43 = vld [vmem:[%s18199_s7 + $0xc78] sm:$0xff]  ;;  %v8039_v22 = vsel %vm4610_vm9, %v8038_v38, %v8005_v33  ;;  %v8681_v38 = vld [vmem:[#allocation3 + $0x72] sm:$0x1]  ;;  %v13901_v11 = vld [vmem:[%s18199_s7 + $0x8c0] sm:$0xff] }
 0x612   :  { %8624 = vmatpush.bf16.msrb.mxu0 %v13979_v45  ;;  %v7220_v19 = vpop.f32.mrf.mxu0  ;;  %v14028_v45 = vld [vmem:[%s18199_s7 + $0xcb8] sm:$0xff] }
 0x613   :  { %8637 = vmatpush.bf16.msrb.mxu1 %v13987_v18  ;;  %8650 = vmatpush.bf16.msrb.mxu2 %v13995_v63  ;;  %v7244_v60 = vpop.f32.mrf.mxu2  ;;  %v7233_v21 = vpop.f32.mrf.mxu1  ;;  %v8034_v18 = vsel %vm4610_vm9, %v8033_v41, %v8003_v13  ;;  %v8007_v63 = vld [vmem:[#allocation3 + $0x2e] sm:$0x1]  ;;  %v14008_v19 = vld [vmem:[%s18199_s7 + $0xc18] sm:$0xff]  ;;  %v14013_v13 = vld [vmem:[%s18199_s7 + $0xc40] sm:$0xff] }
 0x614   :  { %v17578_v59 = vadd.f32 %v7244_v60, %v7232_v5  ;;  %v8044_v35 = vsel %vm4610_vm9, %v8043_v34, %v8007_v63  ;;  %v5910_v5 = vadd.f32 %v17223_v61, %v17576_v24  ;;  %v14026_v61 = vld [vmem:[%s18199_s7 + $0xca8] sm:$0xff]  ;;  %v14025_v24 = vld [vmem:[%s18199_s7 + $0xca0] sm:$0xff]  ;;  %v14016_v21 = vld [vmem:[%s18199_s7 + $0xc58] sm:$0xff] }
 0x615   :  { %7302 = vmatpush.bf16.msra.mxu3 %v13874_v62  ;;  %v6696_v62 = vpack.c.bf16 %v6687_v55, %v6687_v55  ;;  %v14022_v41 = vld [vmem:[%s18199_s7 + $0xc88] sm:$0xff]  ;;  %v14021_v55 = vld [vmem:[%s18199_s7 + $0xc80] sm:$0xff]  ;;  %v13940_v33 = vld [vmem:[%s18199_s7 + $0x9f8] sm:$0xff] }
 0x616   :  { %8625 = vmatpush.bf16.msrb.mxu0 %v13978_v47  ;;  %v13907_v47 = vld [vmem:[%s18199_s7 + $0x8f0] sm:$0xff] }
 0x617   :  { %8638 = vmatpush.bf16.msrb.mxu1 %v13986_v30  ;;  %8651 = vmatpush.bf16.msrb.mxu2 %v13994_v56  ;;  %v5898_v14 = vpop.f32.mrf.mxu3  ;;  %v8055_v30 = vpack.c.bf16 %v8034_v18, %v8034_v18  ;;  %v8056_v56 = vpack.c.bf16 %v8039_v22, %v8039_v22  ;;  %v14044_v18 = vld [vmem:[%s18199_s7 + $0xd38] sm:$0xff] }
 0x618   :  { %v13902_v14 = vld [vmem:[%s18199_s7 + $0x8c8] sm:$0xff]  ;;  %v14052_v22 = vld [vmem:[%s18199_s7 + $0xd78] sm:$0xff] }
 0x619   :  { %7303 = vmatpush.bf16.msra.mxu3 %v13873_v28  ;;  %v8057_v28 = vpack.c.bf16 %v8044_v35, %v8044_v35  ;;  %v8678_v35 = vld [vmem:[#allocation3 + $0x31] sm:$0x1] }
 0x61a   :  { %8626 = vmatpush.bf16.msrb.mxu0 %v13977_v57  ;;  %v13906_v57 = vld [vmem:[%s18199_s7 + $0x8e8] sm:$0xff] }
 0x61b   :  { %8639 = vmatpush.bf16.msrb.mxu1 %v13985_v7  ;;  %8652 = vmatpush.bf16.msrb.mxu2 %v13993_v20  ;;  %v7246_v49 = vpop.f32.mrf.mxu2  ;;  %v14010_v7 = vld [vmem:[%s18199_s7 + $0xc28] sm:$0xff] }
 0x61c   :  { %v14018_v20 = vld [vmem:[%s18199_s7 + $0xc68] sm:$0xff] }
 0x61d   :  { %7304 = vmatpush.bf16.msra.mxu3 %v13872_v2  ;;  %v14014_v49 = vld [vmem:[%s18199_s7 + $0xc48] sm:$0xff] }
 0x61e   :  { %8627 = vmatpush.bf16.msrb.mxu0 %v13976_v16  ;;  %v13905_v16 = vld [vmem:[%s18199_s7 + $0x8e0] sm:$0xff] }
 0x61f   :  { %8640 = vmatpush.bf16.msrb.mxu1 %v13984_v0  ;;  %8653 = vmatpush.bf16.msrb.mxu2 %v13992_v1  ;;  %v5923_v0 = vadd.f32 %v17225_v6, %v5910_v5  ;;  %v14017_v1 = vld [vmem:[%s18199_s7 + $0xc60] sm:$0xff]  ;;  %v13904_v6 = vld [vmem:[%s18199_s7 + $0x8d8] sm:$0xff] }
 0x621   :  { %7305 = vmatpush.bf16.msra.mxu3 %v13871_v48  ;;  %v5936_v60 = vadd.f32 %v17253_v3, %v5923_v0  ;;  %v14042_v0 = vld [vmem:[%s18199_s7 + $0xd28] sm:$0xff] }
 0x622   :  { %8628 = vmatpush.bf16.msrb.mxu0 %v13975_v29  ;;  %v14024_v29 = vld [vmem:[%s18199_s7 + $0xc98] sm:$0xff] }
 0x623   :  { %8641 = vmatpush.bf16.msrb.mxu1 %v13983_v50  ;;  %8654 = vmatpush.bf16.msrb.mxu2 %v13991_v40 }
 0x625   :  { %7306 = vmatpush.bf16.msra.mxu3 %v13870_v15 }
 0x626   :  { %8629 = vmatpush.bf16.msrb.mxu0 %v13974_v53  ;;  %v14015_v53 = vld [vmem:[%s18199_s7 + $0xc50] sm:$0xff] }
 0x627   :  { %8642 = vmatpush.bf16.msrb.mxu1 %v13982_v58  ;;  %8655 = vmatpush.bf16.msrb.mxu2 %v13990_v31  ;;  %v14023_v58 = vld [vmem:[%s18199_s7 + $0xc90] sm:$0xff] }
 0x628   :  { %v8677_v31 = vld [vmem:[#allocation3 + $0x70] sm:$0x1] }
 0x629   :  { %7307 = vmatpush.bf16.msra.mxu3 %v13869_v9  ;;  %v8679_v9 = vld [vmem:[#allocation3 + $0x71] sm:$0x1]  ;;  %v8694_v34 = vrot.slane %v8677_v31, 7 }
 0x62a   :  { %8630 = vmatpush.bf16.msrb.mxu0 %v13973_v54  ;;  %v17658_v2 = vpop.f32.mrf.mxu0 }
 0x62b   :  { %8643 = vmatpush.bf16.msrb.mxu1 %v13981_v36  ;;  %8656 = vmatpush.bf16.msrb.mxu2 %v13989_v12  ;;  %v17660_v4 = vpop.f32.mrf.mxu1  ;;  %v7347_v36 = vrot.slane %v7321_v23, 7  ;;  %v8699_v12 = vrot.slane %v8679_v9, 7  ;;  %v14055_v9 = vld [vmem:[%s18199_s7 + $0xd90] sm:$0xff] }
 0x62c   :  { %7308 = vmatmul.bf16.vlgmr.msra.gmra.mxu3 %v6696_v62  ;;  %v14060_v62 = vld [vmem:[%s18199_s7 + $0xdb8] sm:$0xff] }
 0x62d   :  { %7929 = vmatpush.bf16.msrb.mxu3 %v13908_v42  ;;  %8631 = vmatmul.bf16.vlgmr.msrb.gmra.mxu0 %v8055_v30  ;;  %v14005_v42 = vld [vmem:[%s18199_s7 + $0xc00] sm:$0xff]  ;;  %v8700_v30 = vsel %vm4610_vm9, %v8699_v12, %v8678_v35  ;;  %v8687_v12 = vld [vmem:[#allocation3 + $0x75] sm:$0x1] }
 0x62e   :  { %9252 = vmatpush.bf16.msra.mxu0 %v14012_v37  ;;  %8644 = vmatmul.bf16.vlgmr.msrb.gmra.mxu1 %v8056_v56  ;;  %v7320_v37 = vld [vmem:[#allocation3 + $0x23] sm:$0x1]  ;;  %v8680_v56 = vld [vmem:[#allocation3 + $0x32] sm:$0x1]  ;;  %v8733_v5 = vpack.c.bf16 %v8700_v30, %v8700_v30  ;;  %v8684_v30 = vld [vmem:[#allocation3 + $0x34] sm:$0x1] }
 0x62f   :  { %9265 = vmatpush.bf16.msra.mxu1 %v14020_v43  ;;  %9278 = vmatpush.bf16.msra.mxu2 %v14028_v45  ;;  %v5948_v48 = vpop.f32.mrf.mxu3  ;;  %v8704_v43 = vrot.slane %v8681_v38, 7  ;;  %v8676_v45 = vld [vmem:[#allocation3 + $0x30] sm:$0x1]  ;;  %v7348_v63 = vsel %vm4610_vm9, %v7347_v36, %v7320_v37  ;;  %v7329_v38 = vld [vmem:[#allocation3 + $0x67] sm:$0x1]  ;;  %v14038_v36 = vld [vmem:[%s18199_s7 + $0xd08] sm:$0xff] }
 0x630   :  { %8657 = vmatmul.bf16.vlgmr.msrb.gmra.mxu2 %v8057_v28  ;;  %v17688_v50 = vadd.f32 %v5948_v48, %v5936_v60  ;;  %v13939_v28 = vld [vmem:[%s18199_s7 + $0x9f0] sm:$0xff]  ;;  %v13937_v60 = vld [vmem:[%s18199_s7 + $0x9e0] sm:$0xff] }
 0x631   :  { %7930 = vmatpush.bf16.msrb.mxu3 %v13907_v47  ;;  %v8695_v47 = vsel %vm4610_vm9, %v8694_v34, %v8676_v45  ;;  %v14049_v48 = vld [vmem:[%s18199_s7 + $0xd60] sm:$0xff]  ;;  %v8719_v45 = vrot.slane %v8687_v12, 7  ;;  %v13966_v12 = vld [vmem:[%s18199_s7 + $0xac8] sm:$0xff] }
 0x632   :  { %9253 = vmatpush.bf16.msra.mxu0 %v14011_v44  ;;  %v7272_v3 = vpop.f32.mrf.mxu0  ;;  %v8705_v44 = vsel %vm4610_vm9, %v8704_v43, %v8680_v56  ;;  %v7367_v43 = vrot.slane %v7329_v38, 7  ;;  %v14076_v56 = vld [vmem:[%s18199_s7 + $0xe38] sm:$0xff] }
 0x633   :  { %9266 = vmatpush.bf16.msra.mxu1 %v14019_v46  ;;  %9279 = vmatpush.bf16.msra.mxu2 %v14027_v27  ;;  %v17690_v40 = vpop.f32.mrf.mxu2  ;;  %v7285_v15 = vpop.f32.mrf.mxu1  ;;  %v7373_v46 = vpack.c.bf16 %v7348_v63, %v7348_v63  ;;  %v8732_v27 = vpack.c.bf16 %v8695_v47, %v8695_v47  ;;  %v13936_v3 = vld [vmem:[%s18199_s7 + $0x9d8] sm:$0xff]  ;;  %v7328_v63 = vld [vmem:[#allocation3 + $0x27] sm:$0x1] }
 0x634   :  { %v14040_v15 = vld [vmem:[%s18199_s7 + $0xd18] sm:$0xff] }
 0x635   :  { %7931 = vmatpush.bf16.msrb.mxu3 %v13906_v57  ;;  %v14043_v57 = vld [vmem:[%s18199_s7 + $0xd30] sm:$0xff]  ;;  %v13972_v47 = vld [vmem:[%s18199_s7 + $0xaf8] sm:$0xff] }
 0x636   :  { %9254 = vmatpush.bf16.msra.mxu0 %v14010_v7  ;;  %v14051_v7 = vld [vmem:[%s18199_s7 + $0xd70] sm:$0xff] }
 0x637   :  { %9267 = vmatpush.bf16.msra.mxu1 %v14018_v20  ;;  %9280 = vmatpush.bf16.msra.mxu2 %v14026_v61  ;;  %v5950_v32 = vpop.f32.mrf.mxu3  ;;  %v8734_v20 = vpack.c.bf16 %v8705_v44, %v8705_v44  ;;  %v14059_v61 = vld [vmem:[%s18199_s7 + $0xdb0] sm:$0xff]  ;;  %v14084_v44 = vld [vmem:[%s18199_s7 + $0xe78] sm:$0xff] }
 0x638   :  { %v14039_v32 = vld [vmem:[%s18199_s7 + $0xd10] sm:$0xff] }
 0x639   :  { %7932 = vmatpush.bf16.msrb.mxu3 %v13905_v16  ;;  %v13938_v16 = vld [vmem:[%s18199_s7 + $0x9e8] sm:$0xff] }
 0x63a   :  { %9255 = vmatpush.bf16.msra.mxu0 %v14009_v51  ;;  %v14050_v51 = vld [vmem:[%s18199_s7 + $0xd68] sm:$0xff] }
 0x63b   :  { %9268 = vmatpush.bf16.msra.mxu1 %v14017_v1  ;;  %9281 = vmatpush.bf16.msra.mxu2 %v14025_v24  ;;  %v7298_v54 = vpop.f32.mrf.mxu2  ;;  %v14058_v1 = vld [vmem:[%s18199_s7 + $0xda8] sm:$0xff] }
 0x63c   :  { %v8685_v54 = vld [vmem:[#allocation3 + $0x74] sm:$0x1] }
 0x63d   :  { %7933 = vmatpush.bf16.msrb.mxu3 %v13904_v6 }
 0x63e   :  { %9256 = vmatpush.bf16.msra.mxu0 %v14008_v19 }
 0x63f   :  { %9269 = vmatpush.bf16.msra.mxu1 %v14016_v21  ;;  %9282 = vmatpush.bf16.msra.mxu2 %v14024_v29  ;;  %v14041_v21 = vld [vmem:[%s18199_s7 + $0xd20] sm:$0xff] }
 0x640   :  { %v14057_v29 = vld [vmem:[%s18199_s7 + $0xda0] sm:$0xff] }
 0x641   :  { %7934 = vmatpush.bf16.msrb.mxu3 %v13903_v8  ;;  %v14048_v8 = vld [vmem:[%s18199_s7 + $0xd58] sm:$0xff] }
 0x642   :  { %9257 = vmatpush.bf16.msra.mxu0 %v14007_v10 }
 0x643   :  { %9270 = vmatpush.bf16.msra.mxu1 %v14015_v53  ;;  %9283 = vmatpush.bf16.msra.mxu2 %v14023_v58  ;;  %v14056_v53 = vld [vmem:[%s18199_s7 + $0xd98] sm:$0xff] }
 0x645   :  { %7935 = vmatpush.bf16.msrb.mxu3 %v13902_v14 }
 0x646   :  { %9258 = vmatpush.bf16.msra.mxu0 %v14006_v25 }
 0x647   :  { %9271 = vmatpush.bf16.msra.mxu1 %v14014_v49  ;;  %9284 = vmatpush.bf16.msra.mxu2 %v14022_v41  ;;  %v13935_v49 = vld [vmem:[%s18199_s7 + $0x9d0] sm:$0xff]  ;;  %v13934_v41 = vld [vmem:[%s18199_s7 + $0x9c8] sm:$0xff] }
 0x649   :  { %7936 = vmatpush.bf16.msrb.mxu3 %v13901_v11  ;;  %v14046_v11 = vld [vmem:[%s18199_s7 + $0xd48] sm:$0xff] }
 0x64a   :  { %9259 = vmatpush.bf16.msra.mxu0 %v14005_v42  ;;  %v7899_v24 = vpop.f32.mrf.mxu0  ;;  %v14054_v42 = vld [vmem:[%s18199_s7 + $0xd88] sm:$0xff] }
 0x64b   :  { %9272 = vmatpush.bf16.msra.mxu1 %v14013_v13  ;;  %9285 = vmatpush.bf16.msra.mxu2 %v14021_v55  ;;  %v7912_v6 = vpop.f32.mrf.mxu1  ;;  %v8689_v13 = vld [vmem:[#allocation3 + $0x76] sm:$0x1]  ;;  %v13933_v55 = vld [vmem:[%s18199_s7 + $0x9c0] sm:$0xff] }
 0x64c   :  { %7937 = vmatmul.bf16.vlgmr.msrb.gmra.mxu3 %v7373_v46  ;;  %v7913_v19 = vadd.f32 %v7912_v6, %v7899_v24  ;;  %v8724_v35 = vrot.slane %v8689_v13, 7  ;;  %v7368_v46 = vsel %vm4610_vm9, %v7367_v43, %v7328_v63  ;;  %v14083_v24 = vld [vmem:[%s18199_s7 + $0xe70] sm:$0xff]  ;;  %v9358_v13 = vld [vmem:[#allocation3 + $0x78] sm:$0x1]  ;;  %v14078_v43 = vld [vmem:[%s18199_s7 + $0xe48] sm:$0xff] }
 0x64d   :  { %7981 = vmatpush.bf16.msra.mxu3 %v13940_v33  ;;  %9260 = vmatmul.bf16.vlgmr.msra.gmra.mxu0 %v8732_v27  ;;  %v8714_v33 = vrot.slane %v8685_v54, 7  ;;  %v14092_v27 = vld [vmem:[%s18199_s7 + $0xeb8] sm:$0xff] }
 0x64e   :  { %9304 = vmatpush.bf16.msrb.mxu0 %v14044_v18  ;;  %9273 = vmatmul.bf16.vlgmr.msra.gmra.mxu1 %v8733_v5  ;;  %v14037_v18 = vld [vmem:[%s18199_s7 + $0xd00] sm:$0xff] }
 0x64f   :  { %9317 = vmatpush.bf16.msrb.mxu1 %v14052_v22  ;;  %9330 = vmatpush.bf16.msrb.mxu2 %v14060_v62  ;;  %v6576_v10 = vpop.f32.mrf.mxu3  ;;  %v14045_v22 = vld [vmem:[%s18199_s7 + $0xd40] sm:$0xff]  ;;  %v8715_v5 = vsel %vm4610_vm9, %v8714_v33, %v8684_v30  ;;  %v9360_v33 = vld [vmem:[#allocation3 + $0x79] sm:$0x1] }
 0x650   :  { %9286 = vmatmul.bf16.vlgmr.msra.gmra.mxu2 %v8734_v20  ;;  %v17793_v58 = vadd.f32 %v6576_v10, %v17357_v52  ;;  %v14047_v52 = vld [vmem:[%s18199_s7 + $0xd50] sm:$0xff]  ;;  %v14053_v62 = vld [vmem:[%s18199_s7 + $0xd80] sm:$0xff] }
 0x651   :  { %7982 = vmatpush.bf16.msra.mxu3 %v13939_v28  ;;  %v8686_v28 = vld [vmem:[#allocation3 + $0x35] sm:$0x1]  ;;  %v14069_v30 = vld [vmem:[%s18199_s7 + $0xe00] sm:$0xff] }
 0x652   :  { %9305 = vmatpush.bf16.msrb.mxu0 %v14043_v57  ;;  %v7901_v31 = vpop.f32.mrf.mxu0  ;;  %v8720_v57 = vsel %vm4610_vm9, %v8719_v45, %v8686_v28  ;;  %v14086_v45 = vld [vmem:[%s18199_s7 + $0xe88] sm:$0xff]  ;;  %v14085_v28 = vld [vmem:[%s18199_s7 + $0xe80] sm:$0xff] }
 0x653   :  { %9318 = vmatpush.bf16.msrb.mxu1 %v14051_v7  ;;  %9331 = vmatpush.bf16.msrb.mxu2 %v14059_v61  ;;  %v7925_v14 = vpop.f32.mrf.mxu2  ;;  %v7914_v25 = vpop.f32.mrf.mxu1  ;;  %v8688_v7 = vld [vmem:[#allocation3 + $0x36] sm:$0x1]  ;;  %v7377_v61 = vpack.c.bf16 %v7368_v46, %v7368_v46 }
 0x654   :  { %v17795_v23 = vadd.f32 %v7925_v14, %v7913_v19  ;;  %v8725_v20 = vsel %vm4610_vm9, %v8724_v35, %v8688_v7  ;;  %v6590_v19 = vadd.f32 %v17439_v39, %v17793_v58  ;;  %v14090_v39 = vld [vmem:[%s18199_s7 + $0xea8] sm:$0xff]  ;;  %v14081_v58 = vld [vmem:[%s18199_s7 + $0xe60] sm:$0xff]  ;;  %v14072_v25 = vld [vmem:[%s18199_s7 + $0xe18] sm:$0xff] }
 0x655   :  { %7983 = vmatpush.bf16.msra.mxu3 %v13938_v16  ;;  %v13971_v16 = vld [vmem:[%s18199_s7 + $0xaf0] sm:$0xff]  ;;  %v8738_v6 = vpack.c.bf16 %v8725_v20, %v8725_v20  ;;  %v14089_v14 = vld [vmem:[%s18199_s7 + $0xea0] sm:$0xff]  ;;  %v14116_v7 = vld [vmem:[%s18199_s7 + $0xf78] sm:$0xff] }
 0x656   :  { %9306 = vmatpush.bf16.msrb.mxu0 %v14042_v0  ;;  %v8736_v0 = vpack.c.bf16 %v8715_v5, %v8715_v5  ;;  %v6603_v10 = vadd.f32 %v17441_v17, %v6590_v19  ;;  %v13968_v17 = vld [vmem:[%s18199_s7 + $0xad8] sm:$0xff]  ;;  %v13965_v35 = vld [vmem:[%s18199_s7 + $0xac0] sm:$0xff] }
 0x657   :  { %9319 = vmatpush.bf16.msrb.mxu1 %v14050_v51  ;;  %9332 = vmatpush.bf16.msrb.mxu2 %v14058_v1  ;;  %v6578_v34 = vpop.f32.mrf.mxu3  ;;  %v8737_v51 = vpack.c.bf16 %v8720_v57, %v8720_v57  ;;  %v14075_v1 = vld [vmem:[%s18199_s7 + $0xe30] sm:$0xff]  ;;  %v9357_v5 = vld [vmem:[#allocation3 + $0x38] sm:$0x1] }
 0x658   :  { %v6616_v31 = vadd.f32 %v17470_v26, %v6603_v10  ;;  %v14079_v34 = vld [vmem:[%s18199_s7 + $0xe50] sm:$0xff]  ;;  %v14108_v57 = vld [vmem:[%s18199_s7 + $0xf38] sm:$0xff]  ;;  %v14002_v10 = vld [vmem:[%s18199_s7 + $0xbe8] sm:$0xff] }
 0x659   :  { %7984 = vmatpush.bf16.msra.mxu3 %v13937_v60  ;;  %v14091_v60 = vld [vmem:[%s18199_s7 + $0xeb0] sm:$0xff] }
 0x65a   :  { %9307 = vmatpush.bf16.msrb.mxu0 %v14041_v21  ;;  %v13970_v21 = vld [vmem:[%s18199_s7 + $0xae8] sm:$0xff] }
 0x65b   :  { %9320 = vmatpush.bf16.msrb.mxu1 %v14049_v48  ;;  %9333 = vmatpush.bf16.msrb.mxu2 %v14057_v29  ;;  %v7927_v37 = vpop.f32.mrf.mxu2  ;;  %v14074_v48 = vld [vmem:[%s18199_s7 + $0xe28] sm:$0xff] }
 0x65c   :  { %v14082_v29 = vld [vmem:[%s18199_s7 + $0xe68] sm:$0xff] }
 0x65d   :  { %7985 = vmatpush.bf16.msra.mxu3 %v13936_v3  ;;  %v14070_v37 = vld [vmem:[%s18199_s7 + $0xe08] sm:$0xff] }
 0x65e   :  { %9308 = vmatpush.bf16.msrb.mxu0 %v14040_v15 }
 0x65f   :  { %9321 = vmatpush.bf16.msrb.mxu1 %v14048_v8  ;;  %9334 = vmatpush.bf16.msrb.mxu2 %v14056_v53  ;;  %v13969_v8 = vld [vmem:[%s18199_s7 + $0xae0] sm:$0xff] }
 0x660   :  { %v14073_v53 = vld [vmem:[%s18199_s7 + $0xe20] sm:$0xff] }
 0x661   :  { %7986 = vmatpush.bf16.msra.mxu3 %v13935_v49  ;;  %v14080_v49 = vld [vmem:[%s18199_s7 + $0xe58] sm:$0xff] }
 0x662   :  { %9309 = vmatpush.bf16.msrb.mxu0 %v14039_v32 }
 0x663   :  { %9322 = vmatpush.bf16.msrb.mxu1 %v14047_v52  ;;  %9335 = vmatpush.bf16.msrb.mxu2 %v14055_v9  ;;  %v14088_v52 = vld [vmem:[%s18199_s7 + $0xe98] sm:$0xff] }
 0x665   :  { %7987 = vmatpush.bf16.msra.mxu3 %v13934_v41 }
 0x666   :  { %9310 = vmatpush.bf16.msrb.mxu0 %v14038_v36  ;;  %v13967_v36 = vld [vmem:[%s18199_s7 + $0xad0] sm:$0xff] }
 0x667   :  { %9323 = vmatpush.bf16.msrb.mxu1 %v14046_v11  ;;  %9336 = vmatpush.bf16.msrb.mxu2 %v14054_v42  ;;  %v14071_v11 = vld [vmem:[%s18199_s7 + $0xe10] sm:$0xff]  ;;  %v8002_v42 = vld [vmem:[#allocation3 + $0x6b] sm:$0x1] }
 0x668   :  { %v8028_v63 = vrot.slane %v8002_v42, 7 }
 0x669   :  { %7988 = vmatpush.bf16.msra.mxu3 %v13933_v55 }
 0x66a   :  { %9311 = vmatpush.bf16.msrb.mxu0 %v14037_v18  ;;  %v17875_v3 = vpop.f32.mrf.mxu0  ;;  %v9362_v18 = vld [vmem:[#allocation3 + $0x7a] sm:$0x1] }
 0x66b   :  { %9324 = vmatpush.bf16.msrb.mxu1 %v14045_v22  ;;  %9337 = vmatpush.bf16.msrb.mxu2 %v14053_v62  ;;  %v17877_v15 = vpop.f32.mrf.mxu1  ;;  %v9375_v62 = vrot.slane %v9358_v13, 7  ;;  %v9385_v46 = vrot.slane %v9362_v18, 7  ;;  %v13998_v18 = vld [vmem:[%s18199_s7 + $0xbc8] sm:$0xff] }
 0x66c   :  { %7989 = vmatmul.bf16.vlgmr.msra.gmra.mxu3 %v7377_v61  ;;  %v9359_v61 = vld [vmem:[#allocation3 + $0x39] sm:$0x1] }
 0x66d   :  { %8610 = vmatpush.bf16.msrb.mxu3 %v13972_v47  ;;  %9312 = vmatmul.bf16.vlgmr.msrb.gmra.mxu0 %v8736_v0  ;;  %v9380_v47 = vrot.slane %v9360_v33, 7  ;;  %v9376_v0 = vsel %vm4610_vm9, %v9375_v62, %v9357_v5  ;;  %v14119_v33 = vld [vmem:[%s18199_s7 + $0xf90] sm:$0xff]  ;;  %v14110_v62 = vld [vmem:[%s18199_s7 + $0xf48] sm:$0xff]  ;;  %v13997_v5 = vld [vmem:[%s18199_s7 + $0xbc0] sm:$0xff] }
 0x66e   :  { %9933 = vmatpush.bf16.msra.mxu0 %v14076_v56  ;;  %9325 = vmatmul.bf16.vlgmr.msrb.gmra.mxu1 %v8737_v51  ;;  %v14077_v56 = vld [vmem:[%s18199_s7 + $0xe40] sm:$0xff]  ;;  %v9413_v19 = vpack.c.bf16 %v9376_v0, %v9376_v0 }
 0x66f   :  { %9946 = vmatpush.bf16.msra.mxu1 %v14084_v44  ;;  %9959 = vmatpush.bf16.msra.mxu2 %v14092_v27  ;;  %v6628_v32 = vpop.f32.mrf.mxu3  ;;  %v8001_v44 = vld [vmem:[#allocation3 + $0x2b] sm:$0x1]  ;;  %v14004_v27 = vld [vmem:[%s18199_s7 + $0xbf8] sm:$0xff]  ;;  %v9381_v51 = vsel %vm4610_vm9, %v9380_v47, %v9359_v61  ;;  %v14109_v61 = vld [vmem:[%s18199_s7 + $0xf40] sm:$0xff] }
 0x670   :  { %9338 = vmatmul.bf16.vlgmr.msrb.gmra.mxu2 %v8738_v6  ;;  %v6629_v9 = vadd.f32 %v6628_v32, %v6616_v31  ;;  %v8029_v20 = vsel %vm4610_vm9, %v8028_v63, %v8001_v44  ;;  %v14105_v32 = vld [vmem:[%s18199_s7 + $0xf20] sm:$0xff]  ;;  %v9368_v63 = vld [vmem:[#allocation3 + $0x7d] sm:$0x1] }
 0x671   :  { %8611 = vmatpush.bf16.msrb.mxu3 %v13971_v16  ;;  %v14124_v16 = vld [vmem:[%s18199_s7 + $0xfb8] sm:$0xff]  ;;  %v8054_v6 = vpack.c.bf16 %v8029_v20, %v8029_v20  ;;  %v14101_v20 = vld [vmem:[%s18199_s7 + $0xf00] sm:$0xff] }
 0x672   :  { %9934 = vmatpush.bf16.msra.mxu0 %v14075_v1  ;;  %v17908_v26 = vadd.f32 %v6629_v9, %v17688_v50  ;;  %v7953_v38 = vpop.f32.mrf.mxu0  ;;  %v14087_v50 = vld [vmem:[%s18199_s7 + $0xe90] sm:$0xff]  ;;  %v9361_v1 = vld [vmem:[#allocation3 + $0x3a] sm:$0x1]  ;;  %v14121_v9 = vld [vmem:[%s18199_s7 + $0xfa0] sm:$0xff] }
 0x673   :  { %9947 = vmatpush.bf16.msra.mxu1 %v14083_v24  ;;  %9960 = vmatpush.bf16.msra.mxu2 %v14091_v60  ;;  %v17905_v41 = vpop.f32.mrf.mxu2  ;;  %v7966_v54 = vpop.f32.mrf.mxu1  ;;  %v9386_v24 = vsel %vm4610_vm9, %v9385_v46, %v9361_v1  ;;  %v14003_v60 = vld [vmem:[%s18199_s7 + $0xbf0] sm:$0xff]  ;;  %v14000_v38 = vld [vmem:[%s18199_s7 + $0xbd8] sm:$0xff]  ;;  %v14117_v0 = vld [vmem:[%s18199_s7 + $0xf80] sm:$0xff] }
 0x674   :  { %v14104_v54 = vld [vmem:[%s18199_s7 + $0xf18] sm:$0xff] }
 0x675   :  { %8612 = vmatpush.bf16.msrb.mxu3 %v13970_v21  ;;  %v9414_v21 = vpack.c.bf16 %v9381_v51, %v9381_v51  ;;  %v14036_v51 = vld [vmem:[%s18199_s7 + $0xcf8] sm:$0xff] }
 0x676   :  { %9935 = vmatpush.bf16.msra.mxu0 %v14074_v48  ;;  %v14107_v48 = vld [vmem:[%s18199_s7 + $0xf30] sm:$0xff] }
 0x677   :  { %9948 = vmatpush.bf16.msra.mxu1 %v14082_v29  ;;  %9961 = vmatpush.bf16.msra.mxu2 %v14090_v39  ;;  %v6630_v55 = vpop.f32.mrf.mxu3  ;;  %v14115_v29 = vld [vmem:[%s18199_s7 + $0xf70] sm:$0xff]  ;;  %v9415_v39 = vpack.c.bf16 %v9386_v24, %v9386_v24  ;;  %v9367_v24 = vld [vmem:[#allocation3 + $0x3d] sm:$0x1] }
 0x678   :  { %v14103_v55 = vld [vmem:[%s18199_s7 + $0xf10] sm:$0xff] }
 0x679   :  { %8613 = vmatpush.bf16.msrb.mxu3 %v13969_v8  ;;  %v14123_v8 = vld [vmem:[%s18199_s7 + $0xfb0] sm:$0xff] }
 0x67a   :  { %9936 = vmatpush.bf16.msra.mxu0 %v14073_v53  ;;  %v14106_v53 = vld [vmem:[%s18199_s7 + $0xf28] sm:$0xff] }
 0x67b   :  { %9949 = vmatpush.bf16.msra.mxu1 %v14081_v58  ;;  %9962 = vmatpush.bf16.msra.mxu2 %v14089_v14  ;;  %v7979_v22 = vpop.f32.mrf.mxu2  ;;  %v14114_v58 = vld [vmem:[%s18199_s7 + $0xf68] sm:$0xff] }
 0x67c   :  { %v14122_v14 = vld [vmem:[%s18199_s7 + $0xfa8] sm:$0xff]  ;;  %v9366_v22 = vld [vmem:[#allocation3 + $0x7c] sm:$0x1] }
 0x67d   :  { %8614 = vmatpush.bf16.msrb.mxu3 %v13968_v17 }
 0x67e   :  { %9937 = vmatpush.bf16.msra.mxu0 %v14072_v25  ;;  %v14001_v25 = vld [vmem:[%s18199_s7 + $0xbe0] sm:$0xff] }
 0x67f   :  { %9950 = vmatpush.bf16.msra.mxu1 %v14080_v49  ;;  %9963 = vmatpush.bf16.msra.mxu2 %v14088_v52  ;;  %v14113_v52 = vld [vmem:[%s18199_s7 + $0xf60] sm:$0xff] }
 0x681   :  { %8615 = vmatpush.bf16.msrb.mxu3 %v13967_v36  ;;  %v14112_v36 = vld [vmem:[%s18199_s7 + $0xf58] sm:$0xff] }
 0x682   :  { %9938 = vmatpush.bf16.msra.mxu0 %v14071_v11 }
 0x683   :  { %9951 = vmatpush.bf16.msra.mxu1 %v14079_v34  ;;  %9964 = vmatpush.bf16.msra.mxu2 %v14087_v50  ;;  %v14120_v34 = vld [vmem:[%s18199_s7 + $0xf98] sm:$0xff] }
 0x685   :  { %8616 = vmatpush.bf16.msrb.mxu3 %v13966_v12 }
 0x686   :  { %9939 = vmatpush.bf16.msra.mxu0 %v14070_v37 }
 0x687   :  { %9952 = vmatpush.bf16.msra.mxu1 %v14078_v43  ;;  %9965 = vmatpush.bf16.msra.mxu2 %v14086_v45  ;;  %v13999_v43 = vld [vmem:[%s18199_s7 + $0xbd0] sm:$0xff]  ;;  %v8010_v45 = vld [vmem:[#allocation3 + $0x6f] sm:$0x1] }
 0x688   :  { %v8048_v44 = vrot.slane %v8010_v45, 7  ;;  %v14065_v45 = vld [vmem:[%s18199_s7 + $0xde0] sm:$0xff] }
 0x689   :  { %8617 = vmatpush.bf16.msrb.mxu3 %v13965_v35  ;;  %v14102_v35 = vld [vmem:[%s18199_s7 + $0xf08] sm:$0xff] }
 0x68a   :  { %9940 = vmatpush.bf16.msra.mxu0 %v14069_v30  ;;  %v8580_v17 = vpop.f32.mrf.mxu0  ;;  %v9370_v30 = vld [vmem:[#allocation3 + $0x7e] sm:$0x1] }
 0x68b   :  { %9953 = vmatpush.bf16.msra.mxu1 %v14077_v56  ;;  %9966 = vmatpush.bf16.msra.mxu2 %v14085_v28  ;;  %v8593_v31 = vpop.f32.mrf.mxu1  ;;  %v14118_v56 = vld [vmem:[%s18199_s7 + $0xf88] sm:$0xff]  ;;  %v9395_v28 = vrot.slane %v9366_v22, 7 }
 0x68c   :  { %8618 = vmatmul.bf16.vlgmr.msrb.gmra.mxu3 %v8054_v6  ;;  %v8594_v49 = vadd.f32 %v8593_v31, %v8580_v17  ;;  %v14033_v31 = vld [vmem:[%s18199_s7 + $0xce0] sm:$0xff] }
 0x68d   :  { %8662 = vmatpush.bf16.msra.mxu3 %v14004_v27  ;;  %9941 = vmatmul.bf16.vlgmr.msra.gmra.mxu0 %v9413_v19  ;;  %v9400_v27 = vrot.slane %v9368_v63, 7  ;;  %v9369_v19 = vld [vmem:[#allocation3 + $0x3e] sm:$0x1] }
 0x68e   :  { %9985 = vmatpush.bf16.msrb.mxu0 %v14108_v57  ;;  %9954 = vmatmul.bf16.vlgmr.msra.gmra.mxu1 %v9414_v21  ;;  %v8009_v57 = vld [vmem:[#allocation3 + $0x2f] sm:$0x1] }
 0x68f   :  { %9998 = vmatpush.bf16.msrb.mxu1 %v14116_v7  ;;  %10011 = vmatpush.bf16.msrb.mxu2 %v14124_v16  ;;  %v7257_v11 = vpop.f32.mrf.mxu3  ;;  %v9405_v7 = vrot.slane %v9370_v30, 7  ;;  %v9365_v16 = vld [vmem:[#allocation3 + $0x3c] sm:$0x1]  ;;  %v8049_v1 = vsel %vm4610_vm9, %v8048_v44, %v8009_v57 }
 0x690   :  { %9967 = vmatmul.bf16.vlgmr.msra.gmra.mxu2 %v9415_v39  ;;  %v7258_v50 = vadd.f32 %v7257_v11, %v17578_v59  ;;  %v14111_v59 = vld [vmem:[%s18199_s7 + $0xf50] sm:$0xff]  ;;  %v9396_v6 = vsel %vm4610_vm9, %v9395_v28, %v9365_v16 }
 0x691   :  { %8663 = vmatpush.bf16.msra.mxu3 %v14003_v60  ;;  %v9401_v60 = vsel %vm4610_vm9, %v9400_v27, %v9367_v24  ;;  %v9406_v21 = vsel %vm4610_vm9, %v9405_v7, %v9369_v19  ;;  %v8683_v11 = vld [vmem:[#allocation3 + $0x73] sm:$0x1]  ;;  %v8691_v27 = vld [vmem:[#allocation3 + $0x77] sm:$0x1]  ;;  %v14098_v24 = vld [vmem:[%s18199_s7 + $0xee8] sm:$0xff] }
 0x692   :  { %9986 = vmatpush.bf16.msrb.mxu0 %v14107_v48  ;;  %v8582_v13 = vpop.f32.mrf.mxu0  ;;  %v8058_v48 = vpack.c.bf16 %v8049_v1, %v8049_v1  ;;  %v9418_v39 = vpack.c.bf16 %v9401_v60, %v9401_v60  ;;  %v8729_v7 = vrot.slane %v8691_v27, 7  ;;  %v8690_v16 = vld [vmem:[#allocation3 + $0x37] sm:$0x1]  ;;  %v14097_v60 = vld [vmem:[%s18199_s7 + $0xee0] sm:$0xff] }
 0x693   :  { %9999 = vmatpush.bf16.msrb.mxu1 %v14115_v29  ;;  %10012 = vmatpush.bf16.msrb.mxu2 %v14123_v8  ;;  %v8606_v12 = vpop.f32.mrf.mxu2  ;;  %v8595_v37 = vpop.f32.mrf.mxu1  ;;  %v9417_v29 = vpack.c.bf16 %v9396_v6, %v9396_v6  ;;  %v14035_v8 = vld [vmem:[%s18199_s7 + $0xcf0] sm:$0xff]  ;;  %v14068_v13 = vld [vmem:[%s18199_s7 + $0xdf8] sm:$0xff] }
 0x694   :  { %v18011_v42 = vadd.f32 %v8606_v12, %v8594_v49  ;;  %v8682_v37 = vld [vmem:[#allocation3 + $0x33] sm:$0x1] }
 0x695   :  { %8664 = vmatpush.bf16.msra.mxu3 %v14002_v10  ;;  %v9419_v10 = vpack.c.bf16 %v9406_v21, %v9406_v21  ;;  %v14099_v1 = vld [vmem:[%s18199_s7 + $0xef0] sm:$0xff] }
 0x696   :  { %9987 = vmatpush.bf16.msrb.mxu0 %v14106_v53  ;;  %v7271_v53 = vadd.f32 %v17658_v2, %v7258_v50  ;;  %v14032_v2 = vld [vmem:[%s18199_s7 + $0xcd8] sm:$0xff]  ;;  %v8709_v50 = vrot.slane %v8683_v11, 7  ;;  %v14131_v11 = vld [vmem:[%s18199_s7 + $0xff0] sm:$0xff] }
 0x697   :  { %10000 = vmatpush.bf16.msrb.mxu1 %v14114_v58  ;;  %10013 = vmatpush.bf16.msrb.mxu2 %v14122_v14  ;;  %v7259_v47 = vpop.f32.mrf.mxu3  ;;  %v14034_v58 = vld [vmem:[%s18199_s7 + $0xce8] sm:$0xff] }
 0x699   :  { %8665 = vmatpush.bf16.msra.mxu3 %v14001_v25  ;;  %v7284_v25 = vadd.f32 %v17660_v4, %v7271_v53  ;;  %v14031_v4 = vld [vmem:[%s18199_s7 + $0xcd0] sm:$0xff] }
 0x69a   :  { %9988 = vmatpush.bf16.msrb.mxu0 %v14105_v32 }
 0x69b   :  { %10001 = vmatpush.bf16.msrb.mxu1 %v14113_v52  ;;  %10014 = vmatpush.bf16.msrb.mxu2 %v14121_v9  ;;  %v8608_v46 = vpop.f32.mrf.mxu2  ;;  %v7297_v49 = vadd.f32 %v17690_v40, %v7284_v25  ;;  %v14030_v40 = vld [vmem:[%s18199_s7 + $0xcc8] sm:$0xff]  ;;  %v9364_v25 = vld [vmem:[#allocation3 + $0x7b] sm:$0x1] }
 0x69d   :  { %8666 = vmatpush.bf16.msra.mxu3 %v14000_v38 }
 0x69e   :  { %9989 = vmatpush.bf16.msrb.mxu0 %v14104_v54 }
 0x69f   :  { %10002 = vmatpush.bf16.msrb.mxu1 %v14112_v36  ;;  %10015 = vmatpush.bf16.msrb.mxu2 %v14120_v34 }
 0x6a1   :  { %8667 = vmatpush.bf16.msra.mxu3 %v13999_v43  ;;  %v8710_v43 = vsel %vm4610_vm9, %v8709_v50, %v8682_v37 }
 0x6a2   :  { %9990 = vmatpush.bf16.msrb.mxu0 %v14103_v55  ;;  %v8735_v55 = vpack.c.bf16 %v8710_v43, %v8710_v43  ;;  %v14127_v43 = vld [vmem:[%s18199_s7 + $0xfd0] sm:$0xff] }
 0x6a3   :  { %10003 = vmatpush.bf16.msrb.mxu1 %v14111_v59  ;;  %10016 = vmatpush.bf16.msrb.mxu2 %v14119_v33  ;;  %v14067_v59 = vld [vmem:[%s18199_s7 + $0xdf0] sm:$0xff]  ;;  %v14066_v33 = vld [vmem:[%s18199_s7 + $0xde8] sm:$0xff] }
 0x6a5   :  { %8668 = vmatpush.bf16.msra.mxu3 %v13998_v18 }
 0x6a6   :  { %9991 = vmatpush.bf16.msrb.mxu0 %v14102_v35  ;;  %v14064_v35 = vld [vmem:[%s18199_s7 + $0xdd8] sm:$0xff] }
 0x6a7   :  { %10004 = vmatpush.bf16.msrb.mxu1 %v14110_v62  ;;  %10017 = vmatpush.bf16.msrb.mxu2 %v14118_v56  ;;  %v14063_v56 = vld [vmem:[%s18199_s7 + $0xdd0] sm:$0xff] }
 0x6a9   :  { %8669 = vmatpush.bf16.msra.mxu3 %v13997_v5  ;;  %v14062_v5 = vld [vmem:[%s18199_s7 + $0xdc8] sm:$0xff] }
 0x6aa   :  { %9992 = vmatpush.bf16.msrb.mxu0 %v14101_v20  ;;  %v18063_v14 = vpop.f32.mrf.mxu0  ;;  %v14061_v20 = vld [vmem:[%s18199_s7 + $0xdc0] sm:$0xff] }
 0x6ab   :  { %10005 = vmatpush.bf16.msrb.mxu1 %v14109_v61  ;;  %10018 = vmatpush.bf16.msrb.mxu2 %v14117_v0  ;;  %v18065_v17 = vpop.f32.mrf.mxu1  ;;  %v14100_v61 = vld [vmem:[%s18199_s7 + $0xef8] sm:$0xff]  ;;  %v8730_v0 = vsel %vm4610_vm9, %v8729_v7, %v8690_v16 }
 0x6ac   :  { %8670 = vmatmul.bf16.vlgmr.msra.gmra.mxu3 %v8058_v48 }
 0x6ad   :  { %9291 = vmatpush.bf16.msrb.mxu3 %v14036_v51  ;;  %9993 = vmatmul.bf16.vlgmr.msrb.gmra.mxu0 %v9417_v29  ;;  %v8739_v51 = vpack.c.bf16 %v8730_v0, %v8730_v0  ;;  %v14096_v29 = vld [vmem:[%s18199_s7 + $0xed8] sm:$0xff] }
 0x6ae   :  { %10006 = vmatmul.bf16.vlgmr.msrb.gmra.mxu1 %v9418_v39  ;;  %10019 = vmatmul.bf16.vlgmr.msrb.gmra.mxu2 %v9419_v10  ;;  %v14095_v10 = vld [vmem:[%s18199_s7 + $0xed0] sm:$0xff] }
 0x6af   :  { %v7309_v32 = vpop.f32.mrf.mxu3 }
 0x6b0   :  { %v7310_v52 = vadd.f32 %v7309_v32, %v7297_v49  ;;  %v14093_v32 = vld [vmem:[%s18199_s7 + $0xec0] sm:$0xff] }
 0x6b1   :  { %9292 = vmatpush.bf16.msrb.mxu3 %v14035_v8 }
 0x6b2   :  { %v18078_v38 = vadd.f32 %v7310_v52, %v17908_v26  ;;  %v8634_v54 = vpop.f32.mrf.mxu0  ;;  %v14029_v26 = vld [vmem:[%s18199_s7 + $0xcc0] sm:$0xff] }
 0x6b3   :  { %v18075_v9 = vpop.f32.mrf.mxu2  ;;  %v8647_v36 = vpop.f32.mrf.mxu1  ;;  %v9363_v54 = vld [vmem:[#allocation3 + $0x3b] sm:$0x1] }
 0x6b5   :  { %9293 = vmatpush.bf16.msrb.mxu3 %v14034_v58 }
 0x6b7   :  { %v7311_v34 = vpop.f32.mrf.mxu3 }
 0x6b8   :  { %v14129_v34 = vld [vmem:[%s18199_s7 + $0xfe0] sm:$0xff] }
 0x6b9   :  { %9294 = vmatpush.bf16.msrb.mxu3 %v14033_v31 }
 0x6bb   :  { %v8660_v12 = vpop.f32.mrf.mxu2 }
 0x6bd   :  { %9295 = vmatpush.bf16.msrb.mxu3 %v14032_v2  ;;  %v14094_v2 = vld [vmem:[%s18199_s7 + $0xec8] sm:$0xff] }
 0x6c1   :  { %9296 = vmatpush.bf16.msrb.mxu3 %v14031_v4 }
 0x6c5   :  { %9297 = vmatpush.bf16.msrb.mxu3 %v14030_v40  ;;  %v14130_v40 = vld [vmem:[%s18199_s7 + $0xfe8] sm:$0xff] }
 0x6c9   :  { %9298 = vmatpush.bf16.msrb.mxu3 %v14029_v26 }
 0x6ca   :  { %v9261_v18 = vpop.f32.mrf.mxu0 }
 0x6cb   :  { %v9274_v22 = vpop.f32.mrf.mxu1 }
 0x6cc   :  { %9299 = vmatmul.bf16.vlgmr.msrb.gmra.mxu3 %v8735_v55  ;;  %v9275_v63 = vadd.f32 %v9274_v22, %v9261_v18  ;;  %v9372_v22 = vld [vmem:[#allocation3 + $0x7f] sm:$0x1] }
 0x6cd   :  { %9343 = vmatpush.bf16.msra.mxu3 %v14068_v13  ;;  %v14128_v13 = vld [vmem:[%s18199_s7 + $0xfd8] sm:$0xff] }
 0x6cf   :  { %v7938_v62 = vpop.f32.mrf.mxu3 }
 0x6d0   :  { %v7939_v47 = vadd.f32 %v7938_v62, %v17795_v23 }
 0x6d1   :  { %9344 = vmatpush.bf16.msra.mxu3 %v14067_v59 }
 0x6d2   :  { %v9263_v46 = vpop.f32.mrf.mxu0  ;;  %v7952_v6 = vadd.f32 %v17875_v3, %v7939_v47  ;;  %v14125_v47 = vld [vmem:[%s18199_s7 + $0xfc0] sm:$0xff] }
 0x6d3   :  { %v9287_v30 = vpop.f32.mrf.mxu2  ;;  %v9276_v28 = vpop.f32.mrf.mxu1 }
 0x6d4   :  { %v18109_v44 = vadd.f32 %v9287_v30, %v9275_v63  ;;  %v7965_v48 = vadd.f32 %v17877_v15, %v7952_v6  ;;  %v14126_v63 = vld [vmem:[%s18199_s7 + $0xfc8] sm:$0xff]  ;;  %v9371_v30 = vld [vmem:[#allocation3 + $0x3f] sm:$0x1] }
 0x6d5   :  { %9345 = vmatpush.bf16.msra.mxu3 %v14066_v33 }
 0x6d6   :  { %v7978_v39 = vadd.f32 %v17905_v41, %v7965_v48  ;;  %v9390_v41 = vrot.slane %v9364_v25, 7 }
 0x6d7   :  { %v7940_v57 = vpop.f32.mrf.mxu3 }
 0x6d8   :  { %v9391_v36 = vsel %vm4610_vm9, %v9390_v41, %v9363_v54 }
 0x6d9   :  { %9346 = vmatpush.bf16.msra.mxu3 %v14065_v45  ;;  %v9416_v4 = vpack.c.bf16 %v9391_v36, %v9391_v36 }
 0x6db   :  { %v9289_v23 = vpop.f32.mrf.mxu2 }
 0x6dd   :  { %9347 = vmatpush.bf16.msra.mxu3 %v14064_v35  ;;  %v9410_v35 = vrot.slane %v9372_v22, 7 }
 0x6e1   :  { %9348 = vmatpush.bf16.msra.mxu3 %v14063_v56 }
 0x6e5   :  { %9349 = vmatpush.bf16.msra.mxu3 %v14062_v5 }
 0x6e9   :  { %9350 = vmatpush.bf16.msra.mxu3 %v14061_v20 }
 0x6ea   :  { %v18131_v19 = vpop.f32.mrf.mxu0 }
 0x6eb   :  { %v18133_v21 = vpop.f32.mrf.mxu1 }
 0x6ec   :  { %9351 = vmatmul.bf16.vlgmr.msra.gmra.mxu3 %v8739_v51 }
 0x6ed   :  { %9972 = vmatpush.bf16.msrb.mxu3 %v14100_v61 }
 0x6ef   :  { %v7990_v8 = vpop.f32.mrf.mxu3 }
 0x6f0   :  { %v7991_v3 = vadd.f32 %v7990_v8, %v7978_v39 }
 0x6f1   :  { %9973 = vmatpush.bf16.msrb.mxu3 %v14099_v1 }
 0x6f2   :  { %v7994_v58 = vadd.f32 %v7991_v3, %v18078_v38  ;;  %v9315_v31 = vpop.f32.mrf.mxu0  ;;  %v14132_v38 = vld [vmem:[%s18199_s7 + $0xff8] sm:$0xff] }
 0x6f3   :  { %v18143_v53 = vpop.f32.mrf.mxu2  ;;  %v9328_v15 = vpop.f32.mrf.mxu1 }
 0x6f5   :  { %9974 = vmatpush.bf16.msrb.mxu3 %v14098_v24 }
 0x6f7   :  { %v7992_v49 = vpop.f32.mrf.mxu3 }
 0x6f9   :  { %9975 = vmatpush.bf16.msrb.mxu3 %v14097_v60 }
 0x6fb   :  { %v9341_v52 = vpop.f32.mrf.mxu2 }
 0x6fd   :  { %9976 = vmatpush.bf16.msrb.mxu3 %v14096_v29 }
 0x701   :  { %9977 = vmatpush.bf16.msrb.mxu3 %v14095_v10 }
 0x705   :  { %9978 = vmatpush.bf16.msrb.mxu3 %v14094_v2 }
 0x709   :  { %9979 = vmatpush.bf16.msrb.mxu3 %v14093_v32 }
 0x70a   :  { %v9942_v50 = vpop.f32.mrf.mxu0 }
 0x70b   :  { %v9955_v12 = vpop.f32.mrf.mxu1 }
 0x70c   :  { %9980 = vmatmul.bf16.vlgmr.msrb.gmra.mxu3 %v9416_v4  ;;  %v9956_v26 = vadd.f32 %v9955_v12, %v9942_v50 }
 0x70d   :  { %10024 = vmatpush.bf16.msra.mxu3 %v14132_v38 }
 0x70f   :  { %v8619_v37 = vpop.f32.mrf.mxu3 }
 0x710   :  { %v8620_v55 = vadd.f32 %v8619_v37, %v18011_v42  ;;  %v9411_v42 = vsel %vm4610_vm9, %v9410_v35, %v9371_v30 }
 0x711   :  { %10025 = vmatpush.bf16.msra.mxu3 %v14131_v11  ;;  %v9420_v46 = vpack.c.bf16 %v9411_v42, %v9411_v42 }
 0x712   :  { %v9944_v45 = vpop.f32.mrf.mxu0  ;;  %v8633_v28 = vadd.f32 %v18063_v14, %v8620_v55 }
 0x713   :  { %v9968_v59 = vpop.f32.mrf.mxu2  ;;  %v9957_v18 = vpop.f32.mrf.mxu1 }
 0x714   :  { %v9969_v33 = vadd.f32 %v9968_v59, %v9956_v26  ;;  %v8646_v57 = vadd.f32 %v18065_v17, %v8633_v28 }
 0x715   :  { %10026 = vmatpush.bf16.msra.mxu3 %v14130_v40 }
 0x716   :  { %v8659_v7 = vadd.f32 %v18075_v9, %v8646_v57 }
 0x717   :  { %v8621_v62 = vpop.f32.mrf.mxu3 }
 0x719   :  { %10027 = vmatpush.bf16.msra.mxu3 %v14129_v34 }
 0x71b   :  { %v9970_v56 = vpop.f32.mrf.mxu2 }
 0x71d   :  { %10028 = vmatpush.bf16.msra.mxu3 %v14128_v13 }
 0x721   :  { %10029 = vmatpush.bf16.msra.mxu3 %v14127_v43 }
 0x725   :  { %10030 = vmatpush.bf16.msra.mxu3 %v14126_v63 }
 0x729   :  { %10031 = vmatpush.bf16.msra.mxu3 %v14125_v47 }
 0x72a   :  { %v9994_v27 = vpop.f32.mrf.mxu0 }
 0x72b   :  { %v10007_v5 = vpop.f32.mrf.mxu1 }
 0x72c   :  { %10032 = vmatmul.bf16.vlgmr.msra.gmra.mxu3 %v9420_v46 }
 0x72f   :  { %v8671_v23 = vpop.f32.mrf.mxu3 }
 0x730   :  { %v8672_v20 = vadd.f32 %v8671_v23, %v8659_v7 }
 0x731   :  { %v10020_v61 = vpop.f32.mrf.mxu2 }
 0x732   :  { %v8675_v16 = vadd.f32 %v8672_v20, %v7994_v58  ;;  %v9996_v0 = vpop.f32.mrf.mxu0 }
 0x733   :  { %v10009_v51 = vpop.f32.mrf.mxu1 }
 0x737   :  { %v8673_v1 = vpop.f32.mrf.mxu3 }
 0x739   :  { %v10022_v24 = vpop.f32.mrf.mxu2 }
 0x74f   :  { %v9300_v6 = vpop.f32.mrf.mxu3 }
 0x750   :  { %v9301_v60 = vadd.f32 %v9300_v6, %v18109_v44  ;;  %v14139_v44 = vld [vmem:[%s18200_s8] ss:$0 sm:$0xff] }
 0x752   :  { %v9314_v14 = vadd.f32 %v18131_v19, %v9301_v60 }
 0x754   :  { %v9327_v29 = vadd.f32 %v18133_v21, %v9314_v14 }
 0x756   :  { %v9340_v17 = vadd.f32 %v18143_v53, %v9327_v29 }
 0x757   :  { %v9302_v48 = vpop.f32.mrf.mxu3 }
 0x76f   :  { %v9352_v39 = vpop.f32.mrf.mxu3 }
 0x770   :  { %v9353_v9 = vadd.f32 %v9352_v39, %v9340_v17 }
 0x772   :  { %v9356_v8 = vadd.f32 %v9353_v9, %v8675_v16 }
 0x777   :  { %v9354_v3 = vpop.f32.mrf.mxu3 }
 0x78f   :  { %v9981_v10 = vpop.f32.mrf.mxu3 }
 0x790   :  { %v9982_v31 = vadd.f32 %v9981_v10, %v9969_v33 }
 0x792   :  { %v9995_v15 = vadd.f32 %v9994_v27, %v9982_v31 }
 0x794   :  { %v10008_v25 = vadd.f32 %v10007_v5, %v9995_v15 }
 0x796   :  { %v10021_v2 = vadd.f32 %v10020_v61, %v10008_v25 }
 0x797   :  { %v9983_v58 = vpop.f32.mrf.mxu3 }
 0x7af   :  { %v10033_v41 = vpop.f32.mrf.mxu3 }
 0x7b0   :  { %v10034_v49 = vadd.f32 %v10033_v41, %v10021_v2 }
 0x7b2   :  { %v10037_v19 = vadd.f32 %v10034_v49, %v9356_v8 }
 0x7b4   :  { %v10042_v21 = vadd.f32 %v14139_v44, %v10037_v19 }
 0x7b6   :  { %10044 = vst.msk [vmem:[#allocation4] sm:$0x3] %vm10043_vm10, %v10042_v21 }
 0x7b7   :  { %v10035_v53 = vpop.f32.mrf.mxu3  ;;  %10055 = dma.vmem_to_hbm [thread:$0]  %s10051_s25, 32, %s10053_s28, [#allocation5]  }
 0x7b8   :  { %14166 = dma.done.wait [#allocation5], 32  }
 0x7b9   :  { %14167 = vsyncadd [#allocation5], 4294967264 }
 0x7ba   :  { %10060 = vsyncpa [#allocation5], 1 }

</bundles_post_ra>
